<compile_context>
chip_gen: v7x
topology: tpu7x:2x2x1
jax: 0.10.0
libtpu: 0.0.40
codegen_flags: <defaults>
</compile_context>

<pallas_src>
import functools

import numpy as np
import jax
import jax.numpy as jnp
from jax import lax
from jax.experimental import pallas as pl
from jax.experimental.pallas import tpu as pltpu

LN_EPS = 1e-3      # parse_nk.LayerNormalization: (z - mean) / (unbiased_std + 1e-3) * a + b
NEG_BIG = -1e30    # finite "-inf" used for padded-KV / padded-vocab masking


def _round_up(x, m):
    return ((x + m - 1) // m) * m


def _ln_in_kernel(z, a, b):
    """parse_nk LayerNormalization (unbiased std), EUP reciprocal for the division."""
    mu = jnp.mean(z, axis=-1, keepdims=True)
    var = jnp.sum((z - mu) ** 2, axis=-1, keepdims=True) / (z.shape[-1] - 1)
    inv = pl.reciprocal(jnp.sqrt(var) + LN_EPS, approx=True)
    return (z - mu) * inv * a + b


def _ln_ref(z, a, b):
    mu = jnp.mean(z, axis=-1, keepdims=True)
    var = jnp.sum((z - mu) ** 2, axis=-1, keepdims=True) / (z.shape[-1] - 1)
    return (z - mu) / (jnp.sqrt(var) + LN_EPS) * a + b


# ---- Kernel A: linear_pre MLP (Linear -> LN -> ReLU -> Linear) + fused Q / KV projections ----
def _pre_mlp_qkv_kernel(x_ref, w1_ref, b1_ref, ga_ref, gb_ref, w2_ref, b2_ref,
                        wq_ref, wkv_ref, res_ref, q_ref, kv_ref):
    # x/w1/w2/wq/wkv are bf16; accumulation + LN in f32.
    h = jnp.dot(x_ref[...], w1_ref[...], preferred_element_type=jnp.float32) + b1_ref[...]
    h = _ln_in_kernel(h, ga_ref[...], gb_ref[...])
    h = jnp.maximum(h, 0.0).astype(jnp.bfloat16)
    res = jnp.dot(h, w2_ref[...], preferred_element_type=jnp.float32) + b2_ref[...]
    res_ref[...] = res.astype(res_ref.dtype)
    res_bf = res.astype(jnp.bfloat16)
    q_ref[...] = jnp.dot(res_bf, wq_ref[...],
                         preferred_element_type=jnp.float32).astype(q_ref.dtype)
    kv_ref[...] = jnp.dot(res_bf, wkv_ref[...],
                          preferred_element_type=jnp.float32).astype(kv_ref.dtype)


def pre_mlp_qkv_block(x, w1, b1, ga, gb, w2, b2, wq, wkv, *, tm):
    n_pad, din_pad = x.shape
    dh = w1.shape[1]
    de = w2.shape[1]
    qp = wq.shape[1]
    kvp = wkv.shape[1]
    return pl.pallas_call(
        _pre_mlp_qkv_kernel,
        out_shape=(jax.ShapeDtypeStruct((n_pad, de), jnp.bfloat16),
                   jax.ShapeDtypeStruct((n_pad, qp), jnp.bfloat16),
                   jax.ShapeDtypeStruct((n_pad, kvp), jnp.bfloat16)),
        grid=(n_pad // tm,),
        in_specs=[
            pl.BlockSpec((tm, din_pad), lambda i: (i, 0)),
            pl.BlockSpec((din_pad, dh), lambda i: (0, 0)),
            pl.BlockSpec((1, dh), lambda i: (0, 0)),
            pl.BlockSpec((1, dh), lambda i: (0, 0)),
            pl.BlockSpec((1, dh), lambda i: (0, 0)),
            pl.BlockSpec((dh, de), lambda i: (0, 0)),
            pl.BlockSpec((1, de), lambda i: (0, 0)),
            pl.BlockSpec((de, qp), lambda i: (0, 0)),
            pl.BlockSpec((de, kvp), lambda i: (0, 0)),
        ],
        out_specs=(pl.BlockSpec((tm, de), lambda i: (i, 0)),
                   pl.BlockSpec((tm, qp), lambda i: (i, 0)),
                   pl.BlockSpec((tm, kvp), lambda i: (i, 0))),
        compiler_params=pltpu.CompilerParams(dimension_semantics=("parallel",)),
    )(x, w1, b1, ga, gb, w2, b2, wq, wkv)


# ---- Kernel B: tiled flash-style MHA (select_forward) + output proj + residual + LN ----
def attention_block(q, kv, res, wo_c, ga, gb, *, tq, tkv, n_actual,
                    num_heads, d_k, d_v):
    n_pad, de = res.shape
    qp = q.shape[1]
    kvp = kv.shape[1]
    hdk = num_heads * d_k
    hdv = num_heads * d_v
    inv_temper = 1.0 / float(np.sqrt(de))     # parse_nk: temper = d_model ** 0.5
    need_mask = (n_pad != n_actual)

    def kernel(q_ref, kv_ref, res_ref, wo_ref, ga_ref, gb_ref, o_ref,
               m_sc, l_sc, acc_sc):
        ki = pl.program_id(1)

        @pl.when(ki == 0)
        def _():
            m_sc[...] = jnp.full_like(m_sc, -jnp.inf)
            l_sc[...] = jnp.zeros_like(l_sc)
            acc_sc[...] = jnp.zeros_like(acc_sc)

        if need_mask:
            kv_ids = ki * tkv + lax.broadcasted_iota(jnp.int32, (1, tkv), 1)
            kv_valid = kv_ids < n_actual

        for h in range(num_heads):                     # static unroll (num_heads = 2)
            qh = q_ref[:, h * d_k:(h + 1) * d_k]                           # [tq, dk] bf16
            kh = kv_ref[:, h * d_k:(h + 1) * d_k]                          # [tkv, dk] bf16
            vh = kv_ref[:, hdk + h * d_v: hdk + (h + 1) * d_v]             # [tkv, dv] bf16
            # contract on d_k of both operands (no explicit k.T relayout)
            s = lax.dot_general(qh, kh, (((1,), (1,)), ((), ())),
                                preferred_element_type=jnp.float32) * inv_temper
            if need_mask:
                s = jnp.where(kv_valid, s, NEG_BIG)
            m_prev = m_sc[h]                                               # [tq, 1]
            m_new = jnp.maximum(m_prev, jnp.max(s, axis=-1, keepdims=True))
            alpha = jnp.exp(m_prev - m_new)
            p = jnp.exp(s - m_new)   # masked entries: exp(NEG_BIG - finite) == 0 exactly
            l_sc[h] = alpha * l_sc[h] + jnp.sum(p, axis=-1, keepdims=True)
            acc_sc[h] = alpha * acc_sc[h] + jnp.dot(
                p.astype(jnp.bfloat16), vh, preferred_element_type=jnp.float32)
            m_sc[h] = m_new

        @pl.when(ki == pl.num_programs(1) - 1)
        def _():
            heads = [acc_sc[h] * pl.reciprocal(l_sc[h], approx=True)
                     for h in range(num_heads)]
            normed = jnp.concatenate(heads, axis=-1).astype(jnp.bfloat16)   # [tq, H*dv]
            # concat(heads) @ wo_c == sum_h head_h @ wo[h]  (bias-free output projection)
            attn_out = jnp.dot(normed, wo_ref[...], preferred_element_type=jnp.float32)
            y = attn_out + res_ref[...].astype(jnp.float32)                 # residual
            o_ref[...] = _ln_in_kernel(y, ga_ref[...], gb_ref[...]).astype(o_ref.dtype)

    return pl.pallas_call(
        kernel,
        out_shape=jax.ShapeDtypeStruct((n_pad, de), jnp.bfloat16),
        grid=(n_pad // tq, n_pad // tkv),
        in_specs=[
            pl.BlockSpec((tq, qp), lambda qi, ki: (qi, 0)),     # Q rows (128 lanes, bf16)
            pl.BlockSpec((tkv, kvp), lambda qi, ki: (ki, 0)),   # packed K|V rows (128 lanes)
            pl.BlockSpec((tq, de), lambda qi, ki: (qi, 0)),     # residual input
            pl.BlockSpec((hdv, de), lambda qi, ki: (0, 0)),     # output projection
            pl.BlockSpec((1, de), lambda qi, ki: (0, 0)),
            pl.BlockSpec((1, de), lambda qi, ki: (0, 0)),
        ],
        out_specs=pl.BlockSpec((tq, de), lambda qi, ki: (qi, 0)),
        scratch_shapes=[
            pltpu.VMEM((num_heads, tq, 1), jnp.float32),    # running max, leading head axis
            pltpu.VMEM((num_heads, tq, 1), jnp.float32),    # running denom
            pltpu.VMEM((num_heads, tq, d_v), jnp.float32),  # running numerator
        ],
        compiler_params=pltpu.CompilerParams(
            dimension_semantics=("parallel", "arbitrary")),
    )(q, kv, res, wo_c, ga, gb)


# ---- Kernel C: linear_label MLP + (mask + gumbel noise) + log_softmax, fully fused ----
def _label_gumbel_kernel(res_ref, w1_ref, b1_ref, ga_ref, gb_ref, w2_ref, b2_ref,
                         mask_ref, noise_ref, o_ref):
    h = jnp.dot(res_ref[...], w1_ref[...], preferred_element_type=jnp.float32) + b1_ref[...]
    h = _ln_in_kernel(h, ga_ref[...], gb_ref[...])
    h = jnp.maximum(h, 0.0).astype(jnp.bfloat16)
    logits = jnp.dot(h, w2_ref[...], preferred_element_type=jnp.float32) + b2_ref[...]
    y = logits + mask_ref[...] + noise_ref[...]
    m = jnp.max(y, axis=-1, keepdims=True)
    z = y - m
    lse = jnp.log(jnp.sum(jnp.exp(z), axis=-1, keepdims=True))
    o_ref[...] = (z - lse).astype(o_ref.dtype)


def label_gumbel_block(res, w1, b1, ga, gb, w2, b2, mask, noise, *, tm):
    n_pad, de = res.shape
    dh = w1.shape[1]
    p_pad = w2.shape[1]
    return pl.pallas_call(
        _label_gumbel_kernel,
        out_shape=jax.ShapeDtypeStruct((n_pad, p_pad), jnp.float32),
        grid=(n_pad // tm,),
        in_specs=[
            pl.BlockSpec((tm, de), lambda i: (i, 0)),
            pl.BlockSpec((de, dh), lambda i: (0, 0)),
            pl.BlockSpec((1, dh), lambda i: (0, 0)),
            pl.BlockSpec((1, dh), lambda i: (0, 0)),
            pl.BlockSpec((1, dh), lambda i: (0, 0)),
            pl.BlockSpec((dh, p_pad), lambda i: (0, 0)),
            pl.BlockSpec((1, p_pad), lambda i: (0, 0)),
            pl.BlockSpec((tm, p_pad), lambda i: (i, 0)),
            pl.BlockSpec((1, p_pad), lambda i: (0, 0)),
        ],
        out_specs=pl.BlockSpec((tm, p_pad), lambda i: (i, 0)),
        compiler_params=pltpu.CompilerParams(dimension_semantics=("parallel",)),
    )(res, w1, b1, ga, gb, w2, b2, mask, noise)


# ---------------------------- parameter preparation (runs once) ----------------------------
def prepare_params(params):
    """Fuse / pad / bf16-cast weights once, outside the jitted forward."""
    H, de, d_k = params["wq"].shape
    d_v = params["wv"].shape[-1]
    din = params["pre_w1"].shape[0]
    P = params["lab_w2"].shape[1]
    din_pad = _round_up(din, 128)
    p_pad = _round_up(P, 128)
    qp = _round_up(H * d_k, 128)              # pad Q lanes for unmasked stores
    kvp = _round_up(H * (d_k + d_v), 128)     # packed K|V lanes (exactly 128 here)

    bf = jnp.bfloat16
    row = lambda v: v.reshape(1, -1).astype(jnp.float32)

    wq_c = jnp.transpose(params["wq"], (1, 0, 2)).reshape(de, H * d_k)
    wk_c = jnp.transpose(params["wk"], (1, 0, 2)).reshape(de, H * d_k)
    wv_c = jnp.transpose(params["wv"], (1, 0, 2)).reshape(de, H * d_v)

    return dict(
        pre_w1=jnp.pad(params["pre_w1"], ((0, din_pad - din), (0, 0))).astype(bf),
        pre_b1=row(params["pre_b1"]),
        pre_ga=row(params["pre_ga"]), pre_gb=row(params["pre_gb"]),
        pre_w2=params["pre_w2"].astype(bf),
        pre_b2=row(params["pre_b2"]),
        wq=jnp.pad(wq_c, ((0, 0), (0, qp - H * d_k))).astype(bf),
        wkv=jnp.pad(jnp.concatenate([wk_c, wv_c], axis=1),
                    ((0, 0), (0, kvp - H * (d_k + d_v)))).astype(bf),
        wo=params["wo"].reshape(H * d_v, de).astype(bf),
        attn_ga=row(params["attn_ga"]), attn_gb=row(params["attn_gb"]),
        lab_w1=params["lab_w1"].astype(bf),
        lab_b1=row(params["lab_b1"]),
        lab_ga=row(params["lab_ga"]), lab_gb=row(params["lab_gb"]),
        lab_w2=jnp.pad(params["lab_w2"], ((0, 0), (0, p_pad - P))).astype(bf),
        lab_b2=jnp.pad(row(params["lab_b2"]), ((0, 0), (0, p_pad - P))),
    )


# ---------------------------- full forward ----------------------------
def poly_phoneme_classifier_forward(prep, features, mask_padded, gumbel_noise,
                                    *, num_heads, d_k, d_v, tm=256):
    # tm=256 fits v5e's 16 MiB default scoped VMEM at bf16; v6e can run tm=512.
    B, T, din = features.shape
    N = B * T
    P = mask_padded.shape[-1]
    de = prep["pre_w2"].shape[1]
    din_pad = prep["pre_w1"].shape[0]
    p_pad = prep["lab_w2"].shape[1]

    tm = min(tm, _round_up(N, 8))
    n_pad = _round_up(N, tm)
    tkv = 128 if tm % 128 == 0 else tm       # smaller KV tile cuts score-tile vreg pressure

    x = features.reshape(N, din).astype(jnp.bfloat16)
    x = jnp.pad(x, ((0, n_pad - N), (0, din_pad - din)))

    # linear_pre + fused Q / KV projections
    res, q, kv = pre_mlp_qkv_block(
        x, prep["pre_w1"], prep["pre_b1"], prep["pre_ga"], prep["pre_gb"],
        prep["pre_w2"], prep["pre_b2"], prep["wq"], prep["wkv"], tm=tm)

    # attention stack (num_layers = 1); ff modules are never called in forward
    res = attention_block(q, kv, res, prep["wo"], prep["attn_ga"], prep["attn_gb"],
                          tq=tm, tkv=tkv, n_actual=N,
                          num_heads=num_heads, d_k=d_k, d_v=d_v)

    # linear_label + mask + gumbel noise + log_softmax, fused
    mask2 = mask_padded.reshape(N, P)
    mask2 = jnp.pad(mask2, ((0, n_pad - N), (0, 0)))                           # rows -> 0
    mask2 = jnp.pad(mask2, ((0, 0), (0, p_pad - P)), constant_values=NEG_BIG)  # cols -> -big
    noise = jnp.pad(gumbel_noise.reshape(1, P), ((0, 0), (0, p_pad - P)))

    out = label_gumbel_block(res, prep["lab_w1"], prep["lab_b1"], prep["lab_ga"],
                             prep["lab_gb"], prep["lab_w2"], prep["lab_b2"],
                             mask2, noise, tm=tm)
    return out[:N, :P].reshape(B, T, P)


# ---------------------------- pure-JAX reference (f32) ----------------------------
def reference_forward(params, features, mask_padded, gumbel_noise):
    B, T, din = features.shape
    x = features.reshape(B * T, din)
    h = x @ params["pre_w1"] + params["pre_b1"]
    h = _ln_ref(h, params["pre_ga"], params["pre_gb"])
    res = jnp.maximum(h, 0.0) @ params["pre_w2"] + params["pre_b2"]
    de = res.shape[-1]
    out = jnp.zeros_like(res)
    for hh in range(params["wq"].shape[0]):
        q = res @ params["wq"][hh]
        k = res @ params["wk"][hh]
        v = res @ params["wv"][hh]
        p = jax.nn.softmax((q @ k.T) / jnp.sqrt(jnp.float32(de)), axis=-1)
        out = out + (p @ v) @ params["wo"][hh]
    res = _ln_ref(out + res, params["attn_ga"], params["attn_gb"])
    h = res @ params["lab_w1"] + params["lab_b1"]
    h = _ln_ref(h, params["lab_ga"], params["lab_gb"])
    logits = jnp.maximum(h, 0.0) @ params["lab_w2"] + params["lab_b2"]
    y = logits + mask_padded.reshape(B * T, -1) + gumbel_noise
    return jax.nn.log_softmax(y, axis=-1).reshape(B, T, -1)


if __name__ == "__main__":
    B, T = 2, 7            # B*T = 14 -> exercises the row-padding / KV-mask path
    D_SEL = 1024 + 300     # select_model_dim
    D_HID = 512            # select_model_hidden_dim
    D_EMB = 1024           # embedding_features_dim
    N_HEAD, D_KV = 2, 32
    N_PINYIN = 256         # hparams.n_pinyin_symbols (small synthetic value)

    key = jax.random.PRNGKey(0)
    ks = jax.random.split(key, 16)

    def nrm(k, shape, scale=0.02):
        return scale * jax.random.normal(k, shape, dtype=jnp.float32)

    params = dict(
        pre_w1=nrm(ks[0], (D_SEL, D_HID)),
        pre_b1=nrm(ks[1], (D_HID,)),
        pre_ga=jnp.ones((D_HID,), jnp.float32),
        pre_gb=jnp.zeros((D_HID,), jnp.float32),
        pre_w2=nrm(ks[2], (D_HID, D_EMB)),
        pre_b2=nrm(ks[3], (D_EMB,)),
        wq=nrm(ks[4], (N_HEAD, D_EMB, D_KV), scale=0.03),
        wk=nrm(ks[5], (N_HEAD, D_EMB, D_KV), scale=0.03),
        wv=nrm(ks[6], (N_HEAD, D_EMB, D_KV), scale=0.03),
        wo=nrm(ks[7], (N_HEAD, D_KV, D_EMB), scale=0.03),  # proj (bias-free), per-head slices
        attn_ga=jnp.ones((D_EMB,), jnp.float32),
        attn_gb=jnp.zeros((D_EMB,), jnp.float32),
        lab_w1=nrm(ks[8], (D_EMB, D_HID)),
        lab_b1=nrm(ks[9], (D_HID,)),
        lab_ga=jnp.ones((D_HID,), jnp.float32),
        lab_gb=jnp.zeros((D_HID,), jnp.float32),
        lab_w2=nrm(ks[10], (D_HID, N_PINYIN)),
        lab_b2=nrm(ks[11], (N_PINYIN,)),
    )

    features = jax.random.normal(ks[12], (B, T, D_SEL), dtype=jnp.float32)
    # polyphone candidate mask: 0 where allowed, -inf where disallowed (as in the module)
    allow = jax.random.bernoulli(ks[13], p=0.25, shape=(B, T, N_PINYIN))
    allow = allow.at[..., 0].set(True)
    mask_padded = jnp.where(allow, 0.0, -jnp.inf).astype(jnp.float32)
    # gumbel noise, one sample per vocab entry (broadcast over tokens), fixed seed
    u = jax.random.uniform(ks[14], (1, N_PINYIN), dtype=jnp.float32)
    gumbel_noise = -jnp.log(-jnp.log(u + 1e-20) + 1e-20)

    prep = prepare_params(params)   # weight fusing/padding/bf16 done once, outside jit
    fwd = jax.jit(functools.partial(poly_phoneme_classifier_forward,
                                    num_heads=N_HEAD, d_k=D_KV, d_v=D_KV))
    out = fwd(prep, features, mask_padded, gumbel_noise)
    out = jax.block_until_ready(out)

    ref = reference_forward(params, features, mask_padded, gumbel_noise)
    np.testing.assert_allclose(np.asarray(out), np.asarray(ref), rtol=5e-2, atol=5e-2)
    assert out.shape == (B, T, N_PINYIN)
    print("KERNEL_OK")
</pallas_src>

<mosaic_0001>
module attributes {stable_mosaic.version = 11 : i64} {
  func.func @_pre_mlp_qkv_kernel(%arg0: i32, %arg1: memref<16x1408xbf16, #tpu.memory_space<vmem>>, %arg2: memref<1408x512xbf16, #tpu.memory_space<vmem>>, %arg3: memref<1x512xf32, #tpu.memory_space<vmem>>, %arg4: memref<1x512xf32, #tpu.memory_space<vmem>>, %arg5: memref<1x512xf32, #tpu.memory_space<vmem>>, %arg6: memref<512x1024xbf16, #tpu.memory_space<vmem>>, %arg7: memref<1x1024xf32, #tpu.memory_space<vmem>>, %arg8: memref<1024x128xbf16, #tpu.memory_space<vmem>>, %arg9: memref<1024x128xbf16, #tpu.memory_space<vmem>>, %arg10: memref<16x1024xbf16, #tpu.memory_space<vmem>>, %arg11: memref<16x128xbf16, #tpu.memory_space<vmem>>, %arg12: memref<16x128xbf16, #tpu.memory_space<vmem>>) attributes {dimension_semantics = [#tpu.dimension_semantics<parallel>], iteration_bounds = array<i64: 1>, scalar_prefetch = 0 : i64, scratch_operands = 0 : i64, tpu.core_type = #tpu.core_type<tc>, window_params = [{transform_indices = @transform_0, window_bounds = array<i64: 16, 1408>}, {pipeline_mode = #tpu.pipeline_mode<synchronous>, transform_indices = @transform_1, window_bounds = array<i64: 1408, 512>}, {pipeline_mode = #tpu.pipeline_mode<synchronous>, transform_indices = @transform_2, window_bounds = array<i64: 1, 512>}, {pipeline_mode = #tpu.pipeline_mode<synchronous>, transform_indices = @transform_3, window_bounds = array<i64: 1, 512>}, {pipeline_mode = #tpu.pipeline_mode<synchronous>, transform_indices = @transform_4, window_bounds = array<i64: 1, 512>}, {pipeline_mode = #tpu.pipeline_mode<synchronous>, transform_indices = @transform_5, window_bounds = array<i64: 512, 1024>}, {pipeline_mode = #tpu.pipeline_mode<synchronous>, transform_indices = @transform_6, window_bounds = array<i64: 1, 1024>}, {pipeline_mode = #tpu.pipeline_mode<synchronous>, transform_indices = @transform_7, window_bounds = array<i64: 1024, 128>}, {pipeline_mode = #tpu.pipeline_mode<synchronous>, transform_indices = @transform_8, window_bounds = array<i64: 1024, 128>}, {transform_indices = @transform_9, window_bounds = array<i64: 16, 1024>}, {transform_indices = @transform_10, window_bounds = array<i64: 16, 128>}, {transform_indices = @transform_11, window_bounds = array<i64: 16, 128>}]} {
    %c0 = arith.constant 0 : index
    %c0_0 = arith.constant 0 : index
    %0 = vector.load %arg1[%c0, %c0_0] : memref<16x1408xbf16, #tpu.memory_space<vmem>>, vector<16x1408xbf16>
    %c0_1 = arith.constant 0 : index
    %c0_2 = arith.constant 0 : index
    %1 = vector.load %arg2[%c0_1, %c0_2] : memref<1408x512xbf16, #tpu.memory_space<vmem>>, vector<1408x512xbf16>
    %cst = arith.constant dense<0.000000e+00> : vector<16x512xf32>
    %2 = tpu.matmul %0, %1, %cst {dimension_numbers = #tpu.dot_dimension_numbers<[1], [0], [0], [1], [0, 0, 1, 1], [], []>} : vector<16x1408xbf16>, vector<1408x512xbf16>, vector<16x512xf32> -> vector<16x512xf32>
    %c0_3 = arith.constant 0 : index
    %c0_4 = arith.constant 0 : index
    %3 = vector.load %arg3[%c0_3, %c0_4] : memref<1x512xf32, #tpu.memory_space<vmem>>, vector<1x512xf32>
    %4 = vector.broadcast %3 : vector<1x512xf32> to vector<16x512xf32>
    %5 = arith.addf %2, %4 : vector<16x512xf32>
    %c0_5 = arith.constant 0 : index
    %c0_6 = arith.constant 0 : index
    %6 = vector.load %arg4[%c0_5, %c0_6] : memref<1x512xf32, #tpu.memory_space<vmem>>, vector<1x512xf32>
    %c0_7 = arith.constant 0 : index
    %c0_8 = arith.constant 0 : index
    %7 = vector.load %arg5[%c0_7, %c0_8] : memref<1x512xf32, #tpu.memory_space<vmem>>, vector<1x512xf32>
    %cst_9 = arith.constant dense<0.000000e+00> : vector<16xf32>
    %8 = vector.multi_reduction <add>, %5, %cst_9 [1] : vector<16x512xf32> to vector<16xf32>
    %9 = vector.shape_cast %8 : vector<16xf32> to vector<16x1xf32>
    %cst_10 = arith.constant 5.120000e+02 : f32
    %10 = vector.broadcast %cst_10 : f32 to vector<16x1xf32>
    %11 = arith.divf %9, %10 : vector<16x1xf32>
    %12 = vector.broadcast %11 : vector<16x1xf32> to vector<16x512xf32>
    %13 = arith.subf %5, %12 : vector<16x512xf32>
    %14 = arith.mulf %13, %13 : vector<16x512xf32>
    %cst_11 = arith.constant dense<0.000000e+00> : vector<16xf32>
    %15 = vector.multi_reduction <add>, %14, %cst_11 [1] : vector<16x512xf32> to vector<16xf32>
    %16 = vector.shape_cast %15 : vector<16xf32> to vector<16x1xf32>
    %cst_12 = arith.constant 5.110000e+02 : f32
    %17 = vector.broadcast %cst_12 : f32 to vector<16x1xf32>
    %18 = arith.divf %16, %17 : vector<16x1xf32>
    %19 = math.sqrt %18 : vector<16x1xf32>
    %cst_13 = arith.constant 1.000000e-03 : f32
    %20 = vector.broadcast %cst_13 : f32 to vector<16x1xf32>
    %21 = arith.addf %19, %20 : vector<16x1xf32>
    %22 = tpu.reciprocal %21 {approx = true} : vector<16x1xf32> -> vector<16x1xf32>
    %23 = vector.broadcast %11 : vector<16x1xf32> to vector<16x512xf32>
    %24 = arith.subf %5, %23 : vector<16x512xf32>
    %25 = vector.broadcast %22 : vector<16x1xf32> to vector<16x512xf32>
    %26 = arith.mulf %24, %25 : vector<16x512xf32>
    %27 = vector.broadcast %6 : vector<1x512xf32> to vector<16x512xf32>
    %28 = arith.mulf %26, %27 : vector<16x512xf32>
    %29 = vector.broadcast %7 : vector<1x512xf32> to vector<16x512xf32>
    %30 = arith.addf %28, %29 : vector<16x512xf32>
    %cst_14 = arith.constant 0.000000e+00 : f32
    %31 = vector.broadcast %cst_14 : f32 to vector<16x512xf32>
    %32 = arith.maximumf %30, %31 : vector<16x512xf32>
    %33 = arith.truncf %32 : vector<16x512xf32> to vector<16x512xbf16>
    %c0_15 = arith.constant 0 : index
    %c0_16 = arith.constant 0 : index
    %34 = vector.load %arg6[%c0_15, %c0_16] : memref<512x1024xbf16, #tpu.memory_space<vmem>>, vector<512x1024xbf16>
    %cst_17 = arith.constant dense<0.000000e+00> : vector<16x1024xf32>
    %35 = tpu.matmul %33, %34, %cst_17 {dimension_numbers = #tpu.dot_dimension_numbers<[1], [0], [0], [1], [0, 0, 1, 1], [], []>} : vector<16x512xbf16>, vector<512x1024xbf16>, vector<16x1024xf32> -> vector<16x1024xf32>
    %c0_18 = arith.constant 0 : index
    %c0_19 = arith.constant 0 : index
    %36 = vector.load %arg7[%c0_18, %c0_19] : memref<1x1024xf32, #tpu.memory_space<vmem>>, vector<1x1024xf32>
    %37 = vector.broadcast %36 : vector<1x1024xf32> to vector<16x1024xf32>
    %38 = arith.addf %35, %37 : vector<16x1024xf32>
    %39 = arith.truncf %38 : vector<16x1024xf32> to vector<16x1024xbf16>
    %c0_20 = arith.constant 0 : index
    %c0_21 = arith.constant 0 : index
    %40 = vector.load %arg10[%c0_20, %c0_21] : memref<16x1024xbf16, #tpu.memory_space<vmem>>, vector<16x1024xbf16>
    tpu.vector_store %arg10[%c0_20, %c0_21], %39 {strides = array<i32>} : memref<16x1024xbf16, #tpu.memory_space<vmem>>, vector<16x1024xbf16>,
    %41 = arith.truncf %38 : vector<16x1024xf32> to vector<16x1024xbf16>
    %c0_22 = arith.constant 0 : index
    %c0_23 = arith.constant 0 : index
    %42 = vector.load %arg8[%c0_22, %c0_23] : memref<1024x128xbf16, #tpu.memory_space<vmem>>, vector<1024x128xbf16>
    %cst_24 = arith.constant dense<0.000000e+00> : vector<16x128xf32>
    %43 = tpu.matmul %41, %42, %cst_24 {dimension_numbers = #tpu.dot_dimension_numbers<[1], [0], [0], [1], [0, 0, 1, 1], [], []>} : vector<16x1024xbf16>, vector<1024x128xbf16>, vector<16x128xf32> -> vector<16x128xf32>
    %44 = arith.truncf %43 : vector<16x128xf32> to vector<16x128xbf16>
    %c0_25 = arith.constant 0 : index
    %c0_26 = arith.constant 0 : index
    %45 = vector.load %arg11[%c0_25, %c0_26] : memref<16x128xbf16, #tpu.memory_space<vmem>>, vector<16x128xbf16>
    tpu.vector_store %arg11[%c0_25, %c0_26], %44 {strides = array<i32>} : memref<16x128xbf16, #tpu.memory_space<vmem>>, vector<16x128xbf16>,
    %c0_27 = arith.constant 0 : index
    %c0_28 = arith.constant 0 : index
    %46 = vector.load %arg9[%c0_27, %c0_28] : memref<1024x128xbf16, #tpu.memory_space<vmem>>, vector<1024x128xbf16>
    %cst_29 = arith.constant dense<0.000000e+00> : vector<16x128xf32>
    %47 = tpu.matmul %41, %46, %cst_29 {dimension_numbers = #tpu.dot_dimension_numbers<[1], [0], [0], [1], [0, 0, 1, 1], [], []>} : vector<16x1024xbf16>, vector<1024x128xbf16>, vector<16x128xf32> -> vector<16x128xf32>
    %48 = arith.truncf %47 : vector<16x128xf32> to vector<16x128xbf16>
    %c0_30 = arith.constant 0 : index
    %c0_31 = arith.constant 0 : index
    %49 = vector.load %arg12[%c0_30, %c0_31] : memref<16x128xbf16, #tpu.memory_space<vmem>>, vector<16x128xbf16>
    tpu.vector_store %arg12[%c0_30, %c0_31], %48 {strides = array<i32>} : memref<16x128xbf16, #tpu.memory_space<vmem>>, vector<16x128xbf16>,
    return
  }
  func.func @transform_0(%arg0: i32) -> (i32, i32) {
    %c0_i32 = arith.constant 0 : i32
    %c0_i32_0 = arith.constant 0 : i32
    return %arg0, %c0_i32 : i32, i32
  }
  func.func @transform_1(%arg0: i32) -> (i32, i32) {
    %c0_i32 = arith.constant 0 : i32
    %c0_i32_0 = arith.constant 0 : i32
    %c0_i32_1 = arith.constant 0 : i32
    return %c0_i32, %c0_i32_0 : i32, i32
  }
  func.func @transform_2(%arg0: i32) -> (i32, i32) {
    %c0_i32 = arith.constant 0 : i32
    %c0_i32_0 = arith.constant 0 : i32
    %c0_i32_1 = arith.constant 0 : i32
    return %c0_i32, %c0_i32_0 : i32, i32
  }
  func.func @transform_3(%arg0: i32) -> (i32, i32) {
    %c0_i32 = arith.constant 0 : i32
    %c0_i32_0 = arith.constant 0 : i32
    %c0_i32_1 = arith.constant 0 : i32
    return %c0_i32, %c0_i32_0 : i32, i32
  }
  func.func @transform_4(%arg0: i32) -> (i32, i32) {
    %c0_i32 = arith.constant 0 : i32
    %c0_i32_0 = arith.constant 0 : i32
    %c0_i32_1 = arith.constant 0 : i32
    return %c0_i32, %c0_i32_0 : i32, i32
  }
  func.func @transform_5(%arg0: i32) -> (i32, i32) {
    %c0_i32 = arith.constant 0 : i32
    %c0_i32_0 = arith.constant 0 : i32
    %c0_i32_1 = arith.constant 0 : i32
    return %c0_i32, %c0_i32_0 : i32, i32
  }
  func.func @transform_6(%arg0: i32) -> (i32, i32) {
    %c0_i32 = arith.constant 0 : i32
    %c0_i32_0 = arith.constant 0 : i32
    %c0_i32_1 = arith.constant 0 : i32
    return %c0_i32, %c0_i32_0 : i32, i32
  }
  func.func @transform_7(%arg0: i32) -> (i32, i32) {
    %c0_i32 = arith.constant 0 : i32
    %c0_i32_0 = arith.constant 0 : i32
    %c0_i32_1 = arith.constant 0 : i32
    return %c0_i32, %c0_i32_0 : i32, i32
  }
  func.func @transform_8(%arg0: i32) -> (i32, i32) {
    %c0_i32 = arith.constant 0 : i32
    %c0_i32_0 = arith.constant 0 : i32
    %c0_i32_1 = arith.constant 0 : i32
    return %c0_i32, %c0_i32_0 : i32, i32
  }
  func.func @transform_9(%arg0: i32) -> (i32, i32) {
    %c0_i32 = arith.constant 0 : i32
    %c0_i32_0 = arith.constant 0 : i32
    return %arg0, %c0_i32 : i32, i32
  }
  func.func @transform_10(%arg0: i32) -> (i32, i32) {
    %c0_i32 = arith.constant 0 : i32
    %c0_i32_0 = arith.constant 0 : i32
    return %arg0, %c0_i32 : i32, i32
  }
  func.func @transform_11(%arg0: i32) -> (i32, i32) {
    %c0_i32 = arith.constant 0 : i32
    %c0_i32_0 = arith.constant 0 : i32
    return %arg0, %c0_i32 : i32, i32
  }
}

module attributes {stable_mosaic.version = 11 : i64} {
  func.func @_label_gumbel_kernel(%arg0: i32, %arg1: memref<16x1024xbf16, #tpu.memory_space<vmem>>, %arg2: memref<1024x512xbf16, #tpu.memory_space<vmem>>, %arg3: memref<1x512xf32, #tpu.memory_space<vmem>>, %arg4: memref<1x512xf32, #tpu.memory_space<vmem>>, %arg5: memref<1x512xf32, #tpu.memory_space<vmem>>, %arg6: memref<512x256xbf16, #tpu.memory_space<vmem>>, %arg7: memref<1x256xf32, #tpu.memory_space<vmem>>, %arg8: memref<16x256xf32, #tpu.memory_space<vmem>>, %arg9: memref<1x256xf32, #tpu.memory_space<vmem>>, %arg10: memref<16x256xf32, #tpu.memory_space<vmem>>) attributes {dimension_semantics = [#tpu.dimension_semantics<parallel>], iteration_bounds = array<i64: 1>, scalar_prefetch = 0 : i64, scratch_operands = 0 : i64, tpu.core_type = #tpu.core_type<tc>, window_params = [{transform_indices = @transform_0, window_bounds = array<i64: 16, 1024>}, {pipeline_mode = #tpu.pipeline_mode<synchronous>, transform_indices = @transform_1, window_bounds = array<i64: 1024, 512>}, {pipeline_mode = #tpu.pipeline_mode<synchronous>, transform_indices = @transform_2, window_bounds = array<i64: 1, 512>}, {pipeline_mode = #tpu.pipeline_mode<synchronous>, transform_indices = @transform_3, window_bounds = array<i64: 1, 512>}, {pipeline_mode = #tpu.pipeline_mode<synchronous>, transform_indices = @transform_4, window_bounds = array<i64: 1, 512>}, {pipeline_mode = #tpu.pipeline_mode<synchronous>, transform_indices = @transform_5, window_bounds = array<i64: 512, 256>}, {pipeline_mode = #tpu.pipeline_mode<synchronous>, transform_indices = @transform_6, window_bounds = array<i64: 1, 256>}, {transform_indices = @transform_7, window_bounds = array<i64: 16, 256>}, {pipeline_mode = #tpu.pipeline_mode<synchronous>, transform_indices = @transform_8, window_bounds = array<i64: 1, 256>}, {transform_indices = @transform_9, window_bounds = array<i64: 16, 256>}]} {
    %c0 = arith.constant 0 : index
    %c0_0 = arith.constant 0 : index
    %0 = vector.load %arg1[%c0, %c0_0] : memref<16x1024xbf16, #tpu.memory_space<vmem>>, vector<16x1024xbf16>
    %c0_1 = arith.constant 0 : index
    %c0_2 = arith.constant 0 : index
    %1 = vector.load %arg2[%c0_1, %c0_2] : memref<1024x512xbf16, #tpu.memory_space<vmem>>, vector<1024x512xbf16>
    %cst = arith.constant dense<0.000000e+00> : vector<16x512xf32>
    %2 = tpu.matmul %0, %1, %cst {dimension_numbers = #tpu.dot_dimension_numbers<[1], [0], [0], [1], [0, 0, 1, 1], [], []>} : vector<16x1024xbf16>, vector<1024x512xbf16>, vector<16x512xf32> -> vector<16x512xf32>
    %c0_3 = arith.constant 0 : index
    %c0_4 = arith.constant 0 : index
    %3 = vector.load %arg3[%c0_3, %c0_4] : memref<1x512xf32, #tpu.memory_space<vmem>>, vector<1x512xf32>
    %4 = vector.broadcast %3 : vector<1x512xf32> to vector<16x512xf32>
    %5 = arith.addf %2, %4 : vector<16x512xf32>
    %c0_5 = arith.constant 0 : index
    %c0_6 = arith.constant 0 : index
    %6 = vector.load %arg4[%c0_5, %c0_6] : memref<1x512xf32, #tpu.memory_space<vmem>>, vector<1x512xf32>
    %c0_7 = arith.constant 0 : index
    %c0_8 = arith.constant 0 : index
    %7 = vector.load %arg5[%c0_7, %c0_8] : memref<1x512xf32, #tpu.memory_space<vmem>>, vector<1x512xf32>
    %cst_9 = arith.constant dense<0.000000e+00> : vector<16xf32>
    %8 = vector.multi_reduction <add>, %5, %cst_9 [1] : vector<16x512xf32> to vector<16xf32>
    %9 = vector.shape_cast %8 : vector<16xf32> to vector<16x1xf32>
    %cst_10 = arith.constant 5.120000e+02 : f32
    %10 = vector.broadcast %cst_10 : f32 to vector<16x1xf32>
    %11 = arith.divf %9, %10 : vector<16x1xf32>
    %12 = vector.broadcast %11 : vector<16x1xf32> to vector<16x512xf32>
    %13 = arith.subf %5, %12 : vector<16x512xf32>
    %14 = arith.mulf %13, %13 : vector<16x512xf32>
    %cst_11 = arith.constant dense<0.000000e+00> : vector<16xf32>
    %15 = vector.multi_reduction <add>, %14, %cst_11 [1] : vector<16x512xf32> to vector<16xf32>
    %16 = vector.shape_cast %15 : vector<16xf32> to vector<16x1xf32>
    %cst_12 = arith.constant 5.110000e+02 : f32
    %17 = vector.broadcast %cst_12 : f32 to vector<16x1xf32>
    %18 = arith.divf %16, %17 : vector<16x1xf32>
    %19 = math.sqrt %18 : vector<16x1xf32>
    %cst_13 = arith.constant 1.000000e-03 : f32
    %20 = vector.broadcast %cst_13 : f32 to vector<16x1xf32>
    %21 = arith.addf %19, %20 : vector<16x1xf32>
    %22 = tpu.reciprocal %21 {approx = true} : vector<16x1xf32> -> vector<16x1xf32>
    %23 = vector.broadcast %11 : vector<16x1xf32> to vector<16x512xf32>
    %24 = arith.subf %5, %23 : vector<16x512xf32>
    %25 = vector.broadcast %22 : vector<16x1xf32> to vector<16x512xf32>
    %26 = arith.mulf %24, %25 : vector<16x512xf32>
    %27 = vector.broadcast %6 : vector<1x512xf32> to vector<16x512xf32>
    %28 = arith.mulf %26, %27 : vector<16x512xf32>
    %29 = vector.broadcast %7 : vector<1x512xf32> to vector<16x512xf32>
    %30 = arith.addf %28, %29 : vector<16x512xf32>
    %cst_14 = arith.constant 0.000000e+00 : f32
    %31 = vector.broadcast %cst_14 : f32 to vector<16x512xf32>
    %32 = arith.maximumf %30, %31 : vector<16x512xf32>
    %33 = arith.truncf %32 : vector<16x512xf32> to vector<16x512xbf16>
    %c0_15 = arith.constant 0 : index
    %c0_16 = arith.constant 0 : index
    %34 = vector.load %arg6[%c0_15, %c0_16] : memref<512x256xbf16, #tpu.memory_space<vmem>>, vector<512x256xbf16>
    %cst_17 = arith.constant dense<0.000000e+00> : vector<16x256xf32>
    %35 = tpu.matmul %33, %34, %cst_17 {dimension_numbers = #tpu.dot_dimension_numbers<[1], [0], [0], [1], [0, 0, 1, 1], [], []>} : vector<16x512xbf16>, vector<512x256xbf16>, vector<16x256xf32> -> vector<16x256xf32>
    %c0_18 = arith.constant 0 : index
    %c0_19 = arith.constant 0 : index
    %36 = vector.load %arg7[%c0_18, %c0_19] : memref<1x256xf32, #tpu.memory_space<vmem>>, vector<1x256xf32>
    %37 = vector.broadcast %36 : vector<1x256xf32> to vector<16x256xf32>
    %38 = arith.addf %35, %37 : vector<16x256xf32>
    %c0_20 = arith.constant 0 : index
    %c0_21 = arith.constant 0 : index
    %39 = vector.load %arg8[%c0_20, %c0_21] : memref<16x256xf32, #tpu.memory_space<vmem>>, vector<16x256xf32>
    %40 = arith.addf %38, %39 : vector<16x256xf32>
    %c0_22 = arith.constant 0 : index
    %c0_23 = arith.constant 0 : index
    %41 = vector.load %arg9[%c0_22, %c0_23] : memref<1x256xf32, #tpu.memory_space<vmem>>, vector<1x256xf32>
    %42 = vector.broadcast %41 : vector<1x256xf32> to vector<16x256xf32>
    %43 = arith.addf %40, %42 : vector<16x256xf32>
    %cst_24 = arith.constant dense<0xFF800000> : vector<16xf32>
    %44 = vector.multi_reduction <maximumf>, %43, %cst_24 [1] : vector<16x256xf32> to vector<16xf32>
    %45 = vector.shape_cast %44 : vector<16xf32> to vector<16x1xf32>
    %46 = vector.broadcast %45 : vector<16x1xf32> to vector<16x256xf32>
    %47 = arith.subf %43, %46 : vector<16x256xf32>
    %48 = math.exp %47 : vector<16x256xf32>
    %cst_25 = arith.constant dense<0.000000e+00> : vector<16xf32>
    %49 = vector.multi_reduction <add>, %48, %cst_25 [1] : vector<16x256xf32> to vector<16xf32>
    %50 = vector.shape_cast %49 : vector<16xf32> to vector<16x1xf32>
    %51 = math.log %50 : vector<16x1xf32>
    %52 = vector.broadcast %51 : vector<16x1xf32> to vector<16x256xf32>
    %53 = arith.subf %47, %52 : vector<16x256xf32>
    %c0_26 = arith.constant 0 : index
    %c0_27 = arith.constant 0 : index
    %54 = vector.load %arg10[%c0_26, %c0_27] : memref<16x256xf32, #tpu.memory_space<vmem>>, vector<16x256xf32>
    tpu.vector_store %arg10[%c0_26, %c0_27], %53 {strides = array<i32>} : memref<16x256xf32, #tpu.memory_space<vmem>>, vector<16x256xf32>,
    return
  }
  func.func @transform_0(%arg0: i32) -> (i32, i32) {
    %c0_i32 = arith.constant 0 : i32
    %c0_i32_0 = arith.constant 0 : i32
    return %arg0, %c0_i32 : i32, i32
  }
  func.func @transform_1(%arg0: i32) -> (i32, i32) {
    %c0_i32 = arith.constant 0 : i32
    %c0_i32_0 = arith.constant 0 : i32
    %c0_i32_1 = arith.constant 0 : i32
    return %c0_i32, %c0_i32_0 : i32, i32
  }
  func.func @transform_2(%arg0: i32) -> (i32, i32) {
    %c0_i32 = arith.constant 0 : i32
    %c0_i32_0 = arith.constant 0 : i32
    %c0_i32_1 = arith.constant 0 : i32
    return %c0_i32, %c0_i32_0 : i32, i32
  }
  func.func @transform_3(%arg0: i32) -> (i32, i32) {
    %c0_i32 = arith.constant 0 : i32
    %c0_i32_0 = arith.constant 0 : i32
    %c0_i32_1 = arith.constant 0 : i32
    return %c0_i32, %c0_i32_0 : i32, i32
  }
  func.func @transform_4(%arg0: i32) -> (i32, i32) {
    %c0_i32 = arith.constant 0 : i32
    %c0_i32_0 = arith.constant 0 : i32
    %c0_i32_1 = arith.constant 0 : i32
    return %c0_i32, %c0_i32_0 : i32, i32
  }
  func.func @transform_5(%arg0: i32) -> (i32, i32) {
    %c0_i32 = arith.constant 0 : i32
    %c0_i32_0 = arith.constant 0 : i32
    %c0_i32_1 = arith.constant 0 : i32
    return %c0_i32, %c0_i32_0 : i32, i32
  }
  func.func @transform_6(%arg0: i32) -> (i32, i32) {
    %c0_i32 = arith.constant 0 : i32
    %c0_i32_0 = arith.constant 0 : i32
    %c0_i32_1 = arith.constant 0 : i32
    return %c0_i32, %c0_i32_0 : i32, i32
  }
  func.func @transform_7(%arg0: i32) -> (i32, i32) {
    %c0_i32 = arith.constant 0 : i32
    %c0_i32_0 = arith.constant 0 : i32
    return %arg0, %c0_i32 : i32, i32
  }
  func.func @transform_8(%arg0: i32) -> (i32, i32) {
    %c0_i32 = arith.constant 0 : i32
    %c0_i32_0 = arith.constant 0 : i32
    %c0_i32_1 = arith.constant 0 : i32
    return %c0_i32, %c0_i32_0 : i32, i32
  }
  func.func @transform_9(%arg0: i32) -> (i32, i32) {
    %c0_i32 = arith.constant 0 : i32
    %c0_i32_0 = arith.constant 0 : i32
    return %arg0, %c0_i32 : i32, i32
  }
}

module attributes {stable_mosaic.version = 11 : i64} {
  func.func @kernel(%arg0: i32, %arg1: i32, %arg2: memref<16x128xbf16, #tpu.memory_space<vmem>>, %arg3: memref<16x128xbf16, #tpu.memory_space<vmem>>, %arg4: memref<16x1024xbf16, #tpu.memory_space<vmem>>, %arg5: memref<64x1024xbf16, #tpu.memory_space<vmem>>, %arg6: memref<1x1024xf32, #tpu.memory_space<vmem>>, %arg7: memref<1x1024xf32, #tpu.memory_space<vmem>>, %arg8: memref<16x1024xbf16, #tpu.memory_space<vmem>>, %arg9: memref<2x16x1xf32, #tpu.memory_space<vmem>>, %arg10: memref<2x16x1xf32, #tpu.memory_space<vmem>>, %arg11: memref<2x16x32xf32, #tpu.memory_space<vmem>>) attributes {dimension_semantics = [#tpu.dimension_semantics<parallel>, #tpu.dimension_semantics<arbitrary>], iteration_bounds = array<i64: 1, 1>, scalar_prefetch = 0 : i64, scratch_operands = 3 : i64, tpu.core_type = #tpu.core_type<tc>, window_params = [{transform_indices = @transform_0, window_bounds = array<i64: 16, 128>}, {transform_indices = @transform_1, window_bounds = array<i64: 16, 128>}, {transform_indices = @transform_2, window_bounds = array<i64: 16, 1024>}, {pipeline_mode = #tpu.pipeline_mode<synchronous>, transform_indices = @transform_3, window_bounds = array<i64: 64, 1024>}, {pipeline_mode = #tpu.pipeline_mode<synchronous>, transform_indices = @transform_4, window_bounds = array<i64: 1, 1024>}, {pipeline_mode = #tpu.pipeline_mode<synchronous>, transform_indices = @transform_5, window_bounds = array<i64: 1, 1024>}, {transform_indices = @transform_6, window_bounds = array<i64: 16, 1024>}]} {
    %c0_i32 = arith.constant 0 : i32
    %0 = arith.cmpi eq, %arg1, %c0_i32 : i32
    %1 = arith.extui %0 : i1 to i32
    %c0_i32_0 = arith.constant 0 : i32
    %2 = arith.cmpi ne, %1, %c0_i32_0 : i32
    scf.if %2 {
      %cst_57 = arith.constant 0xFF800000 : f32
      %96 = vector.broadcast %cst_57 : f32 to vector<2x16x1xf32>
      %c0_58 = arith.constant 0 : index
      %c0_59 = arith.constant 0 : index
      %c0_60 = arith.constant 0 : index
      %97 = vector.load %arg9[%c0_58, %c0_59, %c0_60] : memref<2x16x1xf32, #tpu.memory_space<vmem>>, vector<2x16x1xf32>
      tpu.vector_store %arg9[%c0_58, %c0_59, %c0_60], %96 {strides = array<i32>} : memref<2x16x1xf32, #tpu.memory_space<vmem>>, vector<2x16x1xf32>,
      %cst_61 = arith.constant 0.000000e+00 : f32
      %98 = vector.broadcast %cst_61 : f32 to vector<2x16x1xf32>
      %c0_62 = arith.constant 0 : index
      %c0_63 = arith.constant 0 : index
      %c0_64 = arith.constant 0 : index
      %99 = vector.load %arg10[%c0_62, %c0_63, %c0_64] : memref<2x16x1xf32, #tpu.memory_space<vmem>>, vector<2x16x1xf32>
      tpu.vector_store %arg10[%c0_62, %c0_63, %c0_64], %98 {strides = array<i32>} : memref<2x16x1xf32, #tpu.memory_space<vmem>>, vector<2x16x1xf32>,
      %cst_65 = arith.constant 0.000000e+00 : f32
      %100 = vector.broadcast %cst_65 : f32 to vector<2x16x32xf32>
      %c0_66 = arith.constant 0 : index
      %c0_67 = arith.constant 0 : index
      %c0_68 = arith.constant 0 : index
      %101 = vector.load %arg11[%c0_66, %c0_67, %c0_68] : memref<2x16x32xf32, #tpu.memory_space<vmem>>, vector<2x16x32xf32>
      tpu.vector_store %arg11[%c0_66, %c0_67, %c0_68], %100 {strides = array<i32>} : memref<2x16x32xf32, #tpu.memory_space<vmem>>, vector<2x16x32xf32>,
    } else {
    }
    %c16_i32 = arith.constant 16 : i32
    %3 = arith.muli %arg1, %c16_i32 : i32
    %4 = tpu.iota {dimensions = array<i32: 1>} : vector<1x16xi32>
    %5 = vector.broadcast %3 : i32 to vector<1x16xi32>
    %6 = arith.addi %5, %4 : vector<1x16xi32>
    %c14_i32 = arith.constant 14 : i32
    %7 = vector.broadcast %c14_i32 : i32 to vector<1x16xi32>
    %8 = arith.cmpi slt, %6, %7 : vector<1x16xi32>
    %c0 = arith.constant 0 : index
    %c0_1 = arith.constant 0 : index
    %9 = vector.load %arg2[%c0, %c0_1] : memref<16x128xbf16, #tpu.memory_space<vmem>>, vector<16x32xbf16>
    %c0_2 = arith.constant 0 : index
    %c0_3 = arith.constant 0 : index
    %10 = vector.load %arg3[%c0_2, %c0_3] : memref<16x128xbf16, #tpu.memory_space<vmem>>, vector<16x32xbf16>
    %c0_4 = arith.constant 0 : index
    %c64 = arith.constant 64 : index
    %11 = vector.load %arg3[%c0_4, %c64] : memref<16x128xbf16, #tpu.memory_space<vmem>>, vector<16x32xbf16>
    %cst = arith.constant dense<0.000000e+00> : vector<16x16xf32>
    %12 = tpu.matmul %9, %10, %cst {dimension_numbers = #tpu.dot_dimension_numbers<[1], [1], [0], [0], [0, 0, 1, 0], [], []>} : vector<16x32xbf16>, vector<16x32xbf16>, vector<16x16xf32> -> vector<16x16xf32>
    %cst_5 = arith.constant 3.125000e-02 : f32
    %13 = vector.broadcast %cst_5 : f32 to vector<16x16xf32>
    %14 = arith.mulf %12, %13 : vector<16x16xf32>
    %cst_6 = arith.constant -1.000000e+30 : f32
    %15 = vector.shape_cast %8 : vector<1x16xi1> to vector<1x16xi1>
    %16 = vector.broadcast %15 : vector<1x16xi1> to vector<16x16xi1>
    %17 = vector.broadcast %cst_6 : f32 to vector<16x16xf32>
    %18 = arith.select %16, %14, %17 : vector<16x16xi1>, vector<16x16xf32>
    %c0_7 = arith.constant 0 : index
    %c0_8 = arith.constant 0 : index
    %c0_9 = arith.constant 0 : index
    %19 = vector.load %arg9[%c0_7, %c0_8, %c0_9] : memref<2x16x1xf32, #tpu.memory_space<vmem>>, vector<1x16x1xf32>
    %20 = vector.shape_cast %19 : vector<1x16x1xf32> to vector<16x1xf32>
    %cst_10 = arith.constant dense<0xFF800000> : vector<16xf32>
    %21 = vector.multi_reduction <maximumf>, %18, %cst_10 [1] : vector<16x16xf32> to vector<16xf32>
    %22 = vector.shape_cast %21 : vector<16xf32> to vector<16x1xf32>
    %23 = arith.maximumf %20, %22 : vector<16x1xf32>
    %24 = arith.subf %20, %23 : vector<16x1xf32>
    %25 = math.exp %24 : vector<16x1xf32>
    %26 = vector.broadcast %23 : vector<16x1xf32> to vector<16x16xf32>
    %27 = arith.subf %18, %26 : vector<16x16xf32>
    %28 = math.exp %27 : vector<16x16xf32>
    %c0_11 = arith.constant 0 : index
    %c0_12 = arith.constant 0 : index
    %c0_13 = arith.constant 0 : index
    %29 = vector.load %arg10[%c0_11, %c0_12, %c0_13] : memref<2x16x1xf32, #tpu.memory_space<vmem>>, vector<1x16x1xf32>
    %30 = vector.shape_cast %29 : vector<1x16x1xf32> to vector<16x1xf32>
    %31 = arith.mulf %25, %30 : vector<16x1xf32>
    %cst_14 = arith.constant dense<0.000000e+00> : vector<16xf32>
    %32 = vector.multi_reduction <add>, %28, %cst_14 [1] : vector<16x16xf32> to vector<16xf32>
    %33 = vector.shape_cast %32 : vector<16xf32> to vector<16x1xf32>
    %34 = arith.addf %31, %33 : vector<16x1xf32>
    %c0_15 = arith.constant 0 : index
    %c0_16 = arith.constant 0 : index
    %c0_17 = arith.constant 0 : index
    %35 = vector.load %arg10[%c0_15, %c0_16, %c0_17] : memref<2x16x1xf32, #tpu.memory_space<vmem>>, vector<1x16x1xf32>
    %36 = vector.shape_cast %35 : vector<1x16x1xf32> to vector<16x1xf32>
    %37 = vector.shape_cast %34 : vector<16x1xf32> to vector<1x16x1xf32>
    tpu.vector_store %arg10[%c0_15, %c0_16, %c0_17], %37 {strides = array<i32>} : memref<2x16x1xf32, #tpu.memory_space<vmem>>, vector<1x16x1xf32>,
    %c0_18 = arith.constant 0 : index
    %c0_19 = arith.constant 0 : index
    %c0_20 = arith.constant 0 : index
    %38 = vector.load %arg11[%c0_18, %c0_19, %c0_20] : memref<2x16x32xf32, #tpu.memory_space<vmem>>, vector<1x16x32xf32>
    %39 = vector.shape_cast %38 : vector<1x16x32xf32> to vector<16x32xf32>
    %40 = vector.broadcast %25 : vector<16x1xf32> to vector<16x32xf32>
    %41 = arith.mulf %40, %39 : vector<16x32xf32>
    %42 = arith.truncf %28 : vector<16x16xf32> to vector<16x16xbf16>
    %cst_21 = arith.constant dense<0.000000e+00> : vector<16x32xf32>
    %43 = tpu.matmul %42, %11, %cst_21 {dimension_numbers = #tpu.dot_dimension_numbers<[1], [0], [0], [1], [0, 0, 1, 1], [], []>} : vector<16x16xbf16>, vector<16x32xbf16>, vector<16x32xf32> -> vector<16x32xf32>
    %44 = arith.addf %41, %43 : vector<16x32xf32>
    %c0_22 = arith.constant 0 : index
    %c0_23 = arith.constant 0 : index
    %c0_24 = arith.constant 0 : index
    %45 = vector.load %arg11[%c0_22, %c0_23, %c0_24] : memref<2x16x32xf32, #tpu.memory_space<vmem>>, vector<1x16x32xf32>
    %46 = vector.shape_cast %45 : vector<1x16x32xf32> to vector<16x32xf32>
    %47 = vector.shape_cast %44 : vector<16x32xf32> to vector<1x16x32xf32>
    tpu.vector_store %arg11[%c0_22, %c0_23, %c0_24], %47 {strides = array<i32>} : memref<2x16x32xf32, #tpu.memory_space<vmem>>, vector<1x16x32xf32>,
    %c0_25 = arith.constant 0 : index
    %c0_26 = arith.constant 0 : index
    %c0_27 = arith.constant 0 : index
    %48 = vector.load %arg9[%c0_25, %c0_26, %c0_27] : memref<2x16x1xf32, #tpu.memory_space<vmem>>, vector<1x16x1xf32>
    %49 = vector.shape_cast %48 : vector<1x16x1xf32> to vector<16x1xf32>
    %50 = vector.shape_cast %23 : vector<16x1xf32> to vector<1x16x1xf32>
    tpu.vector_store %arg9[%c0_25, %c0_26, %c0_27], %50 {strides = array<i32>} : memref<2x16x1xf32, #tpu.memory_space<vmem>>, vector<1x16x1xf32>,
    %c0_28 = arith.constant 0 : index
    %c32 = arith.constant 32 : index
    %51 = vector.load %arg2[%c0_28, %c32] : memref<16x128xbf16, #tpu.memory_space<vmem>>, vector<16x32xbf16>
    %c0_29 = arith.constant 0 : index
    %c32_30 = arith.constant 32 : index
    %52 = vector.load %arg3[%c0_29, %c32_30] : memref<16x128xbf16, #tpu.memory_space<vmem>>, vector<16x32xbf16>
    %c0_31 = arith.constant 0 : index
    %c96 = arith.constant 96 : index
    %53 = vector.load %arg3[%c0_31, %c96] : memref<16x128xbf16, #tpu.memory_space<vmem>>, vector<16x32xbf16>
    %cst_32 = arith.constant dense<0.000000e+00> : vector<16x16xf32>
    %54 = tpu.matmul %51, %52, %cst_32 {dimension_numbers = #tpu.dot_dimension_numbers<[1], [1], [0], [0], [0, 0, 1, 0], [], []>} : vector<16x32xbf16>, vector<16x32xbf16>, vector<16x16xf32> -> vector<16x16xf32>
    %cst_33 = arith.constant 3.125000e-02 : f32
    %55 = vector.broadcast %cst_33 : f32 to vector<16x16xf32>
    %56 = arith.mulf %54, %55 : vector<16x16xf32>
    %cst_34 = arith.constant -1.000000e+30 : f32
    %57 = vector.shape_cast %8 : vector<1x16xi1> to vector<1x16xi1>
    %58 = vector.broadcast %57 : vector<1x16xi1> to vector<16x16xi1>
    %59 = vector.broadcast %cst_34 : f32 to vector<16x16xf32>
    %60 = arith.select %58, %56, %59 : vector<16x16xi1>, vector<16x16xf32>
    %c1 = arith.constant 1 : index
    %c0_35 = arith.constant 0 : index
    %c0_36 = arith.constant 0 : index
    %61 = vector.load %arg9[%c1, %c0_35, %c0_36] : memref<2x16x1xf32, #tpu.memory_space<vmem>>, vector<1x16x1xf32>
    %62 = vector.shape_cast %61 : vector<1x16x1xf32> to vector<16x1xf32>
    %cst_37 = arith.constant dense<0xFF800000> : vector<16xf32>
    %63 = vector.multi_reduction <maximumf>, %60, %cst_37 [1] : vector<16x16xf32> to vector<16xf32>
    %64 = vector.shape_cast %63 : vector<16xf32> to vector<16x1xf32>
    %65 = arith.maximumf %62, %64 : vector<16x1xf32>
    %66 = arith.subf %62, %65 : vector<16x1xf32>
    %67 = math.exp %66 : vector<16x1xf32>
    %68 = vector.broadcast %65 : vector<16x1xf32> to vector<16x16xf32>
    %69 = arith.subf %60, %68 : vector<16x16xf32>
    %70 = math.exp %69 : vector<16x16xf32>
    %c1_38 = arith.constant 1 : index
    %c0_39 = arith.constant 0 : index
    %c0_40 = arith.constant 0 : index
    %71 = vector.load %arg10[%c1_38, %c0_39, %c0_40] : memref<2x16x1xf32, #tpu.memory_space<vmem>>, vector<1x16x1xf32>
    %72 = vector.shape_cast %71 : vector<1x16x1xf32> to vector<16x1xf32>
    %73 = arith.mulf %67, %72 : vector<16x1xf32>
    %cst_41 = arith.constant dense<0.000000e+00> : vector<16xf32>
    %74 = vector.multi_reduction <add>, %70, %cst_41 [1] : vector<16x16xf32> to vector<16xf32>
    %75 = vector.shape_cast %74 : vector<16xf32> to vector<16x1xf32>
    %76 = arith.addf %73, %75 : vector<16x1xf32>
    %c1_42 = arith.constant 1 : index
    %c0_43 = arith.constant 0 : index
    %c0_44 = arith.constant 0 : index
    %77 = vector.load %arg10[%c1_42, %c0_43, %c0_44] : memref<2x16x1xf32, #tpu.memory_space<vmem>>, vector<1x16x1xf32>
    %78 = vector.shape_cast %77 : vector<1x16x1xf32> to vector<16x1xf32>
    %79 = vector.shape_cast %76 : vector<16x1xf32> to vector<1x16x1xf32>
    tpu.vector_store %arg10[%c1_42, %c0_43, %c0_44], %79 {strides = array<i32>} : memref<2x16x1xf32, #tpu.memory_space<vmem>>, vector<1x16x1xf32>,
    %c1_45 = arith.constant 1 : index
    %c0_46 = arith.constant 0 : index
    %c0_47 = arith.constant 0 : index
    %80 = vector.load %arg11[%c1_45, %c0_46, %c0_47] : memref<2x16x32xf32, #tpu.memory_space<vmem>>, vector<1x16x32xf32>
    %81 = vector.shape_cast %80 : vector<1x16x32xf32> to vector<16x32xf32>
    %82 = vector.broadcast %67 : vector<16x1xf32> to vector<16x32xf32>
    %83 = arith.mulf %82, %81 : vector<16x32xf32>
    %84 = arith.truncf %70 : vector<16x16xf32> to vector<16x16xbf16>
    %cst_48 = arith.constant dense<0.000000e+00> : vector<16x32xf32>
    %85 = tpu.matmul %84, %53, %cst_48 {dimension_numbers = #tpu.dot_dimension_numbers<[1], [0], [0], [1], [0, 0, 1, 1], [], []>} : vector<16x16xbf16>, vector<16x32xbf16>, vector<16x32xf32> -> vector<16x32xf32>
    %86 = arith.addf %83, %85 : vector<16x32xf32>
    %c1_49 = arith.constant 1 : index
    %c0_50 = arith.constant 0 : index
    %c0_51 = arith.constant 0 : index
    %87 = vector.load %arg11[%c1_49, %c0_50, %c0_51] : memref<2x16x32xf32, #tpu.memory_space<vmem>>, vector<1x16x32xf32>
    %88 = vector.shape_cast %87 : vector<1x16x32xf32> to vector<16x32xf32>
    %89 = vector.shape_cast %86 : vector<16x32xf32> to vector<1x16x32xf32>
    tpu.vector_store %arg11[%c1_49, %c0_50, %c0_51], %89 {strides = array<i32>} : memref<2x16x32xf32, #tpu.memory_space<vmem>>, vector<1x16x32xf32>,
    %c1_52 = arith.constant 1 : index
    %c0_53 = arith.constant 0 : index
    %c0_54 = arith.constant 0 : index
    %90 = vector.load %arg9[%c1_52, %c0_53, %c0_54] : memref<2x16x1xf32, #tpu.memory_space<vmem>>, vector<1x16x1xf32>
    %91 = vector.shape_cast %90 : vector<1x16x1xf32> to vector<16x1xf32>
    %92 = vector.shape_cast %65 : vector<16x1xf32> to vector<1x16x1xf32>
    tpu.vector_store %arg9[%c1_52, %c0_53, %c0_54], %92 {strides = array<i32>} : memref<2x16x1xf32, #tpu.memory_space<vmem>>, vector<1x16x1xf32>,
    %c0_i32_55 = arith.constant 0 : i32
    %93 = arith.cmpi eq, %arg1, %c0_i32_55 : i32
    %94 = arith.extui %93 : i1 to i32
    %c0_i32_56 = arith.constant 0 : i32
    %95 = arith.cmpi ne, %94, %c0_i32_56 : i32
    scf.if %95 {
      %c0_57 = arith.constant 0 : index
      %c0_58 = arith.constant 0 : index
      %c0_59 = arith.constant 0 : index
      %96 = vector.load %arg11[%c0_57, %c0_58, %c0_59] : memref<2x16x32xf32, #tpu.memory_space<vmem>>, vector<1x16x32xf32>
      %97 = vector.shape_cast %96 : vector<1x16x32xf32> to vector<16x32xf32>
      %c0_60 = arith.constant 0 : index
      %c0_61 = arith.constant 0 : index
      %c0_62 = arith.constant 0 : index
      %98 = vector.load %arg10[%c0_60, %c0_61, %c0_62] : memref<2x16x1xf32, #tpu.memory_space<vmem>>, vector<1x16x1xf32>
      %99 = vector.shape_cast %98 : vector<1x16x1xf32> to vector<16x1xf32>
      %100 = tpu.reciprocal %99 {approx = true} : vector<16x1xf32> -> vector<16x1xf32>
      %101 = vector.broadcast %100 : vector<16x1xf32> to vector<16x32xf32>
      %102 = arith.mulf %97, %101 : vector<16x32xf32>
      %c1_63 = arith.constant 1 : index
      %c0_64 = arith.constant 0 : index
      %c0_65 = arith.constant 0 : index
      %103 = vector.load %arg11[%c1_63, %c0_64, %c0_65] : memref<2x16x32xf32, #tpu.memory_space<vmem>>, vector<1x16x32xf32>
      %104 = vector.shape_cast %103 : vector<1x16x32xf32> to vector<16x32xf32>
      %c1_66 = arith.constant 1 : index
      %c0_67 = arith.constant 0 : index
      %c0_68 = arith.constant 0 : index
      %105 = vector.load %arg10[%c1_66, %c0_67, %c0_68] : memref<2x16x1xf32, #tpu.memory_space<vmem>>, vector<1x16x1xf32>
      %106 = vector.shape_cast %105 : vector<1x16x1xf32> to vector<16x1xf32>
      %107 = tpu.reciprocal %106 {approx = true} : vector<16x1xf32> -> vector<16x1xf32>
      %108 = vector.broadcast %107 : vector<16x1xf32> to vector<16x32xf32>
      %109 = arith.mulf %104, %108 : vector<16x32xf32>
      %110 = tpu.concatenate %102, %109 in 1 : vector<16x32xf32>, vector<16x32xf32> -> vector<16x64xf32>
      %111 = arith.truncf %110 : vector<16x64xf32> to vector<16x64xbf16>
      %c0_69 = arith.constant 0 : index
      %c0_70 = arith.constant 0 : index
      %112 = vector.load %arg5[%c0_69, %c0_70] : memref<64x1024xbf16, #tpu.memory_space<vmem>>, vector<64x1024xbf16>
      %cst_71 = arith.constant dense<0.000000e+00> : vector<16x1024xf32>
      %113 = tpu.matmul %111, %112, %cst_71 {dimension_numbers = #tpu.dot_dimension_numbers<[1], [0], [0], [1], [0, 0, 1, 1], [], []>} : vector<16x64xbf16>, vector<64x1024xbf16>, vector<16x1024xf32> -> vector<16x1024xf32>
      %c0_72 = arith.constant 0 : index
      %c0_73 = arith.constant 0 : index
      %114 = vector.load %arg4[%c0_72, %c0_73] : memref<16x1024xbf16, #tpu.memory_space<vmem>>, vector<16x1024xbf16>
      %115 = arith.extf %114 : vector<16x1024xbf16> to vector<16x1024xf32>
      %116 = arith.addf %113, %115 : vector<16x1024xf32>
      %c0_74 = arith.constant 0 : index
      %c0_75 = arith.constant 0 : index
      %117 = vector.load %arg6[%c0_74, %c0_75] : memref<1x1024xf32, #tpu.memory_space<vmem>>, vector<1x1024xf32>
      %c0_76 = arith.constant 0 : index
      %c0_77 = arith.constant 0 : index
      %118 = vector.load %arg7[%c0_76, %c0_77] : memref<1x1024xf32, #tpu.memory_space<vmem>>, vector<1x1024xf32>
      %cst_78 = arith.constant dense<0.000000e+00> : vector<16xf32>
      %119 = vector.multi_reduction <add>, %116, %cst_78 [1] : vector<16x1024xf32> to vector<16xf32>
      %120 = vector.shape_cast %119 : vector<16xf32> to vector<16x1xf32>
      %cst_79 = arith.constant 1.024000e+03 : f32
      %121 = vector.broadcast %cst_79 : f32 to vector<16x1xf32>
      %122 = arith.divf %120, %121 : vector<16x1xf32>
      %123 = vector.broadcast %122 : vector<16x1xf32> to vector<16x1024xf32>
      %124 = arith.subf %116, %123 : vector<16x1024xf32>
      %125 = arith.mulf %124, %124 : vector<16x1024xf32>
      %cst_80 = arith.constant dense<0.000000e+00> : vector<16xf32>
      %126 = vector.multi_reduction <add>, %125, %cst_80 [1] : vector<16x1024xf32> to vector<16xf32>
      %127 = vector.shape_cast %126 : vector<16xf32> to vector<16x1xf32>
      %cst_81 = arith.constant 1.023000e+03 : f32
      %128 = vector.broadcast %cst_81 : f32 to vector<16x1xf32>
      %129 = arith.divf %127, %128 : vector<16x1xf32>
      %130 = math.sqrt %129 : vector<16x1xf32>
      %cst_82 = arith.constant 1.000000e-03 : f32
      %131 = vector.broadcast %cst_82 : f32 to vector<16x1xf32>
      %132 = arith.addf %130, %131 : vector<16x1xf32>
      %133 = tpu.reciprocal %132 {approx = true} : vector<16x1xf32> -> vector<16x1xf32>
      %134 = vector.broadcast %122 : vector<16x1xf32> to vector<16x1024xf32>
      %135 = arith.subf %116, %134 : vector<16x1024xf32>
      %136 = vector.broadcast %133 : vector<16x1xf32> to vector<16x1024xf32>
      %137 = arith.mulf %135, %136 : vector<16x1024xf32>
      %138 = vector.broadcast %117 : vector<1x1024xf32> to vector<16x1024xf32>
      %139 = arith.mulf %137, %138 : vector<16x1024xf32>
      %140 = vector.broadcast %118 : vector<1x1024xf32> to vector<16x1024xf32>
      %141 = arith.addf %139, %140 : vector<16x1024xf32>
      %142 = arith.truncf %141 : vector<16x1024xf32> to vector<16x1024xbf16>
      %c0_83 = arith.constant 0 : index
      %c0_84 = arith.constant 0 : index
      %143 = vector.load %arg8[%c0_83, %c0_84] : memref<16x1024xbf16, #tpu.memory_space<vmem>>, vector<16x1024xbf16>
      tpu.vector_store %arg8[%c0_83, %c0_84], %142 {strides = array<i32>} : memref<16x1024xbf16, #tpu.memory_space<vmem>>, vector<16x1024xbf16>,
    } else {
    }
    return
  }
  func.func @transform_0(%arg0: i32, %arg1: i32) -> (i32, i32) {
    %c0_i32 = arith.constant 0 : i32
    %c0_i32_0 = arith.constant 0 : i32
    return %arg0, %c0_i32 : i32, i32
  }
  func.func @transform_1(%arg0: i32, %arg1: i32) -> (i32, i32) {
    %c0_i32 = arith.constant 0 : i32
    %c0_i32_0 = arith.constant 0 : i32
    return %arg1, %c0_i32 : i32, i32
  }
  func.func @transform_2(%arg0: i32, %arg1: i32) -> (i32, i32) {
    %c0_i32 = arith.constant 0 : i32
    %c0_i32_0 = arith.constant 0 : i32
    return %arg0, %c0_i32 : i32, i32
  }
  func.func @transform_3(%arg0: i32, %arg1: i32) -> (i32, i32) {
    %c0_i32 = arith.constant 0 : i32
    %c0_i32_0 = arith.constant 0 : i32
    %c0_i32_1 = arith.constant 0 : i32
    return %c0_i32, %c0_i32_0 : i32, i32
  }
  func.func @transform_4(%arg0: i32, %arg1: i32) -> (i32, i32) {
    %c0_i32 = arith.constant 0 : i32
    %c0_i32_0 = arith.constant 0 : i32
    %c0_i32_1 = arith.constant 0 : i32
    return %c0_i32, %c0_i32_0 : i32, i32
  }
  func.func @transform_5(%arg0: i32, %arg1: i32) -> (i32, i32) {
    %c0_i32 = arith.constant 0 : i32
    %c0_i32_0 = arith.constant 0 : i32
    %c0_i32_1 = arith.constant 0 : i32
    return %c0_i32, %c0_i32_0 : i32, i32
  }
  func.func @transform_6(%arg0: i32, %arg1: i32) -> (i32, i32) {
    %c0_i32 = arith.constant 0 : i32
    %c0_i32_0 = arith.constant 0 : i32
    return %arg0, %c0_i32 : i32, i32
  }
}

</mosaic_0001>

<bundles_post_ra>
// kernel: poly_phoneme_classifier_forward.4
= control target key start
LH: loop header
LB: loop body
LE: loop exit
PB: predicated region body
PF: predicated region fallthrough
CT: control target
= control target key end

     0   :  { %vm37_vm0 = vcmask 261120   ;;  %v1286_v0 = vmov 0.0   ;;  %vm1287_vm1 = vmmov 0   ;;  %vm28_vm2 = vcmask 7168   ;;  %s1290_s25 = smov 64   ;;  %s1291_s28 = smov 96   ;;  %s1693_s1 = inlined_call_operand.vmem [shape: bf16[16,128], index: 1, kind: input, shape index: {}]   ;;  %s1694_s0 = inlined_call_operand.vmem [shape: bf16[16,128], index: 0, kind: input, shape index: {}]   ;;  %s1695_s3 = inlined_call_operand.vmem [shape: bf16[64,1024], index: 3, kind: input, shape index: {}]   ;;  %s1696_s2 = inlined_call_operand.vmem [shape: bf16[16,1024], index: 2, kind: input, shape index: {}]   ;;  %s1697_s4 = inlined_call_operand.vmem [shape: f32[1,1024], index: 4, kind: input, shape index: {}]   ;;  %s1698_s5 = inlined_call_operand.vmem [shape: f32[1,1024], index: 5, kind: input, shape index: {}]   ;;  %s1699_s6 = inlined_call_operand.vmem [shape: bf16[16,1024], index: 6, kind: output, shape index: {}]  }
   0x1   :  { %1212 = vmatprep.subr.bf16.mxu0 %v1286_v0  ;;  %v1250_v1 = vld [vmem:[%s1693_s1] sm:$0xff]   ;;  %38 = vst.msk [vmem:[#allocation4] sm:$0xff] %vm37_vm0, %v1286_v0  ;;  %39 = vst.msk [vmem:[#allocation4 + $0x8] sm:$0xff] %vm37_vm0, %v1286_v0  ;;  %1214 = vmatprep.mubr.msk.bf16.mxu0 %vm1287_vm1, %v1286_v0  ;;  %v1288_v4 = vmov -inf   ;;  %v43_v5 = vlaneseq  ;;  %vm118_vm4 = vcmask 130048   ;;  %v1289_v17 = vmov 0  }
   0x2   :  { %40 = vst.msk [vmem:[#allocation4 + $0x10] sm:$0xff] %vm37_vm0, %v1286_v0  ;;  %41 = vst.msk [vmem:[#allocation4 + $0x18] sm:$0xff] %vm37_vm0, %v1286_v0  ;;  %1218 = vmatprep.subr.bf16.mxu1 %v1286_v0  ;;  %1220 = vmatprep.mubr.msk.bf16.mxu1 %vm1287_vm1, %v1286_v0  ;;  %v67_v2 = vsel %vm37_vm0, %v1250_v1, 0  ;;  %v1251_v3 = vld [vmem:[%s1694_s0] sm:$0xff]   ;;  %vm684_vm5 = vcmask 523264  }
   0x3   :  { %1213 = vmatpush3.bf16.xpose.msra.mxu0 %v67_v2  ;;  %29 = vst.msk [vmem:[#allocation2] sm:$0xff] %vm28_vm2, %v1288_v4  ;;  %30 = vst.msk [vmem:[#allocation2 + $0x8] sm:$0xff] %vm28_vm2, %v1288_v4  ;;  %v1366_v6 = vand.u32 127, %v43_v5  ;;  %1243 = vset.pattern.permute.xlu1 %v1289_v17  ;;  %v1252_v26 = vld [vmem:[%s1693_s1] sm:$0xff]  }
   0x4   :  { %1230 = vmatprep.subr.bf16.mxu0 %v1286_v0  ;;  %31 = vst.msk [vmem:[#allocation2 + $0x10] sm:$0xff] %vm28_vm2, %v1288_v4  ;;  %32 = vst.msk [vmem:[#allocation2 + $0x18] sm:$0xff] %vm28_vm2, %v1288_v4  ;;  %1244 = vset.pattern.permute.xlu0 %v1289_v17  ;;  %v1253_v27 = vld [vmem:[%s1694_s0] sm:$0xff]   ;;  %s1292_s0 = smov 32  }
   0x5   :  { %33 = vst.msk [vmem:[#allocation3] sm:$0xff] %vm28_vm2, %v1286_v0  ;;  %34 = vst.msk [vmem:[#allocation3 + $0x8] sm:$0xff] %vm28_vm2, %v1286_v0  ;;  %vm47_vm3 = vcmp.lt.s32.totalorder %v1366_v6, 14 }
   0x6   :  { %35 = vst.msk [vmem:[#allocation3 + $0x10] sm:$0xff] %vm28_vm2, %v1286_v0  ;;  %36 = vst.msk [vmem:[#allocation3 + $0x18] sm:$0xff] %vm28_vm2, %v1286_v0 }
   0xa   :  { %1215 = vmatmul.mubr.msk.bf16.vlgmr.msra.gmra.mrb[0].mxu0 %vm37_vm0, %v1251_v3  ;;  %v1377_v18 = vld [vmem:[#allocation2] sm:$0xff]  ;;  %v1382_v21 = vld [vmem:[#allocation2 + $0x8] sm:$0xff] }
   0xb   :  { %1232 = vmatprep.mubr.msk.bf16.mxu0 %vm1287_vm1, %v1286_v0  ;;  %v302_v55 = vld [vmem:[#allocation2 + $0x10] sm:$0xff]  ;;  %v303_v57 = vld [vmem:[#allocation2 + $0x18] sm:$0xff] }
  0xdd   :  { %v103_v7 = vpop.f32.mrb[0].mxu0 }
  0xde   :  { %v110_v8 = vmul.f32 0.03125, %v103_v7  ;;  %v1216_v9 = vpop.f32.mrb[1].mxu0 }
  0xdf   :  { %v106_v10 = vpop.f32.mrb[2].mxu0 }
  0xe0   :  { %v111_v11 = vmul.f32 0.03125, %v106_v10  ;;  %v1217_v12 = vpop.f32.mrb[3].mxu0  ;;  %v114_v13 = vsel %vm47_vm3, %v110_v8, -1e+30 }
  0xe1   :  { %v119_v14 = vsel %vm118_vm4, %v114_v13, -inf }
  0xe2   :  { %120 = vmax.xlane.f32.xlu0 %v119_v14  ;;  %v115_v15 = vsel %vm47_vm3, %v111_v11, -1e+30 }
  0xe3   :  { %v122_v16 = vsel %vm118_vm4, %v115_v15, -inf }
  0xe6   :  { %123 = vmax.xlane.f32.xlu0 %v122_v16 }
  0xfc   :  { %179 = vrot.lane.b32.xlu0 %v1250_v1, %s1290_s25 }
 0x16f   :  { %v121_v19 = vpop.xlane.xlu0 %120 }
 0x170   :  { %v1380_v20 = vmax.f32 %v1377_v18, %v121_v19 }
 0x172   :  { %v127_v22 = vsub.f32 %v1377_v18, %v1380_v20  ;;  %230 = vst.msk [vmem:[#allocation2] sm:$0xff] %vm28_vm2, %v1380_v20  ;;  %135 = vperm.xlu1 %1243, %v1380_v20  }
 0x173   :  { %v124_v23 = vpop.xlane.xlu0 %123 }
 0x174   :  { %v1390_v24 = vmax.f32 %v1382_v21, %v124_v23  ;;  %v129_v23 = vmul.f32 1.442695, %v127_v22 }
 0x176   :  { %v128_v25 = vsub.f32 %v1382_v21, %v1390_v24  ;;  %231 = vst.msk [vmem:[#allocation2 + $0x8] sm:$0xff] %vm28_vm2, %v1390_v24  ;;  %140 = vperm.xlu1 %1243, %v1390_v24  }
 0x177   :  { %v180_v28 = vpop.permute.xlu0 %179 }
 0x178   :  { %1219 = vmatpush3.bf16.msra.mxu1 %v180_v28  ;;  %v336_v28 = vld [vmem:[#allocation3 + $0x18] sm:$0xff] }
 0x179   :  { %1224 = vmatprep.subr.bf16.mxu1 %v1286_v0 }
 0x17a   :  { %248 = vrot.lane.b32.xlu1 %v1252_v26, %s1291_s28 }
 0x17e   :  { %241 = vrot.lane.b32.xlu1 %v1253_v27, %s1291_s28  ;;  %v335_v27 = vld [vmem:[#allocation3 + $0x10] sm:$0xff] }
 0x1f1   :  { %v136_v29 = vpop.permute.xlu1 %135 }
 0x1f2   :  { %v143_v30 = vsub.f32 %v114_v13, %v136_v29 }
 0x1f4   :  { %v145_v31 = vmul.f32 1.442695, %v143_v30 }
 0x1f5   :  { %v141_v32 = vpop.permute.xlu1 %140 }
 0x1f6   :  { %v144_v33 = vsub.f32 %v115_v15, %v141_v32  ;;  %1254 = vpow2.f32 %v145_v31  ;;  %v149_v32 = vld [vmem:[#allocation3] sm:$0xff] }
 0x1f8   :  { %v147_v34 = vmul.f32 1.442695, %v144_v33 }
 0x1f9   :  { %v249_v35 = vpop.permute.xlu1 %248 }
 0x1fa   :  { %1256 = vpow2.f32 %v147_v34  ;;  %v254_v38 = vsel %vm37_vm0, %v249_v35, 0 }
 0x1fd   :  { %v242_v40 = vpop.permute.xlu1 %241 }
 0x200   :  { %v1255_v36 = vpop.eup %1254 }
 0x201   :  { %v153_v12 = vsel %vm118_vm4, %v1255_v36, 0.0 }
 0x204   :  { %v1257_v37 = vpop.eup %1256 }
 0x205   :  { %v178_v39 = vpack.c.bf16 %v1257_v37, %v1255_v36  ;;  %v156_v13 = vsel %vm118_vm4, %v1257_v37, 0.0  ;;  %v150_v37 = vld [vmem:[#allocation3 + $0x8] sm:$0xff] }
 0x207   :  { %1221 = vmatmul.mubr.msk.bf16.vlgmr.msra.gmra.mrb[0].mxu1 %vm118_vm4, %v178_v39 }
 0x208   :  { %1225 = vmatpush3.bf16.xpose.msra.mxu1 %v254_v38  ;;  %1226 = vmatprep.mubr.msk.bf16.mxu1 %vm1287_vm1, %v1286_v0 }
 0x20f   :  { %1227 = vmatmul.mubr.msk.bf16.vlgmr.msra.gmra.mrb[4].mxu1 %vm37_vm0, %v242_v40 }
 0x210   :  { %720 = vmatprep.mubr.bf16.mxu1 %v1289_v17 }
 0x2da   :  { %v1410_v41 = vpop.f32.mrb[0].mxu1 }
 0x2db   :  { %v1222_v42 = vpop.f32.mrb[1].mxu1 }
 0x2dc   :  { %v1412_v43 = vpop.f32.mrb[2].mxu1 }
 0x2dd   :  { %v1223_v44 = vpop.f32.mrb[3].mxu1 }
 0x2e2   :  { %v290_v45 = vpop.f32.mrb[4].mxu1 }
 0x2e3   :  { %v297_v46 = vmul.f32 0.03125, %v290_v45  ;;  %v1228_v47 = vpop.f32.mrb[5].mxu1 }
 0x2e4   :  { %v293_v48 = vpop.f32.mrb[6].mxu1 }
 0x2e5   :  { %v298_v49 = vmul.f32 0.03125, %v293_v48  ;;  %v1229_v50 = vpop.f32.mrb[7].mxu1  ;;  %v299_v51 = vsel %vm47_vm3, %v297_v46, -1e+30 }
 0x2e6   :  { %v304_v52 = vsel %vm118_vm4, %v299_v51, -inf  ;;  %v472_v50 = vld [vmem:[%s1695_s3 + $0x20] sm:$0xff] }
 0x2e7   :  { %305 = vmax.xlane.f32.xlu1 %v304_v52  ;;  %v300_v53 = vsel %vm47_vm3, %v298_v49, -1e+30  ;;  %v468_v49 = vld [vmem:[%s1695_s3] sm:$0xff] }
 0x2e8   :  { %v307_v54 = vsel %vm118_vm4, %v300_v53, -inf  ;;  %v1152_v52 = vcombine.low %v468_v49, %v472_v50 }
 0x2e9   :  { %308 = vmax.xlane.f32.xlu0 %v307_v54  ;;  %v473_v54 = vld [vmem:[%s1695_s3 + $0x28] sm:$0xff] }
 0x374   :  { %v306_v56 = vpop.xlane.xlu1 %305 }
 0x375   :  { %v310_v58 = vmax.f32 %v302_v55, %v306_v56  ;;  %v480_v56 = vld [vmem:[%s1695_s3 + $0x60] sm:$0xff] }
 0x376   :  { %v309_v59 = vpop.xlane.xlu0 %308 }
 0x377   :  { %v312_v60 = vsub.f32 %v302_v55, %v310_v58  ;;  %416 = vst.msk [vmem:[#allocation2 + $0x10] sm:$0xff] %vm28_vm2, %v310_v58  ;;  %v311_v61 = vmax.f32 %v303_v57, %v309_v59  ;;  %320 = vperm.xlu1 %1243, %v310_v58   ;;  %v476_v55 = vld [vmem:[%s1695_s3 + $0x40] sm:$0xff] }
 0x378   :  { %v1161_v59 = vcombine.high %v476_v55, %v480_v56 }
 0x379   :  { %v313_v62 = vsub.f32 %v303_v57, %v311_v61  ;;  %417 = vst.msk [vmem:[#allocation2 + $0x18] sm:$0xff] %vm28_vm2, %v311_v61  ;;  %325 = vperm.xlu0 %1244, %v311_v61   ;;  %v314_v14 = vmul.f32 1.442695, %v312_v60  ;;  %v477_v60 = vld [vmem:[%s1695_s3 + $0x48] sm:$0xff] }
 0x37a   :  { %v481_v61 = vld [vmem:[%s1695_s3 + $0x68] sm:$0xff] }
 0x37b   :  { %365 = vrot.lane.b32.xlu1 %v1252_v26, %s1292_s0  ;;  %v316_v15 = vmul.f32 1.442695, %v313_v62  ;;  %v131_v26 = vmul.f32 1.442695, %v128_v25  ;;  %v484_v62 = vld [vmem:[%s1695_s3 + $0x80] sm:$0xff] }
 0x3f6   :  { %v321_v63 = vpop.permute.xlu1 %320 }
 0x3f7   :  { %v328_v0 = vsub.f32 %v299_v51, %v321_v63  ;;  %v469_v51 = vld [vmem:[%s1695_s3 + $0x8] sm:$0xff]  ;;  %v1163_v63 = vcombine.high %v477_v60, %v481_v61 }
 0x3f8   :  { %v326_v1 = vpop.permute.xlu0 %325  ;;  %v1154_v57 = vcombine.low %v469_v51, %v473_v54  ;;  %v1155_v58 = vcombine.high %v469_v51, %v473_v54  ;;  %v165_v51 = vld [vmem:[#allocation4 + $0x8] sm:$0xff] }
 0x3f9   :  { %v330_v2 = vmul.f32 1.442695, %v328_v0  ;;  %v329_v3 = vsub.f32 %v300_v53, %v326_v1  ;;  %v1153_v53 = vcombine.high %v468_v49, %v472_v50  ;;  %v488_v0 = vld [vmem:[%s1695_s3 + $0xa0] sm:$0xff]  ;;  %v485_v1 = vld [vmem:[%s1695_s3 + $0x88] sm:$0xff] }
 0x3fa   :  { %v366_v4 = vpop.permute.xlu1 %365 }
 0x3fb   :  { %1258 = vpow2.f32 %v330_v2  ;;  %v332_v6 = vmul.f32 1.442695, %v329_v3  ;;  %1231 = vmatpush3.bf16.msra.mxu0 %v366_v4  ;;  %688 = vmatprep.subr.bf16.mxu1 %v1153_v53  ;;  %v489_v2 = vld [vmem:[%s1695_s3 + $0xa8] sm:$0xff]  ;;  %v1160_v3 = vcombine.low %v476_v55, %v480_v56  ;;  %v1162_v4 = vcombine.low %v477_v60, %v481_v61  ;;  %v478_v61 = vld [vmem:[%s1695_s3 + $0x50] sm:$0xff] }
 0x3fc   :  { %731 = vmatprep.subr.bf16.mxu0 %v1155_v58  ;;  %689 = vmatpush1.bf16.msra.mxu1 %v1152_v52 }
 0x3fd   :  { %1260 = vpow2.f32 %v332_v6  ;;  %690 = vmatprep.subr.bf16.mxu1 %v1161_v59  ;;  %v1169_v6 = vcombine.high %v484_v62, %v488_v0 }
 0x3fe   :  { %1262 = vpow2.f32 %v314_v14 }
 0x3ff   :  { %1264 = vpow2.f32 %v316_v15 }
 0x400   :  { %1266 = vpow2.f32 %v129_v23  ;;  %691 = vmatpush1.bf16.msra.mxu1 %v1160_v3 }
 0x401   :  { %1268 = vpow2.f32 %v131_v26  ;;  %692 = vmatprep.subr.bf16.mxu1 %v1169_v6 }
 0x405   :  { %v1259_v7 = vpop.eup %1258 }
 0x406   :  { %v339_v8 = vsel %vm118_vm4, %v1259_v7, 0.0 }
 0x407   :  { %v1261_v9 = vpop.eup %1260  ;;  %340 = vadd.xlane.f32.xlu1 %v339_v8  ;;  %v1168_v8 = vcombine.low %v484_v62, %v488_v0 }
 0x408   :  { %v342_v10 = vsel %vm118_vm4, %v1261_v9, 0.0  ;;  %v364_v11 = vpack.c.bf16 %v1261_v9, %v1259_v7  ;;  %v1263_v16 = vpop.eup %1262  ;;  %v1171_v7 = vcombine.high %v485_v1, %v489_v2  ;;  %v1170_v9 = vcombine.low %v485_v1, %v489_v2  ;;  %v482_v1 = vld [vmem:[%s1695_s3 + $0x70] sm:$0xff]  ;;  %v483_v2 = vld [vmem:[%s1695_s3 + $0x78] sm:$0xff] }
 0x409   :  { %343 = vadd.xlane.f32.xlu0 %v342_v10  ;;  %v1265_v19 = vpop.eup %1264  ;;  %v337_v29 = vmul.f32 %v1263_v16, %v335_v27  ;;  %693 = vmatpush1.bf16.msra.mxu1 %v1168_v8 }
 0x40a   :  { %1233 = vmatmul.mubr.msk.bf16.vlgmr.msra.gmra.mrb[4].mxu0 %vm118_vm4, %v364_v11  ;;  %v1267_v30 = vpop.eup %1266  ;;  %v338_v34 = vmul.f32 %v1265_v19, %v336_v28  ;;  %v350_v11 = vld [vmem:[#allocation4 + $0x10] sm:$0xff] }
 0x40b   :  { %154 = vadd.xlane.f32.xlu1 %v153_v12  ;;  %763 = vmatprep.mubr.bf16.mxu0 %v1289_v17  ;;  %v151_v18 = vmul.f32 %v1267_v30, %v149_v32  ;;  %v1269_v20 = vpop.eup %1268  ;;  %v351_v12 = vld [vmem:[#allocation4 + $0x18] sm:$0xff] }
 0x40c   :  { %v152_v24 = vmul.f32 %v1269_v20, %v150_v37  ;;  %732 = vmatpush1.bf16.msra.mxu0 %v1154_v57 }
 0x40d   :  { %733 = vmatprep.subr.bf16.mxu0 %v1163_v63 }
 0x40f   :  { %157 = vadd.xlane.f32.xlu1 %v156_v13 }
 0x410   :  { %734 = vmatpush1.bf16.msra.mxu0 %v1162_v4 }
 0x411   :  { %735 = vmatprep.subr.bf16.mxu0 %v1171_v7  ;;  %v1165_v7 = vcombine.high %v478_v61, %v482_v1 }
 0x414   :  { %736 = vmatpush1.bf16.msra.mxu0 %v1170_v9  ;;  %v486_v9 = vld [vmem:[%s1695_s3 + $0x90] sm:$0xff] }
 0x420   :  { %354 = vperm.xlu1 %1243, %v1263_v16  }
 0x424   :  { %359 = vperm.xlu1 %1243, %v1265_v19  }
 0x494   :  { %v341_v31 = vpop.xlane.xlu1 %340 }
 0x495   :  { %v345_v33 = vadd.f32 %v341_v31, %v337_v29  ;;  %v492_v29 = vld [vmem:[%s1695_s3 + $0xc0] sm:$0xff]  ;;  %v493_v31 = vld [vmem:[%s1695_s3 + $0xc8] sm:$0xff] }
 0x496   :  { %v344_v35 = vpop.xlane.xlu0 %343 }
 0x497   :  { %347 = vst.msk [vmem:[#allocation3 + $0x10] sm:$0xff] %vm28_vm2, %v345_v33  ;;  %v346_v36 = vadd.f32 %v344_v35, %v338_v34  ;;  %v497_v33 = vld [vmem:[%s1695_s3 + $0xe8] sm:$0xff] }
 0x498   :  { %v155_v22 = vpop.xlane.xlu1 %154  ;;  %v1178_v35 = vcombine.low %v493_v31, %v497_v33 }
 0x499   :  { %348 = vst.msk [vmem:[#allocation3 + $0x18] sm:$0xff] %vm28_vm2, %v346_v36  ;;  %v159_v21 = vadd.f32 %v155_v22, %v151_v18  ;;  %v1179_v36 = vcombine.high %v493_v31, %v497_v33  ;;  %v470_v18 = vld [vmem:[%s1695_s3 + $0x10] sm:$0xff]  ;;  %v471_v22 = vld [vmem:[%s1695_s3 + $0x18] sm:$0xff] }
 0x49b   :  { %162 = vst.msk [vmem:[#allocation3] sm:$0xff] %vm28_vm2, %v159_v21  ;;  %737 = vmatprep.subr.bf16.mxu0 %v1179_v36  ;;  %v475_v21 = vld [vmem:[%s1695_s3 + $0x38] sm:$0xff]  ;;  %v504_v36 = vld [vmem:[%s1696_s2 + $0x20] sm:$0xff] }
 0x49c   :  { %v158_v25 = vpop.xlane.xlu1 %157  ;;  %738 = vmatpush1.bf16.msra.mxu0 %v1178_v35 }
 0x49d   :  { %v160_v38 = vadd.f32 %v158_v25, %v152_v24  ;;  %v1158_v25 = vcombine.low %v471_v22, %v475_v21 }
 0x49e   :  { %v441_v39 = vld [vmem:[#allocation3 + $0x10] sm:$0xff] }
 0x49f   :  { %163 = vst.msk [vmem:[#allocation3 + $0x8] sm:$0xff] %vm28_vm2, %v160_v38  ;;  %1270 = vrcp.f32 %v441_v39  ;;  %v1159_v38 = vcombine.high %v471_v22, %v475_v21 }
 0x4a0   :  { %v442_v40 = vld [vmem:[#allocation3 + $0x18] sm:$0xff]  ;;  %v355_v10 = vpop.permute.xlu1 %354 }
 0x4a1   :  { %1272 = vrcp.f32 %v442_v40  ;;  %v362_v14 = vmul.f32 %v355_v10, %v350_v11  ;;  %817 = vmatprep.subr.bf16.mxu0 %v1159_v38  ;;  %v490_v10 = vld [vmem:[%s1695_s3 + $0xb0] sm:$0xff]  ;;  %v487_v11 = vld [vmem:[%s1695_s3 + $0x98] sm:$0xff]  ;;  %v517_v38 = vunpack.c.h.bf16 %v504_v36 }
 0x4a2   :  { %v423_v44 = vld [vmem:[#allocation3] sm:$0xff] }
 0x4a3   :  { %1274 = vrcp.f32 %v423_v44 }
 0x4a4   :  { %v360_v13 = vpop.permute.xlu1 %359 }
 0x4a5   :  { %v363_v16 = vmul.f32 %v360_v13, %v351_v12  ;;  %v491_v12 = vld [vmem:[%s1695_s3 + $0xb8] sm:$0xff]  ;;  %v1164_v13 = vcombine.low %v478_v61, %v482_v1 }
 0x4a6   :  { %v424_v46 = vld [vmem:[#allocation3 + $0x8] sm:$0xff]  ;;  %v503_v61 = vld [vmem:[%s1696_s2 + $0x18] sm:$0xff] }
 0x4a7   :  { %1276 = vrcp.f32 %v424_v46 }
 0x4a9   :  { %v1271_v42 = vpop.eup %1270 }
 0x4aa   :  { %447 = vperm.xlu0 %1244, %v1271_v42  }
 0x4ab   :  { %v1273_v45 = vpop.eup %1272 }
 0x4ac   :  { %452 = vperm.xlu1 %1243, %v1273_v45  }
 0x4ad   :  { %v1275_v47 = vpop.eup %1274 }
 0x4b0   :  { %168 = vperm.xlu1 %1243, %v1267_v30   ;;  %v496_v30 = vld [vmem:[%s1695_s3 + $0xe0] sm:$0xff] }
 0x4b1   :  { %v1277_v48 = vpop.eup %1276  ;;  %v1177_v32 = vcombine.high %v492_v29, %v496_v30  ;;  %v1176_v34 = vcombine.low %v492_v29, %v496_v30  ;;  %v1174_v29 = vcombine.low %v487_v11, %v491_v12 }
 0x4b3   :  { %694 = vmatprep.subr.bf16.mxu1 %v1177_v32 }
 0x4b4   :  { %173 = vperm.xlu1 %1243, %v1269_v20   ;;  %695 = vmatpush1.bf16.msra.mxu1 %v1176_v34  ;;  %v474_v20 = vld [vmem:[%s1695_s3 + $0x30] sm:$0xff] }
 0x4b5   :  { %v1157_v37 = vcombine.high %v470_v18, %v474_v20  ;;  %v1156_v24 = vcombine.low %v470_v18, %v474_v20 }
 0x4b7   :  { %774 = vmatprep.subr.bf16.mxu1 %v1157_v37 }
 0x4b8   :  { %429 = vperm.xlu1 %1243, %v1275_v47   ;;  %v164_v47 = vld [vmem:[#allocation4] sm:$0xff] }
 0x4bc   :  { %434 = vperm.xlu1 %1243, %v1277_v48  }
 0x4dd   :  { %v405_v15 = vpop.f32.mrb[4].mxu0 }
 0x4de   :  { %v412_v19 = vadd.f32 %v405_v15, %v362_v14  ;;  %v1234_v23 = vpop.f32.mrb[5].mxu0  ;;  %v1173_v15 = vcombine.high %v486_v9, %v490_v10 }
 0x4df   :  { %v408_v26 = vpop.f32.mrb[6].mxu0  ;;  %v498_v23 = vld [vmem:[%s1695_s3 + $0xf0] sm:$0xff] }
 0x4e0   :  { %414 = vst.msk [vmem:[#allocation4 + $0x10] sm:$0xff] %vm37_vm0, %v412_v19  ;;  %v413_v27 = vadd.f32 %v408_v26, %v363_v16  ;;  %v1235_v28 = vpop.f32.mrb[7].mxu0  ;;  %v1175_v16 = vcombine.high %v487_v11, %v491_v12  ;;  %v494_v19 = vld [vmem:[%s1695_s3 + $0xd0] sm:$0xff]  ;;  %v495_v26 = vld [vmem:[%s1695_s3 + $0xd8] sm:$0xff]  ;;  %v515_v12 = vunpack.c.h.bf16 %v503_v61 }
 0x4e1   :  { %v1172_v28 = vcombine.low %v486_v9, %v490_v10  ;;  %v1181_v30 = vcombine.high %v494_v19, %v498_v23  ;;  %v1180_v32 = vcombine.low %v494_v19, %v498_v23 }
 0x4e2   :  { %415 = vst.msk [vmem:[#allocation4 + $0x18] sm:$0xff] %vm37_vm0, %v413_v27  ;;  %v499_v27 = vld [vmem:[%s1695_s3 + $0xf8] sm:$0xff] }
 0x4e3   :  { %v1183_v31 = vcombine.high %v495_v26, %v499_v27  ;;  %v1182_v33 = vcombine.low %v495_v26, %v499_v27 }
 0x4e7   :  { %v439_v40 = vld [vmem:[#allocation4 + $0x10] sm:$0xff] }
 0x4e9   :  { %v440_v44 = vld [vmem:[#allocation4 + $0x18] sm:$0xff] }
 0x529   :  { %v448_v39 = vpop.permute.xlu0 %447 }
 0x52a   :  { %v455_v45 = vmul.f32 %v448_v39, %v439_v40 }
 0x52b   :  { %v453_v42 = vpop.permute.xlu1 %452 }
 0x52c   :  { %v456_v46 = vmul.f32 %v453_v42, %v440_v44  ;;  %v501_v42 = vld [vmem:[%s1696_s2 + $0x8] sm:$0xff] }
 0x52e   :  { %v1245_v48 = vpack.i.bf16 %v456_v46, %v455_v45  ;;  %v505_v46 = vld [vmem:[%s1696_s2 + $0x28] sm:$0xff] }
 0x52f   :  { %v169_v49 = vpop.permute.xlu1 %168 }
 0x530   :  { %v176_v50 = vmul.f32 %v169_v49, %v164_v47  ;;  %1246 = vrot.lane.b32.xlu0 %v1245_v48, %s1292_s0  ;;  %v510_v47 = vunpack.c.l.bf16 %v501_v42 }
 0x532   :  { %v226_v52 = vadd.f32 %v1410_v41, %v176_v50 }
 0x533   :  { %v174_v53 = vpop.permute.xlu1 %173 }
 0x534   :  { %228 = vst.msk [vmem:[#allocation4] sm:$0xff] %vm37_vm0, %v226_v52  ;;  %v177_v54 = vmul.f32 %v174_v53, %v165_v51  ;;  %v518_v51 = vunpack.c.l.bf16 %v505_v46  ;;  %v502_v52 = vld [vmem:[%s1696_s2 + $0x10] sm:$0xff] }
 0x536   :  { %v227_v55 = vadd.f32 %v1412_v43, %v177_v54  ;;  %v479_v43 = vld [vmem:[%s1695_s3 + $0x58] sm:$0xff]  ;;  %v511_v54 = vunpack.c.h.bf16 %v501_v42 }
 0x537   :  { %v430_v56 = vpop.permute.xlu1 %429  ;;  %v1167_v8 = vcombine.high %v479_v43, %v483_v2  ;;  %v1166_v14 = vcombine.low %v479_v43, %v483_v2  ;;  %v507_v2 = vld [vmem:[%s1696_s2 + $0x38] sm:$0xff] }
 0x538   :  { %229 = vst.msk [vmem:[#allocation4 + $0x8] sm:$0xff] %vm37_vm0, %v227_v55  ;;  %v522_v23 = vunpack.c.l.bf16 %v507_v2 }
 0x53b   :  { %v421_v57 = vld [vmem:[#allocation4] sm:$0xff]  ;;  %v435_v59 = vpop.permute.xlu1 %434 }
 0x53c   :  { %v437_v62 = vmul.f32 %v430_v56, %v421_v57  ;;  %v506_v56 = vld [vmem:[%s1696_s2 + $0x30] sm:$0xff] }
 0x53f   :  { %v422_v58 = vld [vmem:[#allocation4 + $0x8] sm:$0xff] }
 0x540   :  { %v438_v63 = vmul.f32 %v435_v59, %v422_v58  ;;  %v519_v59 = vunpack.c.h.bf16 %v505_v46 }
 0x5a2   :  { %v1247_v60 = vpop.permute.xlu0 %1246 }
 0x5a3   :  { %v1249_v41 = vunpack.i.h.bf16 %v1247_v60  ;;  %v1248_v0 = vunpack.i.l.bf16 %v1247_v60  ;;  %v512_v60 = vunpack.c.l.bf16 %v502_v52 }
 0x5a5   :  { %v466_v3 = vsel %vm37_vm0, %v438_v63, %v1249_v41  ;;  %v465_v4 = vsel %vm37_vm0, %v437_v62, %v1248_v0  ;;  %v513_v62 = vunpack.c.h.bf16 %v502_v52  ;;  %v520_v0 = vunpack.c.l.bf16 %v506_v56 }
 0x5a6   :  { %v467_v6 = vpack.c.bf16 %v466_v3, %v465_v4  ;;  %v521_v3 = vunpack.c.h.bf16 %v506_v56 }
 0x5a8   :  { %1184 = vmatmul.mubr.msk.bf16.vlgmr.msra.gmra.mrb[8].mxu1 %vm684_vm5, %v467_v6  ;;  %1185 = vmatmul.mubr.msk.bf16.vlgmr.msra.gmra.mrb[8].mxu0 %vm684_vm5, %v467_v6 }
 0x5a9   :  { %775 = vmatpush1.bf16.msra.mxu1 %v1156_v24  ;;  %818 = vmatpush1.bf16.msra.mxu0 %v1158_v25  ;;  %v516_v25 = vunpack.c.l.bf16 %v504_v36 }
 0x5aa   :  { %776 = vmatprep.subr.bf16.mxu1 %v1165_v7  ;;  %819 = vmatprep.subr.bf16.mxu0 %v1167_v8  ;;  %v514_v8 = vunpack.c.l.bf16 %v503_v61 }
 0x5ab   :  { %806 = vmatprep.mubr.bf16.mxu1 %v1289_v17  ;;  %849 = vmatprep.mubr.bf16.mxu0 %v1289_v17  ;;  %v500_v17 = vld [vmem:[%s1696_s2] sm:$0xff] }
 0x5ac   :  { %v508_v18 = vunpack.c.l.bf16 %v500_v17  ;;  %v509_v20 = vunpack.c.h.bf16 %v500_v17 }
 0x5ad   :  { %777 = vmatpush1.bf16.msra.mxu1 %v1164_v13  ;;  %820 = vmatpush1.bf16.msra.mxu0 %v1166_v14 }
 0x5ae   :  { %778 = vmatprep.subr.bf16.mxu1 %v1173_v15  ;;  %821 = vmatprep.subr.bf16.mxu0 %v1175_v16 }
 0x5b1   :  { %779 = vmatpush1.bf16.msra.mxu1 %v1172_v28  ;;  %822 = vmatpush1.bf16.msra.mxu0 %v1174_v29 }
 0x5b2   :  { %780 = vmatprep.subr.bf16.mxu1 %v1181_v30  ;;  %823 = vmatprep.subr.bf16.mxu0 %v1183_v31 }
 0x5b5   :  { %781 = vmatpush1.bf16.msra.mxu1 %v1180_v32  ;;  %824 = vmatpush1.bf16.msra.mxu0 %v1182_v33  ;;  %v523_v32 = vunpack.c.h.bf16 %v507_v2 }
 0x5b8   :  { %1186 = vmatmul.mubr.msk.bf16.vlgmr.msra.gmra.mrb[12].mxu1 %vm684_vm5, %v467_v6  ;;  %1187 = vmatmul.mubr.msk.bf16.vlgmr.msra.gmra.mrb[12].mxu0 %vm684_vm5, %v467_v6 }
 0x67b   :  { %v722_v34 = vpop.f32.mrb[8].mxu1  ;;  %v765_v35 = vpop.f32.mrb[8].mxu0 }
 0x67c   :  { %v724_v22 = vpop.f32.mrb[9].mxu1  ;;  %v767_v37 = vpop.f32.mrb[9].mxu0  ;;  %v723_v44 = vadd.f32 %v722_v34, %v508_v18  ;;  %v766_v53 = vadd.f32 %v765_v35, %v510_v47 }
 0x67d   :  { %v726_v21 = vpop.f32.mrb[10].mxu1  ;;  %v769_v24 = vpop.f32.mrb[10].mxu0  ;;  %v725_v45 = vadd.f32 %v724_v22, %v509_v20  ;;  %v768_v63 = vadd.f32 %v767_v37, %v511_v54 }
 0x67e   :  { %v728_v39 = vpop.f32.mrb[11].mxu1  ;;  %v771_v40 = vpop.f32.mrb[11].mxu0  ;;  %v1562_v48 = vadd.f32 %v726_v21, %v516_v25  ;;  %v770_v58 = vadd.f32 %v769_v24, %v518_v51 }
 0x67f   :  { %v1564_v49 = vadd.f32 %v728_v39, %v517_v38  ;;  %v862_v50 = vadd.f32 %v725_v45, %v723_v44  ;;  %v772_v6 = vadd.f32 %v771_v40, %v519_v59 }
 0x681   :  { %v871_v55 = vadd.f32 %v1564_v49, %v1562_v48  ;;  %v863_v57 = vadd.f32 %v862_v50, %v766_v53 }
 0x683   :  { %v872_v41 = vadd.f32 %v871_v55, %v770_v58  ;;  %v864_v4 = vadd.f32 %v863_v57, %v768_v63 }
 0x685   :  { %v873_v15 = vadd.f32 %v872_v41, %v772_v6 }
 0x68b   :  { %v808_v1 = vpop.f32.mrb[12].mxu1  ;;  %v851_v43 = vpop.f32.mrb[12].mxu0 }
 0x68c   :  { %v809_v7 = vadd.f32 %v808_v1, %v512_v60  ;;  %v810_v9 = vpop.f32.mrb[13].mxu1  ;;  %v853_v10 = vpop.f32.mrb[13].mxu0  ;;  %v852_v29 = vadd.f32 %v851_v43, %v514_v8 }
 0x68d   :  { %v811_v11 = vadd.f32 %v810_v9, %v513_v62  ;;  %v812_v13 = vpop.f32.mrb[14].mxu1  ;;  %v855_v14 = vpop.f32.mrb[14].mxu0  ;;  %v854_v33 = vadd.f32 %v853_v10, %v515_v12 }
 0x68e   :  { %v865_v16 = vadd.f32 %v864_v4, %v809_v7  ;;  %v813_v19 = vadd.f32 %v812_v13, %v520_v0  ;;  %v814_v26 = vpop.f32.mrb[15].mxu1  ;;  %v857_v27 = vpop.f32.mrb[15].mxu0  ;;  %v856_v17 = vadd.f32 %v855_v14, %v522_v23 }
 0x68f   :  { %v815_v28 = vadd.f32 %v814_v26, %v521_v3  ;;  %v858_v36 = vadd.f32 %v857_v27, %v523_v32 }
 0x690   :  { %v866_v30 = vadd.f32 %v865_v16, %v811_v11  ;;  %v874_v31 = vadd.f32 %v873_v15, %v813_v19 }
 0x692   :  { %v875_v34 = vadd.f32 %v874_v31, %v815_v28  ;;  %v867_v35 = vadd.f32 %v866_v30, %v852_v29 }
 0x694   :  { %v868_v18 = vadd.f32 %v867_v35, %v854_v33  ;;  %v876_v20 = vadd.f32 %v875_v34, %v856_v17 }
 0x696   :  { %869 = vadd.xlane.f32.xlu1 %v868_v18  ;;  %v877_v22 = vadd.f32 %v876_v20, %v858_v36  ;;  %v972_v18 = vshrl.u32 %v43_v5, 7 }
 0x698   :  { %878 = vadd.xlane.f32.xlu0 %v877_v22  ;;  %v997_v5 = vsub.s32 6, %v972_v18 }
 0x723   :  { %v870_v37 = vpop.xlane.xlu1 %869 }
 0x724   :  { %v881_v21 = vmul.f32 0.0009765625, %v870_v37 }
 0x725   :  { %v879_v24 = vpop.xlane.xlu0 %878 }
 0x726   :  { %v882_v25 = vmul.f32 0.0009765625, %v879_v24  ;;  %v1580_v38 = vsub.f32 %v723_v44, %v881_v21  ;;  %v1582_v39 = vsub.f32 %v725_v45, %v881_v21  ;;  %v1584_v40 = vsub.f32 %v766_v53, %v881_v21 }
 0x727   :  { %v1586_v42 = vsub.f32 %v768_v63, %v881_v21  ;;  %v1592_v50 = vsub.f32 %v809_v7, %v881_v21  ;;  %v1604_v54 = vsub.f32 %v811_v11, %v881_v21  ;;  %v1614_v60 = vsub.f32 %v852_v29, %v881_v21 }
 0x728   :  { %v899_v46 = vmul.f32 %v1580_v38, %v1580_v38  ;;  %v900_v47 = vmul.f32 %v1582_v39, %v1582_v39  ;;  %v901_v51 = vmul.f32 %v1584_v40, %v1584_v40  ;;  %v1597_v44 = vsub.f32 %v1562_v48, %v882_v25 }
 0x729   :  { %v1600_v45 = vsub.f32 %v1564_v49, %v882_v25  ;;  %v1602_v53 = vsub.f32 %v770_v58, %v882_v25  ;;  %v902_v55 = vmul.f32 %v1586_v42, %v1586_v42  ;;  %v1610_v59 = vsub.f32 %v772_v6, %v882_v25 }
 0x72a   :  { %v915_v52 = vadd.f32 %v900_v47, %v899_v46  ;;  %v907_v57 = vmul.f32 %v1597_v44, %v1597_v44  ;;  %v903_v49 = vmul.f32 %v1592_v50, %v1592_v50  ;;  %v1618_v61 = vsub.f32 %v813_v19, %v882_v25 }
 0x72b   :  { %v908_v48 = vmul.f32 %v1600_v45, %v1600_v45  ;;  %v909_v62 = vmul.f32 %v1602_v53, %v1602_v53  ;;  %v1622_v41 = vsub.f32 %v854_v33, %v881_v21  ;;  %v904_v0 = vmul.f32 %v1604_v54, %v1604_v54 }
 0x72c   :  { %v916_v56 = vadd.f32 %v915_v52, %v901_v51  ;;  %v1626_v43 = vsub.f32 %v815_v28, %v882_v25  ;;  %v910_v2 = vmul.f32 %v1610_v59, %v1610_v59  ;;  %v905_v4 = vmul.f32 %v1614_v60, %v1614_v60 }
 0x72d   :  { %v924_v63 = vadd.f32 %v908_v48, %v907_v57  ;;  %v1632_v7 = vsub.f32 %v856_v17, %v882_v25  ;;  %v911_v8 = vmul.f32 %v1618_v61, %v1618_v61  ;;  %v906_v10 = vmul.f32 %v1622_v41, %v1622_v41 }
 0x72e   :  { %v917_v58 = vadd.f32 %v916_v56, %v902_v55  ;;  %v1638_v12 = vsub.f32 %v858_v36, %v882_v25  ;;  %v912_v13 = vmul.f32 %v1626_v43, %v1626_v43  ;;  %v973_v24 = vsub.s32 0, %v972_v18  ;;  %v860_v55 = vld [vmem:[%s1697_s4] sm:$0xff] }
 0x72f   :  { %v925_v3 = vadd.f32 %v924_v63, %v909_v62  ;;  %v913_v16 = vmul.f32 %v1632_v7, %v1632_v7  ;;  %v977_v46 = vsub.s32 1, %v972_v18  ;;  %v981_v47 = vsub.s32 2, %v972_v18 }
 0x730   :  { %v918_v1 = vadd.f32 %v917_v58, %v903_v49  ;;  %v914_v23 = vmul.f32 %v1638_v12, %v1638_v12  ;;  %v985_v51 = vsub.s32 3, %v972_v18  ;;  %v989_v56 = vsub.s32 4, %v972_v18  ;;  %v861_v49 = vld [vmem:[%s1698_s5] sm:$0xff] }
 0x731   :  { %v926_v9 = vadd.f32 %v925_v3, %v910_v2  ;;  %v993_v57 = vsub.s32 5, %v972_v18  ;;  %v1001_v48 = vsub.s32 7, %v972_v18  ;;  %v974_v58 = vrot.slane %v860_v55, %v973_v24 }
 0x732   :  { %v919_v6 = vadd.f32 %v918_v1, %v904_v0  ;;  %v978_v62 = vrot.slane %v860_v55, %v977_v46  ;;  %v982_v63 = vrot.slane %v860_v55, %v981_v47  ;;  %v986_v0 = vrot.slane %v860_v55, %v985_v51 }
 0x733   :  { %v927_v14 = vadd.f32 %v926_v9, %v911_v8  ;;  %v990_v1 = vrot.slane %v860_v55, %v989_v56  ;;  %v994_v2 = vrot.slane %v860_v55, %v993_v57  ;;  %v998_v3 = vrot.slane %v860_v55, %v997_v5 }
 0x734   :  { %v920_v11 = vadd.f32 %v919_v6, %v905_v4  ;;  %v1002_v4 = vrot.slane %v860_v55, %v1001_v48  ;;  %v1031_v6 = vrot.slane %v861_v49, %v973_v24  ;;  %v1035_v8 = vrot.slane %v861_v49, %v977_v46 }
 0x735   :  { %v928_v19 = vadd.f32 %v927_v14, %v912_v13  ;;  %v1039_v9 = vrot.slane %v861_v49, %v981_v47  ;;  %v1047_v13 = vrot.slane %v861_v49, %v989_v56  ;;  %v1051_v14 = vrot.slane %v861_v49, %v993_v57 }
 0x736   :  { %v921_v15 = vadd.f32 %v920_v11, %v906_v10  ;;  %v1043_v10 = vrot.slane %v861_v49, %v985_v51 }
 0x737   :  { %v929_v26 = vadd.f32 %v928_v19, %v913_v16  ;;  %v1059_v16 = vrot.slane %v861_v49, %v1001_v48 }
 0x738   :  { %922 = vadd.xlane.f32.xlu0 %v921_v15  ;;  %v1055_v15 = vrot.slane %v861_v49, %v997_v5 }
 0x739   :  { %v930_v27 = vadd.f32 %v929_v26, %v914_v23 }
 0x73b   :  { %931 = vadd.xlane.f32.xlu1 %v930_v27 }
 0x7c5   :  { %v923_v28 = vpop.xlane.xlu0 %922 }
 0x7c6   :  { %v934_v29 = vmul.f32 0.0009775171, %v923_v28 }
 0x7c8   :  { %1278 = vrsqrt.f32 %v934_v29  ;;  %v932_v30 = vpop.xlane.xlu1 %931  ;;  %vm938_vm6 = vcmp.eq.f32.partialorder %v934_v29, inf  ;;  %v941_v17 = vand.u32 2147483648, %v934_v29  ;;  %vm940_vm7 = vcmp.eq.f32.partialorder %v934_v29, 0.0 }
 0x7c9   :  { %v935_v31 = vmul.f32 0.0009775171, %v932_v30 }
 0x7cb   :  { %1280 = vrsqrt.f32 %v935_v31  ;;  %vm945_vm8 = vcmp.eq.f32.partialorder %v935_v31, inf  ;;  %v948_v37 = vand.u32 2147483648, %v935_v31  ;;  %vm947_vm9 = vcmp.eq.f32.partialorder %v935_v31, 0.0 }
 0x7d2   :  { %v1279_v32 = vpop.eup %1278 }
 0x7d3   :  { %v937_v33 = vmul.f32 %v1279_v32, %v934_v29 }
 0x7d5   :  { %v939_v34 = vsel %vm938_vm6, %v934_v29, %v937_v33  ;;  %v1281_v36 = vpop.eup %1280 }
 0x7d6   :  { %v942_v35 = vsel %vm940_vm7, %v941_v17, %v939_v34  ;;  %v944_v22 = vmul.f32 %v1281_v36, %v935_v31 }
 0x7d7   :  { %v950_v20 = vadd.f32 0.001, %v942_v35 }
 0x7d8   :  { %v946_v21 = vsel %vm945_vm8, %v935_v31, %v944_v22 }
 0x7d9   :  { %1282 = vrcp.f32 %v950_v20  ;;  %v949_v25 = vsel %vm947_vm9, %v948_v37, %v946_v21 }
 0x7da   :  { %v951_v52 = vadd.f32 0.001, %v949_v25 }
 0x7dc   :  { %1284 = vrcp.f32 %v951_v52 }
 0x7e3   :  { %v1283_v11 = vpop.eup %1282 }
 0x7e4   :  { %v954_v19 = vmul.f32 %v1283_v11, %v1580_v38  ;;  %v955_v23 = vmul.f32 %v1283_v11, %v1582_v39  ;;  %v956_v26 = vmul.f32 %v1283_v11, %v1584_v40  ;;  %v957_v27 = vmul.f32 %v1283_v11, %v1586_v42 }
 0x7e5   :  { %v958_v28 = vmul.f32 %v1283_v11, %v1592_v50  ;;  %v959_v29 = vmul.f32 %v1283_v11, %v1604_v54  ;;  %v960_v30 = vmul.f32 %v1283_v11, %v1614_v60  ;;  %v961_v31 = vmul.f32 %v1283_v11, %v1622_v41 }
 0x7e6   :  { %v1011_v32 = vmul.f32 %v974_v58, %v954_v19  ;;  %v1012_v33 = vmul.f32 %v978_v62, %v955_v23  ;;  %v1013_v17 = vmul.f32 %v982_v63, %v956_v26  ;;  %v1014_v34 = vmul.f32 %v986_v0, %v957_v27  ;;  %v1285_v18 = vpop.eup %1284 }
 0x7e7   :  { %v1015_v35 = vmul.f32 %v990_v1, %v958_v28  ;;  %v1016_v38 = vmul.f32 %v994_v2, %v959_v29  ;;  %v1017_v36 = vmul.f32 %v998_v3, %v960_v30  ;;  %v1018_v39 = vmul.f32 %v1002_v4, %v961_v31 }
 0x7e8   :  { %v1068_v40 = vadd.f32 %v1031_v6, %v1011_v32  ;;  %v1069_v20 = vadd.f32 %v1035_v8, %v1012_v33  ;;  %v1070_v42 = vadd.f32 %v1039_v9, %v1013_v17  ;;  %v1071_v22 = vadd.f32 %v1043_v10, %v1014_v34 }
 0x7e9   :  { %v1072_v50 = vadd.f32 %v1047_v13, %v1015_v35  ;;  %v1073_v37 = vadd.f32 %v1051_v14, %v1016_v38  ;;  %v1074_v54 = vadd.f32 %v1055_v15, %v1017_v36  ;;  %v1075_v21 = vadd.f32 %v1059_v16, %v1018_v39 }
 0x7ea   :  { %v1196_v60 = vpack.c.bf16 %v1069_v20, %v1068_v40  ;;  %v1197_v24 = vpack.c.bf16 %v1071_v22, %v1070_v42  ;;  %v962_v41 = vmul.f32 %v1285_v18, %v1597_v44  ;;  %v963_v25 = vmul.f32 %v1285_v18, %v1600_v45 }
 0x7eb   :  { %v1198_v46 = vpack.c.bf16 %v1073_v37, %v1072_v50  ;;  %v1199_v47 = vpack.c.bf16 %v1075_v21, %v1074_v54  ;;  %v964_v51 = vmul.f32 %v1285_v18, %v1602_v53  ;;  %v965_v52 = vmul.f32 %v1285_v18, %v1610_v59 }
 0x7ec   :  { %1132 = vst [vmem:[%s1699_s6] sm:$0xff] %v1196_v60  ;;  %1133 = vst [vmem:[%s1699_s6 + $0x8] sm:$0xff] %v1197_v24  ;;  %v966_v55 = vmul.f32 %v1285_v18, %v1618_v61  ;;  %v967_v44 = vmul.f32 %v1285_v18, %v1626_v43  ;;  %v968_v45 = vmul.f32 %v1285_v18, %v1632_v7 }
 0x7ed   :  { %v969_v56 = vmul.f32 %v1285_v18, %v1638_v12  ;;  %1134 = vst [vmem:[%s1699_s6 + $0x10] sm:$0xff] %v1198_v46  ;;  %1135 = vst [vmem:[%s1699_s6 + $0x18] sm:$0xff] %v1199_v47  ;;  %v1019_v53 = vmul.f32 %v974_v58, %v962_v41  ;;  %v1020_v59 = vmul.f32 %v978_v62, %v963_v25 }
 0x7ee   :  { %v1021_v57 = vmul.f32 %v982_v63, %v964_v51  ;;  %v1022_v5 = vmul.f32 %v986_v0, %v965_v52  ;;  %v1023_v48 = vmul.f32 %v990_v1, %v966_v55  ;;  %v1024_v61 = vmul.f32 %v994_v2, %v967_v44 }
 0x7ef   :  { %v1025_v49 = vmul.f32 %v998_v3, %v968_v45  ;;  %v1026_v43 = vmul.f32 %v1002_v4, %v969_v56  ;;  %v1076_v11 = vadd.f32 %v1031_v6, %v1019_v53  ;;  %v1077_v7 = vadd.f32 %v1035_v8, %v1020_v59 }
 0x7f0   :  { %v1078_v19 = vadd.f32 %v1039_v9, %v1021_v57  ;;  %v1079_v12 = vadd.f32 %v1043_v10, %v1022_v5  ;;  %v1080_v23 = vadd.f32 %v1047_v13, %v1023_v48  ;;  %v1081_v26 = vadd.f32 %v1051_v14, %v1024_v61 }
 0x7f1   :  { %v1082_v27 = vadd.f32 %v1055_v15, %v1025_v49  ;;  %v1083_v28 = vadd.f32 %v1059_v16, %v1026_v43  ;;  %v1200_v29 = vpack.c.bf16 %v1077_v7, %v1076_v11 }
 0x7f2   :  { %v1201_v30 = vpack.c.bf16 %v1079_v12, %v1078_v19  ;;  %v1202_v31 = vpack.c.bf16 %v1081_v26, %v1080_v23 }
 0x7f3   :  { %v1203_v32 = vpack.c.bf16 %v1083_v28, %v1082_v27  ;;  %1136 = vst [vmem:[%s1699_s6 + $0x20] sm:$0xff] %v1200_v29 }
 0x7f4   :  { %1137 = vst [vmem:[%s1699_s6 + $0x28] sm:$0xff] %v1201_v30  ;;  %1138 = vst [vmem:[%s1699_s6 + $0x30] sm:$0xff] %v1202_v31 }
 0x7f5   :  { %1139 = vst [vmem:[%s1699_s6 + $0x38] sm:$0xff] %v1203_v32 }

// kernel: poly_phoneme_classifier_forward.5
= control target key start
LH: loop header
LB: loop body
LE: loop exit
PB: predicated region body
PF: predicated region fallthrough
CT: control target
= control target key end

     0   :  { %s4720_s1 = inlined_call_operand.vmem [shape: bf16[1024,512], index: 1, kind: input, shape index: {}]   ;;  %s4721_s0 = inlined_call_operand.vmem [shape: bf16[16,1024], index: 0, kind: input, shape index: {}]   ;;  %s4722_s2 = inlined_call_operand.vmem [shape: f32[1,512], index: 2, kind: input, shape index: {}]   ;;  %s4723_s5 = inlined_call_operand.vmem [shape: bf16[512,256], index: 5, kind: input, shape index: {}]   ;;  %s4724_s3 = inlined_call_operand.vmem [shape: f32[1,512], index: 3, kind: input, shape index: {}]   ;;  %s4725_s4 = inlined_call_operand.vmem [shape: f32[1,512], index: 4, kind: input, shape index: {}]   ;;  %s4726_s6 = inlined_call_operand.vmem [shape: f32[1,256], index: 6, kind: input, shape index: {}]   ;;  %s4727_s8 = inlined_call_operand.vmem [shape: f32[1,256], index: 8, kind: input, shape index: {}]   ;;  %s4728_s7 = inlined_call_operand.vmem [shape: f32[16,256], index: 7, kind: input, shape index: {}]   ;;  %s4729_s9 = inlined_call_operand.vmem [shape: f32[16,256], index: 9, kind: output, shape index: {}]  }
   0x1   :  { %v3036_v0 = vld [vmem:[%s4720_s1 + $0x4] ss:$16 sps:$4 sm:$0xff]   ;;  %v3040_v2 = vld [vmem:[%s4720_s1] ss:$16 sps:$4 sm:$0xff]   ;;  %v33_v50 = vld [vmem:[%s4721_s0 + $0x8] sm:$0xff] }
   0x2   :  { %v3038_v1 = vld [vmem:[%s4720_s1 + $0x204] ss:$16 sps:$4 sm:$0xff]   ;;  %1638 = vmatprep.subr.bf16.mxu1 %v3036_v0  ;;  %v3041_v3 = vld [vmem:[%s4720_s1 + $0x200] ss:$16 sps:$4 sm:$0xff]   ;;  %v37_v51 = vld [vmem:[%s4721_s0 + $0x28] sm:$0xff] }
   0x3   :  { %1681 = vmatprep.subr.bf16.mxu0 %v3038_v1  ;;  %v3042_v4 = vld [vmem:[%s4720_s1 + $0x24] ss:$16 sps:$4 sm:$0xff]   ;;  %1639 = vmatpush1.bf16.msra.mxu1 %v3040_v2  ;;  %v3046_v6 = vld [vmem:[%s4720_s1 + $0x20] ss:$16 sps:$4 sm:$0xff]   ;;  %v3748_v55 = vcombine.high %v33_v50, %v37_v51 }
   0x4   :  { %1682 = vmatpush1.bf16.msra.mxu0 %v3041_v3  ;;  %v3044_v5 = vld [vmem:[%s4720_s1 + $0x224] ss:$16 sps:$4 sm:$0xff]   ;;  %1640 = vmatprep.subr.bf16.mxu1 %v3042_v4  ;;  %v3047_v7 = vld [vmem:[%s4720_s1 + $0x220] ss:$16 sps:$4 sm:$0xff]  }
   0x5   :  { %1683 = vmatprep.subr.bf16.mxu0 %v3044_v5  ;;  %v3048_v8 = vld [vmem:[%s4720_s1 + $0x44] ss:$16 sps:$4 sm:$0xff]   ;;  %v3052_v10 = vld [vmem:[%s4720_s1 + $0x40] ss:$16 sps:$4 sm:$0xff]   ;;  %1713 = vmatprep.mubr.bf16.mxu0 %v3748_v55 }
   0x6   :  { %v3050_v9 = vld [vmem:[%s4720_s1 + $0x244] ss:$16 sps:$4 sm:$0xff]   ;;  %v3053_v11 = vld [vmem:[%s4720_s1 + $0x240] ss:$16 sps:$4 sm:$0xff]  }
   0x7   :  { %1641 = vmatpush1.bf16.msra.mxu1 %v3046_v6  ;;  %v3054_v12 = vld [vmem:[%s4720_s1 + $0x64] ss:$16 sps:$4 sm:$0xff]   ;;  %v3058_v14 = vld [vmem:[%s4720_s1 + $0x60] ss:$16 sps:$4 sm:$0xff]  }
   0x8   :  { %1684 = vmatpush1.bf16.msra.mxu0 %v3047_v7  ;;  %1642 = vmatprep.subr.bf16.mxu1 %v3048_v8  ;;  %v3056_v13 = vld [vmem:[%s4720_s1 + $0x264] ss:$16 sps:$4 sm:$0xff]   ;;  %v3059_v15 = vld [vmem:[%s4720_s1 + $0x260] ss:$16 sps:$4 sm:$0xff]   ;;  %v3137_v7 = vld [vmem:[%s4720_s1 + $0xc] ss:$16 sps:$4 sm:$0xff]  }
   0x9   :  { %1685 = vmatprep.subr.bf16.mxu0 %v3050_v9  ;;  %v3060_v16 = vld [vmem:[%s4720_s1 + $0x84] ss:$16 sps:$4 sm:$0xff]   ;;  %v3064_v18 = vld [vmem:[%s4720_s1 + $0x80] ss:$16 sps:$4 sm:$0xff]   ;;  %v3801_v9 = vcombine.low %v33_v50, %v37_v51  ;;  %v3189_v50 = vld [vmem:[%s4720_s1 + $0x128] ss:$16 sps:$4 sm:$0xff]  }
   0xa   :  { %v3062_v17 = vld [vmem:[%s4720_s1 + $0x284] ss:$16 sps:$4 sm:$0xff]   ;;  %v3065_v19 = vld [vmem:[%s4720_s1 + $0x280] ss:$16 sps:$4 sm:$0xff]  }
   0xb   :  { %1643 = vmatpush1.bf16.msra.mxu1 %v3052_v10  ;;  %v3066_v20 = vld [vmem:[%s4720_s1 + $0xa4] ss:$16 sps:$4 sm:$0xff]   ;;  %v3070_v22 = vld [vmem:[%s4720_s1 + $0xa0] ss:$16 sps:$4 sm:$0xff]  }
   0xc   :  { %1686 = vmatpush1.bf16.msra.mxu0 %v3053_v11  ;;  %1644 = vmatprep.subr.bf16.mxu1 %v3054_v12  ;;  %v3068_v21 = vld [vmem:[%s4720_s1 + $0x2a4] ss:$16 sps:$4 sm:$0xff]   ;;  %v3071_v23 = vld [vmem:[%s4720_s1 + $0x2a0] ss:$16 sps:$4 sm:$0xff]   ;;  %v3135_v11 = vld [vmem:[%s4720_s1 + $0x8] ss:$16 sps:$4 sm:$0xff]  }
   0xd   :  { %1687 = vmatprep.subr.bf16.mxu0 %v3056_v13  ;;  %v3072_v24 = vld [vmem:[%s4720_s1 + $0xc4] ss:$16 sps:$4 sm:$0xff]   ;;  %v3076_v26 = vld [vmem:[%s4720_s1 + $0xc0] ss:$16 sps:$4 sm:$0xff]   ;;  %v3143_v13 = vld [vmem:[%s4720_s1 + $0x2c] ss:$16 sps:$4 sm:$0xff]  }
   0xe   :  { %v3074_v25 = vld [vmem:[%s4720_s1 + $0x2c4] ss:$16 sps:$4 sm:$0xff]   ;;  %v3077_v27 = vld [vmem:[%s4720_s1 + $0x2c0] ss:$16 sps:$4 sm:$0xff]  }
   0xf   :  { %1645 = vmatpush1.bf16.msra.mxu1 %v3058_v14  ;;  %v3078_v28 = vld [vmem:[%s4720_s1 + $0xe4] ss:$16 sps:$4 sm:$0xff]   ;;  %v3082_v30 = vld [vmem:[%s4720_s1 + $0xe0] ss:$16 sps:$4 sm:$0xff]  }
  0x10   :  { %1688 = vmatpush1.bf16.msra.mxu0 %v3059_v15  ;;  %1646 = vmatprep.subr.bf16.mxu1 %v3060_v16  ;;  %v3080_v29 = vld [vmem:[%s4720_s1 + $0x2e4] ss:$16 sps:$4 sm:$0xff]   ;;  %v3083_v31 = vld [vmem:[%s4720_s1 + $0x2e0] ss:$16 sps:$4 sm:$0xff]   ;;  %v3141_v15 = vld [vmem:[%s4720_s1 + $0x28] ss:$16 sps:$4 sm:$0xff]  }
  0x11   :  { %1689 = vmatprep.subr.bf16.mxu0 %v3062_v17  ;;  %v3084_v32 = vld [vmem:[%s4720_s1 + $0x104] ss:$16 sps:$4 sm:$0xff]   ;;  %v3088_v34 = vld [vmem:[%s4720_s1 + $0x100] ss:$16 sps:$4 sm:$0xff]   ;;  %v3149_v17 = vld [vmem:[%s4720_s1 + $0x4c] ss:$16 sps:$4 sm:$0xff]  }
  0x12   :  { %v3086_v33 = vld [vmem:[%s4720_s1 + $0x304] ss:$16 sps:$4 sm:$0xff]   ;;  %v3089_v35 = vld [vmem:[%s4720_s1 + $0x300] ss:$16 sps:$4 sm:$0xff]  }
  0x13   :  { %1647 = vmatpush1.bf16.msra.mxu1 %v3064_v18  ;;  %v3090_v36 = vld [vmem:[%s4720_s1 + $0x124] ss:$16 sps:$4 sm:$0xff]   ;;  %v3094_v38 = vld [vmem:[%s4720_s1 + $0x120] ss:$16 sps:$4 sm:$0xff]  }
  0x14   :  { %1690 = vmatpush1.bf16.msra.mxu0 %v3065_v19  ;;  %1648 = vmatprep.subr.bf16.mxu1 %v3066_v20  ;;  %v3092_v37 = vld [vmem:[%s4720_s1 + $0x324] ss:$16 sps:$4 sm:$0xff]   ;;  %v3095_v39 = vld [vmem:[%s4720_s1 + $0x320] ss:$16 sps:$4 sm:$0xff]   ;;  %v3147_v19 = vld [vmem:[%s4720_s1 + $0x48] ss:$16 sps:$4 sm:$0xff]  }
  0x15   :  { %1691 = vmatprep.subr.bf16.mxu0 %v3068_v21  ;;  %v3096_v40 = vld [vmem:[%s4720_s1 + $0x144] ss:$16 sps:$4 sm:$0xff]   ;;  %v3100_v42 = vld [vmem:[%s4720_s1 + $0x140] ss:$16 sps:$4 sm:$0xff]   ;;  %v3155_v21 = vld [vmem:[%s4720_s1 + $0x6c] ss:$16 sps:$4 sm:$0xff]  }
  0x16   :  { %v3098_v41 = vld [vmem:[%s4720_s1 + $0x344] ss:$16 sps:$4 sm:$0xff]   ;;  %v3101_v43 = vld [vmem:[%s4720_s1 + $0x340] ss:$16 sps:$4 sm:$0xff]  }
  0x17   :  { %1649 = vmatpush1.bf16.msra.mxu1 %v3070_v22  ;;  %v3102_v44 = vld [vmem:[%s4720_s1 + $0x164] ss:$16 sps:$4 sm:$0xff]   ;;  %v3106_v46 = vld [vmem:[%s4720_s1 + $0x160] ss:$16 sps:$4 sm:$0xff]  }
  0x18   :  { %1692 = vmatpush1.bf16.msra.mxu0 %v3071_v23  ;;  %1650 = vmatprep.subr.bf16.mxu1 %v3072_v24  ;;  %v3104_v45 = vld [vmem:[%s4720_s1 + $0x364] ss:$16 sps:$4 sm:$0xff]   ;;  %v3107_v47 = vld [vmem:[%s4720_s1 + $0x360] ss:$16 sps:$4 sm:$0xff]   ;;  %v3153_v23 = vld [vmem:[%s4720_s1 + $0x68] ss:$16 sps:$4 sm:$0xff]  }
  0x19   :  { %1693 = vmatprep.subr.bf16.mxu0 %v3074_v25  ;;  %v32_v48 = vld [vmem:[%s4721_s0] sm:$0xff]  ;;  %v3161_v25 = vld [vmem:[%s4720_s1 + $0x8c] ss:$16 sps:$4 sm:$0xff]  }
  0x1a   :  { %v36_v49 = vld [vmem:[%s4721_s0 + $0x20] sm:$0xff] }
  0x1b   :  { %1651 = vmatpush1.bf16.msra.mxu1 %v3076_v26  ;;  %v3108_v52 = vld [vmem:[%s4720_s1 + $0x184] ss:$16 sps:$4 sm:$0xff]   ;;  %v2669_v53 = vcombine.high %v32_v48, %v36_v49  ;;  %v3112_v56 = vld [vmem:[%s4720_s1 + $0x180] ss:$16 sps:$4 sm:$0xff]   ;;  %v3799_v8 = vcombine.low %v32_v48, %v36_v49  ;;  %v3191_v48 = vld [vmem:[%s4720_s1 + $0x12c] ss:$16 sps:$4 sm:$0xff]  }
  0x1c   :  { %1694 = vmatpush1.bf16.msra.mxu0 %v3077_v27  ;;  %1652 = vmatprep.subr.bf16.mxu1 %v3078_v28  ;;  %v3110_v54 = vld [vmem:[%s4720_s1 + $0x384] ss:$16 sps:$4 sm:$0xff]   ;;  %v3113_v57 = vld [vmem:[%s4720_s1 + $0x380] ss:$16 sps:$4 sm:$0xff]   ;;  %v3159_v27 = vld [vmem:[%s4720_s1 + $0x88] ss:$16 sps:$4 sm:$0xff]  }
  0x1d   :  { %1695 = vmatprep.subr.bf16.mxu0 %v3080_v29  ;;  %1670 = vmatprep.mubr.bf16.mxu1 %v2669_v53  ;;  %v3114_v58 = vld [vmem:[%s4720_s1 + $0x1a4] ss:$16 sps:$4 sm:$0xff]   ;;  %v3118_v60 = vld [vmem:[%s4720_s1 + $0x1a0] ss:$16 sps:$4 sm:$0xff]   ;;  %v3167_v29 = vld [vmem:[%s4720_s1 + $0xac] ss:$16 sps:$4 sm:$0xff]  }
  0x1e   :  { %v3116_v59 = vld [vmem:[%s4720_s1 + $0x3a4] ss:$16 sps:$4 sm:$0xff]   ;;  %v3119_v61 = vld [vmem:[%s4720_s1 + $0x3a0] ss:$16 sps:$4 sm:$0xff]  }
  0x1f   :  { %1653 = vmatpush1.bf16.msra.mxu1 %v3082_v30  ;;  %v3120_v62 = vld [vmem:[%s4720_s1 + $0x1c4] ss:$16 sps:$4 sm:$0xff]   ;;  %v3124_v0 = vld [vmem:[%s4720_s1 + $0x1c0] ss:$16 sps:$4 sm:$0xff]  }
  0x20   :  { %1696 = vmatpush1.bf16.msra.mxu0 %v3083_v31  ;;  %1654 = vmatprep.subr.bf16.mxu1 %v3084_v32  ;;  %v3122_v63 = vld [vmem:[%s4720_s1 + $0x3c4] ss:$16 sps:$4 sm:$0xff]   ;;  %v3125_v1 = vld [vmem:[%s4720_s1 + $0x3c0] ss:$16 sps:$4 sm:$0xff]   ;;  %v3165_v31 = vld [vmem:[%s4720_s1 + $0xa8] ss:$16 sps:$4 sm:$0xff]  }
  0x21   :  { %1697 = vmatprep.subr.bf16.mxu0 %v3086_v33  ;;  %v3126_v2 = vld [vmem:[%s4720_s1 + $0x1e4] ss:$16 sps:$4 sm:$0xff]   ;;  %v3130_v4 = vld [vmem:[%s4720_s1 + $0x1e0] ss:$16 sps:$4 sm:$0xff]   ;;  %v3173_v33 = vld [vmem:[%s4720_s1 + $0xcc] ss:$16 sps:$4 sm:$0xff]  }
  0x22   :  { %v3128_v3 = vld [vmem:[%s4720_s1 + $0x3e4] ss:$16 sps:$4 sm:$0xff]   ;;  %v3131_v5 = vld [vmem:[%s4720_s1 + $0x3e0] ss:$16 sps:$4 sm:$0xff]  }
  0x23   :  { %1655 = vmatpush1.bf16.msra.mxu1 %v3088_v34  ;;  %v3134_v6 = vld [vmem:[%s4720_s1 + $0x404] ss:$16 sps:$4 sm:$0xff]   ;;  %v3132_v10 = vld [vmem:[%s4720_s1 + $0x400] ss:$16 sps:$4 sm:$0xff]  }
  0x24   :  { %1698 = vmatpush1.bf16.msra.mxu0 %v3089_v35  ;;  %1656 = vmatprep.subr.bf16.mxu1 %v3090_v36  ;;  %v3140_v12 = vld [vmem:[%s4720_s1 + $0x424] ss:$16 sps:$4 sm:$0xff]   ;;  %v3138_v14 = vld [vmem:[%s4720_s1 + $0x420] ss:$16 sps:$4 sm:$0xff]  }
  0x25   :  { %1699 = vmatprep.subr.bf16.mxu0 %v3092_v37  ;;  %v3146_v16 = vld [vmem:[%s4720_s1 + $0x444] ss:$16 sps:$4 sm:$0xff]   ;;  %v3144_v18 = vld [vmem:[%s4720_s1 + $0x440] ss:$16 sps:$4 sm:$0xff]   ;;  %v3171_v37 = vld [vmem:[%s4720_s1 + $0xc8] ss:$16 sps:$4 sm:$0xff]  }
  0x26   :  { %v3152_v20 = vld [vmem:[%s4720_s1 + $0x464] ss:$16 sps:$4 sm:$0xff]   ;;  %v3150_v22 = vld [vmem:[%s4720_s1 + $0x460] ss:$16 sps:$4 sm:$0xff]  }
  0x27   :  { %1657 = vmatpush1.bf16.msra.mxu1 %v3094_v38  ;;  %v3158_v24 = vld [vmem:[%s4720_s1 + $0x484] ss:$16 sps:$4 sm:$0xff]   ;;  %v3156_v26 = vld [vmem:[%s4720_s1 + $0x480] ss:$16 sps:$4 sm:$0xff]  }
  0x28   :  { %1700 = vmatpush1.bf16.msra.mxu0 %v3095_v39  ;;  %1658 = vmatprep.subr.bf16.mxu1 %v3096_v40  ;;  %v3164_v28 = vld [vmem:[%s4720_s1 + $0x4a4] ss:$16 sps:$4 sm:$0xff]   ;;  %v3162_v30 = vld [vmem:[%s4720_s1 + $0x4a0] ss:$16 sps:$4 sm:$0xff]   ;;  %v3179_v40 = vld [vmem:[%s4720_s1 + $0xec] ss:$16 sps:$4 sm:$0xff]  }
  0x29   :  { %1701 = vmatprep.subr.bf16.mxu0 %v3098_v41  ;;  %v3170_v32 = vld [vmem:[%s4720_s1 + $0x4c4] ss:$16 sps:$4 sm:$0xff]   ;;  %v3168_v36 = vld [vmem:[%s4720_s1 + $0x4c0] ss:$16 sps:$4 sm:$0xff]  }
  0x2a   :  { %v3880_v34 = vld [vmem:[%s4721_s0 + $0x10] sm:$0xff] }
  0x2b   :  { %1659 = vmatpush1.bf16.msra.mxu1 %v3100_v42  ;;  %v3885_v35 = vld [vmem:[%s4721_s0 + $0x30] sm:$0xff]  ;;  %v3177_v42 = vld [vmem:[%s4720_s1 + $0xe8] ss:$16 sps:$4 sm:$0xff]  }
  0x2c   :  { %1702 = vmatpush1.bf16.msra.mxu0 %v3101_v43  ;;  %1660 = vmatprep.subr.bf16.mxu1 %v3102_v44  ;;  %v3895_v38 = vcombine.high %v3880_v34, %v3885_v35  ;;  %v3176_v39 = vld [vmem:[%s4720_s1 + $0x4e4] ss:$16 sps:$4 sm:$0xff]   ;;  %v3174_v41 = vld [vmem:[%s4720_s1 + $0x4e0] ss:$16 sps:$4 sm:$0xff]   ;;  %v3185_v44 = vld [vmem:[%s4720_s1 + $0x10c] ss:$16 sps:$4 sm:$0xff]  }
  0x2d   :  { %1703 = vmatprep.subr.bf16.mxu0 %v3104_v45  ;;  %v3182_v43 = vld [vmem:[%s4720_s1 + $0x504] ss:$16 sps:$4 sm:$0xff]   ;;  %v3180_v45 = vld [vmem:[%s4720_s1 + $0x500] ss:$16 sps:$4 sm:$0xff]  }
  0x2e   :  { %v3186_v49 = vld [vmem:[%s4720_s1 + $0x520] ss:$16 sps:$4 sm:$0xff]   ;;  %v3194_v51 = vld [vmem:[%s4720_s1 + $0x544] ss:$16 sps:$4 sm:$0xff]  }
  0x2f   :  { %1661 = vmatpush1.bf16.msra.mxu1 %v3106_v46  ;;  %v3183_v46 = vld [vmem:[%s4720_s1 + $0x108] ss:$16 sps:$4 sm:$0xff]  }
  0x30   :  { %1704 = vmatpush1.bf16.msra.mxu0 %v3107_v47  ;;  %1662 = vmatprep.subr.bf16.mxu1 %v3108_v52  ;;  %v3188_v47 = vld [vmem:[%s4720_s1 + $0x524] ss:$16 sps:$4 sm:$0xff]   ;;  %v3197_v52 = vld [vmem:[%s4720_s1 + $0x14c] ss:$16 sps:$4 sm:$0xff]  }
  0x31   :  { %1705 = vmatprep.subr.bf16.mxu0 %v3110_v54  ;;  %v3195_v54 = vld [vmem:[%s4720_s1 + $0x148] ss:$16 sps:$4 sm:$0xff]  }
  0x33   :  { %1663 = vmatpush1.bf16.msra.mxu1 %v3112_v56  ;;  %v3200_v56 = vld [vmem:[%s4720_s1 + $0x564] ss:$16 sps:$4 sm:$0xff]  }
  0x34   :  { %1706 = vmatpush1.bf16.msra.mxu0 %v3113_v57  ;;  %1664 = vmatprep.subr.bf16.mxu1 %v3114_v58  ;;  %v3203_v57 = vld [vmem:[%s4720_s1 + $0x16c] ss:$16 sps:$4 sm:$0xff]   ;;  %v3198_v58 = vld [vmem:[%s4720_s1 + $0x560] ss:$16 sps:$4 sm:$0xff]  }
  0x35   :  { %1707 = vmatprep.subr.bf16.mxu0 %v3116_v59  ;;  %v3201_v59 = vld [vmem:[%s4720_s1 + $0x168] ss:$16 sps:$4 sm:$0xff]  }
  0x37   :  { %1665 = vmatpush1.bf16.msra.mxu1 %v3118_v60  ;;  %v3206_v60 = vld [vmem:[%s4720_s1 + $0x584] ss:$16 sps:$4 sm:$0xff]  }
  0x38   :  { %1708 = vmatpush1.bf16.msra.mxu0 %v3119_v61  ;;  %1666 = vmatprep.subr.bf16.mxu1 %v3120_v62  ;;  %v3209_v61 = vld [vmem:[%s4720_s1 + $0x18c] ss:$16 sps:$4 sm:$0xff]   ;;  %v3204_v62 = vld [vmem:[%s4720_s1 + $0x580] ss:$16 sps:$4 sm:$0xff]  }
  0x39   :  { %1709 = vmatprep.subr.bf16.mxu0 %v3122_v63  ;;  %v3207_v63 = vld [vmem:[%s4720_s1 + $0x188] ss:$16 sps:$4 sm:$0xff]  }
  0x3b   :  { %1667 = vmatpush1.bf16.msra.mxu1 %v3124_v0  ;;  %v3212_v0 = vld [vmem:[%s4720_s1 + $0x5a4] ss:$16 sps:$4 sm:$0xff]  }
  0x3c   :  { %1710 = vmatpush1.bf16.msra.mxu0 %v3125_v1  ;;  %1668 = vmatprep.subr.bf16.mxu1 %v3126_v2  ;;  %v3215_v1 = vld [vmem:[%s4720_s1 + $0x1ac] ss:$16 sps:$4 sm:$0xff]   ;;  %v3210_v2 = vld [vmem:[%s4720_s1 + $0x5a0] ss:$16 sps:$4 sm:$0xff]  }
  0x3d   :  { %1711 = vmatprep.subr.bf16.mxu0 %v3128_v3  ;;  %v3213_v3 = vld [vmem:[%s4720_s1 + $0x1a8] ss:$16 sps:$4 sm:$0xff]  }
  0x3f   :  { %1669 = vmatpush1.bf16.msra.mxu1 %v3130_v4  ;;  %v3218_v4 = vld [vmem:[%s4720_s1 + $0x5c4] ss:$16 sps:$4 sm:$0xff]  }
  0x40   :  { %1712 = vmatpush1.bf16.msra.mxu0 %v3131_v5  ;;  %1810 = vmatprep.subr.bf16.mxu1 %v3137_v7  ;;  %v3221_v5 = vld [vmem:[%s4720_s1 + $0x1cc] ss:$16 sps:$4 sm:$0xff]   ;;  %v3219_v7 = vld [vmem:[%s4720_s1 + $0x1c8] ss:$16 sps:$4 sm:$0xff]  }
  0x41   :  { %1724 = vmatprep.subr.bf16.mxu0 %v3134_v6  ;;  %v3216_v6 = vld [vmem:[%s4720_s1 + $0x5c0] ss:$16 sps:$4 sm:$0xff]  }
  0x42   :  { %1671 = vmatmul.mubr.bf16.vlgmr.msra.gmra.mrb[0].mxu1 %v3799_v8 }
  0x43   :  { %1714 = vmatmul.mubr.bf16.vlgmr.msra.gmra.mrb[0].mxu0 %v3801_v9  ;;  %1811 = vmatpush1.bf16.msra.mxu1 %v3135_v11  ;;  %v3227_v11 = vld [vmem:[%s4720_s1 + $0x1ec] ss:$16 sps:$4 sm:$0xff]  }
  0x44   :  { %1725 = vmatpush1.bf16.msra.mxu0 %v3132_v10  ;;  %1812 = vmatprep.subr.bf16.mxu1 %v3143_v13  ;;  %v3224_v10 = vld [vmem:[%s4720_s1 + $0x5e4] ss:$16 sps:$4 sm:$0xff]   ;;  %v3225_v13 = vld [vmem:[%s4720_s1 + $0x1e8] ss:$16 sps:$4 sm:$0xff]  }
  0x45   :  { %1726 = vmatprep.subr.bf16.mxu0 %v3140_v12  ;;  %1842 = vmatprep.mubr.bf16.mxu1 %v2669_v53  ;;  %v3192_v53 = vld [vmem:[%s4720_s1 + $0x540] ss:$16 sps:$4 sm:$0xff]  }
  0x46   :  { %1756 = vmatprep.mubr.bf16.mxu0 %v3895_v38  ;;  %v3222_v12 = vld [vmem:[%s4720_s1 + $0x5e0] ss:$16 sps:$4 sm:$0xff]  }
  0x47   :  { %1813 = vmatpush1.bf16.msra.mxu1 %v3141_v15  ;;  %v3233_v15 = vld [vmem:[%s4720_s1 + $0x20c] ss:$16 sps:$4 sm:$0xff]  }
  0x48   :  { %1727 = vmatpush1.bf16.msra.mxu0 %v3138_v14  ;;  %1814 = vmatprep.subr.bf16.mxu1 %v3149_v17  ;;  %v3230_v14 = vld [vmem:[%s4720_s1 + $0x604] ss:$16 sps:$4 sm:$0xff]   ;;  %v3228_v17 = vld [vmem:[%s4720_s1 + $0x600] ss:$16 sps:$4 sm:$0xff]  }
  0x49   :  { %1728 = vmatprep.subr.bf16.mxu0 %v3146_v16  ;;  %v4014_v16 = vcombine.low %v3880_v34, %v3885_v35  ;;  %v3252_v34 = vld [vmem:[%s4720_s1 + $0x680] ss:$16 sps:$4 sm:$0xff]   ;;  %v3255_v35 = vld [vmem:[%s4720_s1 + $0x288] ss:$16 sps:$4 sm:$0xff]  }
  0x4b   :  { %1815 = vmatpush1.bf16.msra.mxu1 %v3147_v19  ;;  %v3236_v19 = vld [vmem:[%s4720_s1 + $0x624] ss:$16 sps:$4 sm:$0xff]  }
  0x4c   :  { %1729 = vmatpush1.bf16.msra.mxu0 %v3144_v18  ;;  %1816 = vmatprep.subr.bf16.mxu1 %v3155_v21  ;;  %v3231_v18 = vld [vmem:[%s4720_s1 + $0x208] ss:$16 sps:$4 sm:$0xff]  }
  0x4d   :  { %1730 = vmatprep.subr.bf16.mxu0 %v3152_v20  ;;  %v3239_v20 = vld [vmem:[%s4720_s1 + $0x22c] ss:$16 sps:$4 sm:$0xff]  }
  0x4e   :  { %v4031_v21 = vld [vmem:[%s4721_s0 + $0x18] sm:$0xff] }
  0x4f   :  { %1817 = vmatpush1.bf16.msra.mxu1 %v3153_v23  ;;  %v3234_v23 = vld [vmem:[%s4720_s1 + $0x620] ss:$16 sps:$4 sm:$0xff]  }
  0x50   :  { %1731 = vmatpush1.bf16.msra.mxu0 %v3150_v22  ;;  %1818 = vmatprep.subr.bf16.mxu1 %v3161_v25  ;;  %v4036_v22 = vld [vmem:[%s4721_s0 + $0x38] sm:$0xff] }
  0x51   :  { %1732 = vmatprep.subr.bf16.mxu0 %v3158_v24  ;;  %v3237_v24 = vld [vmem:[%s4720_s1 + $0x228] ss:$16 sps:$4 sm:$0xff]   ;;  %v4048_v25 = vcombine.high %v4031_v21, %v4036_v22 }
  0x53   :  { %1819 = vmatpush1.bf16.msra.mxu1 %v3159_v27  ;;  %v3240_v27 = vld [vmem:[%s4720_s1 + $0x640] ss:$16 sps:$4 sm:$0xff]  }
  0x54   :  { %1733 = vmatpush1.bf16.msra.mxu0 %v3156_v26  ;;  %1820 = vmatprep.subr.bf16.mxu1 %v3167_v29  ;;  %v3242_v26 = vld [vmem:[%s4720_s1 + $0x644] ss:$16 sps:$4 sm:$0xff]  }
  0x55   :  { %1734 = vmatprep.subr.bf16.mxu0 %v3164_v28  ;;  %v3243_v28 = vld [vmem:[%s4720_s1 + $0x248] ss:$16 sps:$4 sm:$0xff]   ;;  %v3248_v29 = vld [vmem:[%s4720_s1 + $0x664] ss:$16 sps:$4 sm:$0xff]  }
  0x57   :  { %1821 = vmatpush1.bf16.msra.mxu1 %v3165_v31  ;;  %v3249_v31 = vld [vmem:[%s4720_s1 + $0x268] ss:$16 sps:$4 sm:$0xff]  }
  0x58   :  { %1735 = vmatpush1.bf16.msra.mxu0 %v3162_v30  ;;  %1822 = vmatprep.subr.bf16.mxu1 %v3173_v33  ;;  %v3246_v30 = vld [vmem:[%s4720_s1 + $0x660] ss:$16 sps:$4 sm:$0xff]   ;;  %v3257_v33 = vld [vmem:[%s4720_s1 + $0x28c] ss:$16 sps:$4 sm:$0xff]  }
  0x59   :  { %1736 = vmatprep.subr.bf16.mxu0 %v3170_v32  ;;  %v3254_v32 = vld [vmem:[%s4720_s1 + $0x684] ss:$16 sps:$4 sm:$0xff]  }
  0x5b   :  { %1823 = vmatpush1.bf16.msra.mxu1 %v3171_v37  ;;  %v3263_v37 = vld [vmem:[%s4720_s1 + $0x2ac] ss:$16 sps:$4 sm:$0xff]  }
  0x5c   :  { %1737 = vmatpush1.bf16.msra.mxu0 %v3168_v36  ;;  %1824 = vmatprep.subr.bf16.mxu1 %v3179_v40  ;;  %v3260_v36 = vld [vmem:[%s4720_s1 + $0x6a4] ss:$16 sps:$4 sm:$0xff]   ;;  %v3261_v40 = vld [vmem:[%s4720_s1 + $0x2a8] ss:$16 sps:$4 sm:$0xff]  }
  0x5d   :  { %1738 = vmatprep.subr.bf16.mxu0 %v3176_v39  ;;  %v3258_v39 = vld [vmem:[%s4720_s1 + $0x6a0] ss:$16 sps:$4 sm:$0xff]  }
  0x5f   :  { %1825 = vmatpush1.bf16.msra.mxu1 %v3177_v42  ;;  %v3269_v42 = vld [vmem:[%s4720_s1 + $0x2cc] ss:$16 sps:$4 sm:$0xff]  }
  0x60   :  { %1739 = vmatpush1.bf16.msra.mxu0 %v3174_v41  ;;  %1826 = vmatprep.subr.bf16.mxu1 %v3185_v44  ;;  %v3266_v41 = vld [vmem:[%s4720_s1 + $0x6c4] ss:$16 sps:$4 sm:$0xff]   ;;  %v3267_v44 = vld [vmem:[%s4720_s1 + $0x2c8] ss:$16 sps:$4 sm:$0xff]  }
  0x61   :  { %1740 = vmatprep.subr.bf16.mxu0 %v3182_v43  ;;  %v3264_v43 = vld [vmem:[%s4720_s1 + $0x6c0] ss:$16 sps:$4 sm:$0xff]  }
  0x63   :  { %1827 = vmatpush1.bf16.msra.mxu1 %v3183_v46  ;;  %v3275_v46 = vld [vmem:[%s4720_s1 + $0x2ec] ss:$16 sps:$4 sm:$0xff]  }
  0x64   :  { %1741 = vmatpush1.bf16.msra.mxu0 %v3180_v45  ;;  %1828 = vmatprep.subr.bf16.mxu1 %v3191_v48  ;;  %v3272_v45 = vld [vmem:[%s4720_s1 + $0x6e4] ss:$16 sps:$4 sm:$0xff]   ;;  %v3273_v48 = vld [vmem:[%s4720_s1 + $0x2e8] ss:$16 sps:$4 sm:$0xff]  }
  0x65   :  { %1742 = vmatprep.subr.bf16.mxu0 %v3188_v47  ;;  %v3270_v47 = vld [vmem:[%s4720_s1 + $0x6e0] ss:$16 sps:$4 sm:$0xff]  }
  0x67   :  { %1829 = vmatpush1.bf16.msra.mxu1 %v3189_v50  ;;  %v3281_v50 = vld [vmem:[%s4720_s1 + $0x30c] ss:$16 sps:$4 sm:$0xff]  }
  0x68   :  { %1743 = vmatpush1.bf16.msra.mxu0 %v3186_v49  ;;  %1830 = vmatprep.subr.bf16.mxu1 %v3197_v52  ;;  %v3278_v49 = vld [vmem:[%s4720_s1 + $0x704] ss:$16 sps:$4 sm:$0xff]   ;;  %v3279_v52 = vld [vmem:[%s4720_s1 + $0x308] ss:$16 sps:$4 sm:$0xff]  }
  0x69   :  { %1744 = vmatprep.subr.bf16.mxu0 %v3194_v51  ;;  %v3276_v51 = vld [vmem:[%s4720_s1 + $0x700] ss:$16 sps:$4 sm:$0xff]  }
  0x6b   :  { %1831 = vmatpush1.bf16.msra.mxu1 %v3195_v54  ;;  %v3287_v54 = vld [vmem:[%s4720_s1 + $0x32c] ss:$16 sps:$4 sm:$0xff]  }
  0x6c   :  { %1745 = vmatpush1.bf16.msra.mxu0 %v3192_v53  ;;  %1832 = vmatprep.subr.bf16.mxu1 %v3203_v57  ;;  %v3284_v53 = vld [vmem:[%s4720_s1 + $0x724] ss:$16 sps:$4 sm:$0xff]   ;;  %v3285_v57 = vld [vmem:[%s4720_s1 + $0x328] ss:$16 sps:$4 sm:$0xff]  }
  0x6d   :  { %1746 = vmatprep.subr.bf16.mxu0 %v3200_v56  ;;  %v3282_v56 = vld [vmem:[%s4720_s1 + $0x720] ss:$16 sps:$4 sm:$0xff]  }
  0x6f   :  { %1833 = vmatpush1.bf16.msra.mxu1 %v3201_v59  ;;  %v3293_v59 = vld [vmem:[%s4720_s1 + $0x34c] ss:$16 sps:$4 sm:$0xff]  }
  0x70   :  { %1747 = vmatpush1.bf16.msra.mxu0 %v3198_v58  ;;  %1834 = vmatprep.subr.bf16.mxu1 %v3209_v61  ;;  %v3290_v58 = vld [vmem:[%s4720_s1 + $0x744] ss:$16 sps:$4 sm:$0xff]   ;;  %v3291_v61 = vld [vmem:[%s4720_s1 + $0x348] ss:$16 sps:$4 sm:$0xff]  }
  0x71   :  { %1748 = vmatprep.subr.bf16.mxu0 %v3206_v60  ;;  %v3288_v60 = vld [vmem:[%s4720_s1 + $0x740] ss:$16 sps:$4 sm:$0xff]  }
  0x73   :  { %1835 = vmatpush1.bf16.msra.mxu1 %v3207_v63  ;;  %v3299_v63 = vld [vmem:[%s4720_s1 + $0x36c] ss:$16 sps:$4 sm:$0xff]  }
  0x74   :  { %1749 = vmatpush1.bf16.msra.mxu0 %v3204_v62  ;;  %1836 = vmatprep.subr.bf16.mxu1 %v3215_v1  ;;  %v3296_v62 = vld [vmem:[%s4720_s1 + $0x764] ss:$16 sps:$4 sm:$0xff]   ;;  %v3297_v1 = vld [vmem:[%s4720_s1 + $0x368] ss:$16 sps:$4 sm:$0xff]  }
  0x75   :  { %1750 = vmatprep.subr.bf16.mxu0 %v3212_v0  ;;  %v3294_v0 = vld [vmem:[%s4720_s1 + $0x760] ss:$16 sps:$4 sm:$0xff]  }
  0x77   :  { %1837 = vmatpush1.bf16.msra.mxu1 %v3213_v3  ;;  %v3305_v3 = vld [vmem:[%s4720_s1 + $0x38c] ss:$16 sps:$4 sm:$0xff]  }
  0x78   :  { %1751 = vmatpush1.bf16.msra.mxu0 %v3210_v2  ;;  %1838 = vmatprep.subr.bf16.mxu1 %v3221_v5  ;;  %v3302_v2 = vld [vmem:[%s4720_s1 + $0x784] ss:$16 sps:$4 sm:$0xff]   ;;  %v3303_v5 = vld [vmem:[%s4720_s1 + $0x388] ss:$16 sps:$4 sm:$0xff]  }
  0x79   :  { %1752 = vmatprep.subr.bf16.mxu0 %v3218_v4  ;;  %v3300_v4 = vld [vmem:[%s4720_s1 + $0x780] ss:$16 sps:$4 sm:$0xff]  }
  0x7b   :  { %1839 = vmatpush1.bf16.msra.mxu1 %v3219_v7  ;;  %v3311_v7 = vld [vmem:[%s4720_s1 + $0x3ac] ss:$16 sps:$4 sm:$0xff]  }
  0x7c   :  { %1753 = vmatpush1.bf16.msra.mxu0 %v3216_v6  ;;  %1840 = vmatprep.subr.bf16.mxu1 %v3227_v11  ;;  %v3308_v6 = vld [vmem:[%s4720_s1 + $0x7a4] ss:$16 sps:$4 sm:$0xff]   ;;  %v3309_v11 = vld [vmem:[%s4720_s1 + $0x3a8] ss:$16 sps:$4 sm:$0xff]  }
  0x7d   :  { %1754 = vmatprep.subr.bf16.mxu0 %v3224_v10  ;;  %v3306_v10 = vld [vmem:[%s4720_s1 + $0x7a0] ss:$16 sps:$4 sm:$0xff]  }
  0x7f   :  { %1841 = vmatpush1.bf16.msra.mxu1 %v3225_v13  ;;  %v3317_v13 = vld [vmem:[%s4720_s1 + $0x3cc] ss:$16 sps:$4 sm:$0xff]  }
  0x80   :  { %1755 = vmatpush1.bf16.msra.mxu0 %v3222_v12  ;;  %1853 = vmatprep.subr.bf16.mxu1 %v3233_v15  ;;  %v3314_v12 = vld [vmem:[%s4720_s1 + $0x7c4] ss:$16 sps:$4 sm:$0xff]   ;;  %v3315_v15 = vld [vmem:[%s4720_s1 + $0x3c8] ss:$16 sps:$4 sm:$0xff]  }
  0x81   :  { %1767 = vmatprep.subr.bf16.mxu0 %v3230_v14  ;;  %v3312_v14 = vld [vmem:[%s4720_s1 + $0x7c0] ss:$16 sps:$4 sm:$0xff]  }
  0x82   :  { %1843 = vmatmul.mubr.bf16.vlgmr.msra.gmra.mrb[4].mxu1 %v3799_v8  ;;  %v3245_v8 = vld [vmem:[%s4720_s1 + $0x24c] ss:$16 sps:$4 sm:$0xff]  }
  0x83   :  { %1757 = vmatmul.mubr.bf16.vlgmr.msra.gmra.mrb[0].mxu0 %v4014_v16  ;;  %1854 = vmatpush1.bf16.msra.mxu1 %v3231_v18  ;;  %v3323_v18 = vld [vmem:[%s4720_s1 + $0x3ec] ss:$16 sps:$4 sm:$0xff]  }
  0x84   :  { %1768 = vmatpush1.bf16.msra.mxu0 %v3228_v17  ;;  %1855 = vmatprep.subr.bf16.mxu1 %v3239_v20  ;;  %v3320_v17 = vld [vmem:[%s4720_s1 + $0x7e4] ss:$16 sps:$4 sm:$0xff]   ;;  %v3321_v20 = vld [vmem:[%s4720_s1 + $0x3e8] ss:$16 sps:$4 sm:$0xff]  }
  0x85   :  { %1769 = vmatprep.subr.bf16.mxu0 %v3236_v19  ;;  %1799 = vmatprep.mubr.bf16.mxu0 %v4048_v25  ;;  %v3318_v19 = vld [vmem:[%s4720_s1 + $0x7e0] ss:$16 sps:$4 sm:$0xff]  }
  0x86   :  { %1885 = vmatprep.mubr.bf16.mxu1 %v3748_v55  ;;  %v3251_v55 = vld [vmem:[%s4720_s1 + $0x26c] ss:$16 sps:$4 sm:$0xff]  }
  0x87   :  { %1856 = vmatpush1.bf16.msra.mxu1 %v3237_v24  ;;  %v4225_v24 = vcombine.low %v4031_v21, %v4036_v22  ;;  %v3327_v21 = vld [vmem:[%s4720_s1 + $0x428] ss:$16 sps:$4 sm:$0xff]   ;;  %v3332_v22 = vld [vmem:[%s4720_s1 + $0x44c] ss:$16 sps:$4 sm:$0xff]  }
  0x88   :  { %1770 = vmatpush1.bf16.msra.mxu0 %v3234_v23  ;;  %1857 = vmatprep.subr.bf16.mxu1 %v3245_v8  ;;  %v3326_v23 = vld [vmem:[%s4720_s1 + $0x40c] ss:$16 sps:$4 sm:$0xff]  }
  0x89   :  { %1771 = vmatprep.subr.bf16.mxu0 %v3242_v26  ;;  %v3324_v26 = vld [vmem:[%s4720_s1 + $0x408] ss:$16 sps:$4 sm:$0xff]   ;;  %v3329_v8 = vld [vmem:[%s4720_s1 + $0x42c] ss:$16 sps:$4 sm:$0xff]  }
  0x8b   :  { %1858 = vmatpush1.bf16.msra.mxu1 %v3243_v28  ;;  %v3338_v28 = vld [vmem:[%s4720_s1 + $0x48c] ss:$16 sps:$4 sm:$0xff]  }
  0x8c   :  { %1772 = vmatpush1.bf16.msra.mxu0 %v3240_v27  ;;  %1859 = vmatprep.subr.bf16.mxu1 %v3251_v55  ;;  %v3330_v27 = vld [vmem:[%s4720_s1 + $0x448] ss:$16 sps:$4 sm:$0xff]   ;;  %v3341_v55 = vld [vmem:[%s4720_s1 + $0x4ac] ss:$16 sps:$4 sm:$0xff]  }
  0x8d   :  { %1773 = vmatprep.subr.bf16.mxu0 %v3248_v29  ;;  %v3336_v29 = vld [vmem:[%s4720_s1 + $0x488] ss:$16 sps:$4 sm:$0xff]  }
  0x8f   :  { %1860 = vmatpush1.bf16.msra.mxu1 %v3249_v31  ;;  %v3344_v31 = vld [vmem:[%s4720_s1 + $0x4cc] ss:$16 sps:$4 sm:$0xff]  }
  0x90   :  { %1774 = vmatpush1.bf16.msra.mxu0 %v3246_v30  ;;  %1861 = vmatprep.subr.bf16.mxu1 %v3257_v33  ;;  %v3339_v30 = vld [vmem:[%s4720_s1 + $0x4a8] ss:$16 sps:$4 sm:$0xff]   ;;  %v3347_v33 = vld [vmem:[%s4720_s1 + $0x4ec] ss:$16 sps:$4 sm:$0xff]  }
  0x91   :  { %1775 = vmatprep.subr.bf16.mxu0 %v3254_v32  ;;  %v3342_v32 = vld [vmem:[%s4720_s1 + $0x4c8] ss:$16 sps:$4 sm:$0xff]  }
  0x93   :  { %1862 = vmatpush1.bf16.msra.mxu1 %v3255_v35  ;;  %v3350_v35 = vld [vmem:[%s4720_s1 + $0x50c] ss:$16 sps:$4 sm:$0xff]  }
  0x94   :  { %1776 = vmatpush1.bf16.msra.mxu0 %v3252_v34  ;;  %1863 = vmatprep.subr.bf16.mxu1 %v3263_v37  ;;  %v3345_v34 = vld [vmem:[%s4720_s1 + $0x4e8] ss:$16 sps:$4 sm:$0xff]   ;;  %v3353_v37 = vld [vmem:[%s4720_s1 + $0x52c] ss:$16 sps:$4 sm:$0xff]  }
  0x95   :  { %1777 = vmatprep.subr.bf16.mxu0 %v3260_v36  ;;  %v3348_v36 = vld [vmem:[%s4720_s1 + $0x508] ss:$16 sps:$4 sm:$0xff]  }
  0x97   :  { %1864 = vmatpush1.bf16.msra.mxu1 %v3261_v40  ;;  %v3356_v40 = vld [vmem:[%s4720_s1 + $0x54c] ss:$16 sps:$4 sm:$0xff]  }
  0x98   :  { %1778 = vmatpush1.bf16.msra.mxu0 %v3258_v39  ;;  %1865 = vmatprep.subr.bf16.mxu1 %v3269_v42  ;;  %v3351_v39 = vld [vmem:[%s4720_s1 + $0x528] ss:$16 sps:$4 sm:$0xff]   ;;  %v3359_v42 = vld [vmem:[%s4720_s1 + $0x56c] ss:$16 sps:$4 sm:$0xff]  }
  0x99   :  { %1779 = vmatprep.subr.bf16.mxu0 %v3266_v41  ;;  %v3354_v41 = vld [vmem:[%s4720_s1 + $0x548] ss:$16 sps:$4 sm:$0xff]  }
  0x9b   :  { %1866 = vmatpush1.bf16.msra.mxu1 %v3267_v44  ;;  %v3362_v44 = vld [vmem:[%s4720_s1 + $0x58c] ss:$16 sps:$4 sm:$0xff]  }
  0x9c   :  { %1780 = vmatpush1.bf16.msra.mxu0 %v3264_v43  ;;  %1867 = vmatprep.subr.bf16.mxu1 %v3275_v46  ;;  %v3357_v43 = vld [vmem:[%s4720_s1 + $0x568] ss:$16 sps:$4 sm:$0xff]   ;;  %v3365_v46 = vld [vmem:[%s4720_s1 + $0x5ac] ss:$16 sps:$4 sm:$0xff]  }
  0x9d   :  { %1781 = vmatprep.subr.bf16.mxu0 %v3272_v45  ;;  %v3360_v45 = vld [vmem:[%s4720_s1 + $0x588] ss:$16 sps:$4 sm:$0xff]  }
  0x9f   :  { %1868 = vmatpush1.bf16.msra.mxu1 %v3273_v48  ;;  %v3368_v48 = vld [vmem:[%s4720_s1 + $0x5cc] ss:$16 sps:$4 sm:$0xff]  }
  0xa0   :  { %1782 = vmatpush1.bf16.msra.mxu0 %v3270_v47  ;;  %1869 = vmatprep.subr.bf16.mxu1 %v3281_v50  ;;  %v3363_v47 = vld [vmem:[%s4720_s1 + $0x5a8] ss:$16 sps:$4 sm:$0xff]   ;;  %v3371_v50 = vld [vmem:[%s4720_s1 + $0x5ec] ss:$16 sps:$4 sm:$0xff]  }
  0xa1   :  { %1783 = vmatprep.subr.bf16.mxu0 %v3278_v49  ;;  %v3366_v49 = vld [vmem:[%s4720_s1 + $0x5c8] ss:$16 sps:$4 sm:$0xff]  }
  0xa3   :  { %1870 = vmatpush1.bf16.msra.mxu1 %v3279_v52  ;;  %v3374_v52 = vld [vmem:[%s4720_s1 + $0x60c] ss:$16 sps:$4 sm:$0xff]  }
  0xa4   :  { %1784 = vmatpush1.bf16.msra.mxu0 %v3276_v51  ;;  %1871 = vmatprep.subr.bf16.mxu1 %v3287_v54  ;;  %v3369_v51 = vld [vmem:[%s4720_s1 + $0x5e8] ss:$16 sps:$4 sm:$0xff]   ;;  %v3377_v54 = vld [vmem:[%s4720_s1 + $0x62c] ss:$16 sps:$4 sm:$0xff]  }
  0xa5   :  { %1785 = vmatprep.subr.bf16.mxu0 %v3284_v53  ;;  %v3372_v53 = vld [vmem:[%s4720_s1 + $0x608] ss:$16 sps:$4 sm:$0xff]  }
  0xa7   :  { %1872 = vmatpush1.bf16.msra.mxu1 %v3285_v57  ;;  %v3380_v57 = vld [vmem:[%s4720_s1 + $0x64c] ss:$16 sps:$4 sm:$0xff]  }
  0xa8   :  { %1786 = vmatpush1.bf16.msra.mxu0 %v3282_v56  ;;  %1873 = vmatprep.subr.bf16.mxu1 %v3293_v59  ;;  %v3375_v56 = vld [vmem:[%s4720_s1 + $0x628] ss:$16 sps:$4 sm:$0xff]   ;;  %v3386_v59 = vld [vmem:[%s4720_s1 + $0x68c] ss:$16 sps:$4 sm:$0xff]  }
  0xa9   :  { %1787 = vmatprep.subr.bf16.mxu0 %v3290_v58  ;;  %v3378_v58 = vld [vmem:[%s4720_s1 + $0x648] ss:$16 sps:$4 sm:$0xff]  }
  0xab   :  { %1874 = vmatpush1.bf16.msra.mxu1 %v3291_v61  ;;  %v3389_v61 = vld [vmem:[%s4720_s1 + $0x6ac] ss:$16 sps:$4 sm:$0xff]  }
  0xac   :  { %1788 = vmatpush1.bf16.msra.mxu0 %v3288_v60  ;;  %1875 = vmatprep.subr.bf16.mxu1 %v3299_v63  ;;  %v3384_v60 = vld [vmem:[%s4720_s1 + $0x688] ss:$16 sps:$4 sm:$0xff]   ;;  %v3392_v63 = vld [vmem:[%s4720_s1 + $0x6cc] ss:$16 sps:$4 sm:$0xff]  }
  0xad   :  { %1789 = vmatprep.subr.bf16.mxu0 %v3296_v62  ;;  %v3387_v62 = vld [vmem:[%s4720_s1 + $0x6a8] ss:$16 sps:$4 sm:$0xff]  }
  0xaf   :  { %1876 = vmatpush1.bf16.msra.mxu1 %v3297_v1 }
  0xb0   :  { %1790 = vmatpush1.bf16.msra.mxu0 %v3294_v0  ;;  %1877 = vmatprep.subr.bf16.mxu1 %v3305_v3  ;;  %v3390_v3 = vld [vmem:[%s4720_s1 + $0x6c8] ss:$16 sps:$4 sm:$0xff]  }
  0xb1   :  { %1791 = vmatprep.subr.bf16.mxu0 %v3302_v2 }
  0xb3   :  { %1878 = vmatpush1.bf16.msra.mxu1 %v3303_v5  ;;  %v3395_v5 = vld [vmem:[%s4720_s1 + $0x6ec] ss:$16 sps:$4 sm:$0xff]  }
  0xb4   :  { %1792 = vmatpush1.bf16.msra.mxu0 %v3300_v4  ;;  %1879 = vmatprep.subr.bf16.mxu1 %v3311_v7  ;;  %v3398_v7 = vld [vmem:[%s4720_s1 + $0x70c] ss:$16 sps:$4 sm:$0xff]  }
  0xb5   :  { %1793 = vmatprep.subr.bf16.mxu0 %v3308_v6  ;;  %v3393_v6 = vld [vmem:[%s4720_s1 + $0x6e8] ss:$16 sps:$4 sm:$0xff]  }
  0xb7   :  { %1880 = vmatpush1.bf16.msra.mxu1 %v3309_v11  ;;  %v3401_v11 = vld [vmem:[%s4720_s1 + $0x72c] ss:$16 sps:$4 sm:$0xff]  }
  0xb8   :  { %1794 = vmatpush1.bf16.msra.mxu0 %v3306_v10  ;;  %1881 = vmatprep.subr.bf16.mxu1 %v3317_v13  ;;  %v3396_v10 = vld [vmem:[%s4720_s1 + $0x708] ss:$16 sps:$4 sm:$0xff]   ;;  %v3404_v13 = vld [vmem:[%s4720_s1 + $0x74c] ss:$16 sps:$4 sm:$0xff]  }
  0xb9   :  { %1795 = vmatprep.subr.bf16.mxu0 %v3314_v12  ;;  %v3399_v12 = vld [vmem:[%s4720_s1 + $0x728] ss:$16 sps:$4 sm:$0xff]  }
  0xbb   :  { %1882 = vmatpush1.bf16.msra.mxu1 %v3315_v15  ;;  %v3407_v15 = vld [vmem:[%s4720_s1 + $0x76c] ss:$16 sps:$4 sm:$0xff]  }
  0xbc   :  { %1796 = vmatpush1.bf16.msra.mxu0 %v3312_v14  ;;  %1883 = vmatprep.subr.bf16.mxu1 %v3323_v18  ;;  %v3402_v14 = vld [vmem:[%s4720_s1 + $0x748] ss:$16 sps:$4 sm:$0xff]   ;;  %v3410_v18 = vld [vmem:[%s4720_s1 + $0x78c] ss:$16 sps:$4 sm:$0xff]  }
  0xbd   :  { %1797 = vmatprep.subr.bf16.mxu0 %v3320_v17  ;;  %v3405_v17 = vld [vmem:[%s4720_s1 + $0x768] ss:$16 sps:$4 sm:$0xff]  }
  0xbf   :  { %1884 = vmatpush1.bf16.msra.mxu1 %v3321_v20  ;;  %v3413_v20 = vld [vmem:[%s4720_s1 + $0x7ac] ss:$16 sps:$4 sm:$0xff]  }
  0xc0   :  { %1798 = vmatpush1.bf16.msra.mxu0 %v3318_v19  ;;  %1896 = vmatprep.subr.bf16.mxu1 %v3326_v23  ;;  %v3408_v19 = vld [vmem:[%s4720_s1 + $0x788] ss:$16 sps:$4 sm:$0xff]  }
  0xc1   :  { %v3411_v23 = vld [vmem:[%s4720_s1 + $0x7a8] ss:$16 sps:$4 sm:$0xff]  }
  0xc2   :  { %1886 = vmatmul.mubr.bf16.vlgmr.msra.gmra.mrb[4].mxu1 %v3801_v9  ;;  %v3335_v9 = vld [vmem:[%s4720_s1 + $0x46c] ss:$16 sps:$4 sm:$0xff]  }
  0xc3   :  { %1800 = vmatmul.mubr.bf16.vlgmr.msra.gmra.mrb[0].mxu0 %v4225_v24  ;;  %1897 = vmatpush1.bf16.msra.mxu1 %v3324_v26  ;;  %v3416_v26 = vld [vmem:[%s4720_s1 + $0x7cc] ss:$16 sps:$4 sm:$0xff]  }
  0xc4   :  { %1928 = vmatprep.mubr.bf16.mxu1 %v3895_v38  ;;  %1898 = vmatprep.subr.bf16.mxu1 %v3329_v8  ;;  %v3333_v38 = vld [vmem:[%s4720_s1 + $0x468] ss:$16 sps:$4 sm:$0xff]  }
  0xc5   :  { %v3414_v8 = vld [vmem:[%s4720_s1 + $0x7c8] ss:$16 sps:$4 sm:$0xff]  }
  0xc7   :  { %1899 = vmatpush1.bf16.msra.mxu1 %v3327_v21  ;;  %v3419_v21 = vld [vmem:[%s4720_s1 + $0x7ec] ss:$16 sps:$4 sm:$0xff]  }
  0xc8   :  { %1900 = vmatprep.subr.bf16.mxu1 %v3332_v22  ;;  %v3417_v22 = vld [vmem:[%s4720_s1 + $0x7e8] ss:$16 sps:$4 sm:$0xff]  }
  0xcb   :  { %1901 = vmatpush1.bf16.msra.mxu1 %v3330_v27  ;;  %v298_v27 = vlaneseq }
  0xcc   :  { %1902 = vmatprep.subr.bf16.mxu1 %v3335_v9 }
  0xcd   :  { %v299_v9 = vshrl.u32 %v298_v27, 7 }
  0xcf   :  { %1903 = vmatpush1.bf16.msra.mxu1 %v3333_v38  ;;  %v4422_v38 = vsub.s32 0, %v299_v9 }
  0xd0   :  { %1904 = vmatprep.subr.bf16.mxu1 %v3338_v28  ;;  %v296_v28 = vld [vmem:[%s4722_s2] sm:$0xf] }
  0xd3   :  { %1905 = vmatpush1.bf16.msra.mxu1 %v3336_v29  ;;  %v4427_v29 = vsub.s32 1, %v299_v9 }
  0xd4   :  { %1906 = vmatprep.subr.bf16.mxu1 %v3341_v55  ;;  %v301_v55 = vrot.slane %v296_v28, %v4422_v38 }
  0xd7   :  { %1907 = vmatpush1.bf16.msra.mxu1 %v3339_v30  ;;  %v305_v30 = vrot.slane %v296_v28, %v4427_v29 }
  0xd8   :  { %1908 = vmatprep.subr.bf16.mxu1 %v3344_v31 }
  0xdb   :  { %1909 = vmatpush1.bf16.msra.mxu1 %v3342_v32 }
  0xdc   :  { %1910 = vmatprep.subr.bf16.mxu1 %v3347_v33 }
  0xdf   :  { %1911 = vmatpush1.bf16.msra.mxu1 %v3345_v34 }
  0xe0   :  { %1912 = vmatprep.subr.bf16.mxu1 %v3350_v35 }
  0xe3   :  { %1913 = vmatpush1.bf16.msra.mxu1 %v3348_v36 }
  0xe4   :  { %1914 = vmatprep.subr.bf16.mxu1 %v3353_v37 }
  0xe7   :  { %1915 = vmatpush1.bf16.msra.mxu1 %v3351_v39 }
  0xe8   :  { %1916 = vmatprep.subr.bf16.mxu1 %v3356_v40 }
  0xeb   :  { %1917 = vmatpush1.bf16.msra.mxu1 %v3354_v41 }
  0xec   :  { %1918 = vmatprep.subr.bf16.mxu1 %v3359_v42 }
  0xef   :  { %1919 = vmatpush1.bf16.msra.mxu1 %v3357_v43  ;;  %v4431_v43 = vsub.s32 2, %v299_v9 }
  0xf0   :  { %1920 = vmatprep.subr.bf16.mxu1 %v3362_v44  ;;  %v4433_v44 = vsub.s32 3, %v299_v9 }
  0xf3   :  { %1921 = vmatpush1.bf16.msra.mxu1 %v3360_v45  ;;  %v309_v45 = vrot.slane %v296_v28, %v4431_v43 }
  0xf4   :  { %1922 = vmatprep.subr.bf16.mxu1 %v3365_v46  ;;  %v313_v46 = vrot.slane %v296_v28, %v4433_v44 }
  0xf7   :  { %1923 = vmatpush1.bf16.msra.mxu1 %v3363_v47 }
  0xf8   :  { %1924 = vmatprep.subr.bf16.mxu1 %v3368_v48 }
  0xfb   :  { %1925 = vmatpush1.bf16.msra.mxu1 %v3366_v49 }
  0xfc   :  { %1926 = vmatprep.subr.bf16.mxu1 %v3371_v50 }
  0xff   :  { %1927 = vmatpush1.bf16.msra.mxu1 %v3369_v51 }
 0x100   :  { %1939 = vmatprep.subr.bf16.mxu1 %v3374_v52 }
 0x102   :  { %1929 = vmatmul.mubr.bf16.vlgmr.msra.gmra.mrb[4].mxu1 %v4014_v16  ;;  %v3383_v16 = vld [vmem:[%s4720_s1 + $0x66c] ss:$16 sps:$4 sm:$0xff]  }
 0x103   :  { %1940 = vmatpush1.bf16.msra.mxu1 %v3372_v53  ;;  %1971 = vmatprep.mubr.bf16.mxu1 %v4048_v25  ;;  %v3381_v25 = vld [vmem:[%s4720_s1 + $0x668] ss:$16 sps:$4 sm:$0xff]  }
 0x104   :  { %1941 = vmatprep.subr.bf16.mxu1 %v3377_v54 }
 0x107   :  { %1942 = vmatpush1.bf16.msra.mxu1 %v3375_v56 }
 0x108   :  { %1943 = vmatprep.subr.bf16.mxu1 %v3380_v57 }
 0x10b   :  { %1944 = vmatpush1.bf16.msra.mxu1 %v3378_v58 }
 0x10c   :  { %1945 = vmatprep.subr.bf16.mxu1 %v3383_v16 }
 0x10f   :  { %1946 = vmatpush1.bf16.msra.mxu1 %v3381_v25 }
 0x110   :  { %1947 = vmatprep.subr.bf16.mxu1 %v3386_v59 }
 0x113   :  { %1948 = vmatpush1.bf16.msra.mxu1 %v3384_v60  ;;  %v3420_v60 = vld [vmem:[%s4723_s5] ss:$8 sps:$4 sm:$0xff]  }
 0x114   :  { %1949 = vmatprep.subr.bf16.mxu1 %v3389_v61  ;;  %v3422_v61 = vld [vmem:[%s4723_s5 + $0x4] ss:$8 sps:$4 sm:$0xff]  }
 0x115   :  { %v1672_v0 = vpop.f32.mrb[0].mxu1  ;;  %2518 = vmatprep.subr.bf16.mxu0 %v3422_v61 }
 0x116   :  { %v1674_v1 = vpop.f32.mrb[1].mxu1  ;;  %v1673_v31 = vadd.f32 %v1672_v0, %v301_v55  ;;  %2519 = vmatpush1.bf16.msra.mxu0 %v3420_v60  ;;  %v3428_v0 = vld [vmem:[%s4723_s5 + $0x24] ss:$8 sps:$4 sm:$0xff]  }
 0x117   :  { %v1676_v2 = vpop.f32.mrb[2].mxu1  ;;  %1950 = vmatpush1.bf16.msra.mxu1 %v3387_v62  ;;  %v1675_v32 = vadd.f32 %v1674_v1, %v305_v30  ;;  %v3425_v62 = vld [vmem:[%s4723_s5 + $0x14] ss:$8 sps:$4 sm:$0xff]   ;;  %v3426_v1 = vld [vmem:[%s4723_s5 + $0x20] ss:$8 sps:$4 sm:$0xff]  }
 0x118   :  { %v1678_v4 = vpop.f32.mrb[3].mxu1  ;;  %1951 = vmatprep.subr.bf16.mxu1 %v3392_v63  ;;  %v1677_v34 = vadd.f32 %v1676_v2, %v301_v55  ;;  %v3423_v63 = vld [vmem:[%s4723_s5 + $0x10] ss:$8 sps:$4 sm:$0xff]   ;;  %2520 = vmatprep.subr.bf16.mxu0 %v3425_v62  ;;  %v3431_v2 = vld [vmem:[%s4723_s5 + $0x34] ss:$8 sps:$4 sm:$0xff]  }
 0x119   :  { %v1679_v36 = vadd.f32 %v1678_v4, %v305_v30  ;;  %v3434_v4 = vld [vmem:[%s4723_s5 + $0x44] ss:$8 sps:$4 sm:$0xff]  }
 0x11a   :  { %2521 = vmatpush1.bf16.msra.mxu0 %v3423_v63 }
 0x11b   :  { %1952 = vmatpush1.bf16.msra.mxu1 %v3390_v3  ;;  %2522 = vmatprep.subr.bf16.mxu0 %v3428_v0  ;;  %v3429_v3 = vld [vmem:[%s4723_s5 + $0x30] ss:$8 sps:$4 sm:$0xff]  }
 0x11c   :  { %1953 = vmatprep.subr.bf16.mxu1 %v3395_v5  ;;  %v3432_v5 = vld [vmem:[%s4723_s5 + $0x40] ss:$8 sps:$4 sm:$0xff]  }
 0x11e   :  { %2523 = vmatpush1.bf16.msra.mxu0 %v3426_v1 }
 0x11f   :  { %1954 = vmatpush1.bf16.msra.mxu1 %v3393_v6  ;;  %2524 = vmatprep.subr.bf16.mxu0 %v3431_v2 }
 0x120   :  { %1955 = vmatprep.subr.bf16.mxu1 %v3398_v7 }
 0x122   :  { %2525 = vmatpush1.bf16.msra.mxu0 %v3429_v3 }
 0x123   :  { %1956 = vmatpush1.bf16.msra.mxu1 %v3396_v10  ;;  %2526 = vmatprep.subr.bf16.mxu0 %v3434_v4 }
 0x124   :  { %1957 = vmatprep.subr.bf16.mxu1 %v3401_v11 }
 0x126   :  { %2527 = vmatpush1.bf16.msra.mxu0 %v3432_v5 }
 0x127   :  { %1958 = vmatpush1.bf16.msra.mxu1 %v3399_v12 }
 0x128   :  { %1959 = vmatprep.subr.bf16.mxu1 %v3404_v13 }
 0x12b   :  { %1960 = vmatpush1.bf16.msra.mxu1 %v3402_v14 }
 0x12c   :  { %1961 = vmatprep.subr.bf16.mxu1 %v3407_v15 }
 0x12f   :  { %1962 = vmatpush1.bf16.msra.mxu1 %v3405_v17 }
 0x130   :  { %1963 = vmatprep.subr.bf16.mxu1 %v3410_v18 }
 0x133   :  { %1964 = vmatpush1.bf16.msra.mxu1 %v3408_v19 }
 0x134   :  { %1965 = vmatprep.subr.bf16.mxu1 %v3413_v20 }
 0x137   :  { %1966 = vmatpush1.bf16.msra.mxu1 %v3411_v23 }
 0x138   :  { %1967 = vmatprep.subr.bf16.mxu1 %v3416_v26 }
 0x13b   :  { %1968 = vmatpush1.bf16.msra.mxu1 %v3414_v8 }
 0x13c   :  { %1969 = vmatprep.subr.bf16.mxu1 %v3419_v21 }
 0x13f   :  { %1970 = vmatpush1.bf16.msra.mxu1 %v3417_v22 }
 0x142   :  { %1972 = vmatmul.mubr.bf16.vlgmr.msra.gmra.mrb[4].mxu1 %v4225_v24 }
 0x196   :  { %v1801_v33 = vpop.f32.mrb[0].mxu0 }
 0x197   :  { %v2997_v35 = vadd.f32 %v1801_v33, %v1673_v31  ;;  %v1803_v24 = vpop.f32.mrb[1].mxu0 }
 0x198   :  { %v2999_v37 = vadd.f32 %v1803_v24, %v1675_v32  ;;  %v1805_v39 = vpop.f32.mrb[2].mxu0  ;;  %v3435_v24 = vld [vmem:[%s4723_s5 + $0x50] ss:$8 sps:$4 sm:$0xff]  }
 0x199   :  { %v3001_v40 = vadd.f32 %v1805_v39, %v1677_v34  ;;  %v1807_v41 = vpop.f32.mrb[3].mxu0  ;;  %v3443_v39 = vld [vmem:[%s4723_s5 + $0x74] ss:$8 sps:$4 sm:$0xff]  }
 0x19a   :  { %v3003_v42 = vadd.f32 %v1807_v41, %v1679_v36  ;;  %v1984_v48 = vadd.f32 %v2999_v37, %v2997_v35  ;;  %v3440_v36 = vld [vmem:[%s4723_s5 + $0x64] ss:$8 sps:$4 sm:$0xff]  }
 0x19b   :  { %v3446_v41 = vld [vmem:[%s4723_s5 + $0x84] ss:$8 sps:$4 sm:$0xff]  }
 0x19c   :  { %v1989_v53 = vadd.f32 %v3003_v42, %v3001_v40 }
 0x215   :  { %v1973_v47 = vpop.f32.mrb[4].mxu1 }
 0x216   :  { %v3004_v49 = vadd.f32 %v1973_v47, %v309_v45  ;;  %v1975_v50 = vpop.f32.mrb[5].mxu1  ;;  %v3452_v47 = vld [vmem:[%s4723_s5 + $0xa4] ss:$8 sps:$4 sm:$0xff]  }
 0x217   :  { %v3005_v51 = vadd.f32 %v1975_v50, %v313_v46  ;;  %v1977_v52 = vpop.f32.mrb[6].mxu1  ;;  %v3455_v50 = vld [vmem:[%s4723_s5 + $0xb4] ss:$8 sps:$4 sm:$0xff]  }
 0x218   :  { %v3006_v54 = vadd.f32 %v1977_v52, %v309_v45  ;;  %v1979_v56 = vpop.f32.mrb[7].mxu1  ;;  %v1985_v57 = vadd.f32 %v3004_v49, %v1984_v48  ;;  %v3449_v45 = vld [vmem:[%s4723_s5 + $0x94] ss:$8 sps:$4 sm:$0xff]   ;;  %v3450_v48 = vld [vmem:[%s4723_s5 + $0xa0] ss:$8 sps:$4 sm:$0xff]  }
 0x219   :  { %v3007_v16 = vadd.f32 %v1979_v56, %v313_v46  ;;  %v3447_v46 = vld [vmem:[%s4723_s5 + $0x90] ss:$8 sps:$4 sm:$0xff]   ;;  %v3456_v52 = vld [vmem:[%s4723_s5 + $0xc0] ss:$8 sps:$4 sm:$0xff]   ;;  %v3464_v56 = vld [vmem:[%s4723_s5 + $0xe4] ss:$8 sps:$4 sm:$0xff]  }
 0x21a   :  { %v1990_v58 = vadd.f32 %v3006_v54, %v1989_v53  ;;  %v1986_v25 = vadd.f32 %v3005_v51, %v1985_v57  ;;  %v3461_v53 = vld [vmem:[%s4723_s5 + $0xd4] ss:$8 sps:$4 sm:$0xff]   ;;  %v3462_v57 = vld [vmem:[%s4723_s5 + $0xe0] ss:$8 sps:$4 sm:$0xff]  }
 0x21c   :  { %1987 = vadd.xlane.f32.xlu0 %v1986_v25  ;;  %v1991_v59 = vadd.f32 %v3007_v16, %v1990_v58  ;;  %v3467_v58 = vld [vmem:[%s4723_s5 + $0xf4] ss:$8 sps:$4 sm:$0xff]   ;;  %v3470_v25 = vld [vmem:[%s4723_s5 + $0x104] ss:$8 sps:$4 sm:$0xff]  }
 0x220   :  { %1992 = vadd.xlane.f32.xlu0 %v1991_v59 }
 0x2a9   :  { %v1988_v6 = vpop.xlane.xlu0 %1987 }
 0x2aa   :  { %v1995_v7 = vmul.f32 0.001953125, %v1988_v6 }
 0x2ac   :  { %v4467_v10 = vsub.f32 %v2997_v35, %v1995_v7  ;;  %v4469_v11 = vsub.f32 %v2999_v37, %v1995_v7  ;;  %v4471_v12 = vsub.f32 %v3004_v49, %v1995_v7  ;;  %v4473_v14 = vsub.f32 %v3005_v51, %v1995_v7  ;;  %v3437_v35 = vld [vmem:[%s4723_s5 + $0x54] ss:$8 sps:$4 sm:$0xff]   ;;  %v3438_v37 = vld [vmem:[%s4723_s5 + $0x60] ss:$8 sps:$4 sm:$0xff]   ;;  %v3453_v49 = vld [vmem:[%s4723_s5 + $0xb0] ss:$8 sps:$4 sm:$0xff]  }
 0x2ad   :  { %v1993_v13 = vpop.xlane.xlu0 %1992  ;;  %2528 = vmatprep.subr.bf16.mxu0 %v3437_v35  ;;  %v3458_v51 = vld [vmem:[%s4723_s5 + $0xc4] ss:$8 sps:$4 sm:$0xff]  }
 0x2ae   :  { %v1996_v15 = vmul.f32 0.001953125, %v1993_v13  ;;  %v2005_v17 = vmul.f32 %v4467_v10, %v4467_v10  ;;  %v2006_v18 = vmul.f32 %v4469_v11, %v4469_v11  ;;  %v2007_v19 = vmul.f32 %v4471_v12, %v4471_v12  ;;  %2529 = vmatpush1.bf16.msra.mxu0 %v3435_v24 }
 0x2af   :  { %v2008_v21 = vmul.f32 %v4473_v14, %v4473_v14  ;;  %2530 = vmatprep.subr.bf16.mxu0 %v3440_v36 }
 0x2b0   :  { %v4481_v20 = vsub.f32 %v3001_v40, %v1996_v15  ;;  %v4483_v23 = vsub.f32 %v3003_v42, %v1996_v15  ;;  %v2013_v26 = vadd.f32 %v2006_v18, %v2005_v17  ;;  %v4485_v8 = vsub.f32 %v3006_v54, %v1996_v15  ;;  %v3441_v40 = vld [vmem:[%s4723_s5 + $0x70] ss:$8 sps:$4 sm:$0xff]   ;;  %v3444_v42 = vld [vmem:[%s4723_s5 + $0x80] ss:$8 sps:$4 sm:$0xff]  }
 0x2b1   :  { %v4489_v27 = vsub.f32 %v3007_v16, %v1996_v15  ;;  %v3459_v54 = vld [vmem:[%s4723_s5 + $0xd0] ss:$8 sps:$4 sm:$0xff]   ;;  %v1982_v18 = vld [vmem:[%s4724_s3] sm:$0xf] }
 0x2b2   :  { %v2014_v22 = vadd.f32 %v2013_v26, %v2007_v19  ;;  %v2009_v9 = vmul.f32 %v4481_v20, %v4481_v20  ;;  %v2010_v28 = vmul.f32 %v4483_v23, %v4483_v23  ;;  %v2011_v30 = vmul.f32 %v4485_v8, %v4485_v8  ;;  %2531 = vmatpush1.bf16.msra.mxu0 %v3438_v37  ;;  %v3465_v16 = vld [vmem:[%s4723_s5 + $0xf0] ss:$8 sps:$4 sm:$0xff]  }
 0x2b3   :  { %v2012_v32 = vmul.f32 %v4489_v27, %v4489_v27  ;;  %2532 = vmatprep.subr.bf16.mxu0 %v3443_v39  ;;  %v2060_v19 = vrot.slane %v1982_v18, %v4427_v29  ;;  %v2056_v26 = vrot.slane %v1982_v18, %v4422_v38 }
 0x2b4   :  { %v2015_v55 = vadd.f32 %v2014_v22, %v2008_v21  ;;  %v2018_v31 = vadd.f32 %v2010_v28, %v2009_v9  ;;  %v1983_v22 = vld [vmem:[%s4725_s4] sm:$0xf]  ;;  %v2064_v9 = vrot.slane %v1982_v18, %v4431_v43  ;;  %v2068_v28 = vrot.slane %v1982_v18, %v4433_v44  ;;  %v3489_v18 = vld [vmem:[%s4723_s5 + $0x170] ss:$8 sps:$4 sm:$0xff]  }
 0x2b5   :  { %v2085_v24 = vrot.slane %v1983_v22, %v4422_v38  ;;  %v2093_v37 = vrot.slane %v1983_v22, %v4431_v43 }
 0x2b6   :  { %2016 = vadd.xlane.f32.xlu1 %v2015_v55  ;;  %v2019_v33 = vadd.f32 %v2018_v31, %v2011_v30  ;;  %2533 = vmatpush1.bf16.msra.mxu0 %v3441_v40 }
 0x2b7   :  { %2534 = vmatprep.subr.bf16.mxu0 %v3446_v41 }
 0x2b8   :  { %v2020_v34 = vadd.f32 %v2019_v33, %v2012_v32 }
 0x2ba   :  { %2021 = vadd.xlane.f32.xlu1 %v2020_v34  ;;  %2535 = vmatpush1.bf16.msra.mxu0 %v3444_v42  ;;  %v2089_v34 = vrot.slane %v1983_v22, %v4427_v29 }
 0x2bb   :  { %2536 = vmatprep.subr.bf16.mxu0 %v3449_v45 }
 0x2be   :  { %2537 = vmatpush1.bf16.msra.mxu0 %v3447_v46 }
 0x2bf   :  { %2538 = vmatprep.subr.bf16.mxu0 %v3452_v47 }
 0x2c2   :  { %2539 = vmatpush1.bf16.msra.mxu0 %v3450_v48 }
 0x2c3   :  { %2540 = vmatprep.subr.bf16.mxu0 %v3455_v50 }
 0x2c6   :  { %2541 = vmatpush1.bf16.msra.mxu0 %v3453_v49 }
 0x2c7   :  { %2542 = vmatprep.subr.bf16.mxu0 %v3458_v51 }
 0x2ca   :  { %2543 = vmatpush1.bf16.msra.mxu0 %v3456_v52 }
 0x2cb   :  { %2544 = vmatprep.subr.bf16.mxu0 %v3461_v53 }
 0x2ce   :  { %2545 = vmatpush1.bf16.msra.mxu0 %v3459_v54 }
 0x2cf   :  { %2546 = vmatprep.subr.bf16.mxu0 %v3464_v56 }
 0x2d2   :  { %2547 = vmatpush1.bf16.msra.mxu0 %v3462_v57 }
 0x2d3   :  { %2548 = vmatprep.subr.bf16.mxu0 %v3467_v58 }
 0x2d6   :  { %2549 = vmatpush1.bf16.msra.mxu0 %v3465_v16  ;;  %v3468_v16 = vld [vmem:[%s4723_s5 + $0x100] ss:$8 sps:$4 sm:$0xff]  }
 0x2d7   :  { %2561 = vmatprep.subr.bf16.mxu0 %v3470_v25 }
 0x343   :  { %v2017_v59 = vpop.xlane.xlu1 %2016 }
 0x344   :  { %v2024_v60 = vmul.f32 0.0019569471, %v2017_v59 }
 0x346   :  { %3516 = vrsqrt.f32 %v2024_v60  ;;  %vm2028_vm0 = vcmp.eq.f32.partialorder %v2024_v60, inf  ;;  %v2031_v1 = vand.u32 2147483648, %v2024_v60  ;;  %vm2030_vm1 = vcmp.eq.f32.partialorder %v2024_v60, 0.0 }
 0x347   :  { %v2022_v61 = vpop.xlane.xlu1 %2021 }
 0x348   :  { %v2025_v62 = vmul.f32 0.0019569471, %v2022_v61 }
 0x34a   :  { %3518 = vrsqrt.f32 %v2025_v62  ;;  %vm2035_vm2 = vcmp.eq.f32.partialorder %v2025_v62, inf  ;;  %v2038_v7 = vand.u32 2147483648, %v2025_v62  ;;  %vm2037_vm3 = vcmp.eq.f32.partialorder %v2025_v62, 0.0 }
 0x350   :  { %v3517_v63 = vpop.eup %3516 }
 0x351   :  { %v2027_v0 = vmul.f32 %v3517_v63, %v2024_v60  ;;  %v3471_v63 = vld [vmem:[%s4723_s5 + $0x110] ss:$8 sps:$4 sm:$0xff]  }
 0x353   :  { %v2029_v2 = vsel %vm2028_vm0, %v2024_v60, %v2027_v0  ;;  %v3473_v60 = vld [vmem:[%s4723_s5 + $0x114] ss:$8 sps:$4 sm:$0xff]   ;;  %v3476_v0 = vld [vmem:[%s4723_s5 + $0x124] ss:$8 sps:$4 sm:$0xff]  }
 0x354   :  { %v3519_v3 = vpop.eup %3518  ;;  %v2032_v4 = vsel %vm2030_vm1, %v2031_v1, %v2029_v2  ;;  %v3474_v1 = vld [vmem:[%s4723_s5 + $0x120] ss:$8 sps:$4 sm:$0xff]   ;;  %v3479_v2 = vld [vmem:[%s4723_s5 + $0x134] ss:$8 sps:$4 sm:$0xff]  }
 0x355   :  { %v2040_v5 = vadd.f32 0.001, %v2032_v4  ;;  %v2034_v6 = vmul.f32 %v3519_v3, %v2025_v62  ;;  %v3477_v3 = vld [vmem:[%s4723_s5 + $0x130] ss:$8 sps:$4 sm:$0xff]   ;;  %v3482_v4 = vld [vmem:[%s4723_s5 + $0x144] ss:$8 sps:$4 sm:$0xff]  }
 0x357   :  { %3520 = vrcp.f32 %v2040_v5  ;;  %v2036_v13 = vsel %vm2035_vm2, %v2025_v62, %v2034_v6  ;;  %v3480_v5 = vld [vmem:[%s4723_s5 + $0x140] ss:$8 sps:$4 sm:$0xff]   ;;  %v3485_v6 = vld [vmem:[%s4723_s5 + $0x154] ss:$8 sps:$4 sm:$0xff]  }
 0x358   :  { %v2039_v15 = vsel %vm2037_vm3, %v2038_v7, %v2036_v13  ;;  %v3483_v7 = vld [vmem:[%s4723_s5 + $0x150] ss:$8 sps:$4 sm:$0xff]   ;;  %v3488_v13 = vld [vmem:[%s4723_s5 + $0x164] ss:$8 sps:$4 sm:$0xff]  }
 0x359   :  { %v2041_v17 = vadd.f32 0.001, %v2039_v15  ;;  %v3486_v15 = vld [vmem:[%s4723_s5 + $0x160] ss:$8 sps:$4 sm:$0xff]  }
 0x35b   :  { %3522 = vrcp.f32 %v2041_v17  ;;  %v3491_v17 = vld [vmem:[%s4723_s5 + $0x174] ss:$8 sps:$4 sm:$0xff]  }
 0x361   :  { %v3521_v21 = vpop.eup %3520 }
 0x362   :  { %v2045_v55 = vmul.f32 %v3521_v21, %v4469_v11  ;;  %v2044_v30 = vmul.f32 %v3521_v21, %v4467_v10  ;;  %v2047_v31 = vmul.f32 %v3521_v21, %v4473_v14  ;;  %v2046_v32 = vmul.f32 %v3521_v21, %v4471_v12  ;;  %v3497_v21 = vld [vmem:[%s4723_s5 + $0x194] ss:$8 sps:$4 sm:$0xff]  }
 0x363   :  { %v2097_v10 = vrot.slane %v1983_v22, %v4433_v44  ;;  %v3495_v22 = vld [vmem:[%s4723_s5 + $0x190] ss:$8 sps:$4 sm:$0xff]  }
 0x364   :  { %v2074_v33 = vmul.f32 %v2060_v19, %v2045_v55  ;;  %v2073_v35 = vmul.f32 %v2056_v26, %v2044_v30  ;;  %v2075_v39 = vmul.f32 %v2064_v9, %v2046_v32  ;;  %v2076_v41 = vmul.f32 %v2068_v28, %v2047_v31  ;;  %v3503_v55 = vld [vmem:[%s4723_s5 + $0x1b4] ss:$8 sps:$4 sm:$0xff]   ;;  %v3501_v30 = vld [vmem:[%s4723_s5 + $0x1b0] ss:$8 sps:$4 sm:$0xff]   ;;  %v3506_v31 = vld [vmem:[%s4723_s5 + $0x1c4] ss:$8 sps:$4 sm:$0xff]  }
 0x365   :  { %v3523_v36 = vpop.eup %3522  ;;  %v3504_v32 = vld [vmem:[%s4723_s5 + $0x1c0] ss:$8 sps:$4 sm:$0xff]  }
 0x366   :  { %v2049_v40 = vmul.f32 %v3523_v36, %v4483_v23  ;;  %v2048_v11 = vmul.f32 %v3523_v36, %v4481_v20  ;;  %v2051_v14 = vmul.f32 %v3523_v36, %v4489_v27  ;;  %v2050_v12 = vmul.f32 %v3523_v36, %v4485_v8  ;;  %v3515_v36 = vld [vmem:[%s4723_s5 + $0x1f4] ss:$8 sps:$4 sm:$0xff]  }
 0x367   :  { %v2103_v45 = vadd.f32 %v2089_v34, %v2074_v33  ;;  %v2102_v47 = vadd.f32 %v2085_v24, %v2073_v35  ;;  %v2104_v50 = vadd.f32 %v2093_v37, %v2075_v39  ;;  %v2105_v52 = vadd.f32 %v2097_v10, %v2076_v41  ;;  %v3509_v33 = vld [vmem:[%s4723_s5 + $0x1d4] ss:$8 sps:$4 sm:$0xff]   ;;  %v3512_v35 = vld [vmem:[%s4723_s5 + $0x1e4] ss:$8 sps:$4 sm:$0xff]   ;;  %v2186_v39 = vld [vmem:[%s4726_s6] sm:$0x3] }
 0x368   :  { %v2078_v42 = vmul.f32 %v2060_v19, %v2049_v40  ;;  %v2077_v46 = vmul.f32 %v2056_v26, %v2048_v11  ;;  %v2080_v48 = vmul.f32 %v2068_v28, %v2051_v14  ;;  %v2079_v49 = vmul.f32 %v2064_v9, %v2050_v12  ;;  %v3494_v19 = vld [vmem:[%s4723_s5 + $0x184] ss:$8 sps:$4 sm:$0xff]   ;;  %v3492_v26 = vld [vmem:[%s4723_s5 + $0x180] ss:$8 sps:$4 sm:$0xff]  }
 0x369   :  { %v2111_v20 = vmax.f32 %v2103_v45, 0.0  ;;  %v2110_v56 = vmax.f32 %v2102_v47, 0.0  ;;  %v2112_v27 = vmax.f32 %v2104_v50, 0.0  ;;  %v2113_v59 = vmax.f32 %v2105_v52, 0.0  ;;  %v3500_v9 = vld [vmem:[%s4723_s5 + $0x1a4] ss:$8 sps:$4 sm:$0xff]  }
 0x36a   :  { %v2107_v43 = vadd.f32 %v2089_v34, %v2078_v42  ;;  %v2106_v51 = vadd.f32 %v2085_v24, %v2077_v46  ;;  %v2109_v23 = vadd.f32 %v2097_v10, %v2080_v48  ;;  %v2108_v53 = vadd.f32 %v2093_v37, %v2079_v49  ;;  %v3498_v28 = vld [vmem:[%s4723_s5 + $0x1a0] ss:$8 sps:$4 sm:$0xff]   ;;  %v3507_v34 = vld [vmem:[%s4723_s5 + $0x1d0] ss:$8 sps:$4 sm:$0xff]  }
 0x36b   :  { %v3510_v24 = vld [vmem:[%s4723_s5 + $0x1e0] ss:$8 sps:$4 sm:$0xff]   ;;  %v3513_v37 = vld [vmem:[%s4723_s5 + $0x1f0] ss:$8 sps:$4 sm:$0xff]   ;;  %v2191_v40 = vrot.slane %v2186_v39, %v4422_v38  ;;  %v2195_v11 = vrot.slane %v2186_v39, %v4427_v29 }
 0x36c   :  { %v2115_v54 = vmax.f32 %v2107_v43, 0.0  ;;  %v2114_v44 = vmax.f32 %v2106_v51, 0.0  ;;  %v2117_v57 = vmax.f32 %v2109_v23, 0.0  ;;  %v2116_v58 = vmax.f32 %v2108_v53, 0.0  ;;  %v2612_v41 = vld [vmem:[%s4727_s8] sm:$0x3] }
 0x36d   :  { %v2604_v14 = vld [vmem:[%s4728_s7] sm:$0xff]  ;;  %v2605_v45 = vld [vmem:[%s4728_s7 + $0x8] sm:$0xff]  ;;  %v2617_v46 = vrot.slane %v2612_v41, %v4422_v38  ;;  %v2606_v49 = vld [vmem:[%s4728_s7 + $0x10] sm:$0xff]  ;;  %v2621_v50 = vrot.slane %v2612_v41, %v4427_v29 }
 0x36e   :  { %v2119_v8 = vpack.c.bf16 %v2115_v54, %v2111_v20  ;;  %v2118_v25 = vpack.c.bf16 %v2114_v44, %v2110_v56  ;;  %v4596_v61 = vpack.c.bf16 %v2116_v58, %v2112_v27  ;;  %v2121_v62 = vpack.c.bf16 %v2117_v57, %v2113_v59  ;;  %v2607_v23 = vld [vmem:[%s4728_s7 + $0x18] sm:$0xff] }
 0x370   :  { %2550 = vmatprep.mubr.bf16.mxu0 %v2119_v8 }
 0x371   :  { %2551 = vmatmul.mubr.bf16.vlgmr.msra.gmra.mrb[4].mxu0 %v2118_v25 }
 0x372   :  { %2562 = vmatpush1.bf16.msra.mxu0 %v3468_v16  ;;  %2593 = vmatprep.mubr.bf16.mxu0 %v2121_v62 }
 0x373   :  { %2563 = vmatprep.subr.bf16.mxu0 %v3473_v60 }
 0x376   :  { %2564 = vmatpush1.bf16.msra.mxu0 %v3471_v63 }
 0x377   :  { %2565 = vmatprep.subr.bf16.mxu0 %v3476_v0 }
 0x37a   :  { %2566 = vmatpush1.bf16.msra.mxu0 %v3474_v1 }
 0x37b   :  { %2567 = vmatprep.subr.bf16.mxu0 %v3479_v2 }
 0x37e   :  { %2568 = vmatpush1.bf16.msra.mxu0 %v3477_v3 }
 0x37f   :  { %2569 = vmatprep.subr.bf16.mxu0 %v3482_v4 }
 0x382   :  { %2570 = vmatpush1.bf16.msra.mxu0 %v3480_v5 }
 0x383   :  { %2571 = vmatprep.subr.bf16.mxu0 %v3485_v6 }
 0x386   :  { %2572 = vmatpush1.bf16.msra.mxu0 %v3483_v7 }
 0x387   :  { %2573 = vmatprep.subr.bf16.mxu0 %v3488_v13 }
 0x38a   :  { %2574 = vmatpush1.bf16.msra.mxu0 %v3486_v15 }
 0x38b   :  { %2575 = vmatprep.subr.bf16.mxu0 %v3491_v17 }
 0x38e   :  { %2576 = vmatpush1.bf16.msra.mxu0 %v3489_v18 }
 0x38f   :  { %2577 = vmatprep.subr.bf16.mxu0 %v3494_v19 }
 0x392   :  { %2578 = vmatpush1.bf16.msra.mxu0 %v3492_v26 }
 0x393   :  { %2579 = vmatprep.subr.bf16.mxu0 %v3497_v21 }
 0x396   :  { %2580 = vmatpush1.bf16.msra.mxu0 %v3495_v22 }
 0x397   :  { %2581 = vmatprep.subr.bf16.mxu0 %v3500_v9 }
 0x39a   :  { %2582 = vmatpush1.bf16.msra.mxu0 %v3498_v28 }
 0x39b   :  { %2583 = vmatprep.subr.bf16.mxu0 %v3503_v55 }
 0x39e   :  { %2584 = vmatpush1.bf16.msra.mxu0 %v3501_v30 }
 0x39f   :  { %2585 = vmatprep.subr.bf16.mxu0 %v3506_v31 }
 0x3a2   :  { %2586 = vmatpush1.bf16.msra.mxu0 %v3504_v32 }
 0x3a3   :  { %2587 = vmatprep.subr.bf16.mxu0 %v3509_v33 }
 0x3a6   :  { %2588 = vmatpush1.bf16.msra.mxu0 %v3507_v34 }
 0x3a7   :  { %2589 = vmatprep.subr.bf16.mxu0 %v3512_v35 }
 0x3aa   :  { %2590 = vmatpush1.bf16.msra.mxu0 %v3510_v24 }
 0x3ab   :  { %2591 = vmatprep.subr.bf16.mxu0 %v3515_v36 }
 0x3ae   :  { %2592 = vmatpush1.bf16.msra.mxu0 %v3513_v37 }
 0x3b1   :  { %2594 = vmatmul.mubr.bf16.vlgmr.msra.gmra.mrb[4].mxu0 %v4596_v61 }
 0x484   :  { %v2595_v10 = vpop.f32.mrb[4].mxu0 }
 0x485   :  { %v3008_v12 = vadd.f32 %v2595_v10, %v2191_v40  ;;  %v2597_v42 = vpop.f32.mrb[5].mxu0 }
 0x486   :  { %v3009_v47 = vadd.f32 %v2597_v42, %v2195_v11  ;;  %v2599_v48 = vpop.f32.mrb[6].mxu0 }
 0x487   :  { %v2608_v43 = vadd.f32 %v3008_v12, %v2604_v14  ;;  %v3010_v51 = vadd.f32 %v2599_v48, %v2191_v40  ;;  %v2601_v52 = vpop.f32.mrb[7].mxu0 }
 0x488   :  { %v2609_v53 = vadd.f32 %v3009_v47, %v2605_v45  ;;  %v3011_v20 = vadd.f32 %v2601_v52, %v2195_v11 }
 0x489   :  { %v2610_v54 = vadd.f32 %v3010_v51, %v2606_v49  ;;  %v2624_v56 = vadd.f32 %v2617_v46, %v2608_v43 }
 0x48a   :  { %v2611_v38 = vadd.f32 %v3011_v20, %v2607_v23  ;;  %v2625_v44 = vadd.f32 %v2621_v50, %v2609_v53 }
 0x48b   :  { %v2626_v57 = vadd.f32 %v2617_v46, %v2610_v54 }
 0x48c   :  { %v2628_v27 = vmax.f32 %v2624_v56, %v2625_v44  ;;  %v2627_v58 = vadd.f32 %v2621_v50, %v2611_v38 }
 0x48e   :  { %2629 = vmax.xlane.f32.xlu0 %v2628_v27  ;;  %v2631_v8 = vmax.f32 %v2626_v57, %v2627_v58 }
 0x490   :  { %2632 = vmax.xlane.f32.xlu1 %v2631_v8 }
 0x51b   :  { %v2630_v29 = vpop.xlane.xlu0 %2629 }
 0x51c   :  { %v2634_v16 = vsub.f32 %v2624_v56, %v2630_v29  ;;  %v2635_v25 = vsub.f32 %v2625_v44, %v2630_v29 }
 0x51d   :  { %v2633_v59 = vpop.xlane.xlu1 %2632 }
 0x51e   :  { %v2638_v60 = vmul.f32 1.442695, %v2634_v16  ;;  %v2640_v61 = vmul.f32 1.442695, %v2635_v25  ;;  %v2636_v62 = vsub.f32 %v2626_v57, %v2633_v59  ;;  %v2637_v63 = vsub.f32 %v2627_v58, %v2633_v59 }
 0x520   :  { %3524 = vpow2.f32 %v2638_v60  ;;  %v2642_v0 = vmul.f32 1.442695, %v2636_v62  ;;  %v2644_v1 = vmul.f32 1.442695, %v2637_v63 }
 0x521   :  { %3526 = vpow2.f32 %v2640_v61 }
 0x522   :  { %3528 = vpow2.f32 %v2642_v0 }
 0x523   :  { %3530 = vpow2.f32 %v2644_v1 }
 0x52a   :  { %v3525_v2 = vpop.eup %3524 }
 0x52b   :  { %v3527_v3 = vpop.eup %3526 }
 0x52c   :  { %v3529_v4 = vpop.eup %3528  ;;  %v2646_v5 = vadd.f32 %v3527_v3, %v3525_v2 }
 0x52d   :  { %v3531_v6 = vpop.eup %3530 }
 0x52e   :  { %2647 = vadd.xlane.f32.xlu0 %v2646_v5  ;;  %v2649_v7 = vadd.f32 %v3531_v6, %v3529_v4 }
 0x530   :  { %2650 = vadd.xlane.f32.xlu1 %v2649_v7 }
 0x5bb   :  { %v2648_v13 = vpop.xlane.xlu0 %2647 }
 0x5bc   :  { %3532 = vlog2.f32 %v2648_v13 }
 0x5bd   :  { %v2651_v15 = vpop.xlane.xlu1 %2650 }
 0x5be   :  { %3534 = vlog2.f32 %v2651_v15 }
 0x5c6   :  { %v3533_v17 = vpop.eup %3532 }
 0x5c7   :  { %v2653_v18 = vmul.f32 0.6931472, %v3533_v17 }
 0x5c8   :  { %v3535_v19 = vpop.eup %3534 }
 0x5c9   :  { %v2656_v26 = vsub.f32 %v2634_v16, %v2653_v18  ;;  %v2657_v21 = vsub.f32 %v2635_v25, %v2653_v18  ;;  %v2655_v22 = vmul.f32 0.6931472, %v3535_v19 }
 0x5cb   :  { %2660 = vst [vmem:[%s4729_s9] sm:$0xff] %v2656_v26  ;;  %2661 = vst [vmem:[%s4729_s9 + $0x8] sm:$0xff] %v2657_v21  ;;  %v2658_v9 = vsub.f32 %v2636_v62, %v2655_v22  ;;  %v2659_v28 = vsub.f32 %v2637_v63, %v2655_v22 }
 0x5cd   :  { %2662 = vst [vmem:[%s4729_s9 + $0x10] sm:$0xff] %v2658_v9  ;;  %2663 = vst [vmem:[%s4729_s9 + $0x18] sm:$0xff] %v2659_v28 }

// kernel: poly_phoneme_classifier_forward.3
= control target key start
LH: loop header
LB: loop body
LE: loop exit
PB: predicated region body
PF: predicated region fallthrough
CT: control target
= control target key end

     0   :  { %17 = vsyncpa [#allocation3], 0  ;;  %s8722_s0 = inlined_call_operand.vmem [shape: bf16[16,1408], index: 0, kind: input, shape index: {}]   ;;  %s8723_s1 = inlined_call_operand.hbm [shape: bf16[1408,512], index: 1, kind: input, shape index: {}]   ;;  %s8724_s2 = inlined_call_operand.hbm [shape: f32[1,512], index: 2, kind: input, shape index: {}]   ;;  %s8725_s3 = inlined_call_operand.hbm [shape: f32[1,512], index: 3, kind: input, shape index: {}]   ;;  %s8726_s4 = inlined_call_operand.hbm [shape: f32[1,512], index: 4, kind: input, shape index: {}]   ;;  %s8727_s5 = inlined_call_operand.hbm [shape: bf16[512,1024], index: 5, kind: input, shape index: {}]   ;;  %s8728_s6 = inlined_call_operand.hbm [shape: f32[1,1024], index: 6, kind: input, shape index: {}]   ;;  %s8729_s7 = inlined_call_operand.hbm [shape: bf16[1024,128], index: 7, kind: input, shape index: {}]   ;;  %s8730_s8 = inlined_call_operand.hbm [shape: bf16[1024,128], index: 8, kind: input, shape index: {}]   ;;  %s8731_s9 = inlined_call_operand.vmem [shape: bf16[16,1024], index: 9, kind: output, shape index: {0}]   ;;  %s8732_s10 = inlined_call_operand.vmem [shape: bf16[16,128], index: 10, kind: output, shape index: {1}]   ;;  %s8733_s11 = inlined_call_operand.vmem [shape: bf16[16,128], index: 11, kind: output, shape index: {2}]  }
   0x1   :  { %18 = vsyncpa [#allocation5], 0 }
   0x2   :  { %19 = vsyncpa [#allocation8], 0 }
   0x3   :  { %20 = vsyncpa [#allocation11], 0 }
   0x4   :  { %21 = vsyncpa [#allocation14], 0  ;;  %s8280_s17 = smov [#allocation4]   ;;  %s8281_s19 = smov [#allocation7]  }
   0x5   :  { %s42_s18 = sshll.u32 %s8280_s17, 4  ;;  %s62_s20 = sshll.u32 %s8281_s19, 4  ;;  %s43_s18 = int_to_ptr.vmem [resolvable:$true] %s42_s18  ;;  %s63_s20 = int_to_ptr.vmem [resolvable:$true] %s62_s20 }
   0x6   :  { %s8094_s23 = scalar_lea.hbm %s8724_s2, 64 }
   0x7   :  { %p8095_p0 = scmp.ne.s32.totalorder %s8724_s2, %s8094_s23  ;;  %p8098_p1 = scmp.lt.u32.totalorder %s8094_s23, %s8724_s2 }
   0x9   :  { %p8100_p2 = pnand %p8098_p1, %p8095_p0 }
   0xb   :  { %8103 = shalt.err (!%p8100_p2)
}
   0xc   :  { %s8104_s28 = scalar_lea.vmem %s43_s18, 64  ;;  %p8109_p4 = scmp.lt.s32.totalorder %s43_s18, %s43_s18 }
   0xd   :  { %p8105_p3 = scmp.ne.s32.totalorder %s43_s18, %s8104_s28  ;;  %p8110_p5 = scmp.lt.s32.totalorder %s8104_s28, %s8104_s28 }
   0xf   :  { %p8111_p6 = por %p8110_p5, %p8109_p4 }
  0x11   :  { %p8112_p7 = pnand %p8111_p6, %p8105_p3 }
  0x13   :  { %8115 = shalt.err (!%p8112_p7)
}
  0x14   :  { %45 = dma.hbm_to_vmem [thread:$0]  %s8724_s2, 64, %s43_s18, [#allocation5]  }
  0x15   :  { %s8116_s14 = scalar_lea.hbm %s8726_s4, 64 }
  0x16   :  { %p8117_p8 = scmp.ne.s32.totalorder %s8726_s4, %s8116_s14  ;;  %p8120_p9 = scmp.lt.u32.totalorder %s8116_s14, %s8726_s4 }
  0x18   :  { %p8122_p10 = pnand %p8120_p9, %p8117_p8 }
  0x1a   :  { %8125 = shalt.err (!%p8122_p10)
}
  0x1b   :  { %s8126_s21 = scalar_lea.vmem %s63_s20, 64  ;;  %p8131_p12 = scmp.lt.s32.totalorder %s63_s20, %s63_s20 }
  0x1c   :  { %p8127_p11 = scmp.ne.s32.totalorder %s63_s20, %s8126_s21  ;;  %p8132_p13 = scmp.lt.s32.totalorder %s8126_s21, %s8126_s21 }
  0x1e   :  { %p8133_p0 = por %p8132_p13, %p8131_p12 }
  0x20   :  { %p8134_p1 = pnand %p8133_p0, %p8127_p11 }
  0x22   :  { %8137 = shalt.err (!%p8134_p1)
}
  0x23   :  { %65 = dma.hbm_to_vmem [thread:$0]  %s8726_s4, 64, %s63_s20, [#allocation8]  }
  0x24   :  { %s8282_s22 = smov [#allocation10]   ;;  %s8283_s24 = smov [#allocation2]  }
  0x25   :  { %s84_s23 = sshll.u32 %s8282_s22, 4  ;;  %s29_s25 = sshll.u32 %s8283_s24, 4  ;;  %s85_s23 = int_to_ptr.vmem [resolvable:$true] %s84_s23  ;;  %s8379_s25 = int_to_ptr.vmem [resolvable:$true] %s29_s25 }
  0x26   :  { %s8138_s28 = scalar_lea.hbm %s8728_s6, 128 }
  0x27   :  { %p8139_p2 = scmp.ne.s32.totalorder %s8728_s6, %s8138_s28  ;;  %p8142_p3 = scmp.lt.u32.totalorder %s8138_s28, %s8728_s6 }
  0x29   :  { %p8144_p4 = pnand %p8142_p3, %p8139_p2 }
  0x2b   :  { %8147 = shalt.err (!%p8144_p4)
}
  0x2c   :  { %s8148_s4 = scalar_lea.vmem %s85_s23, 128  ;;  %p8153_p6 = scmp.lt.s32.totalorder %s85_s23, %s85_s23 }
  0x2d   :  { %p8149_p5 = scmp.ne.s32.totalorder %s85_s23, %s8148_s4  ;;  %p8154_p7 = scmp.lt.s32.totalorder %s8148_s4, %s8148_s4 }
  0x2f   :  { %p8155_p8 = por %p8154_p7, %p8153_p6 }
  0x31   :  { %p8156_p9 = pnand %p8155_p8, %p8149_p5 }
  0x33   :  { %8159 = shalt.err (!%p8156_p9)
}
  0x34   :  { %87 = dma.hbm_to_vmem [thread:$0]  %s8728_s6, 128, %s85_s23, [#allocation11]  }
  0x35   :  { %s8160_s17 = scalar_lea.hbm %s8723_s1, 45056 }
  0x36   :  { %p8161_p10 = scmp.ne.s32.totalorder %s8723_s1, %s8160_s17  ;;  %p8164_p11 = scmp.lt.u32.totalorder %s8160_s17, %s8723_s1 }
  0x38   :  { %p8166_p12 = pnand %p8164_p11, %p8161_p10 }
  0x3a   :  { %8169 = shalt.err (!%p8166_p12)
}
  0x3b   :  { %s8170_s22 = scalar_lea.vmem %s8379_s25, 45056  ;;  %p8175_p0 = scmp.lt.s32.totalorder %s8379_s25, %s8379_s25 }
  0x3c   :  { %p8171_p13 = scmp.ne.s32.totalorder %s8379_s25, %s8170_s22  ;;  %p8176_p1 = scmp.lt.s32.totalorder %s8170_s22, %s8170_s22 }
  0x3e   :  { %p8177_p2 = por %p8176_p1, %p8175_p0 }
  0x40   :  { %p8178_p3 = pnand %p8177_p2, %p8171_p13 }
  0x42   :  { %8181 = shalt.err (!%p8178_p3)
}
  0x43   :  { %s8284_s6 = smov 256   ;;  %s8285_s23 = smov 16  }
  0x44   :  { %35 = dma.hbm_to_vmem [thread:$0]  %s8723_s1, 45056, %s8379_s25, [#allocation3], %s8284_s6, %s8284_s6, %s8285_s23  }
  0x45   :  { %s8286_s27 = smov [#allocation6]   ;;  %s8287_s29 = smov [#allocation9]  }
  0x46   :  { %s52_s28 = sshll.u32 %s8286_s27, 4  ;;  %s71_s30 = sshll.u32 %s8287_s29, 4  ;;  %s53_s28 = int_to_ptr.vmem [resolvable:$true] %s52_s28  ;;  %s8410_s30 = int_to_ptr.vmem [resolvable:$true] %s71_s30 }
  0x47   :  { %s8182_s4 = scalar_lea.hbm %s8725_s3, 64 }
  0x48   :  { %p8183_p4 = scmp.ne.s32.totalorder %s8725_s3, %s8182_s4  ;;  %p8186_p5 = scmp.lt.u32.totalorder %s8182_s4, %s8725_s3 }
  0x4a   :  { %p8188_p6 = pnand %p8186_p5, %p8183_p4 }
  0x4c   :  { %8191 = shalt.err (!%p8188_p6)
}
  0x4d   :  { %s8192_s1 = scalar_lea.vmem %s53_s28, 64  ;;  %p8197_p8 = scmp.lt.s32.totalorder %s53_s28, %s53_s28 }
  0x4e   :  { %p8193_p7 = scmp.ne.s32.totalorder %s53_s28, %s8192_s1  ;;  %p8198_p9 = scmp.lt.s32.totalorder %s8192_s1, %s8192_s1 }
  0x50   :  { %p8199_p10 = por %p8198_p9, %p8197_p8 }
  0x52   :  { %p8200_p11 = pnand %p8199_p10, %p8193_p7 }
  0x54   :  { %8203 = shalt.err (!%p8200_p11)
}
  0x55   :  { %55 = dma.hbm_to_vmem [thread:$0]  %s8725_s3, 64, %s53_s28, [#allocation5]  }
  0x56   :  { %s8204_s2 = scalar_lea.hbm %s8727_s5, 32768 }
  0x57   :  { %p8205_p12 = scmp.ne.s32.totalorder %s8727_s5, %s8204_s2  ;;  %p8208_p13 = scmp.lt.u32.totalorder %s8204_s2, %s8727_s5 }
  0x59   :  { %p8210_p0 = pnand %p8208_p13, %p8205_p12 }
  0x5b   :  { %8213 = shalt.err (!%p8210_p0)
}
  0x5c   :  { %s8214_s24 = scalar_lea.vmem %s8410_s30, 32768  ;;  %p8219_p2 = scmp.lt.s32.totalorder %s8410_s30, %s8410_s30 }
  0x5d   :  { %p8215_p1 = scmp.ne.s32.totalorder %s8410_s30, %s8214_s24  ;;  %p8220_p3 = scmp.lt.s32.totalorder %s8214_s24, %s8214_s24 }
  0x5f   :  { %p8221_p4 = por %p8220_p3, %p8219_p2 }
  0x61   :  { %p8222_p5 = pnand %p8221_p4, %p8215_p1 }
  0x63   :  { %8225 = shalt.err (!%p8222_p5)
}
  0x64   :  { %s8288_s3 = smov 512   ;;  %s8289_s26 = smov 32  }
  0x65   :  { %77 = dma.hbm_to_vmem [thread:$0]  %s8727_s5, 32768, %s8410_s30, [#allocation8], %s8288_s3, %s8288_s3, %s8289_s26  }
  0x66   :  { %s8290_s29 = smov [#allocation12]   ;;  %s8226_s20 = scalar_lea.hbm %s8729_s7, 8192 }
  0x67   :  { %s93_s12 = sshll.u32 %s8290_s29, 4  ;;  %p8227_p6 = scmp.ne.s32.totalorder %s8729_s7, %s8226_s20  ;;  %s94_s12 = int_to_ptr.vmem [resolvable:$true] %s93_s12 }
  0x68   :  { %p8230_p7 = scmp.lt.u32.totalorder %s8226_s20, %s8729_s7 }
  0x6a   :  { %p8232_p8 = pnand %p8230_p7, %p8227_p6 }
  0x6c   :  { %8235 = shalt.err (!%p8232_p8)
}
  0x6d   :  { %s8236_s25 = scalar_lea.vmem %s94_s12, 8192  ;;  %p8241_p10 = scmp.lt.s32.totalorder %s94_s12, %s94_s12 }
  0x6e   :  { %p8237_p9 = scmp.ne.s32.totalorder %s94_s12, %s8236_s25  ;;  %p8242_p11 = scmp.lt.s32.totalorder %s8236_s25, %s8236_s25 }
  0x70   :  { %p8243_p12 = por %p8242_p11, %p8241_p10 }
  0x72   :  { %p8244_p13 = pnand %p8243_p12, %p8237_p9 }
  0x74   :  { %8247 = shalt.err (!%p8244_p13)
}
  0x75   :  { %s8291_s5 = smov 64   ;;  %s8292_s30 = smov 4  }
  0x76   :  { %99 = dma.hbm_to_vmem [thread:$0]  %s8729_s7, 8192, %s94_s12, [#allocation11], %s8291_s5, %s8291_s5, %s8292_s30  }
  0x77   :  { %s8293_s21 = smov [#allocation13]   ;;  %s8248_s6 = scalar_lea.hbm %s8730_s8, 8192 }
  0x78   :  { %s105_s2 = sshll.u32 %s8293_s21, 4  ;;  %p8249_p0 = scmp.ne.s32.totalorder %s8730_s8, %s8248_s6  ;;  %s106_s2 = int_to_ptr.vmem [resolvable:$true] %s105_s2 }
  0x79   :  { %p8252_p1 = scmp.lt.u32.totalorder %s8248_s6, %s8730_s8 }
  0x7b   :  { %p8254_p2 = pnand %p8252_p1, %p8249_p0 }
  0x7d   :  { %8257 = shalt.err (!%p8254_p2)
}
  0x7e   :  { %s8258_s27 = scalar_lea.vmem %s106_s2, 8192  ;;  %p8263_p4 = scmp.lt.s32.totalorder %s106_s2, %s106_s2 }
  0x7f   :  { %p8259_p3 = scmp.ne.s32.totalorder %s106_s2, %s8258_s27  ;;  %p8264_p5 = scmp.lt.s32.totalorder %s8258_s27, %s8258_s27 }
  0x81   :  { %p8265_p6 = por %p8264_p5, %p8263_p4 }
  0x83   :  { %p8266_p7 = pnand %p8265_p6, %p8259_p3 }
  0x85   :  { %8269 = shalt.err (!%p8266_p7)
}
  0x86   :  { %111 = dma.hbm_to_vmem [thread:$0]  %s8730_s8, 8192, %s106_s2, [#allocation14], %s8291_s5, %s8291_s5, %s8292_s30  }
  0x87   :  { %8270 = dma.done.wait [#allocation3], 45056  }
  0x88   :  { %8271 = vsyncadd [#allocation3], 4294922240 }
  0x89   :  { %8272 = dma.done.wait [#allocation5], 128  }
  0x8a   :  { %8273 = vsyncadd [#allocation5], 4294967168 }
  0x8b   :  { %8274 = dma.done.wait [#allocation8], 32832  }
  0x8c   :  { %8275 = vsyncadd [#allocation8], 4294934464 }
  0x8d   :  { %8276 = dma.done.wait [#allocation11], 8320  }
  0x8e   :  { %8277 = vsyncadd [#allocation11], 4294958976 }
  0x8f   :  { %8278 = dma.done.wait [#allocation14], 8192  }
  0x90   :  { %8279 = vsyncadd [#allocation14], 4294959104  ;;  %v7414_v0 = vld [vmem:[#allocation2 + $0x4] ss:$16 sps:$4 sm:$0xff]   ;;  %v7416_v1 = vld [vmem:[#allocation2 + $0xc] ss:$16 sps:$4 sm:$0xff]  }
  0x91   :  { %2339 = vmatprep.subr.bf16.mxu0 %v7414_v0  ;;  %v7418_v2 = vld [vmem:[#allocation2] ss:$16 sps:$4 sm:$0xff]   ;;  %v7419_v3 = vld [vmem:[#allocation2 + $0x8] ss:$16 sps:$4 sm:$0xff]   ;;  %2597 = vmatprep.subr.bf16.mxu1 %v7416_v1  ;;  %v7420_v4 = vld [vmem:[#allocation2 + $0x24] ss:$16 sps:$4 sm:$0xff]  }
  0x92   :  { %2340 = vmatpush1.bf16.msra.mxu0 %v7418_v2  ;;  %2598 = vmatpush1.bf16.msra.mxu1 %v7419_v3  ;;  %v7422_v5 = vld [vmem:[#allocation2 + $0x2c] ss:$16 sps:$4 sm:$0xff]   ;;  %v7424_v6 = vld [vmem:[#allocation2 + $0x20] ss:$16 sps:$4 sm:$0xff]   ;;  %v7425_v7 = vld [vmem:[#allocation2 + $0x28] ss:$16 sps:$4 sm:$0xff]  }
  0x93   :  { %2341 = vmatprep.subr.bf16.mxu0 %v7420_v4  ;;  %2599 = vmatprep.subr.bf16.mxu1 %v7422_v5  ;;  %v7426_v8 = vld [vmem:[#allocation2 + $0x44] ss:$16 sps:$4 sm:$0xff]   ;;  %v7428_v9 = vld [vmem:[#allocation2 + $0x4c] ss:$16 sps:$4 sm:$0xff]   ;;  %v7430_v10 = vld [vmem:[#allocation2 + $0x40] ss:$16 sps:$4 sm:$0xff]  }
  0x94   :  { %v7431_v11 = vld [vmem:[#allocation2 + $0x48] ss:$16 sps:$4 sm:$0xff]   ;;  %v7432_v12 = vld [vmem:[#allocation2 + $0x64] ss:$16 sps:$4 sm:$0xff]   ;;  %v7434_v13 = vld [vmem:[#allocation2 + $0x6c] ss:$16 sps:$4 sm:$0xff]  }
  0x95   :  { %v7436_v14 = vld [vmem:[#allocation2 + $0x60] ss:$16 sps:$4 sm:$0xff]   ;;  %v7437_v15 = vld [vmem:[#allocation2 + $0x68] ss:$16 sps:$4 sm:$0xff]   ;;  %v7438_v16 = vld [vmem:[#allocation2 + $0x84] ss:$16 sps:$4 sm:$0xff]  }
  0x96   :  { %2342 = vmatpush1.bf16.msra.mxu0 %v7424_v6  ;;  %2600 = vmatpush1.bf16.msra.mxu1 %v7425_v7  ;;  %v7440_v17 = vld [vmem:[#allocation2 + $0x8c] ss:$16 sps:$4 sm:$0xff]   ;;  %v7442_v18 = vld [vmem:[#allocation2 + $0x80] ss:$16 sps:$4 sm:$0xff]   ;;  %v7443_v19 = vld [vmem:[#allocation2 + $0x88] ss:$16 sps:$4 sm:$0xff]  }
  0x97   :  { %2343 = vmatprep.subr.bf16.mxu0 %v7426_v8  ;;  %2601 = vmatprep.subr.bf16.mxu1 %v7428_v9  ;;  %v7444_v20 = vld [vmem:[#allocation2 + $0xa4] ss:$16 sps:$4 sm:$0xff]   ;;  %v7446_v21 = vld [vmem:[#allocation2 + $0xac] ss:$16 sps:$4 sm:$0xff]   ;;  %v7448_v22 = vld [vmem:[#allocation2 + $0xa0] ss:$16 sps:$4 sm:$0xff]  }
  0x98   :  { %v7449_v23 = vld [vmem:[#allocation2 + $0xa8] ss:$16 sps:$4 sm:$0xff]   ;;  %v7450_v24 = vld [vmem:[#allocation2 + $0xc4] ss:$16 sps:$4 sm:$0xff]   ;;  %v7452_v25 = vld [vmem:[#allocation2 + $0xcc] ss:$16 sps:$4 sm:$0xff]  }
  0x99   :  { %v7454_v26 = vld [vmem:[#allocation2 + $0xc0] ss:$16 sps:$4 sm:$0xff]   ;;  %v7455_v27 = vld [vmem:[#allocation2 + $0xc8] ss:$16 sps:$4 sm:$0xff]   ;;  %v7456_v28 = vld [vmem:[#allocation2 + $0xe4] ss:$16 sps:$4 sm:$0xff]  }
  0x9a   :  { %2344 = vmatpush1.bf16.msra.mxu0 %v7430_v10  ;;  %2602 = vmatpush1.bf16.msra.mxu1 %v7431_v11  ;;  %v7458_v29 = vld [vmem:[#allocation2 + $0xec] ss:$16 sps:$4 sm:$0xff]   ;;  %v7460_v30 = vld [vmem:[#allocation2 + $0xe0] ss:$16 sps:$4 sm:$0xff]   ;;  %v7461_v31 = vld [vmem:[#allocation2 + $0xe8] ss:$16 sps:$4 sm:$0xff]  }
  0x9b   :  { %2345 = vmatprep.subr.bf16.mxu0 %v7432_v12  ;;  %2603 = vmatprep.subr.bf16.mxu1 %v7434_v13  ;;  %v7462_v32 = vld [vmem:[#allocation2 + $0x104] ss:$16 sps:$4 sm:$0xff]   ;;  %v7464_v33 = vld [vmem:[#allocation2 + $0x10c] ss:$16 sps:$4 sm:$0xff]   ;;  %v7466_v34 = vld [vmem:[#allocation2 + $0x100] ss:$16 sps:$4 sm:$0xff]  }
  0x9c   :  { %v7467_v35 = vld [vmem:[#allocation2 + $0x108] ss:$16 sps:$4 sm:$0xff]   ;;  %v7468_v36 = vld [vmem:[#allocation2 + $0x124] ss:$16 sps:$4 sm:$0xff]   ;;  %v7470_v37 = vld [vmem:[#allocation2 + $0x12c] ss:$16 sps:$4 sm:$0xff]  }
  0x9d   :  { %v7472_v38 = vld [vmem:[#allocation2 + $0x120] ss:$16 sps:$4 sm:$0xff]   ;;  %v7473_v39 = vld [vmem:[#allocation2 + $0x128] ss:$16 sps:$4 sm:$0xff]   ;;  %v7474_v40 = vld [vmem:[#allocation2 + $0x144] ss:$16 sps:$4 sm:$0xff]  }
  0x9e   :  { %2346 = vmatpush1.bf16.msra.mxu0 %v7436_v14  ;;  %2604 = vmatpush1.bf16.msra.mxu1 %v7437_v15  ;;  %v7476_v41 = vld [vmem:[#allocation2 + $0x14c] ss:$16 sps:$4 sm:$0xff]   ;;  %v7478_v42 = vld [vmem:[#allocation2 + $0x140] ss:$16 sps:$4 sm:$0xff]   ;;  %v7479_v43 = vld [vmem:[#allocation2 + $0x148] ss:$16 sps:$4 sm:$0xff]  }
  0x9f   :  { %2347 = vmatprep.subr.bf16.mxu0 %v7438_v16  ;;  %2605 = vmatprep.subr.bf16.mxu1 %v7440_v17  ;;  %v7480_v44 = vld [vmem:[#allocation2 + $0x164] ss:$16 sps:$4 sm:$0xff]   ;;  %v7482_v45 = vld [vmem:[#allocation2 + $0x16c] ss:$16 sps:$4 sm:$0xff]   ;;  %v7484_v46 = vld [vmem:[#allocation2 + $0x160] ss:$16 sps:$4 sm:$0xff]  }
  0xa0   :  { %v7485_v47 = vld [vmem:[#allocation2 + $0x168] ss:$16 sps:$4 sm:$0xff]   ;;  %v7512_v48 = vld [vmem:[%s8722_s0 + $0x4] ss:$44 sps:$4 sm:$0xff]   ;;  %v7488_v50 = vld [vmem:[#allocation2 + $0x18c] ss:$16 sps:$4 sm:$0xff]  }
  0xa1   :  { %v7486_v49 = vld [vmem:[#allocation2 + $0x184] ss:$16 sps:$4 sm:$0xff]   ;;  %2371 = vmatprep.mubr.bf16.mxu0 %v7512_v48  ;;  %2629 = vmatprep.mubr.bf16.mxu1 %v7512_v48  ;;  %v7490_v51 = vld [vmem:[#allocation2 + $0x180] ss:$16 sps:$4 sm:$0xff]   ;;  %v7491_v52 = vld [vmem:[#allocation2 + $0x188] ss:$16 sps:$4 sm:$0xff]  }
  0xa2   :  { %2348 = vmatpush1.bf16.msra.mxu0 %v7442_v18  ;;  %2606 = vmatpush1.bf16.msra.mxu1 %v7443_v19  ;;  %v7492_v53 = vld [vmem:[#allocation2 + $0x1a4] ss:$16 sps:$4 sm:$0xff]   ;;  %v7494_v54 = vld [vmem:[#allocation2 + $0x1ac] ss:$16 sps:$4 sm:$0xff]   ;;  %v7496_v55 = vld [vmem:[#allocation2 + $0x1a0] ss:$16 sps:$4 sm:$0xff]  }
  0xa3   :  { %2349 = vmatprep.subr.bf16.mxu0 %v7444_v20  ;;  %2607 = vmatprep.subr.bf16.mxu1 %v7446_v21  ;;  %v7497_v56 = vld [vmem:[#allocation2 + $0x1a8] ss:$16 sps:$4 sm:$0xff]   ;;  %v7498_v57 = vld [vmem:[#allocation2 + $0x1c4] ss:$16 sps:$4 sm:$0xff]   ;;  %v7500_v58 = vld [vmem:[#allocation2 + $0x1cc] ss:$16 sps:$4 sm:$0xff]  }
  0xa4   :  { %v7502_v59 = vld [vmem:[#allocation2 + $0x1c0] ss:$16 sps:$4 sm:$0xff]   ;;  %v7503_v60 = vld [vmem:[#allocation2 + $0x1c8] ss:$16 sps:$4 sm:$0xff]   ;;  %v7504_v61 = vld [vmem:[#allocation2 + $0x1e4] ss:$16 sps:$4 sm:$0xff]  }
  0xa5   :  { %v7506_v62 = vld [vmem:[#allocation2 + $0x1ec] ss:$16 sps:$4 sm:$0xff]   ;;  %v7508_v63 = vld [vmem:[#allocation2 + $0x1e0] ss:$16 sps:$4 sm:$0xff]   ;;  %v7509_v0 = vld [vmem:[#allocation2 + $0x1e8] ss:$16 sps:$4 sm:$0xff]  }
  0xa6   :  { %2350 = vmatpush1.bf16.msra.mxu0 %v7448_v22  ;;  %2608 = vmatpush1.bf16.msra.mxu1 %v7449_v23  ;;  %v7515_v1 = vld [vmem:[#allocation2 + $0x204] ss:$16 sps:$4 sm:$0xff]   ;;  %v7518_v2 = vld [vmem:[#allocation2 + $0x20c] ss:$16 sps:$4 sm:$0xff]   ;;  %v7513_v4 = vld [vmem:[#allocation2 + $0x200] ss:$16 sps:$4 sm:$0xff]  }
  0xa7   :  { %2351 = vmatprep.subr.bf16.mxu0 %v7450_v24  ;;  %2609 = vmatprep.subr.bf16.mxu1 %v7452_v25  ;;  %v7510_v3 = vld [vmem:[%s8722_s0] ss:$44 sps:$4 sm:$0xff]   ;;  %v7516_v5 = vld [vmem:[#allocation2 + $0x208] ss:$16 sps:$4 sm:$0xff]   ;;  %v7521_v6 = vld [vmem:[#allocation2 + $0x224] ss:$16 sps:$4 sm:$0xff]  }
  0xa8   :  { %v7524_v7 = vld [vmem:[#allocation2 + $0x22c] ss:$16 sps:$4 sm:$0xff]   ;;  %v7519_v8 = vld [vmem:[#allocation2 + $0x220] ss:$16 sps:$4 sm:$0xff]   ;;  %v7522_v9 = vld [vmem:[#allocation2 + $0x228] ss:$16 sps:$4 sm:$0xff]  }
  0xa9   :  { %v7527_v10 = vld [vmem:[#allocation2 + $0x244] ss:$16 sps:$4 sm:$0xff]   ;;  %v7530_v11 = vld [vmem:[#allocation2 + $0x24c] ss:$16 sps:$4 sm:$0xff]   ;;  %v7525_v12 = vld [vmem:[#allocation2 + $0x240] ss:$16 sps:$4 sm:$0xff]  }
  0xaa   :  { %2352 = vmatpush1.bf16.msra.mxu0 %v7454_v26  ;;  %2610 = vmatpush1.bf16.msra.mxu1 %v7455_v27  ;;  %v7528_v13 = vld [vmem:[#allocation2 + $0x248] ss:$16 sps:$4 sm:$0xff]   ;;  %v7533_v14 = vld [vmem:[#allocation2 + $0x264] ss:$16 sps:$4 sm:$0xff]   ;;  %v7536_v15 = vld [vmem:[#allocation2 + $0x26c] ss:$16 sps:$4 sm:$0xff]  }
  0xab   :  { %2353 = vmatprep.subr.bf16.mxu0 %v7456_v28  ;;  %2611 = vmatprep.subr.bf16.mxu1 %v7458_v29  ;;  %v7531_v16 = vld [vmem:[#allocation2 + $0x260] ss:$16 sps:$4 sm:$0xff]   ;;  %v7534_v17 = vld [vmem:[#allocation2 + $0x268] ss:$16 sps:$4 sm:$0xff]   ;;  %v7539_v18 = vld [vmem:[#allocation2 + $0x284] ss:$16 sps:$4 sm:$0xff]  }
  0xac   :  { %v7542_v19 = vld [vmem:[#allocation2 + $0x28c] ss:$16 sps:$4 sm:$0xff]   ;;  %v7537_v20 = vld [vmem:[#allocation2 + $0x280] ss:$16 sps:$4 sm:$0xff]   ;;  %v7540_v21 = vld [vmem:[#allocation2 + $0x288] ss:$16 sps:$4 sm:$0xff]  }
  0xad   :  { %v7545_v22 = vld [vmem:[#allocation2 + $0x2a4] ss:$16 sps:$4 sm:$0xff]   ;;  %v7548_v23 = vld [vmem:[#allocation2 + $0x2ac] ss:$16 sps:$4 sm:$0xff]   ;;  %v7543_v24 = vld [vmem:[#allocation2 + $0x2a0] ss:$16 sps:$4 sm:$0xff]  }
  0xae   :  { %2354 = vmatpush1.bf16.msra.mxu0 %v7460_v30  ;;  %2612 = vmatpush1.bf16.msra.mxu1 %v7461_v31  ;;  %v7546_v25 = vld [vmem:[#allocation2 + $0x2a8] ss:$16 sps:$4 sm:$0xff]   ;;  %v7551_v26 = vld [vmem:[#allocation2 + $0x2c4] ss:$16 sps:$4 sm:$0xff]   ;;  %v7554_v27 = vld [vmem:[#allocation2 + $0x2cc] ss:$16 sps:$4 sm:$0xff]  }
  0xaf   :  { %2355 = vmatprep.subr.bf16.mxu0 %v7462_v32  ;;  %2613 = vmatprep.subr.bf16.mxu1 %v7464_v33  ;;  %v7549_v28 = vld [vmem:[#allocation2 + $0x2c0] ss:$16 sps:$4 sm:$0xff]   ;;  %v7552_v29 = vld [vmem:[#allocation2 + $0x2c8] ss:$16 sps:$4 sm:$0xff]   ;;  %v7557_v31 = vld [vmem:[#allocation2 + $0x2e4] ss:$16 sps:$4 sm:$0xff]  }
  0xb0   :  { %v7611_v30 = vld [vmem:[%s8722_s0 + $0xc] ss:$44 sps:$4 sm:$0xff]   ;;  %v7555_v33 = vld [vmem:[#allocation2 + $0x2e0] ss:$16 sps:$4 sm:$0xff]  }
  0xb1   :  { %v7560_v32 = vld [vmem:[#allocation2 + $0x2ec] ss:$16 sps:$4 sm:$0xff]  }
  0xb2   :  { %2356 = vmatpush1.bf16.msra.mxu0 %v7466_v34  ;;  %2614 = vmatpush1.bf16.msra.mxu1 %v7467_v35  ;;  %v7558_v34 = vld [vmem:[#allocation2 + $0x2e8] ss:$16 sps:$4 sm:$0xff]   ;;  %v7563_v35 = vld [vmem:[#allocation2 + $0x304] ss:$16 sps:$4 sm:$0xff]   ;;  %v7584_v48 = vld [vmem:[#allocation2 + $0x36c] ss:$16 sps:$4 sm:$0xff]  }
  0xb3   :  { %2357 = vmatprep.subr.bf16.mxu0 %v7468_v36  ;;  %2615 = vmatprep.subr.bf16.mxu1 %v7470_v37  ;;  %v7566_v36 = vld [vmem:[#allocation2 + $0x30c] ss:$16 sps:$4 sm:$0xff]   ;;  %v7561_v37 = vld [vmem:[#allocation2 + $0x300] ss:$16 sps:$4 sm:$0xff]  }
  0xb6   :  { %2358 = vmatpush1.bf16.msra.mxu0 %v7472_v38  ;;  %2616 = vmatpush1.bf16.msra.mxu1 %v7473_v39  ;;  %v7564_v38 = vld [vmem:[#allocation2 + $0x308] ss:$16 sps:$4 sm:$0xff]   ;;  %v7569_v39 = vld [vmem:[#allocation2 + $0x324] ss:$16 sps:$4 sm:$0xff]  }
  0xb7   :  { %2359 = vmatprep.subr.bf16.mxu0 %v7474_v40  ;;  %2617 = vmatprep.subr.bf16.mxu1 %v7476_v41  ;;  %v7572_v40 = vld [vmem:[#allocation2 + $0x32c] ss:$16 sps:$4 sm:$0xff]   ;;  %v7567_v41 = vld [vmem:[#allocation2 + $0x320] ss:$16 sps:$4 sm:$0xff]  }
  0xba   :  { %2360 = vmatpush1.bf16.msra.mxu0 %v7478_v42  ;;  %2618 = vmatpush1.bf16.msra.mxu1 %v7479_v43  ;;  %v7570_v42 = vld [vmem:[#allocation2 + $0x328] ss:$16 sps:$4 sm:$0xff]   ;;  %v7575_v43 = vld [vmem:[#allocation2 + $0x344] ss:$16 sps:$4 sm:$0xff]  }
  0xbb   :  { %2361 = vmatprep.subr.bf16.mxu0 %v7480_v44  ;;  %2619 = vmatprep.subr.bf16.mxu1 %v7482_v45  ;;  %v7578_v44 = vld [vmem:[#allocation2 + $0x34c] ss:$16 sps:$4 sm:$0xff]   ;;  %v7573_v45 = vld [vmem:[#allocation2 + $0x340] ss:$16 sps:$4 sm:$0xff]  }
  0xbe   :  { %2362 = vmatpush1.bf16.msra.mxu0 %v7484_v46  ;;  %2620 = vmatpush1.bf16.msra.mxu1 %v7485_v47  ;;  %v7576_v46 = vld [vmem:[#allocation2 + $0x348] ss:$16 sps:$4 sm:$0xff]   ;;  %v7581_v47 = vld [vmem:[#allocation2 + $0x364] ss:$16 sps:$4 sm:$0xff]  }
  0xbf   :  { %2363 = vmatprep.subr.bf16.mxu0 %v7486_v49  ;;  %2621 = vmatprep.subr.bf16.mxu1 %v7488_v50  ;;  %v7579_v49 = vld [vmem:[#allocation2 + $0x360] ss:$16 sps:$4 sm:$0xff]   ;;  %v7582_v50 = vld [vmem:[#allocation2 + $0x368] ss:$16 sps:$4 sm:$0xff]  }
  0xc2   :  { %2364 = vmatpush1.bf16.msra.mxu0 %v7490_v51  ;;  %2622 = vmatpush1.bf16.msra.mxu1 %v7491_v52  ;;  %v7587_v51 = vld [vmem:[#allocation2 + $0x384] ss:$16 sps:$4 sm:$0xff]   ;;  %v7590_v52 = vld [vmem:[#allocation2 + $0x38c] ss:$16 sps:$4 sm:$0xff]  }
  0xc3   :  { %2365 = vmatprep.subr.bf16.mxu0 %v7492_v53  ;;  %2623 = vmatprep.subr.bf16.mxu1 %v7494_v54  ;;  %v7585_v53 = vld [vmem:[#allocation2 + $0x380] ss:$16 sps:$4 sm:$0xff]   ;;  %v7588_v54 = vld [vmem:[#allocation2 + $0x388] ss:$16 sps:$4 sm:$0xff]  }
  0xc6   :  { %2366 = vmatpush1.bf16.msra.mxu0 %v7496_v55  ;;  %2624 = vmatpush1.bf16.msra.mxu1 %v7497_v56  ;;  %v7593_v55 = vld [vmem:[#allocation2 + $0x3a4] ss:$16 sps:$4 sm:$0xff]   ;;  %v7596_v56 = vld [vmem:[#allocation2 + $0x3ac] ss:$16 sps:$4 sm:$0xff]  }
  0xc7   :  { %2367 = vmatprep.subr.bf16.mxu0 %v7498_v57  ;;  %2625 = vmatprep.subr.bf16.mxu1 %v7500_v58  ;;  %v7591_v57 = vld [vmem:[#allocation2 + $0x3a0] ss:$16 sps:$4 sm:$0xff]   ;;  %v7594_v58 = vld [vmem:[#allocation2 + $0x3a8] ss:$16 sps:$4 sm:$0xff]  }
  0xca   :  { %2368 = vmatpush1.bf16.msra.mxu0 %v7502_v59  ;;  %2626 = vmatpush1.bf16.msra.mxu1 %v7503_v60  ;;  %v7599_v59 = vld [vmem:[#allocation2 + $0x3c4] ss:$16 sps:$4 sm:$0xff]   ;;  %v7602_v60 = vld [vmem:[#allocation2 + $0x3cc] ss:$16 sps:$4 sm:$0xff]  }
  0xcb   :  { %2369 = vmatprep.subr.bf16.mxu0 %v7504_v61  ;;  %2627 = vmatprep.subr.bf16.mxu1 %v7506_v62  ;;  %v7597_v61 = vld [vmem:[#allocation2 + $0x3c0] ss:$16 sps:$4 sm:$0xff]   ;;  %v7600_v62 = vld [vmem:[#allocation2 + $0x3c8] ss:$16 sps:$4 sm:$0xff]  }
  0xce   :  { %2370 = vmatpush1.bf16.msra.mxu0 %v7508_v63  ;;  %2628 = vmatpush1.bf16.msra.mxu1 %v7509_v0  ;;  %v7605_v63 = vld [vmem:[#allocation2 + $0x3e4] ss:$16 sps:$4 sm:$0xff]   ;;  %v7608_v0 = vld [vmem:[#allocation2 + $0x3ec] ss:$16 sps:$4 sm:$0xff]  }
  0xcf   :  { %2382 = vmatprep.subr.bf16.mxu0 %v7515_v1  ;;  %2640 = vmatprep.subr.bf16.mxu1 %v7518_v2  ;;  %v7603_v1 = vld [vmem:[#allocation2 + $0x3e0] ss:$16 sps:$4 sm:$0xff]   ;;  %v7606_v2 = vld [vmem:[#allocation2 + $0x3e8] ss:$16 sps:$4 sm:$0xff]  }
  0xd1   :  { %2372 = vmatmul.mubr.bf16.vlgmr.msra.gmra.mrb[0].mxu0 %v7510_v3  ;;  %2630 = vmatmul.mubr.bf16.vlgmr.msra.gmra.mrb[0].mxu1 %v7510_v3  ;;  %v7614_v3 = vld [vmem:[#allocation2 + $0x404] ss:$16 sps:$4 sm:$0xff]  }
  0xd2   :  { %2383 = vmatpush1.bf16.msra.mxu0 %v7513_v4  ;;  %2641 = vmatpush1.bf16.msra.mxu1 %v7516_v5  ;;  %v7617_v4 = vld [vmem:[#allocation2 + $0x40c] ss:$16 sps:$4 sm:$0xff]   ;;  %v7609_v5 = vld [vmem:[%s8722_s0 + $0x8] ss:$44 sps:$4 sm:$0xff]  }
  0xd3   :  { %2384 = vmatprep.subr.bf16.mxu0 %v7521_v6  ;;  %2642 = vmatprep.subr.bf16.mxu1 %v7524_v7  ;;  %v7612_v6 = vld [vmem:[#allocation2 + $0x400] ss:$16 sps:$4 sm:$0xff]   ;;  %v7615_v7 = vld [vmem:[#allocation2 + $0x408] ss:$16 sps:$4 sm:$0xff]  }
  0xd4   :  { %2414 = vmatprep.mubr.bf16.mxu0 %v7611_v30  ;;  %2672 = vmatprep.mubr.bf16.mxu1 %v7611_v30  ;;  %v7653_v30 = vld [vmem:[#allocation2 + $0x4cc] ss:$16 sps:$4 sm:$0xff]  }
  0xd6   :  { %2385 = vmatpush1.bf16.msra.mxu0 %v7519_v8  ;;  %2643 = vmatpush1.bf16.msra.mxu1 %v7522_v9  ;;  %v7620_v8 = vld [vmem:[#allocation2 + $0x424] ss:$16 sps:$4 sm:$0xff]   ;;  %v7623_v9 = vld [vmem:[#allocation2 + $0x42c] ss:$16 sps:$4 sm:$0xff]  }
  0xd7   :  { %2386 = vmatprep.subr.bf16.mxu0 %v7527_v10  ;;  %2644 = vmatprep.subr.bf16.mxu1 %v7530_v11  ;;  %v7618_v10 = vld [vmem:[#allocation2 + $0x420] ss:$16 sps:$4 sm:$0xff]   ;;  %v7621_v11 = vld [vmem:[#allocation2 + $0x428] ss:$16 sps:$4 sm:$0xff]  }
  0xda   :  { %2387 = vmatpush1.bf16.msra.mxu0 %v7525_v12  ;;  %2645 = vmatpush1.bf16.msra.mxu1 %v7528_v13  ;;  %v7710_v12 = vld [vmem:[%s8722_s0 + $0x14] ss:$44 sps:$4 sm:$0xff]  }
  0xdb   :  { %2388 = vmatprep.subr.bf16.mxu0 %v7533_v14  ;;  %2646 = vmatprep.subr.bf16.mxu1 %v7536_v15  ;;  %v7626_v13 = vld [vmem:[#allocation2 + $0x444] ss:$16 sps:$4 sm:$0xff]   ;;  %v7629_v14 = vld [vmem:[#allocation2 + $0x44c] ss:$16 sps:$4 sm:$0xff]   ;;  %v7624_v15 = vld [vmem:[#allocation2 + $0x440] ss:$16 sps:$4 sm:$0xff]  }
  0xde   :  { %2389 = vmatpush1.bf16.msra.mxu0 %v7531_v16  ;;  %2647 = vmatpush1.bf16.msra.mxu1 %v7534_v17  ;;  %v7627_v16 = vld [vmem:[#allocation2 + $0x448] ss:$16 sps:$4 sm:$0xff]   ;;  %v7632_v17 = vld [vmem:[#allocation2 + $0x464] ss:$16 sps:$4 sm:$0xff]  }
  0xdf   :  { %2390 = vmatprep.subr.bf16.mxu0 %v7539_v18  ;;  %2648 = vmatprep.subr.bf16.mxu1 %v7542_v19  ;;  %v7635_v18 = vld [vmem:[#allocation2 + $0x46c] ss:$16 sps:$4 sm:$0xff]   ;;  %v7630_v19 = vld [vmem:[#allocation2 + $0x460] ss:$16 sps:$4 sm:$0xff]  }
  0xe2   :  { %2391 = vmatpush1.bf16.msra.mxu0 %v7537_v20  ;;  %2649 = vmatpush1.bf16.msra.mxu1 %v7540_v21  ;;  %v7633_v20 = vld [vmem:[#allocation2 + $0x468] ss:$16 sps:$4 sm:$0xff]   ;;  %v7638_v21 = vld [vmem:[#allocation2 + $0x484] ss:$16 sps:$4 sm:$0xff]  }
  0xe3   :  { %2392 = vmatprep.subr.bf16.mxu0 %v7545_v22  ;;  %2650 = vmatprep.subr.bf16.mxu1 %v7548_v23  ;;  %v7641_v22 = vld [vmem:[#allocation2 + $0x48c] ss:$16 sps:$4 sm:$0xff]   ;;  %v7636_v23 = vld [vmem:[#allocation2 + $0x480] ss:$16 sps:$4 sm:$0xff]  }
  0xe6   :  { %2393 = vmatpush1.bf16.msra.mxu0 %v7543_v24  ;;  %2651 = vmatpush1.bf16.msra.mxu1 %v7546_v25  ;;  %v7639_v24 = vld [vmem:[#allocation2 + $0x488] ss:$16 sps:$4 sm:$0xff]   ;;  %v7644_v25 = vld [vmem:[#allocation2 + $0x4a4] ss:$16 sps:$4 sm:$0xff]  }
  0xe7   :  { %2394 = vmatprep.subr.bf16.mxu0 %v7551_v26  ;;  %2652 = vmatprep.subr.bf16.mxu1 %v7554_v27  ;;  %v7647_v26 = vld [vmem:[#allocation2 + $0x4ac] ss:$16 sps:$4 sm:$0xff]   ;;  %v7642_v27 = vld [vmem:[#allocation2 + $0x4a0] ss:$16 sps:$4 sm:$0xff]  }
  0xea   :  { %2395 = vmatpush1.bf16.msra.mxu0 %v7549_v28  ;;  %2653 = vmatpush1.bf16.msra.mxu1 %v7552_v29  ;;  %v7645_v28 = vld [vmem:[#allocation2 + $0x4a8] ss:$16 sps:$4 sm:$0xff]   ;;  %v7650_v29 = vld [vmem:[#allocation2 + $0x4c4] ss:$16 sps:$4 sm:$0xff]  }
  0xeb   :  { %2396 = vmatprep.subr.bf16.mxu0 %v7557_v31  ;;  %2654 = vmatprep.subr.bf16.mxu1 %v7560_v32  ;;  %v7648_v31 = vld [vmem:[#allocation2 + $0x4c0] ss:$16 sps:$4 sm:$0xff]   ;;  %v7651_v32 = vld [vmem:[#allocation2 + $0x4c8] ss:$16 sps:$4 sm:$0xff]  }
  0xee   :  { %2397 = vmatpush1.bf16.msra.mxu0 %v7555_v33  ;;  %2655 = vmatpush1.bf16.msra.mxu1 %v7558_v34  ;;  %v7656_v33 = vld [vmem:[#allocation2 + $0x4e4] ss:$16 sps:$4 sm:$0xff]   ;;  %v7659_v34 = vld [vmem:[#allocation2 + $0x4ec] ss:$16 sps:$4 sm:$0xff]  }
  0xef   :  { %2398 = vmatprep.subr.bf16.mxu0 %v7563_v35  ;;  %2656 = vmatprep.subr.bf16.mxu1 %v7566_v36  ;;  %v7654_v35 = vld [vmem:[#allocation2 + $0x4e0] ss:$16 sps:$4 sm:$0xff]   ;;  %v7657_v36 = vld [vmem:[#allocation2 + $0x4e8] ss:$16 sps:$4 sm:$0xff]  }
  0xf2   :  { %2399 = vmatpush1.bf16.msra.mxu0 %v7561_v37  ;;  %2657 = vmatpush1.bf16.msra.mxu1 %v7564_v38  ;;  %v7662_v37 = vld [vmem:[#allocation2 + $0x504] ss:$16 sps:$4 sm:$0xff]   ;;  %v7665_v38 = vld [vmem:[#allocation2 + $0x50c] ss:$16 sps:$4 sm:$0xff]  }
  0xf3   :  { %2400 = vmatprep.subr.bf16.mxu0 %v7569_v39  ;;  %2658 = vmatprep.subr.bf16.mxu1 %v7572_v40  ;;  %v7660_v39 = vld [vmem:[#allocation2 + $0x500] ss:$16 sps:$4 sm:$0xff]   ;;  %v7663_v40 = vld [vmem:[#allocation2 + $0x508] ss:$16 sps:$4 sm:$0xff]  }
  0xf6   :  { %2401 = vmatpush1.bf16.msra.mxu0 %v7567_v41  ;;  %2659 = vmatpush1.bf16.msra.mxu1 %v7570_v42  ;;  %v7668_v41 = vld [vmem:[#allocation2 + $0x524] ss:$16 sps:$4 sm:$0xff]   ;;  %v7671_v42 = vld [vmem:[#allocation2 + $0x52c] ss:$16 sps:$4 sm:$0xff]  }
  0xf7   :  { %2402 = vmatprep.subr.bf16.mxu0 %v7575_v43  ;;  %2660 = vmatprep.subr.bf16.mxu1 %v7578_v44  ;;  %v7666_v43 = vld [vmem:[#allocation2 + $0x520] ss:$16 sps:$4 sm:$0xff]   ;;  %v7669_v44 = vld [vmem:[#allocation2 + $0x528] ss:$16 sps:$4 sm:$0xff]  }
  0xfa   :  { %2403 = vmatpush1.bf16.msra.mxu0 %v7573_v45  ;;  %2661 = vmatpush1.bf16.msra.mxu1 %v7576_v46  ;;  %v7674_v45 = vld [vmem:[#allocation2 + $0x544] ss:$16 sps:$4 sm:$0xff]   ;;  %v7677_v46 = vld [vmem:[#allocation2 + $0x54c] ss:$16 sps:$4 sm:$0xff]  }
  0xfb   :  { %2404 = vmatprep.subr.bf16.mxu0 %v7581_v47  ;;  %2662 = vmatprep.subr.bf16.mxu1 %v7584_v48  ;;  %v7672_v47 = vld [vmem:[#allocation2 + $0x540] ss:$16 sps:$4 sm:$0xff]   ;;  %v7675_v48 = vld [vmem:[#allocation2 + $0x548] ss:$16 sps:$4 sm:$0xff]  }
  0xfe   :  { %2405 = vmatpush1.bf16.msra.mxu0 %v7579_v49  ;;  %2663 = vmatpush1.bf16.msra.mxu1 %v7582_v50  ;;  %v7680_v49 = vld [vmem:[#allocation2 + $0x564] ss:$16 sps:$4 sm:$0xff]   ;;  %v7683_v50 = vld [vmem:[#allocation2 + $0x56c] ss:$16 sps:$4 sm:$0xff]  }
  0xff   :  { %2406 = vmatprep.subr.bf16.mxu0 %v7587_v51  ;;  %2664 = vmatprep.subr.bf16.mxu1 %v7590_v52  ;;  %v7678_v51 = vld [vmem:[#allocation2 + $0x560] ss:$16 sps:$4 sm:$0xff]   ;;  %v7681_v52 = vld [vmem:[#allocation2 + $0x568] ss:$16 sps:$4 sm:$0xff]  }
 0x102   :  { %2407 = vmatpush1.bf16.msra.mxu0 %v7585_v53  ;;  %2665 = vmatpush1.bf16.msra.mxu1 %v7588_v54  ;;  %v7686_v53 = vld [vmem:[#allocation2 + $0x584] ss:$16 sps:$4 sm:$0xff]   ;;  %v7689_v54 = vld [vmem:[#allocation2 + $0x58c] ss:$16 sps:$4 sm:$0xff]  }
 0x103   :  { %2408 = vmatprep.subr.bf16.mxu0 %v7593_v55  ;;  %2666 = vmatprep.subr.bf16.mxu1 %v7596_v56  ;;  %v7684_v55 = vld [vmem:[#allocation2 + $0x580] ss:$16 sps:$4 sm:$0xff]   ;;  %v7687_v56 = vld [vmem:[#allocation2 + $0x588] ss:$16 sps:$4 sm:$0xff]  }
 0x106   :  { %2409 = vmatpush1.bf16.msra.mxu0 %v7591_v57  ;;  %2667 = vmatpush1.bf16.msra.mxu1 %v7594_v58  ;;  %v7692_v57 = vld [vmem:[#allocation2 + $0x5a4] ss:$16 sps:$4 sm:$0xff]   ;;  %v7695_v58 = vld [vmem:[#allocation2 + $0x5ac] ss:$16 sps:$4 sm:$0xff]  }
 0x107   :  { %2410 = vmatprep.subr.bf16.mxu0 %v7599_v59  ;;  %2668 = vmatprep.subr.bf16.mxu1 %v7602_v60  ;;  %v7690_v59 = vld [vmem:[#allocation2 + $0x5a0] ss:$16 sps:$4 sm:$0xff]   ;;  %v7693_v60 = vld [vmem:[#allocation2 + $0x5a8] ss:$16 sps:$4 sm:$0xff]  }
 0x10a   :  { %2411 = vmatpush1.bf16.msra.mxu0 %v7597_v61  ;;  %2669 = vmatpush1.bf16.msra.mxu1 %v7600_v62  ;;  %v7698_v61 = vld [vmem:[#allocation2 + $0x5c4] ss:$16 sps:$4 sm:$0xff]   ;;  %v7701_v62 = vld [vmem:[#allocation2 + $0x5cc] ss:$16 sps:$4 sm:$0xff]  }
 0x10b   :  { %2412 = vmatprep.subr.bf16.mxu0 %v7605_v63  ;;  %2670 = vmatprep.subr.bf16.mxu1 %v7608_v0  ;;  %v7696_v63 = vld [vmem:[#allocation2 + $0x5c0] ss:$16 sps:$4 sm:$0xff]   ;;  %v7699_v0 = vld [vmem:[#allocation2 + $0x5c8] ss:$16 sps:$4 sm:$0xff]  }
 0x10e   :  { %2413 = vmatpush1.bf16.msra.mxu0 %v7603_v1  ;;  %2671 = vmatpush1.bf16.msra.mxu1 %v7606_v2  ;;  %v7704_v1 = vld [vmem:[#allocation2 + $0x5e4] ss:$16 sps:$4 sm:$0xff]   ;;  %v7707_v2 = vld [vmem:[#allocation2 + $0x5ec] ss:$16 sps:$4 sm:$0xff]  }
 0x10f   :  { %2425 = vmatprep.subr.bf16.mxu0 %v7614_v3  ;;  %2683 = vmatprep.subr.bf16.mxu1 %v7617_v4  ;;  %v7702_v3 = vld [vmem:[#allocation2 + $0x5e0] ss:$16 sps:$4 sm:$0xff]   ;;  %v7705_v4 = vld [vmem:[#allocation2 + $0x5e8] ss:$16 sps:$4 sm:$0xff]  }
 0x111   :  { %2415 = vmatmul.mubr.bf16.vlgmr.msra.gmra.mrb[0].mxu0 %v7609_v5  ;;  %2673 = vmatmul.mubr.bf16.vlgmr.msra.gmra.mrb[0].mxu1 %v7609_v5  ;;  %v7713_v5 = vld [vmem:[#allocation2 + $0x604] ss:$16 sps:$4 sm:$0xff]  }
 0x112   :  { %2426 = vmatpush1.bf16.msra.mxu0 %v7612_v6  ;;  %2684 = vmatpush1.bf16.msra.mxu1 %v7615_v7  ;;  %v7716_v6 = vld [vmem:[#allocation2 + $0x60c] ss:$16 sps:$4 sm:$0xff]  }
 0x113   :  { %2427 = vmatprep.subr.bf16.mxu0 %v7620_v8  ;;  %2685 = vmatprep.subr.bf16.mxu1 %v7623_v9  ;;  %v7708_v7 = vld [vmem:[%s8722_s0 + $0x10] ss:$44 sps:$4 sm:$0xff]   ;;  %v7714_v9 = vld [vmem:[#allocation2 + $0x608] ss:$16 sps:$4 sm:$0xff]  }
 0x114   :  { %2457 = vmatprep.mubr.bf16.mxu0 %v7710_v12  ;;  %2715 = vmatprep.mubr.bf16.mxu1 %v7710_v12  ;;  %v7711_v8 = vld [vmem:[#allocation2 + $0x600] ss:$16 sps:$4 sm:$0xff]   ;;  %v7809_v12 = vld [vmem:[%s8722_s0 + $0x1c] ss:$44 sps:$4 sm:$0xff]  }
 0x116   :  { %2428 = vmatpush1.bf16.msra.mxu0 %v7618_v10  ;;  %2686 = vmatpush1.bf16.msra.mxu1 %v7621_v11  ;;  %v7719_v10 = vld [vmem:[#allocation2 + $0x624] ss:$16 sps:$4 sm:$0xff]   ;;  %v7722_v11 = vld [vmem:[#allocation2 + $0x62c] ss:$16 sps:$4 sm:$0xff]  }
 0x117   :  { %2429 = vmatprep.subr.bf16.mxu0 %v7626_v13  ;;  %2687 = vmatprep.subr.bf16.mxu1 %v7629_v14  ;;  %v7717_v13 = vld [vmem:[#allocation2 + $0x620] ss:$16 sps:$4 sm:$0xff]   ;;  %v7720_v14 = vld [vmem:[#allocation2 + $0x628] ss:$16 sps:$4 sm:$0xff]  }
 0x11a   :  { %2430 = vmatpush1.bf16.msra.mxu0 %v7624_v15  ;;  %2688 = vmatpush1.bf16.msra.mxu1 %v7627_v16  ;;  %v7725_v15 = vld [vmem:[#allocation2 + $0x644] ss:$16 sps:$4 sm:$0xff]   ;;  %v7728_v16 = vld [vmem:[#allocation2 + $0x64c] ss:$16 sps:$4 sm:$0xff]  }
 0x11b   :  { %2431 = vmatprep.subr.bf16.mxu0 %v7632_v17  ;;  %2689 = vmatprep.subr.bf16.mxu1 %v7635_v18  ;;  %v7723_v17 = vld [vmem:[#allocation2 + $0x640] ss:$16 sps:$4 sm:$0xff]   ;;  %v7726_v18 = vld [vmem:[#allocation2 + $0x648] ss:$16 sps:$4 sm:$0xff]  }
 0x11e   :  { %2432 = vmatpush1.bf16.msra.mxu0 %v7630_v19  ;;  %2690 = vmatpush1.bf16.msra.mxu1 %v7633_v20  ;;  %v7731_v19 = vld [vmem:[#allocation2 + $0x664] ss:$16 sps:$4 sm:$0xff]   ;;  %v7734_v20 = vld [vmem:[#allocation2 + $0x66c] ss:$16 sps:$4 sm:$0xff]  }
 0x11f   :  { %2433 = vmatprep.subr.bf16.mxu0 %v7638_v21  ;;  %2691 = vmatprep.subr.bf16.mxu1 %v7641_v22  ;;  %v7729_v21 = vld [vmem:[#allocation2 + $0x660] ss:$16 sps:$4 sm:$0xff]   ;;  %v7732_v22 = vld [vmem:[#allocation2 + $0x668] ss:$16 sps:$4 sm:$0xff]  }
 0x122   :  { %2434 = vmatpush1.bf16.msra.mxu0 %v7636_v23  ;;  %2692 = vmatpush1.bf16.msra.mxu1 %v7639_v24  ;;  %v7737_v23 = vld [vmem:[#allocation2 + $0x684] ss:$16 sps:$4 sm:$0xff]   ;;  %v7740_v24 = vld [vmem:[#allocation2 + $0x68c] ss:$16 sps:$4 sm:$0xff]  }
 0x123   :  { %2435 = vmatprep.subr.bf16.mxu0 %v7644_v25  ;;  %2693 = vmatprep.subr.bf16.mxu1 %v7647_v26  ;;  %v7735_v25 = vld [vmem:[#allocation2 + $0x680] ss:$16 sps:$4 sm:$0xff]   ;;  %v7738_v26 = vld [vmem:[#allocation2 + $0x688] ss:$16 sps:$4 sm:$0xff]  }
 0x126   :  { %2436 = vmatpush1.bf16.msra.mxu0 %v7642_v27  ;;  %2694 = vmatpush1.bf16.msra.mxu1 %v7645_v28  ;;  %v7743_v27 = vld [vmem:[#allocation2 + $0x6a4] ss:$16 sps:$4 sm:$0xff]   ;;  %v7746_v28 = vld [vmem:[#allocation2 + $0x6ac] ss:$16 sps:$4 sm:$0xff]  }
 0x127   :  { %2437 = vmatprep.subr.bf16.mxu0 %v7650_v29  ;;  %2695 = vmatprep.subr.bf16.mxu1 %v7653_v30  ;;  %v7741_v29 = vld [vmem:[#allocation2 + $0x6a0] ss:$16 sps:$4 sm:$0xff]   ;;  %v7744_v30 = vld [vmem:[#allocation2 + $0x6a8] ss:$16 sps:$4 sm:$0xff]  }
 0x12a   :  { %2438 = vmatpush1.bf16.msra.mxu0 %v7648_v31  ;;  %2696 = vmatpush1.bf16.msra.mxu1 %v7651_v32  ;;  %v7749_v31 = vld [vmem:[#allocation2 + $0x6c4] ss:$16 sps:$4 sm:$0xff]   ;;  %v7752_v32 = vld [vmem:[#allocation2 + $0x6cc] ss:$16 sps:$4 sm:$0xff]  }
 0x12b   :  { %2439 = vmatprep.subr.bf16.mxu0 %v7656_v33  ;;  %2697 = vmatprep.subr.bf16.mxu1 %v7659_v34  ;;  %v7747_v33 = vld [vmem:[#allocation2 + $0x6c0] ss:$16 sps:$4 sm:$0xff]   ;;  %v7750_v34 = vld [vmem:[#allocation2 + $0x6c8] ss:$16 sps:$4 sm:$0xff]  }
 0x12e   :  { %2440 = vmatpush1.bf16.msra.mxu0 %v7654_v35  ;;  %2698 = vmatpush1.bf16.msra.mxu1 %v7657_v36  ;;  %v7755_v35 = vld [vmem:[#allocation2 + $0x6e4] ss:$16 sps:$4 sm:$0xff]   ;;  %v7758_v36 = vld [vmem:[#allocation2 + $0x6ec] ss:$16 sps:$4 sm:$0xff]  }
 0x12f   :  { %2441 = vmatprep.subr.bf16.mxu0 %v7662_v37  ;;  %2699 = vmatprep.subr.bf16.mxu1 %v7665_v38  ;;  %v7753_v37 = vld [vmem:[#allocation2 + $0x6e0] ss:$16 sps:$4 sm:$0xff]   ;;  %v7756_v38 = vld [vmem:[#allocation2 + $0x6e8] ss:$16 sps:$4 sm:$0xff]  }
 0x132   :  { %2442 = vmatpush1.bf16.msra.mxu0 %v7660_v39  ;;  %2700 = vmatpush1.bf16.msra.mxu1 %v7663_v40  ;;  %v7761_v39 = vld [vmem:[#allocation2 + $0x704] ss:$16 sps:$4 sm:$0xff]   ;;  %v7764_v40 = vld [vmem:[#allocation2 + $0x70c] ss:$16 sps:$4 sm:$0xff]  }
 0x133   :  { %2443 = vmatprep.subr.bf16.mxu0 %v7668_v41  ;;  %2701 = vmatprep.subr.bf16.mxu1 %v7671_v42  ;;  %v7759_v41 = vld [vmem:[#allocation2 + $0x700] ss:$16 sps:$4 sm:$0xff]   ;;  %v7762_v42 = vld [vmem:[#allocation2 + $0x708] ss:$16 sps:$4 sm:$0xff]  }
 0x136   :  { %2444 = vmatpush1.bf16.msra.mxu0 %v7666_v43  ;;  %2702 = vmatpush1.bf16.msra.mxu1 %v7669_v44  ;;  %v7767_v43 = vld [vmem:[#allocation2 + $0x724] ss:$16 sps:$4 sm:$0xff]   ;;  %v7770_v44 = vld [vmem:[#allocation2 + $0x72c] ss:$16 sps:$4 sm:$0xff]  }
 0x137   :  { %2445 = vmatprep.subr.bf16.mxu0 %v7674_v45  ;;  %2703 = vmatprep.subr.bf16.mxu1 %v7677_v46  ;;  %v7765_v45 = vld [vmem:[#allocation2 + $0x720] ss:$16 sps:$4 sm:$0xff]   ;;  %v7768_v46 = vld [vmem:[#allocation2 + $0x728] ss:$16 sps:$4 sm:$0xff]  }
 0x13a   :  { %2446 = vmatpush1.bf16.msra.mxu0 %v7672_v47  ;;  %2704 = vmatpush1.bf16.msra.mxu1 %v7675_v48  ;;  %v7773_v47 = vld [vmem:[#allocation2 + $0x744] ss:$16 sps:$4 sm:$0xff]   ;;  %v7776_v48 = vld [vmem:[#allocation2 + $0x74c] ss:$16 sps:$4 sm:$0xff]  }
 0x13b   :  { %2447 = vmatprep.subr.bf16.mxu0 %v7680_v49  ;;  %2705 = vmatprep.subr.bf16.mxu1 %v7683_v50  ;;  %v7771_v49 = vld [vmem:[#allocation2 + $0x740] ss:$16 sps:$4 sm:$0xff]   ;;  %v7774_v50 = vld [vmem:[#allocation2 + $0x748] ss:$16 sps:$4 sm:$0xff]  }
 0x13e   :  { %2448 = vmatpush1.bf16.msra.mxu0 %v7678_v51  ;;  %2706 = vmatpush1.bf16.msra.mxu1 %v7681_v52  ;;  %v7779_v51 = vld [vmem:[#allocation2 + $0x764] ss:$16 sps:$4 sm:$0xff]   ;;  %v7782_v52 = vld [vmem:[#allocation2 + $0x76c] ss:$16 sps:$4 sm:$0xff]  }
 0x13f   :  { %2449 = vmatprep.subr.bf16.mxu0 %v7686_v53  ;;  %2707 = vmatprep.subr.bf16.mxu1 %v7689_v54  ;;  %v7777_v53 = vld [vmem:[#allocation2 + $0x760] ss:$16 sps:$4 sm:$0xff]   ;;  %v7780_v54 = vld [vmem:[#allocation2 + $0x768] ss:$16 sps:$4 sm:$0xff]  }
 0x142   :  { %2450 = vmatpush1.bf16.msra.mxu0 %v7684_v55  ;;  %2708 = vmatpush1.bf16.msra.mxu1 %v7687_v56  ;;  %v7785_v55 = vld [vmem:[#allocation2 + $0x784] ss:$16 sps:$4 sm:$0xff]   ;;  %v7788_v56 = vld [vmem:[#allocation2 + $0x78c] ss:$16 sps:$4 sm:$0xff]  }
 0x143   :  { %2451 = vmatprep.subr.bf16.mxu0 %v7692_v57  ;;  %2709 = vmatprep.subr.bf16.mxu1 %v7695_v58  ;;  %v7783_v57 = vld [vmem:[#allocation2 + $0x780] ss:$16 sps:$4 sm:$0xff]   ;;  %v7786_v58 = vld [vmem:[#allocation2 + $0x788] ss:$16 sps:$4 sm:$0xff]  }
 0x146   :  { %2452 = vmatpush1.bf16.msra.mxu0 %v7690_v59  ;;  %2710 = vmatpush1.bf16.msra.mxu1 %v7693_v60  ;;  %v7791_v59 = vld [vmem:[#allocation2 + $0x7a4] ss:$16 sps:$4 sm:$0xff]   ;;  %v7794_v60 = vld [vmem:[#allocation2 + $0x7ac] ss:$16 sps:$4 sm:$0xff]  }
 0x147   :  { %2453 = vmatprep.subr.bf16.mxu0 %v7698_v61  ;;  %2711 = vmatprep.subr.bf16.mxu1 %v7701_v62  ;;  %v7789_v61 = vld [vmem:[#allocation2 + $0x7a0] ss:$16 sps:$4 sm:$0xff]   ;;  %v7792_v62 = vld [vmem:[#allocation2 + $0x7a8] ss:$16 sps:$4 sm:$0xff]  }
 0x14a   :  { %2454 = vmatpush1.bf16.msra.mxu0 %v7696_v63  ;;  %2712 = vmatpush1.bf16.msra.mxu1 %v7699_v0  ;;  %v7797_v63 = vld [vmem:[#allocation2 + $0x7c4] ss:$16 sps:$4 sm:$0xff]   ;;  %v7800_v0 = vld [vmem:[#allocation2 + $0x7cc] ss:$16 sps:$4 sm:$0xff]  }
 0x14b   :  { %2455 = vmatprep.subr.bf16.mxu0 %v7704_v1  ;;  %2713 = vmatprep.subr.bf16.mxu1 %v7707_v2  ;;  %v7795_v1 = vld [vmem:[#allocation2 + $0x7c0] ss:$16 sps:$4 sm:$0xff]   ;;  %v7798_v2 = vld [vmem:[#allocation2 + $0x7c8] ss:$16 sps:$4 sm:$0xff]  }
 0x14e   :  { %2456 = vmatpush1.bf16.msra.mxu0 %v7702_v3  ;;  %2714 = vmatpush1.bf16.msra.mxu1 %v7705_v4  ;;  %v7803_v3 = vld [vmem:[#allocation2 + $0x7e4] ss:$16 sps:$4 sm:$0xff]   ;;  %v7806_v4 = vld [vmem:[#allocation2 + $0x7ec] ss:$16 sps:$4 sm:$0xff]  }
 0x14f   :  { %2468 = vmatprep.subr.bf16.mxu0 %v7713_v5  ;;  %2726 = vmatprep.subr.bf16.mxu1 %v7716_v6  ;;  %v7801_v5 = vld [vmem:[#allocation2 + $0x7e0] ss:$16 sps:$4 sm:$0xff]   ;;  %v7804_v6 = vld [vmem:[#allocation2 + $0x7e8] ss:$16 sps:$4 sm:$0xff]  }
 0x151   :  { %2458 = vmatmul.mubr.bf16.vlgmr.msra.gmra.mrb[0].mxu0 %v7708_v7  ;;  %2716 = vmatmul.mubr.bf16.vlgmr.msra.gmra.mrb[0].mxu1 %v7708_v7  ;;  %v7812_v7 = vld [vmem:[#allocation2 + $0x804] ss:$16 sps:$4 sm:$0xff]  }
 0x152   :  { %2469 = vmatpush1.bf16.msra.mxu0 %v7711_v8  ;;  %2727 = vmatpush1.bf16.msra.mxu1 %v7714_v9  ;;  %v7815_v8 = vld [vmem:[#allocation2 + $0x80c] ss:$16 sps:$4 sm:$0xff]   ;;  %v7807_v9 = vld [vmem:[%s8722_s0 + $0x18] ss:$44 sps:$4 sm:$0xff]  }
 0x153   :  { %2470 = vmatprep.subr.bf16.mxu0 %v7719_v10  ;;  %2728 = vmatprep.subr.bf16.mxu1 %v7722_v11  ;;  %v7810_v10 = vld [vmem:[#allocation2 + $0x800] ss:$16 sps:$4 sm:$0xff]   ;;  %v7813_v11 = vld [vmem:[#allocation2 + $0x808] ss:$16 sps:$4 sm:$0xff]  }
 0x154   :  { %2500 = vmatprep.mubr.bf16.mxu0 %v7809_v12  ;;  %2758 = vmatprep.mubr.bf16.mxu1 %v7809_v12  ;;  %v7818_v12 = vld [vmem:[#allocation2 + $0x824] ss:$16 sps:$4 sm:$0xff]  }
 0x156   :  { %2471 = vmatpush1.bf16.msra.mxu0 %v7717_v13  ;;  %2729 = vmatpush1.bf16.msra.mxu1 %v7720_v14  ;;  %v7821_v13 = vld [vmem:[#allocation2 + $0x82c] ss:$16 sps:$4 sm:$0xff]   ;;  %v7908_v14 = vld [vmem:[%s8722_s0 + $0x24] ss:$44 sps:$4 sm:$0xff]  }
 0x157   :  { %2472 = vmatprep.subr.bf16.mxu0 %v7725_v15  ;;  %2730 = vmatprep.subr.bf16.mxu1 %v7728_v16  ;;  %v7816_v15 = vld [vmem:[#allocation2 + $0x820] ss:$16 sps:$4 sm:$0xff]   ;;  %v7819_v16 = vld [vmem:[#allocation2 + $0x828] ss:$16 sps:$4 sm:$0xff]  }
 0x15a   :  { %2473 = vmatpush1.bf16.msra.mxu0 %v7723_v17  ;;  %2731 = vmatpush1.bf16.msra.mxu1 %v7726_v18  ;;  %v7824_v17 = vld [vmem:[#allocation2 + $0x844] ss:$16 sps:$4 sm:$0xff]   ;;  %v7827_v18 = vld [vmem:[#allocation2 + $0x84c] ss:$16 sps:$4 sm:$0xff]  }
 0x15b   :  { %2474 = vmatprep.subr.bf16.mxu0 %v7731_v19  ;;  %2732 = vmatprep.subr.bf16.mxu1 %v7734_v20  ;;  %v7822_v19 = vld [vmem:[#allocation2 + $0x840] ss:$16 sps:$4 sm:$0xff]   ;;  %v7825_v20 = vld [vmem:[#allocation2 + $0x848] ss:$16 sps:$4 sm:$0xff]  }
 0x15e   :  { %2475 = vmatpush1.bf16.msra.mxu0 %v7729_v21  ;;  %2733 = vmatpush1.bf16.msra.mxu1 %v7732_v22  ;;  %v7830_v21 = vld [vmem:[#allocation2 + $0x864] ss:$16 sps:$4 sm:$0xff]   ;;  %v7833_v22 = vld [vmem:[#allocation2 + $0x86c] ss:$16 sps:$4 sm:$0xff]  }
 0x15f   :  { %2476 = vmatprep.subr.bf16.mxu0 %v7737_v23  ;;  %2734 = vmatprep.subr.bf16.mxu1 %v7740_v24  ;;  %v7828_v23 = vld [vmem:[#allocation2 + $0x860] ss:$16 sps:$4 sm:$0xff]   ;;  %v7831_v24 = vld [vmem:[#allocation2 + $0x868] ss:$16 sps:$4 sm:$0xff]  }
 0x162   :  { %2477 = vmatpush1.bf16.msra.mxu0 %v7735_v25  ;;  %2735 = vmatpush1.bf16.msra.mxu1 %v7738_v26  ;;  %v7836_v25 = vld [vmem:[#allocation2 + $0x884] ss:$16 sps:$4 sm:$0xff]   ;;  %v7839_v26 = vld [vmem:[#allocation2 + $0x88c] ss:$16 sps:$4 sm:$0xff]  }
 0x163   :  { %2478 = vmatprep.subr.bf16.mxu0 %v7743_v27  ;;  %2736 = vmatprep.subr.bf16.mxu1 %v7746_v28  ;;  %v7834_v27 = vld [vmem:[#allocation2 + $0x880] ss:$16 sps:$4 sm:$0xff]   ;;  %v7837_v28 = vld [vmem:[#allocation2 + $0x888] ss:$16 sps:$4 sm:$0xff]  }
 0x166   :  { %2479 = vmatpush1.bf16.msra.mxu0 %v7741_v29  ;;  %2737 = vmatpush1.bf16.msra.mxu1 %v7744_v30  ;;  %v7842_v29 = vld [vmem:[#allocation2 + $0x8a4] ss:$16 sps:$4 sm:$0xff]   ;;  %v7845_v30 = vld [vmem:[#allocation2 + $0x8ac] ss:$16 sps:$4 sm:$0xff]  }
 0x167   :  { %2480 = vmatprep.subr.bf16.mxu0 %v7749_v31  ;;  %2738 = vmatprep.subr.bf16.mxu1 %v7752_v32  ;;  %v7840_v31 = vld [vmem:[#allocation2 + $0x8a0] ss:$16 sps:$4 sm:$0xff]   ;;  %v7843_v32 = vld [vmem:[#allocation2 + $0x8a8] ss:$16 sps:$4 sm:$0xff]  }
 0x16a   :  { %2481 = vmatpush1.bf16.msra.mxu0 %v7747_v33  ;;  %2739 = vmatpush1.bf16.msra.mxu1 %v7750_v34  ;;  %v7848_v33 = vld [vmem:[#allocation2 + $0x8c4] ss:$16 sps:$4 sm:$0xff]   ;;  %v7851_v34 = vld [vmem:[#allocation2 + $0x8cc] ss:$16 sps:$4 sm:$0xff]  }
 0x16b   :  { %2482 = vmatprep.subr.bf16.mxu0 %v7755_v35  ;;  %2740 = vmatprep.subr.bf16.mxu1 %v7758_v36  ;;  %v7846_v35 = vld [vmem:[#allocation2 + $0x8c0] ss:$16 sps:$4 sm:$0xff]   ;;  %v7849_v36 = vld [vmem:[#allocation2 + $0x8c8] ss:$16 sps:$4 sm:$0xff]  }
 0x16e   :  { %2483 = vmatpush1.bf16.msra.mxu0 %v7753_v37  ;;  %2741 = vmatpush1.bf16.msra.mxu1 %v7756_v38  ;;  %v7854_v37 = vld [vmem:[#allocation2 + $0x8e4] ss:$16 sps:$4 sm:$0xff]   ;;  %v7857_v38 = vld [vmem:[#allocation2 + $0x8ec] ss:$16 sps:$4 sm:$0xff]  }
 0x16f   :  { %2484 = vmatprep.subr.bf16.mxu0 %v7761_v39  ;;  %2742 = vmatprep.subr.bf16.mxu1 %v7764_v40  ;;  %v7852_v39 = vld [vmem:[#allocation2 + $0x8e0] ss:$16 sps:$4 sm:$0xff]   ;;  %v7855_v40 = vld [vmem:[#allocation2 + $0x8e8] ss:$16 sps:$4 sm:$0xff]  }
 0x172   :  { %2485 = vmatpush1.bf16.msra.mxu0 %v7759_v41  ;;  %2743 = vmatpush1.bf16.msra.mxu1 %v7762_v42  ;;  %v7860_v41 = vld [vmem:[#allocation2 + $0x904] ss:$16 sps:$4 sm:$0xff]   ;;  %v7863_v42 = vld [vmem:[#allocation2 + $0x90c] ss:$16 sps:$4 sm:$0xff]  }
 0x173   :  { %2486 = vmatprep.subr.bf16.mxu0 %v7767_v43  ;;  %2744 = vmatprep.subr.bf16.mxu1 %v7770_v44  ;;  %v7858_v43 = vld [vmem:[#allocation2 + $0x900] ss:$16 sps:$4 sm:$0xff]   ;;  %v7861_v44 = vld [vmem:[#allocation2 + $0x908] ss:$16 sps:$4 sm:$0xff]  }
 0x176   :  { %2487 = vmatpush1.bf16.msra.mxu0 %v7765_v45  ;;  %2745 = vmatpush1.bf16.msra.mxu1 %v7768_v46  ;;  %v7866_v45 = vld [vmem:[#allocation2 + $0x924] ss:$16 sps:$4 sm:$0xff]   ;;  %v7869_v46 = vld [vmem:[#allocation2 + $0x92c] ss:$16 sps:$4 sm:$0xff]  }
 0x177   :  { %2488 = vmatprep.subr.bf16.mxu0 %v7773_v47  ;;  %2746 = vmatprep.subr.bf16.mxu1 %v7776_v48  ;;  %v7864_v47 = vld [vmem:[#allocation2 + $0x920] ss:$16 sps:$4 sm:$0xff]   ;;  %v7867_v48 = vld [vmem:[#allocation2 + $0x928] ss:$16 sps:$4 sm:$0xff]  }
 0x17a   :  { %2489 = vmatpush1.bf16.msra.mxu0 %v7771_v49  ;;  %2747 = vmatpush1.bf16.msra.mxu1 %v7774_v50  ;;  %v7872_v49 = vld [vmem:[#allocation2 + $0x944] ss:$16 sps:$4 sm:$0xff]   ;;  %v7875_v50 = vld [vmem:[#allocation2 + $0x94c] ss:$16 sps:$4 sm:$0xff]  }
 0x17b   :  { %2490 = vmatprep.subr.bf16.mxu0 %v7779_v51  ;;  %2748 = vmatprep.subr.bf16.mxu1 %v7782_v52  ;;  %v7870_v51 = vld [vmem:[#allocation2 + $0x940] ss:$16 sps:$4 sm:$0xff]   ;;  %v7873_v52 = vld [vmem:[#allocation2 + $0x948] ss:$16 sps:$4 sm:$0xff]  }
 0x17e   :  { %2491 = vmatpush1.bf16.msra.mxu0 %v7777_v53  ;;  %2749 = vmatpush1.bf16.msra.mxu1 %v7780_v54  ;;  %v7878_v53 = vld [vmem:[#allocation2 + $0x964] ss:$16 sps:$4 sm:$0xff]   ;;  %v7881_v54 = vld [vmem:[#allocation2 + $0x96c] ss:$16 sps:$4 sm:$0xff]  }
 0x17f   :  { %2492 = vmatprep.subr.bf16.mxu0 %v7785_v55  ;;  %2750 = vmatprep.subr.bf16.mxu1 %v7788_v56  ;;  %v7876_v55 = vld [vmem:[#allocation2 + $0x960] ss:$16 sps:$4 sm:$0xff]   ;;  %v7879_v56 = vld [vmem:[#allocation2 + $0x968] ss:$16 sps:$4 sm:$0xff]  }
 0x182   :  { %2493 = vmatpush1.bf16.msra.mxu0 %v7783_v57  ;;  %2751 = vmatpush1.bf16.msra.mxu1 %v7786_v58  ;;  %v7884_v57 = vld [vmem:[#allocation2 + $0x984] ss:$16 sps:$4 sm:$0xff]   ;;  %v7887_v58 = vld [vmem:[#allocation2 + $0x98c] ss:$16 sps:$4 sm:$0xff]  }
 0x183   :  { %2494 = vmatprep.subr.bf16.mxu0 %v7791_v59  ;;  %2752 = vmatprep.subr.bf16.mxu1 %v7794_v60  ;;  %v7882_v59 = vld [vmem:[#allocation2 + $0x980] ss:$16 sps:$4 sm:$0xff]   ;;  %v7885_v60 = vld [vmem:[#allocation2 + $0x988] ss:$16 sps:$4 sm:$0xff]  }
 0x186   :  { %2495 = vmatpush1.bf16.msra.mxu0 %v7789_v61  ;;  %2753 = vmatpush1.bf16.msra.mxu1 %v7792_v62  ;;  %v7890_v61 = vld [vmem:[#allocation2 + $0x9a4] ss:$16 sps:$4 sm:$0xff]   ;;  %v7893_v62 = vld [vmem:[#allocation2 + $0x9ac] ss:$16 sps:$4 sm:$0xff]  }
 0x187   :  { %2496 = vmatprep.subr.bf16.mxu0 %v7797_v63  ;;  %2754 = vmatprep.subr.bf16.mxu1 %v7800_v0  ;;  %v7888_v63 = vld [vmem:[#allocation2 + $0x9a0] ss:$16 sps:$4 sm:$0xff]   ;;  %v7891_v0 = vld [vmem:[#allocation2 + $0x9a8] ss:$16 sps:$4 sm:$0xff]  }
 0x18a   :  { %2497 = vmatpush1.bf16.msra.mxu0 %v7795_v1  ;;  %2755 = vmatpush1.bf16.msra.mxu1 %v7798_v2  ;;  %v7896_v1 = vld [vmem:[#allocation2 + $0x9c4] ss:$16 sps:$4 sm:$0xff]   ;;  %v7899_v2 = vld [vmem:[#allocation2 + $0x9cc] ss:$16 sps:$4 sm:$0xff]  }
 0x18b   :  { %2498 = vmatprep.subr.bf16.mxu0 %v7803_v3  ;;  %2756 = vmatprep.subr.bf16.mxu1 %v7806_v4  ;;  %v7894_v3 = vld [vmem:[#allocation2 + $0x9c0] ss:$16 sps:$4 sm:$0xff]   ;;  %v7897_v4 = vld [vmem:[#allocation2 + $0x9c8] ss:$16 sps:$4 sm:$0xff]  }
 0x18e   :  { %2499 = vmatpush1.bf16.msra.mxu0 %v7801_v5  ;;  %2757 = vmatpush1.bf16.msra.mxu1 %v7804_v6  ;;  %v7902_v5 = vld [vmem:[#allocation2 + $0x9e4] ss:$16 sps:$4 sm:$0xff]   ;;  %v7905_v6 = vld [vmem:[#allocation2 + $0x9ec] ss:$16 sps:$4 sm:$0xff]  }
 0x18f   :  { %2511 = vmatprep.subr.bf16.mxu0 %v7812_v7  ;;  %2769 = vmatprep.subr.bf16.mxu1 %v7815_v8  ;;  %v7900_v7 = vld [vmem:[#allocation2 + $0x9e0] ss:$16 sps:$4 sm:$0xff]   ;;  %v7903_v8 = vld [vmem:[#allocation2 + $0x9e8] ss:$16 sps:$4 sm:$0xff]  }
 0x191   :  { %2501 = vmatmul.mubr.bf16.vlgmr.msra.gmra.mrb[0].mxu0 %v7807_v9  ;;  %2759 = vmatmul.mubr.bf16.vlgmr.msra.gmra.mrb[0].mxu1 %v7807_v9  ;;  %v7911_v9 = vld [vmem:[#allocation2 + $0xa04] ss:$16 sps:$4 sm:$0xff]  }
 0x192   :  { %2512 = vmatpush1.bf16.msra.mxu0 %v7810_v10  ;;  %2770 = vmatpush1.bf16.msra.mxu1 %v7813_v11  ;;  %v7914_v10 = vld [vmem:[#allocation2 + $0xa0c] ss:$16 sps:$4 sm:$0xff]  }
 0x193   :  { %2513 = vmatprep.subr.bf16.mxu0 %v7818_v12  ;;  %2771 = vmatprep.subr.bf16.mxu1 %v7821_v13  ;;  %v7906_v11 = vld [vmem:[%s8722_s0 + $0x20] ss:$44 sps:$4 sm:$0xff]   ;;  %v7912_v13 = vld [vmem:[#allocation2 + $0xa08] ss:$16 sps:$4 sm:$0xff]  }
 0x194   :  { %2543 = vmatprep.mubr.bf16.mxu0 %v7908_v14  ;;  %2801 = vmatprep.mubr.bf16.mxu1 %v7908_v14  ;;  %v7909_v12 = vld [vmem:[#allocation2 + $0xa00] ss:$16 sps:$4 sm:$0xff]   ;;  %v7917_v14 = vld [vmem:[#allocation2 + $0xa24] ss:$16 sps:$4 sm:$0xff]  }
 0x196   :  { %2514 = vmatpush1.bf16.msra.mxu0 %v7816_v15  ;;  %2772 = vmatpush1.bf16.msra.mxu1 %v7819_v16  ;;  %v7920_v15 = vld [vmem:[#allocation2 + $0xa2c] ss:$16 sps:$4 sm:$0xff]   ;;  %v7915_v16 = vld [vmem:[#allocation2 + $0xa20] ss:$16 sps:$4 sm:$0xff]  }
 0x197   :  { %2515 = vmatprep.subr.bf16.mxu0 %v7824_v17  ;;  %2773 = vmatprep.subr.bf16.mxu1 %v7827_v18  ;;  %v7918_v17 = vld [vmem:[#allocation2 + $0xa28] ss:$16 sps:$4 sm:$0xff]   ;;  %v7923_v18 = vld [vmem:[#allocation2 + $0xa44] ss:$16 sps:$4 sm:$0xff]  }
 0x19a   :  { %2516 = vmatpush1.bf16.msra.mxu0 %v7822_v19  ;;  %2774 = vmatpush1.bf16.msra.mxu1 %v7825_v20  ;;  %v7926_v19 = vld [vmem:[#allocation2 + $0xa4c] ss:$16 sps:$4 sm:$0xff]   ;;  %v8294_v20 = vmov 0  }
 0x19b   :  { %2517 = vmatprep.subr.bf16.mxu0 %v7830_v21  ;;  %2775 = vmatprep.subr.bf16.mxu1 %v7833_v22  ;;  %v7921_v21 = vld [vmem:[#allocation2 + $0xa40] ss:$16 sps:$4 sm:$0xff]   ;;  %v7924_v22 = vld [vmem:[#allocation2 + $0xa48] ss:$16 sps:$4 sm:$0xff]  }
 0x19e   :  { %2518 = vmatpush1.bf16.msra.mxu0 %v7828_v23  ;;  %2776 = vmatpush1.bf16.msra.mxu1 %v7831_v24  ;;  %v7929_v23 = vld [vmem:[#allocation2 + $0xa64] ss:$16 sps:$4 sm:$0xff]   ;;  %v7932_v24 = vld [vmem:[#allocation2 + $0xa6c] ss:$16 sps:$4 sm:$0xff]  }
 0x19f   :  { %2519 = vmatprep.subr.bf16.mxu0 %v7836_v25  ;;  %2777 = vmatprep.subr.bf16.mxu1 %v7839_v26  ;;  %v7927_v25 = vld [vmem:[#allocation2 + $0xa60] ss:$16 sps:$4 sm:$0xff]   ;;  %v7930_v26 = vld [vmem:[#allocation2 + $0xa68] ss:$16 sps:$4 sm:$0xff]  }
 0x1a2   :  { %2520 = vmatpush1.bf16.msra.mxu0 %v7834_v27  ;;  %2778 = vmatpush1.bf16.msra.mxu1 %v7837_v28  ;;  %v7935_v27 = vld [vmem:[#allocation2 + $0xa84] ss:$16 sps:$4 sm:$0xff]   ;;  %v7938_v28 = vld [vmem:[#allocation2 + $0xa8c] ss:$16 sps:$4 sm:$0xff]  }
 0x1a3   :  { %2521 = vmatprep.subr.bf16.mxu0 %v7842_v29  ;;  %2779 = vmatprep.subr.bf16.mxu1 %v7845_v30  ;;  %v7933_v29 = vld [vmem:[#allocation2 + $0xa80] ss:$16 sps:$4 sm:$0xff]   ;;  %v7936_v30 = vld [vmem:[#allocation2 + $0xa88] ss:$16 sps:$4 sm:$0xff]  }
 0x1a6   :  { %2522 = vmatpush1.bf16.msra.mxu0 %v7840_v31  ;;  %2780 = vmatpush1.bf16.msra.mxu1 %v7843_v32  ;;  %v7941_v31 = vld [vmem:[#allocation2 + $0xaa4] ss:$16 sps:$4 sm:$0xff]   ;;  %v7944_v32 = vld [vmem:[#allocation2 + $0xaac] ss:$16 sps:$4 sm:$0xff]  }
 0x1a7   :  { %2523 = vmatprep.subr.bf16.mxu0 %v7848_v33  ;;  %2781 = vmatprep.subr.bf16.mxu1 %v7851_v34  ;;  %v7939_v33 = vld [vmem:[#allocation2 + $0xaa0] ss:$16 sps:$4 sm:$0xff]   ;;  %v7942_v34 = vld [vmem:[#allocation2 + $0xaa8] ss:$16 sps:$4 sm:$0xff]  }
 0x1aa   :  { %2524 = vmatpush1.bf16.msra.mxu0 %v7846_v35  ;;  %2782 = vmatpush1.bf16.msra.mxu1 %v7849_v36  ;;  %v7947_v35 = vld [vmem:[#allocation2 + $0xac4] ss:$16 sps:$4 sm:$0xff]   ;;  %v7950_v36 = vld [vmem:[#allocation2 + $0xacc] ss:$16 sps:$4 sm:$0xff]  }
 0x1ab   :  { %2525 = vmatprep.subr.bf16.mxu0 %v7854_v37  ;;  %2783 = vmatprep.subr.bf16.mxu1 %v7857_v38  ;;  %v7945_v37 = vld [vmem:[#allocation2 + $0xac0] ss:$16 sps:$4 sm:$0xff]   ;;  %v7948_v38 = vld [vmem:[#allocation2 + $0xac8] ss:$16 sps:$4 sm:$0xff]  }
 0x1ae   :  { %2526 = vmatpush1.bf16.msra.mxu0 %v7852_v39  ;;  %2784 = vmatpush1.bf16.msra.mxu1 %v7855_v40  ;;  %v7953_v39 = vld [vmem:[#allocation2 + $0xae4] ss:$16 sps:$4 sm:$0xff]   ;;  %v7956_v40 = vld [vmem:[#allocation2 + $0xaec] ss:$16 sps:$4 sm:$0xff]  }
 0x1af   :  { %2527 = vmatprep.subr.bf16.mxu0 %v7860_v41  ;;  %2785 = vmatprep.subr.bf16.mxu1 %v7863_v42  ;;  %v7951_v41 = vld [vmem:[#allocation2 + $0xae0] ss:$16 sps:$4 sm:$0xff]   ;;  %v7954_v42 = vld [vmem:[#allocation2 + $0xae8] ss:$16 sps:$4 sm:$0xff]  }
 0x1b2   :  { %2528 = vmatpush1.bf16.msra.mxu0 %v7858_v43  ;;  %2786 = vmatpush1.bf16.msra.mxu1 %v7861_v44  ;;  %v7957_v43 = vld [vmem:[%s8722_s0 + $0x28] ss:$44 sps:$4 sm:$0xff]   ;;  %v503_v44 = vlaneseq }
 0x1b3   :  { %2529 = vmatprep.subr.bf16.mxu0 %v7866_v45  ;;  %2787 = vmatprep.subr.bf16.mxu1 %v7869_v46 }
 0x1b4   :  { %v8498_v45 = vshrl.u32 %v503_v44, 7  ;;  %v3031_v44 = vld [vmem:[#allocation9 + $0x120] sm:$0xff] }
 0x1b6   :  { %2530 = vmatpush1.bf16.msra.mxu0 %v7864_v47  ;;  %2788 = vmatpush1.bf16.msra.mxu1 %v7867_v48  ;;  %v8501_v46 = vsub.s32 0, %v8498_v45  ;;  %v501_v47 = vld [vmem:[#allocation4] sm:$0xf]  ;;  %v8504_v48 = vsub.s32 1, %v8498_v45 }
 0x1b7   :  { %2531 = vmatprep.subr.bf16.mxu0 %v7872_v49  ;;  %2789 = vmatprep.subr.bf16.mxu1 %v7875_v50  ;;  %v8507_v49 = vsub.s32 2, %v8498_v45 }
 0x1b8   :  { %v506_v50 = vrot.slane %v501_v47, %v8501_v46 }
 0x1ba   :  { %2532 = vmatpush1.bf16.msra.mxu0 %v7870_v51  ;;  %2790 = vmatpush1.bf16.msra.mxu1 %v7873_v52  ;;  %v510_v51 = vrot.slane %v501_v47, %v8504_v48  ;;  %v8512_v52 = vsub.s32 3, %v8498_v45 }
 0x1bb   :  { %2533 = vmatprep.subr.bf16.mxu0 %v7878_v53  ;;  %2791 = vmatprep.subr.bf16.mxu1 %v7881_v54  ;;  %v514_v54 = vrot.slane %v501_v47, %v8507_v49 }
 0x1be   :  { %2534 = vmatpush1.bf16.msra.mxu0 %v7876_v55  ;;  %2792 = vmatpush1.bf16.msra.mxu1 %v7879_v56 }
 0x1bf   :  { %2535 = vmatprep.subr.bf16.mxu0 %v7884_v57  ;;  %2793 = vmatprep.subr.bf16.mxu1 %v7887_v58 }
 0x1c2   :  { %2536 = vmatpush1.bf16.msra.mxu0 %v7882_v59  ;;  %2794 = vmatpush1.bf16.msra.mxu1 %v7885_v60  ;;  %v518_v60 = vrot.slane %v501_v47, %v8512_v52  ;;  %v3028_v47 = vld [vmem:[#allocation9 + $0x108] sm:$0xff] }
 0x1c3   :  { %2537 = vmatprep.subr.bf16.mxu0 %v7890_v61  ;;  %2795 = vmatprep.subr.bf16.mxu1 %v7893_v62 }
 0x1c6   :  { %2538 = vmatpush1.bf16.msra.mxu0 %v7888_v63  ;;  %2796 = vmatpush1.bf16.msra.mxu1 %v7891_v0 }
 0x1c7   :  { %2539 = vmatprep.subr.bf16.mxu0 %v7896_v1  ;;  %2797 = vmatprep.subr.bf16.mxu1 %v7899_v2 }
 0x1ca   :  { %2540 = vmatpush1.bf16.msra.mxu0 %v7894_v3  ;;  %2798 = vmatpush1.bf16.msra.mxu1 %v7897_v4 }
 0x1cb   :  { %2541 = vmatprep.subr.bf16.mxu0 %v7902_v5  ;;  %2799 = vmatprep.subr.bf16.mxu1 %v7905_v6 }
 0x1ce   :  { %2542 = vmatpush1.bf16.msra.mxu0 %v7900_v7  ;;  %2800 = vmatpush1.bf16.msra.mxu1 %v7903_v8 }
 0x1cf   :  { %2554 = vmatprep.subr.bf16.mxu0 %v7911_v9  ;;  %2812 = vmatprep.subr.bf16.mxu1 %v7914_v10 }
 0x1d1   :  { %2544 = vmatmul.mubr.bf16.vlgmr.msra.gmra.mrb[0].mxu0 %v7906_v11  ;;  %2802 = vmatmul.mubr.bf16.vlgmr.msra.gmra.mrb[0].mxu1 %v7906_v11 }
 0x1d2   :  { %2555 = vmatpush1.bf16.msra.mxu0 %v7909_v12  ;;  %2813 = vmatpush1.bf16.msra.mxu1 %v7912_v13  ;;  %v2995_v13 = vld [vmem:[#allocation9] sm:$0xff] }
 0x1d3   :  { %2556 = vmatprep.subr.bf16.mxu0 %v7917_v14  ;;  %2814 = vmatprep.subr.bf16.mxu1 %v7920_v15  ;;  %v2999_v14 = vld [vmem:[#allocation9 + $0x20] sm:$0xff]  ;;  %v2996_v15 = vld [vmem:[#allocation9 + $0x8] sm:$0xff] }
 0x1d4   :  { %2586 = vmatprep.mubr.bf16.mxu0 %v8294_v20  ;;  %2844 = vmatprep.mubr.bf16.mxu1 %v8294_v20  ;;  %v3007_v20 = vld [vmem:[#allocation9 + $0x60] sm:$0xff] }
 0x1d6   :  { %2557 = vmatpush1.bf16.msra.mxu0 %v7915_v16  ;;  %2815 = vmatpush1.bf16.msra.mxu1 %v7918_v17  ;;  %v6725_v16 = vcombine.low %v2995_v13, %v2999_v14  ;;  %v6726_v17 = vcombine.high %v2995_v13, %v2999_v14 }
 0x1d7   :  { %2558 = vmatprep.subr.bf16.mxu0 %v7923_v18  ;;  %2816 = vmatprep.subr.bf16.mxu1 %v7926_v19  ;;  %v3000_v18 = vld [vmem:[#allocation9 + $0x28] sm:$0xff]  ;;  %v3003_v19 = vld [vmem:[#allocation9 + $0x40] sm:$0xff] }
 0x1da   :  { %2559 = vmatpush1.bf16.msra.mxu0 %v7921_v21  ;;  %2817 = vmatpush1.bf16.msra.mxu1 %v7924_v22  ;;  %v6727_v21 = vcombine.low %v2996_v15, %v3000_v18  ;;  %v6728_v22 = vcombine.high %v2996_v15, %v3000_v18 }
 0x1db   :  { %2560 = vmatprep.subr.bf16.mxu0 %v7929_v23  ;;  %2818 = vmatprep.subr.bf16.mxu1 %v7932_v24  ;;  %v6734_v23 = vcombine.high %v3003_v19, %v3007_v20  ;;  %v3004_v24 = vld [vmem:[#allocation9 + $0x48] sm:$0xff] }
 0x1de   :  { %2561 = vmatpush1.bf16.msra.mxu0 %v7927_v25  ;;  %2819 = vmatpush1.bf16.msra.mxu1 %v7930_v26  ;;  %v3008_v25 = vld [vmem:[#allocation9 + $0x68] sm:$0xff]  ;;  %v3011_v26 = vld [vmem:[#allocation9 + $0x80] sm:$0xff] }
 0x1df   :  { %2562 = vmatprep.subr.bf16.mxu0 %v7935_v27  ;;  %2820 = vmatprep.subr.bf16.mxu1 %v7938_v28  ;;  %v6736_v27 = vcombine.high %v3004_v24, %v3008_v25  ;;  %v3015_v28 = vld [vmem:[#allocation9 + $0xa0] sm:$0xff] }
 0x1e2   :  { %2563 = vmatpush1.bf16.msra.mxu0 %v7933_v29  ;;  %2821 = vmatpush1.bf16.msra.mxu1 %v7936_v30  ;;  %v3012_v29 = vld [vmem:[#allocation9 + $0x88] sm:$0xff] }
 0x1e3   :  { %2564 = vmatprep.subr.bf16.mxu0 %v7941_v31  ;;  %2822 = vmatprep.subr.bf16.mxu1 %v7944_v32  ;;  %v3016_v30 = vld [vmem:[#allocation9 + $0xa8] sm:$0xff]  ;;  %v6733_v31 = vcombine.low %v3003_v19, %v3007_v20  ;;  %v6735_v32 = vcombine.low %v3004_v24, %v3008_v25 }
 0x1e4   :  { %v3040_v24 = vld [vmem:[#allocation9 + $0x168] sm:$0xff] }
 0x1e6   :  { %2565 = vmatpush1.bf16.msra.mxu0 %v7939_v33  ;;  %2823 = vmatpush1.bf16.msra.mxu1 %v7942_v34  ;;  %v6742_v33 = vcombine.high %v3011_v26, %v3015_v28  ;;  %v6744_v34 = vcombine.high %v3012_v29, %v3016_v30 }
 0x1e7   :  { %2566 = vmatprep.subr.bf16.mxu0 %v7947_v35  ;;  %2824 = vmatprep.subr.bf16.mxu1 %v7950_v36  ;;  %v3019_v35 = vld [vmem:[#allocation9 + $0xc0] sm:$0xff] }
 0x1e8   :  { %v3023_v36 = vld [vmem:[#allocation9 + $0xe0] sm:$0xff] }
 0x1ea   :  { %2567 = vmatpush1.bf16.msra.mxu0 %v7945_v37  ;;  %2825 = vmatpush1.bf16.msra.mxu1 %v7948_v38  ;;  %v3020_v37 = vld [vmem:[#allocation9 + $0xc8] sm:$0xff] }
 0x1eb   :  { %2568 = vmatprep.subr.bf16.mxu0 %v7953_v39  ;;  %2826 = vmatprep.subr.bf16.mxu1 %v7956_v40  ;;  %v3024_v38 = vld [vmem:[#allocation9 + $0xe8] sm:$0xff]  ;;  %v6741_v39 = vcombine.low %v3011_v26, %v3015_v28  ;;  %v6743_v40 = vcombine.low %v3012_v29, %v3016_v30  ;;  %v3043_v28 = vld [vmem:[#allocation9 + $0x180] sm:$0xff] }
 0x1ec   :  { %v3047_v29 = vld [vmem:[#allocation9 + $0x1a0] sm:$0xff]  ;;  %v3044_v30 = vld [vmem:[#allocation9 + $0x188] sm:$0xff] }
 0x1ee   :  { %2569 = vmatpush1.bf16.msra.mxu0 %v7951_v41  ;;  %2827 = vmatpush1.bf16.msra.mxu1 %v7954_v42  ;;  %v6750_v41 = vcombine.high %v3019_v35, %v3023_v36  ;;  %v6752_v42 = vcombine.high %v3020_v37, %v3024_v38 }
 0x1ef   :  { %4573 = vmatprep.subr.bf16.mxu0 %v6726_v17  ;;  %4659 = vmatprep.subr.bf16.mxu1 %v6728_v22  ;;  %v3036_v22 = vld [vmem:[#allocation9 + $0x148] sm:$0xff] }
 0x1f0   :  { %v6767_v26 = vcombine.low %v3036_v22, %v3040_v24 }
 0x1f1   :  { %2587 = vmatmul.mubr.bf16.vlgmr.msra.gmra.mrb[0].mxu0 %v7957_v43  ;;  %2845 = vmatmul.mubr.bf16.vlgmr.msra.gmra.mrb[0].mxu1 %v7957_v43  ;;  %v3027_v43 = vld [vmem:[#allocation9 + $0x100] sm:$0xff] }
 0x1f2   :  { %4574 = vmatpush1.bf16.msra.mxu0 %v6725_v16  ;;  %4660 = vmatpush1.bf16.msra.mxu1 %v6727_v21  ;;  %v3039_v21 = vld [vmem:[#allocation9 + $0x160] sm:$0xff] }
 0x1f3   :  { %4575 = vmatprep.subr.bf16.mxu0 %v6734_v23  ;;  %4661 = vmatprep.subr.bf16.mxu1 %v6736_v27  ;;  %v6768_v27 = vcombine.high %v3036_v22, %v3040_v24  ;;  %v3088_v22 = vld [vmem:[#allocation9 + $0x2e8] sm:$0xff]  ;;  %v3095_v24 = vld [vmem:[#allocation9 + $0x320] sm:$0xff] }
 0x1f6   :  { %4576 = vmatpush1.bf16.msra.mxu0 %v6733_v31  ;;  %4662 = vmatpush1.bf16.msra.mxu1 %v6735_v32  ;;  %v6774_v31 = vcombine.high %v3043_v28, %v3047_v29  ;;  %v3048_v32 = vld [vmem:[#allocation9 + $0x1a8] sm:$0xff] }
 0x1f7   :  { %4577 = vmatprep.subr.bf16.mxu0 %v6742_v33  ;;  %4663 = vmatprep.subr.bf16.mxu1 %v6744_v34  ;;  %v6773_v33 = vcombine.low %v3043_v28, %v3047_v29  ;;  %v6775_v34 = vcombine.low %v3044_v30, %v3048_v32  ;;  %v3092_v28 = vld [vmem:[#allocation9 + $0x308] sm:$0xff] }
 0x1f8   :  { %v3096_v29 = vld [vmem:[#allocation9 + $0x328] sm:$0xff] }
 0x1fa   :  { %4578 = vmatpush1.bf16.msra.mxu0 %v6741_v39  ;;  %4664 = vmatpush1.bf16.msra.mxu1 %v6743_v40  ;;  %v3056_v40 = vld [vmem:[#allocation9 + $0x1e8] sm:$0xff] }
 0x1fb   :  { %4579 = vmatprep.subr.bf16.mxu0 %v6750_v41  ;;  %4665 = vmatprep.subr.bf16.mxu1 %v6752_v42 }
 0x2c4   :  { %v2588_v53 = vpop.f32.mrb[0].mxu0  ;;  %v2846_v55 = vpop.f32.mrb[0].mxu1 }
 0x2c5   :  { %v8515_v56 = vadd.f32 %v2588_v53, %v506_v50  ;;  %v2590_v57 = vpop.f32.mrb[1].mxu0  ;;  %v2848_v58 = vpop.f32.mrb[1].mxu1  ;;  %v8522_v2 = vadd.f32 %v2846_v55, %v514_v54  ;;  %v6751_v53 = vcombine.low %v3020_v37, %v3024_v38  ;;  %v3055_v37 = vld [vmem:[#allocation9 + $0x1e0] sm:$0xff]  ;;  %v3052_v38 = vld [vmem:[#allocation9 + $0x1c8] sm:$0xff] }
 0x2c6   :  { %v8517_v59 = vadd.f32 %v2590_v57, %v510_v51  ;;  %v2592_v61 = vpop.f32.mrb[2].mxu0  ;;  %v2850_v62 = vpop.f32.mrb[2].mxu1  ;;  %v8528_v5 = vadd.f32 %v2848_v58, %v518_v60  ;;  %v6757_v57 = vcombine.low %v3027_v43, %v3031_v44  ;;  %v6783_v42 = vcombine.low %v3052_v38, %v3056_v40 }
 0x2c7   :  { %v8520_v63 = vadd.f32 %v2592_v61, %v506_v50  ;;  %v2594_v0 = vpop.f32.mrb[3].mxu0  ;;  %v2852_v1 = vpop.f32.mrb[3].mxu1  ;;  %v8530_v6 = vadd.f32 %v2850_v62, %v514_v54  ;;  %v3032_v50 = vld [vmem:[#allocation9 + $0x128] sm:$0xff]  ;;  %v6758_v54 = vcombine.high %v3027_v43, %v3031_v44  ;;  %4666 = vmatpush1.bf16.msra.mxu1 %v6751_v53  ;;  %v6784_v43 = vcombine.high %v3052_v38, %v3056_v40  ;;  %v3059_v44 = vld [vmem:[#allocation9 + $0x200] sm:$0xff] }
 0x2c8   :  { %v2857_v3 = vadd.f32 %v8517_v59, %v8515_v56  ;;  %v8526_v4 = vadd.f32 %v2594_v0, %v510_v51  ;;  %v8537_v11 = vadd.f32 %v2852_v1, %v518_v60  ;;  %v6749_v51 = vcombine.low %v3019_v35, %v3023_v36  ;;  %v3051_v36 = vld [vmem:[#allocation9 + $0x1c0] sm:$0xff]  ;;  %v3064_v53 = vld [vmem:[#allocation9 + $0x228] sm:$0xff] }
 0x2c9   :  { %v6760_v55 = vcombine.high %v3028_v47, %v3032_v50  ;;  %v6759_v58 = vcombine.low %v3028_v47, %v3032_v50  ;;  %v6776_v35 = vcombine.high %v3044_v30, %v3048_v32  ;;  %v6782_v39 = vcombine.high %v3051_v36, %v3055_v37  ;;  %v3063_v47 = vld [vmem:[#allocation9 + $0x220] sm:$0xff]  ;;  %v3060_v50 = vld [vmem:[#allocation9 + $0x208] sm:$0xff] }
 0x2ca   :  { %v2862_v7 = vadd.f32 %v8526_v4, %v8520_v63  ;;  %v2858_v8 = vadd.f32 %v8522_v2, %v2857_v3  ;;  %4580 = vmatpush1.bf16.msra.mxu0 %v6749_v51  ;;  %v6781_v41 = vcombine.low %v3051_v36, %v3055_v37  ;;  %v6790_v51 = vcombine.high %v3059_v44, %v3063_v47  ;;  %v3099_v30 = vld [vmem:[#allocation9 + $0x340] sm:$0xff] }
 0x2cb   :  { %4581 = vmatprep.subr.bf16.mxu0 %v6758_v54  ;;  %4667 = vmatprep.subr.bf16.mxu1 %v6760_v55  ;;  %v6789_v54 = vcombine.low %v3059_v44, %v3063_v47  ;;  %v6791_v55 = vcombine.low %v3060_v50, %v3064_v53  ;;  %v3103_v32 = vld [vmem:[#allocation9 + $0x360] sm:$0xff]  ;;  %v6823_v36 = vcombine.low %v3092_v28, %v3096_v29 }
 0x2cc   :  { %v2859_v9 = vadd.f32 %v8528_v5, %v2858_v8  ;;  %v2863_v10 = vadd.f32 %v8530_v6, %v2862_v7  ;;  %4668 = vmatpush1.bf16.msra.mxu1 %v6759_v58  ;;  %v3067_v58 = vld [vmem:[#allocation9 + $0x240] sm:$0xff]  ;;  %v6830_v37 = vcombine.high %v3099_v30, %v3103_v32 }
 0x2cd   :  { %4669 = vmatprep.subr.bf16.mxu1 %v6768_v27  ;;  %v3111_v40 = vld [vmem:[#allocation9 + $0x3a0] sm:$0xff] }
 0x2ce   :  { %2860 = vadd.xlane.f32.xlu0 %v2859_v9  ;;  %v2864_v12 = vadd.f32 %v8537_v11, %v2863_v10  ;;  %4582 = vmatpush1.bf16.msra.mxu0 %v6757_v57  ;;  %v6792_v57 = vcombine.high %v3060_v50, %v3064_v53  ;;  %v3119_v53 = vld [vmem:[#allocation9 + $0x3e0] sm:$0xff] }
 0x2d0   :  { %4670 = vmatpush1.bf16.msra.mxu1 %v6767_v26 }
 0x2d1   :  { %4671 = vmatprep.subr.bf16.mxu1 %v6776_v35 }
 0x2d2   :  { %2865 = vadd.xlane.f32.xlu0 %v2864_v12 }
 0x2d4   :  { %4672 = vmatpush1.bf16.msra.mxu1 %v6775_v34  ;;  %v3104_v34 = vld [vmem:[#allocation9 + $0x368] sm:$0xff] }
 0x2d5   :  { %4673 = vmatprep.subr.bf16.mxu1 %v6784_v43  ;;  %v6829_v43 = vcombine.low %v3099_v30, %v3103_v32  ;;  %v2855_v30 = vld [vmem:[#allocation6] sm:$0xf] }
 0x2d6   :  { %v2933_v32 = vrot.slane %v2855_v30, %v8504_v48 }
 0x2d8   :  { %4674 = vmatpush1.bf16.msra.mxu1 %v6783_v42  ;;  %v3112_v42 = vld [vmem:[#allocation9 + $0x3a8] sm:$0xff] }
 0x2d9   :  { %4675 = vmatprep.subr.bf16.mxu1 %v6792_v57 }
 0x2dc   :  { %4676 = vmatpush1.bf16.msra.mxu1 %v6791_v55  ;;  %v3120_v55 = vld [vmem:[#allocation9 + $0x3e8] sm:$0xff] }
 0x35b   :  { %v2861_v60 = vpop.xlane.xlu0 %2860 }
 0x35c   :  { %v2868_v61 = vmul.f32 0.001953125, %v2861_v60  ;;  %v3071_v60 = vld [vmem:[#allocation9 + $0x260] sm:$0xff] }
 0x35e   :  { %v8541_v62 = vsub.f32 %v8515_v56, %v2868_v61  ;;  %v8544_v0 = vsub.f32 %v8517_v59, %v2868_v61  ;;  %v8547_v1 = vsub.f32 %v8522_v2, %v2868_v61  ;;  %v8550_v7 = vsub.f32 %v8528_v5, %v2868_v61  ;;  %v3068_v61 = vld [vmem:[#allocation9 + $0x248] sm:$0xff] }
 0x35f   :  { %v2866_v3 = vpop.xlane.xlu0 %2865 }
 0x360   :  { %v2869_v8 = vmul.f32 0.001953125, %v2866_v3  ;;  %v2878_v9 = vmul.f32 %v8541_v62, %v8541_v62  ;;  %v2879_v10 = vmul.f32 %v8544_v0, %v8544_v0  ;;  %v2880_v56 = vmul.f32 %v8547_v1, %v8547_v1 }
 0x361   :  { %v2881_v13 = vmul.f32 %v8550_v7, %v8550_v7  ;;  %v6798_v3 = vcombine.high %v3067_v58, %v3071_v60 }
 0x362   :  { %v8559_v59 = vsub.f32 %v8520_v63, %v2869_v8  ;;  %v8562_v2 = vsub.f32 %v8526_v4, %v2869_v8  ;;  %v2886_v12 = vadd.f32 %v2879_v10, %v2878_v9  ;;  %v8565_v5 = vsub.f32 %v8530_v6, %v2869_v8 }
 0x363   :  { %v8570_v15 = vsub.f32 %v8537_v11, %v2869_v8  ;;  %v3035_v11 = vld [vmem:[#allocation9 + $0x140] sm:$0xff]  ;;  %v3072_v8 = vld [vmem:[#allocation9 + $0x268] sm:$0xff]  ;;  %v6797_v9 = vcombine.low %v3067_v58, %v3071_v60 }
 0x364   :  { %v2887_v14 = vadd.f32 %v2886_v12, %v2880_v56  ;;  %v2882_v16 = vmul.f32 %v8559_v59, %v8559_v59  ;;  %v2883_v63 = vmul.f32 %v8562_v2, %v8562_v2  ;;  %v2884_v4 = vmul.f32 %v8565_v5, %v8565_v5  ;;  %v3075_v12 = vld [vmem:[#allocation9 + $0x280] sm:$0xff] }
 0x365   :  { %v2885_v6 = vmul.f32 %v8570_v15, %v8570_v15  ;;  %v6766_v23 = vcombine.high %v3035_v11, %v3039_v21  ;;  %v6765_v25 = vcombine.low %v3035_v11, %v3039_v21  ;;  %v6799_v10 = vcombine.low %v3068_v61, %v3072_v8 }
 0x366   :  { %v2888_v17 = vadd.f32 %v2887_v14, %v2881_v13  ;;  %v2891_v18 = vadd.f32 %v2883_v63, %v2882_v16  ;;  %v6800_v56 = vcombine.high %v3068_v61, %v3072_v8  ;;  %v3079_v13 = vld [vmem:[#allocation9 + $0x2a0] sm:$0xff]  ;;  %v3076_v14 = vld [vmem:[#allocation9 + $0x288] sm:$0xff] }
 0x367   :  { %4583 = vmatprep.subr.bf16.mxu0 %v6766_v23  ;;  %v6806_v16 = vcombine.high %v3075_v12, %v3079_v13  ;;  %v3080_v63 = vld [vmem:[#allocation9 + $0x2a8] sm:$0xff]  ;;  %v3091_v23 = vld [vmem:[#allocation9 + $0x300] sm:$0xff] }
 0x368   :  { %2889 = vadd.xlane.f32.xlu1 %v2888_v17  ;;  %v2892_v19 = vadd.f32 %v2891_v18, %v2884_v4  ;;  %4584 = vmatpush1.bf16.msra.mxu0 %v6765_v25  ;;  %v6805_v17 = vcombine.low %v3075_v12, %v3079_v13  ;;  %v6807_v4 = vcombine.low %v3076_v14, %v3080_v63  ;;  %v8588_v13 = vld [vmem:[#allocation9 + $0x428] sm:$0xff] }
 0x369   :  { %4585 = vmatprep.subr.bf16.mxu0 %v6774_v31  ;;  %4677 = vmatprep.subr.bf16.mxu1 %v6800_v56  ;;  %v6808_v18 = vcombine.high %v3076_v14, %v3080_v63  ;;  %v6822_v27 = vcombine.high %v3091_v23, %v3095_v24  ;;  %v6824_v31 = vcombine.high %v3092_v28, %v3096_v29  ;;  %v8584_v56 = vld [vmem:[#allocation9 + $0x408] sm:$0xff] }
 0x36a   :  { %v2893_v20 = vadd.f32 %v2892_v19, %v2885_v6  ;;  %4678 = vmatpush1.bf16.msra.mxu1 %v6799_v10  ;;  %v3083_v6 = vld [vmem:[#allocation9 + $0x2c0] sm:$0xff]  ;;  %v6821_v35 = vcombine.low %v3091_v23, %v3095_v24  ;;  %v6856_v63 = vcombine.high %v8584_v56, %v8588_v13 }
 0x36b   :  { %4679 = vmatprep.subr.bf16.mxu1 %v6808_v18  ;;  %v3087_v19 = vld [vmem:[#allocation9 + $0x2e0] sm:$0xff] }
 0x36c   :  { %2894 = vadd.xlane.f32.xlu1 %v2893_v20  ;;  %4586 = vmatpush1.bf16.msra.mxu0 %v6773_v33  ;;  %v3084_v20 = vld [vmem:[#allocation9 + $0x2c8] sm:$0xff]  ;;  %v6813_v11 = vcombine.low %v3083_v6, %v3087_v19  ;;  %v6814_v21 = vcombine.high %v3083_v6, %v3087_v19  ;;  %v8582_v10 = vld [vmem:[#allocation9 + $0x420] sm:$0xff] }
 0x36d   :  { %4587 = vmatprep.subr.bf16.mxu0 %v6782_v39  ;;  %v6815_v25 = vcombine.low %v3084_v20, %v3088_v22  ;;  %v6816_v26 = vcombine.high %v3084_v20, %v3088_v22  ;;  %v3100_v33 = vld [vmem:[#allocation9 + $0x348] sm:$0xff]  ;;  %v3107_v39 = vld [vmem:[#allocation9 + $0x380] sm:$0xff] }
 0x36e   :  { %4680 = vmatpush1.bf16.msra.mxu1 %v6807_v4  ;;  %v6832_v38 = vcombine.high %v3100_v33, %v3104_v34  ;;  %v6831_v44 = vcombine.low %v3100_v33, %v3104_v34  ;;  %v6838_v47 = vcombine.high %v3107_v39, %v3111_v40  ;;  %v6837_v57 = vcombine.low %v3107_v39, %v3111_v40 }
 0x36f   :  { %4681 = vmatprep.subr.bf16.mxu1 %v6816_v26  ;;  %v2929_v33 = vrot.slane %v2855_v30, %v8501_v46  ;;  %v2937_v34 = vrot.slane %v2855_v30, %v8507_v49 }
 0x370   :  { %4588 = vmatpush1.bf16.msra.mxu0 %v6781_v41  ;;  %v3108_v41 = vld [vmem:[#allocation9 + $0x388] sm:$0xff] }
 0x371   :  { %4589 = vmatprep.subr.bf16.mxu0 %v6790_v51  ;;  %v6840_v50 = vcombine.high %v3108_v41, %v3112_v42  ;;  %v3115_v51 = vld [vmem:[#allocation9 + $0x3c0] sm:$0xff]  ;;  %v6839_v58 = vcombine.low %v3108_v41, %v3112_v42  ;;  %v2941_v41 = vrot.slane %v2855_v30, %v8512_v52 }
 0x372   :  { %4682 = vmatpush1.bf16.msra.mxu1 %v6815_v25  ;;  %v6846_v60 = vcombine.high %v3115_v51, %v3119_v53 }
 0x373   :  { %4683 = vmatprep.subr.bf16.mxu1 %v6824_v31  ;;  %v2856_v31 = vld [vmem:[#allocation7] sm:$0xf] }
 0x374   :  { %4590 = vmatpush1.bf16.msra.mxu0 %v6789_v54  ;;  %v3116_v54 = vld [vmem:[#allocation9 + $0x3c8] sm:$0xff]  ;;  %v2962_v39 = vrot.slane %v2856_v31, %v8504_v48  ;;  %v2966_v42 = vrot.slane %v2856_v31, %v8507_v49 }
 0x375   :  { %4591 = vmatprep.subr.bf16.mxu0 %v6798_v3  ;;  %v6848_v61 = vcombine.high %v3116_v54, %v3120_v55  ;;  %v6845_v3 = vcombine.low %v3115_v51, %v3119_v53  ;;  %v6847_v8 = vcombine.low %v3116_v54, %v3120_v55 }
 0x376   :  { %4684 = vmatpush1.bf16.msra.mxu1 %v6823_v36 }
 0x377   :  { %4685 = vmatprep.subr.bf16.mxu1 %v6832_v38 }
 0x378   :  { %4592 = vmatpush1.bf16.msra.mxu0 %v6797_v9  ;;  %v8580_v9 = vld [vmem:[#allocation9 + $0x400] sm:$0xff] }
 0x379   :  { %4593 = vmatprep.subr.bf16.mxu0 %v6806_v16  ;;  %v6854_v12 = vcombine.high %v8580_v9, %v8582_v10  ;;  %v6853_v14 = vcombine.low %v8580_v9, %v8582_v10  ;;  %v6855_v16 = vcombine.low %v8584_v56, %v8588_v13 }
 0x37a   :  { %4686 = vmatpush1.bf16.msra.mxu1 %v6831_v44 }
 0x37b   :  { %4687 = vmatprep.subr.bf16.mxu1 %v6840_v50 }
 0x37c   :  { %4594 = vmatpush1.bf16.msra.mxu0 %v6805_v17 }
 0x37d   :  { %4595 = vmatprep.subr.bf16.mxu0 %v6814_v21 }
 0x37e   :  { %4688 = vmatpush1.bf16.msra.mxu1 %v6839_v58 }
 0x37f   :  { %4689 = vmatprep.subr.bf16.mxu1 %v6848_v61 }
 0x380   :  { %4596 = vmatpush1.bf16.msra.mxu0 %v6813_v11 }
 0x381   :  { %4597 = vmatprep.subr.bf16.mxu0 %v6822_v27 }
 0x382   :  { %4690 = vmatpush1.bf16.msra.mxu1 %v6847_v8 }
 0x383   :  { %4702 = vmatprep.subr.bf16.mxu1 %v6856_v63 }
 0x384   :  { %4598 = vmatpush1.bf16.msra.mxu0 %v6821_v35 }
 0x385   :  { %4599 = vmatprep.subr.bf16.mxu0 %v6830_v37 }
 0x388   :  { %4600 = vmatpush1.bf16.msra.mxu0 %v6829_v43 }
 0x389   :  { %4601 = vmatprep.subr.bf16.mxu0 %v6838_v47  ;;  %v2958_v47 = vrot.slane %v2856_v31, %v8501_v46 }
 0x38c   :  { %4602 = vmatpush1.bf16.msra.mxu0 %v6837_v57 }
 0x38d   :  { %4603 = vmatprep.subr.bf16.mxu0 %v6846_v60 }
 0x390   :  { %4604 = vmatpush1.bf16.msra.mxu0 %v6845_v3 }
 0x391   :  { %4616 = vmatprep.subr.bf16.mxu0 %v6854_v12 }
 0x3f5   :  { %v2890_v17 = vpop.xlane.xlu1 %2889 }
 0x3f6   :  { %v2897_v4 = vmul.f32 0.0019569471, %v2890_v17 }
 0x3f8   :  { %8086 = vrsqrt.f32 %v2897_v4  ;;  %vm2901_vm0 = vcmp.eq.f32.partialorder %v2897_v4, inf  ;;  %v2904_v11 = vand.u32 2147483648, %v2897_v4  ;;  %vm2903_vm1 = vcmp.eq.f32.partialorder %v2897_v4, 0.0 }
 0x3f9   :  { %v2895_v18 = vpop.xlane.xlu1 %2894 }
 0x3fa   :  { %v2898_v6 = vmul.f32 0.0019569471, %v2895_v18 }
 0x3fc   :  { %8088 = vrsqrt.f32 %v2898_v6  ;;  %vm2908_vm2 = vcmp.eq.f32.partialorder %v2898_v6, inf  ;;  %v2911_v26 = vand.u32 2147483648, %v2898_v6  ;;  %vm2910_vm3 = vcmp.eq.f32.partialorder %v2898_v6, 0.0 }
 0x402   :  { %v8087_v19 = vpop.eup %8086 }
 0x403   :  { %v2900_v20 = vmul.f32 %v8087_v19, %v2897_v4 }
 0x405   :  { %v2902_v21 = vsel %vm2901_vm0, %v2897_v4, %v2900_v20 }
 0x406   :  { %v8089_v22 = vpop.eup %8088  ;;  %v2905_v23 = vsel %vm2903_vm1, %v2904_v11, %v2902_v21  ;;  %v3135_v11 = vld [vmem:[#allocation9 + $0x460] sm:$0xff]  ;;  %v3136_v21 = vld [vmem:[#allocation9 + $0x468] sm:$0xff] }
 0x407   :  { %v2913_v24 = vadd.f32 0.001, %v2905_v23  ;;  %v2907_v25 = vmul.f32 %v8089_v22, %v2898_v6 }
 0x409   :  { %8090 = vrcp.f32 %v2913_v24  ;;  %v2909_v27 = vsel %vm2908_vm2, %v2898_v6, %v2907_v25 }
 0x40a   :  { %v2912_v28 = vsel %vm2910_vm3, %v2911_v26, %v2909_v27  ;;  %v3139_v27 = vld [vmem:[#allocation9 + $0x480] sm:$0xff] }
 0x40b   :  { %v2914_v29 = vadd.f32 0.001, %v2912_v28 }
 0x40d   :  { %8092 = vrcp.f32 %v2914_v29 }
 0x413   :  { %v8091_v35 = vpop.eup %8090 }
 0x414   :  { %v2918_v36 = vmul.f32 %v8091_v35, %v8544_v0  ;;  %v2917_v37 = vmul.f32 %v8091_v35, %v8541_v62  ;;  %v2919_v38 = vmul.f32 %v8091_v35, %v8547_v1  ;;  %v2920_v40 = vmul.f32 %v8091_v35, %v8550_v7 }
 0x415   :  { %v2970_v1 = vrot.slane %v2856_v31, %v8512_v52  ;;  %v3143_v31 = vld [vmem:[#allocation9 + $0x4a0] sm:$0xff] }
 0x416   :  { %v2947_v43 = vmul.f32 %v2933_v32, %v2918_v36  ;;  %v2946_v44 = vmul.f32 %v2929_v33, %v2917_v37  ;;  %v2948_v50 = vmul.f32 %v2937_v34, %v2919_v38  ;;  %v2949_v54 = vmul.f32 %v2941_v41, %v2920_v40  ;;  %v3151_v40 = vld [vmem:[#allocation9 + $0x4e0] sm:$0xff] }
 0x417   :  { %v8093_v51 = vpop.eup %8092  ;;  %v6870_v37 = vcombine.high %v3139_v27, %v3143_v31  ;;  %v6869_v9 = vcombine.low %v3139_v27, %v3143_v31  ;;  %v3195_v31 = vld [vmem:[#allocation9 + $0x640] sm:$0xff] }
 0x418   :  { %v2922_v0 = vmul.f32 %v8093_v51, %v8562_v2  ;;  %v2921_v62 = vmul.f32 %v8093_v51, %v8559_v59  ;;  %v2924_v53 = vmul.f32 %v8093_v51, %v8570_v15  ;;  %v2923_v7 = vmul.f32 %v8093_v51, %v8565_v5  ;;  %v3131_v15 = vld [vmem:[#allocation9 + $0x440] sm:$0xff]  ;;  %v3132_v5 = vld [vmem:[#allocation9 + $0x448] sm:$0xff] }
 0x419   :  { %v2977_v55 = vadd.f32 %v2966_v42, %v2948_v50  ;;  %v2976_v58 = vadd.f32 %v2962_v39, %v2947_v43  ;;  %v2975_v61 = vadd.f32 %v2958_v47, %v2946_v44  ;;  %v2978_v17 = vadd.f32 %v2970_v1, %v2949_v54  ;;  %v3156_v43 = vld [vmem:[#allocation9 + $0x508] sm:$0xff] }
 0x41a   :  { %v2951_v57 = vmul.f32 %v2933_v32, %v2922_v0  ;;  %v2950_v60 = vmul.f32 %v2929_v33, %v2921_v62  ;;  %v2953_v3 = vmul.f32 %v2941_v41, %v2924_v53  ;;  %v2952_v8 = vmul.f32 %v2937_v34, %v2923_v7  ;;  %v3140_v32 = vld [vmem:[#allocation9 + $0x488] sm:$0xff]  ;;  %v3163_v62 = vld [vmem:[#allocation9 + $0x540] sm:$0xff] }
 0x41b   :  { %v2984_v59 = vmax.f32 %v2976_v58, 0.0  ;;  %v2983_v6 = vmax.f32 %v2975_v61, 0.0  ;;  %v2985_v22 = vmax.f32 %v2977_v55, 0.0  ;;  %v2986_v26 = vmax.f32 %v2978_v17, 0.0  ;;  %v3144_v33 = vld [vmem:[#allocation9 + $0x4a8] sm:$0xff]  ;;  %v3175_v61 = vld [vmem:[#allocation9 + $0x5a0] sm:$0xff] }
 0x41c   :  { %v2980_v12 = vadd.f32 %v2962_v39, %v2951_v57  ;;  %v2979_v63 = vadd.f32 %v2958_v47, %v2950_v60  ;;  %v2982_v2 = vadd.f32 %v2970_v1, %v2953_v3  ;;  %v2981_v4 = vadd.f32 %v2966_v42, %v2952_v8  ;;  %v3147_v39 = vld [vmem:[#allocation9 + $0x4c0] sm:$0xff]  ;;  %v3148_v41 = vld [vmem:[#allocation9 + $0x4c8] sm:$0xff] }
 0x41d   :  { %v6862_v29 = vcombine.high %v3131_v15, %v3135_v11  ;;  %v6864_v30 = vcombine.high %v3132_v5, %v3136_v21  ;;  %v6861_v35 = vcombine.low %v3131_v15, %v3135_v11  ;;  %v6863_v36 = vcombine.low %v3132_v5, %v3136_v21  ;;  %v3152_v42 = vld [vmem:[#allocation9 + $0x4e8] sm:$0xff]  ;;  %v3167_v1 = vld [vmem:[#allocation9 + $0x560] sm:$0xff] }
 0x41e   :  { %v2988_v18 = vmax.f32 %v2980_v12, 0.0  ;;  %v2987_v19 = vmax.f32 %v2979_v63, 0.0  ;;  %v2990_v20 = vmax.f32 %v2982_v2, 0.0  ;;  %v2989_v23 = vmax.f32 %v2981_v4, 0.0  ;;  %v3160_v44 = vld [vmem:[#allocation9 + $0x528] sm:$0xff]  ;;  %v3171_v60 = vld [vmem:[#allocation9 + $0x580] sm:$0xff] }
 0x41f   :  { %v6872_v38 = vcombine.high %v3140_v32, %v3144_v33  ;;  %v6871_v10 = vcombine.low %v3140_v32, %v3144_v33  ;;  %v6878_v56 = vcombine.high %v3147_v39, %v3151_v40  ;;  %v6880_v13 = vcombine.high %v3148_v41, %v3152_v42  ;;  %v3164_v53 = vld [vmem:[#allocation9 + $0x548] sm:$0xff]  ;;  %v3179_v4 = vld [vmem:[#allocation9 + $0x5c0] sm:$0xff] }
 0x420   :  { %v8612_v24 = vpack.c.bf16 %v2988_v18, %v2984_v59  ;;  %v8614_v25 = vpack.c.bf16 %v2987_v19, %v2983_v6  ;;  %v8616_v28 = vpack.c.bf16 %v2989_v23, %v2985_v22  ;;  %v8622_v34 = vpack.c.bf16 %v2990_v20, %v2986_v26  ;;  %v3168_v54 = vld [vmem:[#allocation9 + $0x568] sm:$0xff]  ;;  %v3183_v59 = vld [vmem:[#allocation9 + $0x5e0] sm:$0xff] }
 0x421   :  { %v6877_v47 = vcombine.low %v3147_v39, %v3151_v40  ;;  %v6879_v50 = vcombine.low %v3148_v41, %v3152_v42  ;;  %v6888_v0 = vcombine.high %v3156_v43, %v3160_v44  ;;  %v6887_v55 = vcombine.low %v3156_v43, %v3160_v44  ;;  %v3172_v3 = vld [vmem:[#allocation9 + $0x588] sm:$0xff]  ;;  %v3187_v5 = vld [vmem:[#allocation9 + $0x600] sm:$0xff] }
 0x422   :  { %4605 = vmatprep.mubr.bf16.mxu0 %v8612_v24  ;;  %4691 = vmatprep.mubr.bf16.mxu1 %v8612_v24  ;;  %v6894_v57 = vcombine.high %v3163_v62, %v3167_v1  ;;  %v6896_v58 = vcombine.high %v3164_v53, %v3168_v54  ;;  %v3176_v8 = vld [vmem:[#allocation9 + $0x5a8] sm:$0xff]  ;;  %v6893_v12 = vcombine.low %v3163_v62, %v3167_v1  ;;  %v3191_v21 = vld [vmem:[#allocation9 + $0x620] sm:$0xff] }
 0x423   :  { %4606 = vmatmul.mubr.bf16.vlgmr.msra.gmra.mrb[4].mxu0 %v8614_v25  ;;  %4692 = vmatmul.mubr.bf16.vlgmr.msra.gmra.mrb[4].mxu1 %v8614_v25  ;;  %v6895_v63 = vcombine.low %v3164_v53, %v3168_v54  ;;  %v6902_v17 = vcombine.high %v3171_v60, %v3175_v61  ;;  %v6904_v2 = vcombine.high %v3172_v3, %v3176_v8  ;;  %v3180_v18 = vld [vmem:[#allocation9 + $0x5c8] sm:$0xff]  ;;  %v3199_v32 = vld [vmem:[#allocation9 + $0x660] sm:$0xff] }
 0x424   :  { %4617 = vmatpush1.bf16.msra.mxu0 %v6853_v14  ;;  %4703 = vmatpush1.bf16.msra.mxu1 %v6855_v16  ;;  %v3155_v14 = vld [vmem:[#allocation9 + $0x500] sm:$0xff]  ;;  %v3184_v6 = vld [vmem:[#allocation9 + $0x5e8] sm:$0xff]  ;;  %v6901_v19 = vcombine.low %v3171_v60, %v3175_v61  ;;  %v6903_v15 = vcombine.low %v3172_v3, %v3176_v8  ;;  %v6910_v20 = vcombine.high %v3179_v4, %v3183_v59 }
 0x425   :  { %4648 = vmatprep.mubr.bf16.mxu0 %v8622_v34  ;;  %4734 = vmatprep.mubr.bf16.mxu1 %v8622_v34  ;;  %v3159_v16 = vld [vmem:[#allocation9 + $0x520] sm:$0xff]  ;;  %v6912_v11 = vcombine.high %v3180_v18, %v3184_v6  ;;  %v3188_v22 = vld [vmem:[#allocation9 + $0x608] sm:$0xff]  ;;  %v6909_v26 = vcombine.low %v3179_v4, %v3183_v59  ;;  %v6911_v27 = vcombine.low %v3180_v18, %v3184_v6 }
 0x426   :  { %4618 = vmatprep.subr.bf16.mxu0 %v6862_v29  ;;  %4704 = vmatprep.subr.bf16.mxu1 %v6864_v30  ;;  %v6886_v51 = vcombine.high %v3155_v14, %v3159_v16  ;;  %v6885_v7 = vcombine.low %v3155_v14, %v3159_v16  ;;  %v3192_v23 = vld [vmem:[#allocation9 + $0x628] sm:$0xff]  ;;  %v6918_v29 = vcombine.high %v3187_v5, %v3191_v21  ;;  %v3203_v40 = vld [vmem:[#allocation9 + $0x680] sm:$0xff] }
 0x427   :  { %v6920_v30 = vcombine.high %v3188_v22, %v3192_v23  ;;  %v3196_v33 = vld [vmem:[#allocation9 + $0x648] sm:$0xff]  ;;  %v3207_v41 = vld [vmem:[#allocation9 + $0x6a0] sm:$0xff] }
 0x428   :  { %4619 = vmatpush1.bf16.msra.mxu0 %v6861_v35  ;;  %4705 = vmatpush1.bf16.msra.mxu1 %v6863_v36  ;;  %v3200_v35 = vld [vmem:[#allocation9 + $0x668] sm:$0xff]  ;;  %v6917_v36 = vcombine.low %v3187_v5, %v3191_v21  ;;  %v3211_v16 = vld [vmem:[#allocation9 + $0x6c0] sm:$0xff] }
 0x429   :  { %4620 = vmatprep.subr.bf16.mxu0 %v6870_v37  ;;  %4706 = vmatprep.subr.bf16.mxu1 %v6872_v38  ;;  %v6919_v37 = vcombine.low %v3188_v22, %v3192_v23  ;;  %v6926_v38 = vcombine.high %v3195_v31, %v3199_v32  ;;  %v6928_v39 = vcombine.high %v3196_v33, %v3200_v35  ;;  %v3204_v42 = vld [vmem:[#allocation9 + $0x688] sm:$0xff]  ;;  %v3215_v43 = vld [vmem:[#allocation9 + $0x6e0] sm:$0xff] }
 0x42a   :  { %v3212_v44 = vld [vmem:[#allocation9 + $0x6c8] sm:$0xff]  ;;  %v3219_v1 = vld [vmem:[#allocation9 + $0x700] sm:$0xff] }
 0x42b   :  { %v3223_v53 = vld [vmem:[#allocation9 + $0x720] sm:$0xff]  ;;  %v3220_v54 = vld [vmem:[#allocation9 + $0x708] sm:$0xff] }
 0x42c   :  { %4621 = vmatpush1.bf16.msra.mxu0 %v6869_v9  ;;  %4707 = vmatpush1.bf16.msra.mxu1 %v6871_v10  ;;  %v3208_v9 = vld [vmem:[#allocation9 + $0x6a8] sm:$0xff]  ;;  %v6925_v10 = vcombine.low %v3195_v31, %v3199_v32  ;;  %v3227_v61 = vld [vmem:[#allocation9 + $0x740] sm:$0xff]  ;;  %v2997_v32 = vld [vmem:[#allocation9 + $0x10] sm:$0xff] }
 0x42d   :  { %4622 = vmatprep.subr.bf16.mxu0 %v6878_v56  ;;  %4708 = vmatprep.subr.bf16.mxu1 %v6880_v13  ;;  %v6927_v56 = vcombine.low %v3196_v33, %v3200_v35  ;;  %v6934_v13 = vcombine.high %v3203_v40, %v3207_v41  ;;  %v6936_v14 = vcombine.high %v3204_v42, %v3208_v9  ;;  %v3231_v3 = vld [vmem:[#allocation9 + $0x760] sm:$0xff]  ;;  %v3228_v8 = vld [vmem:[#allocation9 + $0x748] sm:$0xff]  ;;  %v3001_v33 = vld [vmem:[#allocation9 + $0x30] sm:$0xff] }
 0x42e   :  { %v3235_v59 = vld [vmem:[#allocation9 + $0x780] sm:$0xff]  ;;  %v3236_v6 = vld [vmem:[#allocation9 + $0x788] sm:$0xff]  ;;  %v2998_v35 = vld [vmem:[#allocation9 + $0x18] sm:$0xff] }
 0x42f   :  { %v3239_v18 = vld [vmem:[#allocation9 + $0x7a0] sm:$0xff]  ;;  %v3244_v23 = vld [vmem:[#allocation9 + $0x7c8] sm:$0xff] }
 0x430   :  { %4623 = vmatpush1.bf16.msra.mxu0 %v6877_v47  ;;  %4709 = vmatpush1.bf16.msra.mxu1 %v6879_v50  ;;  %v3216_v47 = vld [vmem:[#allocation9 + $0x6e8] sm:$0xff]  ;;  %v6933_v50 = vcombine.low %v3203_v40, %v3207_v41  ;;  %v3243_v21 = vld [vmem:[#allocation9 + $0x7c0] sm:$0xff]  ;;  %v3005_v41 = vld [vmem:[#allocation9 + $0x50] sm:$0xff] }
 0x431   :  { %4624 = vmatprep.subr.bf16.mxu0 %v6886_v51  ;;  %4710 = vmatprep.subr.bf16.mxu1 %v6888_v0  ;;  %v6935_v51 = vcombine.low %v3204_v42, %v3208_v9  ;;  %v6942_v0 = vcombine.high %v3211_v16, %v3215_v43  ;;  %v6944_v62 = vcombine.high %v3212_v44, %v3216_v47  ;;  %v3247_v22 = vld [vmem:[#allocation9 + $0x7e0] sm:$0xff]  ;;  %v3009_v42 = vld [vmem:[#allocation9 + $0x70] sm:$0xff]  ;;  %v3006_v9 = vld [vmem:[#allocation9 + $0x58] sm:$0xff] }
 0x434   :  { %4625 = vmatpush1.bf16.msra.mxu0 %v6885_v7  ;;  %4711 = vmatpush1.bf16.msra.mxu1 %v6887_v55  ;;  %v3224_v7 = vld [vmem:[#allocation9 + $0x728] sm:$0xff]  ;;  %v6941_v55 = vcombine.low %v3211_v16, %v3215_v43  ;;  %v3013_v43 = vld [vmem:[#allocation9 + $0x90] sm:$0xff] }
 0x435   :  { %4626 = vmatprep.subr.bf16.mxu0 %v6894_v57  ;;  %4712 = vmatprep.subr.bf16.mxu1 %v6896_v58  ;;  %v6943_v57 = vcombine.low %v3212_v44, %v3216_v47  ;;  %v6950_v58 = vcombine.high %v3219_v1, %v3223_v53  ;;  %v6952_v60 = vcombine.high %v3220_v54, %v3224_v7  ;;  %v3017_v44 = vld [vmem:[#allocation9 + $0xb0] sm:$0xff]  ;;  %v3014_v47 = vld [vmem:[#allocation9 + $0x98] sm:$0xff] }
 0x438   :  { %4627 = vmatpush1.bf16.msra.mxu0 %v6893_v12  ;;  %4713 = vmatpush1.bf16.msra.mxu1 %v6895_v63  ;;  %v3232_v12 = vld [vmem:[#allocation9 + $0x768] sm:$0xff]  ;;  %v6949_v63 = vcombine.low %v3219_v1, %v3223_v53  ;;  %v3021_v53 = vld [vmem:[#allocation9 + $0xd0] sm:$0xff] }
 0x439   :  { %4628 = vmatprep.subr.bf16.mxu0 %v6902_v17  ;;  %4714 = vmatprep.subr.bf16.mxu1 %v6904_v2  ;;  %v6951_v17 = vcombine.low %v3220_v54, %v3224_v7  ;;  %v6958_v2 = vcombine.high %v3227_v61, %v3231_v3  ;;  %v6960_v4 = vcombine.high %v3228_v8, %v3232_v12  ;;  %v3025_v54 = vld [vmem:[#allocation9 + $0xf0] sm:$0xff]  ;;  %v3022_v7 = vld [vmem:[#allocation9 + $0xd8] sm:$0xff] }
 0x43c   :  { %4629 = vmatpush1.bf16.msra.mxu0 %v6901_v19  ;;  %4715 = vmatpush1.bf16.msra.mxu1 %v6903_v15  ;;  %v3240_v19 = vld [vmem:[#allocation9 + $0x7a8] sm:$0xff]  ;;  %v6957_v15 = vcombine.low %v3227_v61, %v3231_v3  ;;  %v3029_v3 = vld [vmem:[#allocation9 + $0x110] sm:$0xff] }
 0x43d   :  { %4630 = vmatprep.subr.bf16.mxu0 %v6910_v20  ;;  %4716 = vmatprep.subr.bf16.mxu1 %v6912_v11  ;;  %v6959_v20 = vcombine.low %v3228_v8, %v3232_v12  ;;  %v6966_v11 = vcombine.high %v3235_v59, %v3239_v18  ;;  %v6968_v5 = vcombine.high %v3236_v6, %v3240_v19  ;;  %v3033_v8 = vld [vmem:[#allocation9 + $0x130] sm:$0xff]  ;;  %v3034_v12 = vld [vmem:[#allocation9 + $0x138] sm:$0xff] }
 0x440   :  { %4631 = vmatpush1.bf16.msra.mxu0 %v6909_v26  ;;  %4717 = vmatpush1.bf16.msra.mxu1 %v6911_v27  ;;  %v3248_v26 = vld [vmem:[#allocation9 + $0x7e8] sm:$0xff]  ;;  %v6965_v27 = vcombine.low %v3235_v59, %v3239_v18  ;;  %v3037_v59 = vld [vmem:[#allocation9 + $0x150] sm:$0xff] }
 0x441   :  { %4632 = vmatprep.subr.bf16.mxu0 %v6918_v29  ;;  %4718 = vmatprep.subr.bf16.mxu1 %v6920_v30  ;;  %v6967_v29 = vcombine.low %v3236_v6, %v3240_v19  ;;  %v6974_v30 = vcombine.high %v3243_v21, %v3247_v22  ;;  %v6976_v31 = vcombine.high %v3244_v23, %v3248_v26  ;;  %v3041_v18 = vld [vmem:[#allocation9 + $0x170] sm:$0xff]  ;;  %v3038_v6 = vld [vmem:[#allocation9 + $0x158] sm:$0xff] }
 0x442   :  { %v3042_v19 = vld [vmem:[#allocation9 + $0x178] sm:$0xff] }
 0x444   :  { %4633 = vmatpush1.bf16.msra.mxu0 %v6917_v36  ;;  %4719 = vmatpush1.bf16.msra.mxu1 %v6919_v37  ;;  %v3002_v36 = vld [vmem:[#allocation9 + $0x38] sm:$0xff]  ;;  %v6973_v37 = vcombine.low %v3243_v21, %v3247_v22  ;;  %v3045_v21 = vld [vmem:[#allocation9 + $0x190] sm:$0xff] }
 0x445   :  { %4634 = vmatprep.subr.bf16.mxu0 %v6926_v38  ;;  %4720 = vmatprep.subr.bf16.mxu1 %v6928_v39  ;;  %v6975_v38 = vcombine.low %v3244_v23, %v3248_v26  ;;  %v6730_v39 = vcombine.high %v2997_v32, %v3001_v33  ;;  %v6732_v40 = vcombine.high %v2998_v35, %v3002_v36  ;;  %v3049_v22 = vld [vmem:[#allocation9 + $0x1b0] sm:$0xff]  ;;  %v3046_v23 = vld [vmem:[#allocation9 + $0x198] sm:$0xff] }
 0x446   :  { %v3050_v26 = vld [vmem:[#allocation9 + $0x1b8] sm:$0xff] }
 0x448   :  { %4635 = vmatpush1.bf16.msra.mxu0 %v6925_v10  ;;  %4721 = vmatpush1.bf16.msra.mxu1 %v6927_v56  ;;  %v3010_v10 = vld [vmem:[#allocation9 + $0x78] sm:$0xff]  ;;  %v6729_v56 = vcombine.low %v2997_v32, %v3001_v33  ;;  %v3053_v32 = vld [vmem:[#allocation9 + $0x1d0] sm:$0xff] }
 0x449   :  { %4636 = vmatprep.subr.bf16.mxu0 %v6934_v13  ;;  %4722 = vmatprep.subr.bf16.mxu1 %v6936_v14  ;;  %v6731_v13 = vcombine.low %v2998_v35, %v3002_v36  ;;  %v6738_v14 = vcombine.high %v3005_v41, %v3009_v42  ;;  %v6740_v16 = vcombine.high %v3006_v9, %v3010_v10  ;;  %v3057_v33 = vld [vmem:[#allocation9 + $0x1f0] sm:$0xff]  ;;  %v3054_v35 = vld [vmem:[#allocation9 + $0x1d8] sm:$0xff] }
 0x44a   :  { %v3058_v36 = vld [vmem:[#allocation9 + $0x1f8] sm:$0xff] }
 0x44c   :  { %4637 = vmatpush1.bf16.msra.mxu0 %v6933_v50  ;;  %4723 = vmatpush1.bf16.msra.mxu1 %v6935_v51  ;;  %v3018_v50 = vld [vmem:[#allocation9 + $0xb8] sm:$0xff]  ;;  %v6737_v51 = vcombine.low %v3005_v41, %v3009_v42  ;;  %v3061_v41 = vld [vmem:[#allocation9 + $0x210] sm:$0xff] }
 0x44d   :  { %4638 = vmatprep.subr.bf16.mxu0 %v6942_v0  ;;  %4724 = vmatprep.subr.bf16.mxu1 %v6944_v62  ;;  %v6739_v0 = vcombine.low %v3006_v9, %v3010_v10  ;;  %v6746_v62 = vcombine.high %v3013_v43, %v3017_v44  ;;  %v6748_v1 = vcombine.high %v3014_v47, %v3018_v50  ;;  %v3065_v42 = vld [vmem:[#allocation9 + $0x230] sm:$0xff]  ;;  %v3062_v9 = vld [vmem:[#allocation9 + $0x218] sm:$0xff] }
 0x44e   :  { %v3066_v10 = vld [vmem:[#allocation9 + $0x238] sm:$0xff] }
 0x450   :  { %4639 = vmatpush1.bf16.msra.mxu0 %v6941_v55  ;;  %4725 = vmatpush1.bf16.msra.mxu1 %v6943_v57  ;;  %v3026_v55 = vld [vmem:[#allocation9 + $0xf8] sm:$0xff]  ;;  %v6745_v57 = vcombine.low %v3013_v43, %v3017_v44  ;;  %v3069_v43 = vld [vmem:[#allocation9 + $0x250] sm:$0xff] }
 0x451   :  { %4640 = vmatprep.subr.bf16.mxu0 %v6950_v58  ;;  %4726 = vmatprep.subr.bf16.mxu1 %v6952_v60  ;;  %v6747_v58 = vcombine.low %v3014_v47, %v3018_v50  ;;  %v6754_v60 = vcombine.high %v3021_v53, %v3025_v54  ;;  %v6756_v61 = vcombine.high %v3022_v7, %v3026_v55  ;;  %v3073_v44 = vld [vmem:[#allocation9 + $0x270] sm:$0xff]  ;;  %v3070_v47 = vld [vmem:[#allocation9 + $0x258] sm:$0xff] }
 0x452   :  { %v3074_v50 = vld [vmem:[#allocation9 + $0x278] sm:$0xff] }
 0x454   :  { %4641 = vmatpush1.bf16.msra.mxu0 %v6949_v63  ;;  %4727 = vmatpush1.bf16.msra.mxu1 %v6951_v17  ;;  %v6753_v63 = vcombine.low %v3021_v53, %v3025_v54  ;;  %v6755_v17 = vcombine.low %v3022_v7, %v3026_v55  ;;  %v3077_v53 = vld [vmem:[#allocation9 + $0x290] sm:$0xff]  ;;  %v3078_v7 = vld [vmem:[#allocation9 + $0x298] sm:$0xff] }
 0x455   :  { %4642 = vmatprep.subr.bf16.mxu0 %v6958_v2  ;;  %4728 = vmatprep.subr.bf16.mxu1 %v6960_v4  ;;  %v6762_v2 = vcombine.high %v3029_v3, %v3033_v8  ;;  %v3081_v54 = vld [vmem:[#allocation9 + $0x2b0] sm:$0xff]  ;;  %v3082_v55 = vld [vmem:[#allocation9 + $0x2b8] sm:$0xff] }
 0x458   :  { %4643 = vmatpush1.bf16.msra.mxu0 %v6957_v15  ;;  %4729 = vmatpush1.bf16.msra.mxu1 %v6959_v20  ;;  %v6761_v15 = vcombine.low %v3029_v3, %v3033_v8  ;;  %v3085_v3 = vld [vmem:[#allocation9 + $0x2d0] sm:$0xff] }
 0x459   :  { %4644 = vmatprep.subr.bf16.mxu0 %v6966_v11  ;;  %4730 = vmatprep.subr.bf16.mxu1 %v6968_v5  ;;  %v6770_v11 = vcombine.high %v3037_v59, %v3041_v18  ;;  %v6772_v5 = vcombine.high %v3038_v6, %v3042_v19  ;;  %v3089_v8 = vld [vmem:[#allocation9 + $0x2f0] sm:$0xff] }
 0x45c   :  { %4645 = vmatpush1.bf16.msra.mxu0 %v6965_v27  ;;  %4731 = vmatpush1.bf16.msra.mxu1 %v6967_v29  ;;  %v6769_v27 = vcombine.low %v3037_v59, %v3041_v18  ;;  %v6771_v29 = vcombine.low %v3038_v6, %v3042_v19  ;;  %v3093_v59 = vld [vmem:[#allocation9 + $0x310] sm:$0xff]  ;;  %v3094_v6 = vld [vmem:[#allocation9 + $0x318] sm:$0xff] }
 0x45d   :  { %4646 = vmatprep.subr.bf16.mxu0 %v6974_v30  ;;  %4732 = vmatprep.subr.bf16.mxu1 %v6976_v31  ;;  %v6778_v30 = vcombine.high %v3045_v21, %v3049_v22  ;;  %v6780_v31 = vcombine.high %v3046_v23, %v3050_v26  ;;  %v3097_v18 = vld [vmem:[#allocation9 + $0x330] sm:$0xff]  ;;  %v3098_v19 = vld [vmem:[#allocation9 + $0x338] sm:$0xff] }
 0x460   :  { %4647 = vmatpush1.bf16.msra.mxu0 %v6973_v37  ;;  %4733 = vmatpush1.bf16.msra.mxu1 %v6975_v38  ;;  %v6777_v37 = vcombine.low %v3045_v21, %v3049_v22  ;;  %v6779_v38 = vcombine.low %v3046_v23, %v3050_v26  ;;  %v3101_v21 = vld [vmem:[#allocation9 + $0x350] sm:$0xff]  ;;  %v3102_v23 = vld [vmem:[#allocation9 + $0x358] sm:$0xff] }
 0x461   :  { %4745 = vmatprep.subr.bf16.mxu0 %v6730_v39  ;;  %4831 = vmatprep.subr.bf16.mxu1 %v6732_v40  ;;  %v6786_v39 = vcombine.high %v3053_v32, %v3057_v33  ;;  %v6788_v40 = vcombine.high %v3054_v35, %v3058_v36  ;;  %v3105_v22 = vld [vmem:[#allocation9 + $0x370] sm:$0xff]  ;;  %v3106_v26 = vld [vmem:[#allocation9 + $0x378] sm:$0xff] }
 0x463   :  { %4649 = vmatmul.mubr.bf16.vlgmr.msra.gmra.mrb[4].mxu0 %v8616_v28  ;;  %4735 = vmatmul.mubr.bf16.vlgmr.msra.gmra.mrb[4].mxu1 %v8616_v28 }
 0x464   :  { %4746 = vmatpush1.bf16.msra.mxu0 %v6729_v56  ;;  %4777 = vmatprep.mubr.bf16.mxu0 %v8612_v24  ;;  %v6785_v56 = vcombine.low %v3053_v32, %v3057_v33  ;;  %v3109_v32 = vld [vmem:[#allocation9 + $0x390] sm:$0xff] }
 0x465   :  { %4832 = vmatpush1.bf16.msra.mxu1 %v6731_v13  ;;  %4863 = vmatprep.mubr.bf16.mxu1 %v8612_v24  ;;  %v3030_v24 = vld [vmem:[#allocation9 + $0x118] sm:$0xff]  ;;  %v6787_v13 = vcombine.low %v3054_v35, %v3058_v36  ;;  %v3113_v33 = vld [vmem:[#allocation9 + $0x3b0] sm:$0xff] }
 0x466   :  { %4747 = vmatprep.subr.bf16.mxu0 %v6738_v14  ;;  %4833 = vmatprep.subr.bf16.mxu1 %v6740_v16  ;;  %v6764_v4 = vcombine.high %v3030_v24, %v3034_v12  ;;  %v6763_v20 = vcombine.low %v3030_v24, %v3034_v12  ;;  %v6794_v14 = vcombine.high %v3061_v41, %v3065_v42  ;;  %v3086_v24 = vld [vmem:[#allocation9 + $0x2d8] sm:$0xff] }
 0x467   :  { %v6796_v16 = vcombine.high %v3062_v9, %v3066_v10  ;;  %v3090_v12 = vld [vmem:[#allocation9 + $0x2f8] sm:$0xff] }
 0x468   :  { %4748 = vmatpush1.bf16.msra.mxu0 %v6737_v51  ;;  %v6793_v51 = vcombine.low %v3061_v41, %v3065_v42  ;;  %v3110_v35 = vld [vmem:[#allocation9 + $0x398] sm:$0xff]  ;;  %v3117_v41 = vld [vmem:[#allocation9 + $0x3d0] sm:$0xff] }
 0x469   :  { %4834 = vmatpush1.bf16.msra.mxu1 %v6739_v0  ;;  %4749 = vmatprep.subr.bf16.mxu0 %v6746_v62  ;;  %v6795_v0 = vcombine.low %v3062_v9, %v3066_v10  ;;  %v6802_v62 = vcombine.high %v3069_v43, %v3073_v44  ;;  %v3114_v36 = vld [vmem:[#allocation9 + $0x3b8] sm:$0xff]  ;;  %v3121_v42 = vld [vmem:[#allocation9 + $0x3f0] sm:$0xff] }
 0x46a   :  { %4835 = vmatprep.subr.bf16.mxu1 %v6748_v1  ;;  %v6804_v1 = vcombine.high %v3070_v47, %v3074_v50  ;;  %v3118_v9 = vld [vmem:[#allocation9 + $0x3d8] sm:$0xff] }
 0x46b   :  { %v3122_v10 = vld [vmem:[#allocation9 + $0x3f8] sm:$0xff] }
 0x46c   :  { %4750 = vmatpush1.bf16.msra.mxu0 %v6745_v57  ;;  %v6801_v57 = vcombine.low %v3069_v43, %v3073_v44  ;;  %v3125_v43 = vld [vmem:[#allocation9 + $0x410] sm:$0xff] }
 0x46d   :  { %4836 = vmatpush1.bf16.msra.mxu1 %v6747_v58  ;;  %4751 = vmatprep.subr.bf16.mxu0 %v6754_v60  ;;  %v6803_v58 = vcombine.low %v3070_v47, %v3074_v50  ;;  %v6810_v60 = vcombine.high %v3077_v53, %v3081_v54  ;;  %v3129_v44 = vld [vmem:[#allocation9 + $0x430] sm:$0xff]  ;;  %v3126_v47 = vld [vmem:[#allocation9 + $0x418] sm:$0xff] }
 0x46e   :  { %4837 = vmatprep.subr.bf16.mxu1 %v6756_v61  ;;  %v6812_v61 = vcombine.high %v3078_v7, %v3082_v55  ;;  %v3130_v50 = vld [vmem:[#allocation9 + $0x438] sm:$0xff] }
 0x470   :  { %4752 = vmatpush1.bf16.msra.mxu0 %v6753_v63  ;;  %v6809_v63 = vcombine.low %v3077_v53, %v3081_v54  ;;  %v3133_v53 = vld [vmem:[#allocation9 + $0x450] sm:$0xff] }
 0x471   :  { %4838 = vmatpush1.bf16.msra.mxu1 %v6755_v17  ;;  %4753 = vmatprep.subr.bf16.mxu0 %v6762_v2  ;;  %v6811_v17 = vcombine.low %v3078_v7, %v3082_v55  ;;  %v6818_v2 = vcombine.high %v3085_v3, %v3089_v8  ;;  %v3137_v54 = vld [vmem:[#allocation9 + $0x470] sm:$0xff]  ;;  %v6857_v7 = vcombine.low %v3125_v43, %v3129_v44  ;;  %v3134_v55 = vld [vmem:[#allocation9 + $0x458] sm:$0xff] }
 0x472   :  { %4839 = vmatprep.subr.bf16.mxu1 %v6764_v4  ;;  %v6820_v4 = vcombine.high %v3086_v24, %v3090_v12 }
 0x474   :  { %4754 = vmatpush1.bf16.msra.mxu0 %v6761_v15  ;;  %v6817_v15 = vcombine.low %v3085_v3, %v3089_v8  ;;  %v3145_v3 = vld [vmem:[#allocation9 + $0x4b0] sm:$0xff] }
 0x475   :  { %4840 = vmatpush1.bf16.msra.mxu1 %v6763_v20  ;;  %4755 = vmatprep.subr.bf16.mxu0 %v6770_v11  ;;  %v6819_v20 = vcombine.low %v3086_v24, %v3090_v12  ;;  %v6826_v11 = vcombine.high %v3093_v59, %v3097_v18  ;;  %v3142_v24 = vld [vmem:[#allocation9 + $0x498] sm:$0xff] }
 0x476   :  { %4841 = vmatprep.subr.bf16.mxu1 %v6772_v5  ;;  %v6828_v5 = vcombine.high %v3094_v6, %v3098_v19  ;;  %v3146_v12 = vld [vmem:[#allocation9 + $0x4b8] sm:$0xff] }
 0x478   :  { %4756 = vmatpush1.bf16.msra.mxu0 %v6769_v27  ;;  %v6825_v27 = vcombine.low %v3093_v59, %v3097_v18  ;;  %v3149_v59 = vld [vmem:[#allocation9 + $0x4d0] sm:$0xff] }
 0x479   :  { %4842 = vmatpush1.bf16.msra.mxu1 %v6771_v29  ;;  %4757 = vmatprep.subr.bf16.mxu0 %v6778_v30  ;;  %v6827_v29 = vcombine.low %v3094_v6, %v3098_v19  ;;  %v6834_v30 = vcombine.high %v3101_v21, %v3105_v22  ;;  %v3153_v18 = vld [vmem:[#allocation9 + $0x4f0] sm:$0xff]  ;;  %v3150_v6 = vld [vmem:[#allocation9 + $0x4d8] sm:$0xff] }
 0x47a   :  { %4843 = vmatprep.subr.bf16.mxu1 %v6780_v31  ;;  %v6836_v31 = vcombine.high %v3102_v23, %v3106_v26  ;;  %v3154_v19 = vld [vmem:[#allocation9 + $0x4f8] sm:$0xff] }
 0x47c   :  { %4758 = vmatpush1.bf16.msra.mxu0 %v6777_v37  ;;  %v6833_v37 = vcombine.low %v3101_v21, %v3105_v22  ;;  %v3161_v21 = vld [vmem:[#allocation9 + $0x530] sm:$0xff]  ;;  %v3158_v22 = vld [vmem:[#allocation9 + $0x518] sm:$0xff] }
 0x47d   :  { %4844 = vmatpush1.bf16.msra.mxu1 %v6779_v38  ;;  %4759 = vmatprep.subr.bf16.mxu0 %v6786_v39  ;;  %v6835_v38 = vcombine.low %v3102_v23, %v3106_v26  ;;  %v6842_v39 = vcombine.high %v3109_v32, %v3113_v33  ;;  %v3162_v23 = vld [vmem:[#allocation9 + $0x538] sm:$0xff]  ;;  %v6883_v26 = vcombine.low %v3150_v6, %v3154_v19 }
 0x47e   :  { %4845 = vmatprep.subr.bf16.mxu1 %v6788_v40  ;;  %v6844_v40 = vcombine.high %v3110_v35, %v3114_v36 }
 0x480   :  { %4760 = vmatpush1.bf16.msra.mxu0 %v6785_v56  ;;  %v6841_v56 = vcombine.low %v3109_v32, %v3113_v33  ;;  %v3166_v32 = vld [vmem:[#allocation9 + $0x558] sm:$0xff] }
 0x481   :  { %4846 = vmatpush1.bf16.msra.mxu1 %v6787_v13  ;;  %4761 = vmatprep.subr.bf16.mxu0 %v6794_v14  ;;  %v6843_v13 = vcombine.low %v3110_v35, %v3114_v36  ;;  %v6850_v14 = vcombine.high %v3117_v41, %v3121_v42  ;;  %v3170_v33 = vld [vmem:[#allocation9 + $0x578] sm:$0xff]  ;;  %v6891_v36 = vcombine.low %v3158_v22, %v3162_v23 }
 0x482   :  { %4847 = vmatprep.subr.bf16.mxu1 %v6796_v16  ;;  %v6852_v16 = vcombine.high %v3118_v9, %v3122_v10 }
 0x484   :  { %4762 = vmatpush1.bf16.msra.mxu0 %v6793_v51  ;;  %v6849_v51 = vcombine.low %v3117_v41, %v3121_v42  ;;  %v3174_v41 = vld [vmem:[#allocation9 + $0x598] sm:$0xff] }
 0x485   :  { %4848 = vmatpush1.bf16.msra.mxu1 %v6795_v0  ;;  %4763 = vmatprep.subr.bf16.mxu0 %v6802_v62  ;;  %v6851_v0 = vcombine.low %v3118_v9, %v3122_v10  ;;  %v6858_v62 = vcombine.high %v3125_v43, %v3129_v44  ;;  %v3178_v42 = vld [vmem:[#allocation9 + $0x5b8] sm:$0xff]  ;;  %v6899_v10 = vcombine.low %v3166_v32, %v3170_v33 }
 0x486   :  { %4849 = vmatprep.subr.bf16.mxu1 %v6804_v1  ;;  %v6860_v1 = vcombine.high %v3126_v47, %v3130_v50  ;;  %v3182_v43 = vld [vmem:[#allocation9 + $0x5d8] sm:$0xff] }
 0x487   :  { %v3186_v44 = vld [vmem:[#allocation9 + $0x5f8] sm:$0xff] }
 0x488   :  { %4764 = vmatpush1.bf16.msra.mxu0 %v6801_v57  ;;  %v3138_v57 = vld [vmem:[#allocation9 + $0x478] sm:$0xff] }
 0x489   :  { %4850 = vmatpush1.bf16.msra.mxu1 %v6803_v58  ;;  %4765 = vmatprep.subr.bf16.mxu0 %v6810_v60  ;;  %v6859_v58 = vcombine.low %v3126_v47, %v3130_v50  ;;  %v6866_v60 = vcombine.high %v3133_v53, %v3137_v54  ;;  %v6868_v8 = vcombine.high %v3134_v55, %v3138_v57 }
 0x48a   :  { %4851 = vmatprep.subr.bf16.mxu1 %v6812_v61  ;;  %v3141_v61 = vld [vmem:[#allocation9 + $0x490] sm:$0xff]  ;;  %v6907_v50 = vcombine.low %v3174_v41, %v3178_v42 }
 0x48c   :  { %4766 = vmatpush1.bf16.msra.mxu0 %v6809_v63  ;;  %v6865_v63 = vcombine.low %v3133_v53, %v3137_v54  ;;  %v3190_v53 = vld [vmem:[#allocation9 + $0x618] sm:$0xff] }
 0x48d   :  { %4852 = vmatpush1.bf16.msra.mxu1 %v6811_v17  ;;  %4767 = vmatprep.subr.bf16.mxu0 %v6818_v2  ;;  %v6867_v17 = vcombine.low %v3134_v55, %v3138_v57  ;;  %v6874_v2 = vcombine.high %v3141_v61, %v3145_v3  ;;  %v3194_v54 = vld [vmem:[#allocation9 + $0x638] sm:$0xff]  ;;  %v6915_v55 = vcombine.low %v3182_v43, %v3186_v44 }
 0x48e   :  { %4853 = vmatprep.subr.bf16.mxu1 %v6820_v4  ;;  %v6876_v4 = vcombine.high %v3142_v24, %v3146_v12 }
 0x490   :  { %4768 = vmatpush1.bf16.msra.mxu0 %v6817_v15  ;;  %v6873_v15 = vcombine.low %v3141_v61, %v3145_v3  ;;  %v3201_v61 = vld [vmem:[#allocation9 + $0x670] sm:$0xff]  ;;  %v3198_v3 = vld [vmem:[#allocation9 + $0x658] sm:$0xff] }
 0x491   :  { %4854 = vmatpush1.bf16.msra.mxu1 %v6819_v20  ;;  %4769 = vmatprep.subr.bf16.mxu0 %v6826_v11  ;;  %v6882_v20 = vcombine.high %v3149_v59, %v3153_v18  ;;  %v6884_v11 = vcombine.high %v3150_v6, %v3154_v19 }
 0x492   :  { %4855 = vmatprep.subr.bf16.mxu1 %v6828_v5  ;;  %v3157_v5 = vld [vmem:[#allocation9 + $0x510] sm:$0xff] }
 0x493   :  { %v6889_v35 = vcombine.low %v3157_v5, %v3161_v21 }
 0x494   :  { %4770 = vmatpush1.bf16.msra.mxu0 %v6825_v27  ;;  %v6890_v27 = vcombine.high %v3157_v5, %v3161_v21  ;;  %v3214_v5 = vld [vmem:[#allocation9 + $0x6d8] sm:$0xff] }
 0x495   :  { %4856 = vmatpush1.bf16.msra.mxu1 %v6827_v29  ;;  %4771 = vmatprep.subr.bf16.mxu0 %v6834_v30  ;;  %v6892_v29 = vcombine.high %v3158_v22, %v3162_v23  ;;  %v3165_v30 = vld [vmem:[#allocation9 + $0x550] sm:$0xff]  ;;  %v3218_v21 = vld [vmem:[#allocation9 + $0x6f8] sm:$0xff] }
 0x496   :  { %4857 = vmatprep.subr.bf16.mxu1 %v6836_v31  ;;  %v3169_v31 = vld [vmem:[#allocation9 + $0x570] sm:$0xff] }
 0x497   :  { %v6897_v9 = vcombine.low %v3165_v30, %v3169_v31 }
 0x498   :  { %4772 = vmatpush1.bf16.msra.mxu0 %v6833_v37  ;;  %v6898_v37 = vcombine.high %v3165_v30, %v3169_v31  ;;  %v3222_v30 = vld [vmem:[#allocation9 + $0x718] sm:$0xff] }
 0x499   :  { %4858 = vmatpush1.bf16.msra.mxu1 %v6835_v38  ;;  %4773 = vmatprep.subr.bf16.mxu0 %v6842_v39  ;;  %v6900_v38 = vcombine.high %v3166_v32, %v3170_v33  ;;  %v3173_v39 = vld [vmem:[#allocation9 + $0x590] sm:$0xff]  ;;  %v3226_v31 = vld [vmem:[#allocation9 + $0x738] sm:$0xff]  ;;  %v6947_v33 = vcombine.low %v3214_v5, %v3218_v21 }
 0x49a   :  { %4859 = vmatprep.subr.bf16.mxu1 %v6844_v40  ;;  %v3177_v40 = vld [vmem:[#allocation9 + $0x5b0] sm:$0xff] }
 0x49b   :  { %v6905_v47 = vcombine.low %v3173_v39, %v3177_v40 }
 0x49c   :  { %4774 = vmatpush1.bf16.msra.mxu0 %v6841_v56  ;;  %v6906_v56 = vcombine.high %v3173_v39, %v3177_v40  ;;  %v3230_v39 = vld [vmem:[#allocation9 + $0x758] sm:$0xff] }
 0x49d   :  { %4860 = vmatpush1.bf16.msra.mxu1 %v6843_v13  ;;  %4775 = vmatprep.subr.bf16.mxu0 %v6850_v14  ;;  %v6908_v13 = vcombine.high %v3174_v41, %v3178_v42  ;;  %v3181_v14 = vld [vmem:[#allocation9 + $0x5d0] sm:$0xff]  ;;  %v3234_v40 = vld [vmem:[#allocation9 + $0x778] sm:$0xff]  ;;  %v6955_v42 = vcombine.low %v3222_v30, %v3226_v31 }
 0x49e   :  { %4861 = vmatprep.subr.bf16.mxu1 %v6852_v16  ;;  %v3185_v16 = vld [vmem:[#allocation9 + $0x5f0] sm:$0xff] }
 0x4a0   :  { %4776 = vmatpush1.bf16.msra.mxu0 %v6849_v51  ;;  %v6914_v51 = vcombine.high %v3181_v14, %v3185_v16 }
 0x4a1   :  { %4862 = vmatpush1.bf16.msra.mxu1 %v6851_v0  ;;  %4788 = vmatprep.subr.bf16.mxu0 %v6858_v62  ;;  %v6916_v0 = vcombine.high %v3182_v43, %v3186_v44  ;;  %v3189_v62 = vld [vmem:[#allocation9 + $0x610] sm:$0xff]  ;;  %v6963_v44 = vcombine.low %v3230_v39, %v3234_v40 }
 0x4a2   :  { %4874 = vmatprep.subr.bf16.mxu1 %v6860_v1  ;;  %v3193_v1 = vld [vmem:[#allocation9 + $0x630] sm:$0xff] }
 0x4a3   :  { %4778 = vmatmul.mubr.bf16.vlgmr.msra.gmra.mrb[8].mxu0 %v8614_v25  ;;  %v6922_v57 = vcombine.high %v3189_v62, %v3193_v1 }
 0x4a4   :  { %4864 = vmatmul.mubr.bf16.vlgmr.msra.gmra.mrb[8].mxu1 %v8614_v25  ;;  %4789 = vmatpush1.bf16.msra.mxu0 %v6857_v7  ;;  %v6875_v25 = vcombine.low %v3142_v24, %v3146_v12  ;;  %v6913_v7 = vcombine.low %v3181_v14, %v3185_v16  ;;  %v6921_v24 = vcombine.low %v3189_v62, %v3193_v1  ;;  %v3238_v14 = vld [vmem:[#allocation9 + $0x798] sm:$0xff] }
 0x4a5   :  { %4820 = vmatprep.mubr.bf16.mxu0 %v8622_v34  ;;  %4875 = vmatpush1.bf16.msra.mxu1 %v6859_v58  ;;  %v6924_v58 = vcombine.high %v3190_v53, %v3194_v54  ;;  %v6923_v12 = vcombine.low %v3190_v53, %v3194_v54  ;;  %v3242_v16 = vld [vmem:[#allocation9 + $0x7b8] sm:$0xff] }
 0x4a6   :  { %4906 = vmatprep.mubr.bf16.mxu1 %v8622_v34  ;;  %4790 = vmatprep.subr.bf16.mxu0 %v6866_v60  ;;  %v6881_v34 = vcombine.low %v3149_v59, %v3153_v18  ;;  %v3197_v60 = vld [vmem:[#allocation9 + $0x650] sm:$0xff]  ;;  %v3206_v59 = vld [vmem:[#allocation9 + $0x698] sm:$0xff]  ;;  %v6971_v54 = vcombine.low %v3238_v14, %v3242_v16 }
 0x4a7   :  { %4876 = vmatprep.subr.bf16.mxu1 %v6868_v8  ;;  %v3202_v8 = vld [vmem:[#allocation9 + $0x678] sm:$0xff]  ;;  %v6929_v6 = vcombine.low %v3197_v60, %v3201_v61 }
 0x4a8   :  { %4791 = vmatpush1.bf16.msra.mxu0 %v6865_v63  ;;  %v6930_v63 = vcombine.high %v3197_v60, %v3201_v61  ;;  %v3210_v18 = vld [vmem:[#allocation9 + $0x6b8] sm:$0xff]  ;;  %v6931_v19 = vcombine.low %v3198_v3, %v3202_v8  ;;  %v7958_v60 = vld [vmem:[#allocation12 + $0x40] sm:$0xff]  }
 0x4a9   :  { %4877 = vmatpush1.bf16.msra.mxu1 %v6867_v17  ;;  %4792 = vmatprep.subr.bf16.mxu0 %v6874_v2  ;;  %v6932_v17 = vcombine.high %v3198_v3, %v3202_v8  ;;  %v3205_v2 = vld [vmem:[#allocation9 + $0x690] sm:$0xff]  ;;  %v6939_v23 = vcombine.low %v3206_v59, %v3210_v18  ;;  %v3246_v62 = vld [vmem:[#allocation9 + $0x7d8] sm:$0xff]  ;;  %v7959_v61 = vld [vmem:[#allocation12 + $0xc0] sm:$0xff]  }
 0x4aa   :  { %4878 = vmatprep.subr.bf16.mxu1 %v6876_v4  ;;  %v3209_v4 = vld [vmem:[#allocation9 + $0x6b0] sm:$0xff]  ;;  %v3250_v1 = vld [vmem:[#allocation9 + $0x7f8] sm:$0xff]  ;;  %v7960_v3 = vld [vmem:[#allocation12] sm:$0xff]  }
 0x4ab   :  { %v6937_v22 = vcombine.low %v3205_v2, %v3209_v4  ;;  %v7961_v8 = vld [vmem:[#allocation12 + $0x80] sm:$0xff]  }
 0x4ac   :  { %4793 = vmatpush1.bf16.msra.mxu0 %v6873_v15  ;;  %v6938_v15 = vcombine.high %v3205_v2, %v3209_v4  ;;  %v7966_v2 = vld [vmem:[#allocation12 + $0x50] sm:$0xff]  }
 0x4ad   :  { %4879 = vmatpush1.bf16.msra.mxu1 %v6875_v25  ;;  %4794 = vmatprep.subr.bf16.mxu0 %v6882_v20  ;;  %v6940_v25 = vcombine.high %v3206_v59, %v3210_v18  ;;  %v3213_v20 = vld [vmem:[#allocation9 + $0x6d0] sm:$0xff]  ;;  %v7967_v4 = vld [vmem:[#allocation12 + $0xd0] sm:$0xff]  }
 0x4ae   :  { %4880 = vmatprep.subr.bf16.mxu1 %v6884_v11  ;;  %v3217_v11 = vld [vmem:[#allocation9 + $0x6f0] sm:$0xff]  ;;  %v7968_v59 = vld [vmem:[#allocation12 + $0x10] sm:$0xff]  }
 0x4af   :  { %v6945_v32 = vcombine.low %v3213_v20, %v3217_v11  ;;  %v7969_v18 = vld [vmem:[#allocation12 + $0x90] sm:$0xff]  }
 0x4b0   :  { %4795 = vmatpush1.bf16.msra.mxu0 %v6881_v34  ;;  %v6946_v34 = vcombine.high %v3213_v20, %v3217_v11  ;;  %v7975_v20 = vld [vmem:[#allocation12 + $0xe0] sm:$0xff]  }
 0x4b1   :  { %4881 = vmatpush1.bf16.msra.mxu1 %v6883_v26  ;;  %4796 = vmatprep.subr.bf16.mxu0 %v6890_v27  ;;  %v6948_v26 = vcombine.high %v3214_v5, %v3218_v21  ;;  %v3221_v27 = vld [vmem:[#allocation9 + $0x710] sm:$0xff]  ;;  %v7976_v11 = vld [vmem:[#allocation12 + $0x20] sm:$0xff]  }
 0x4b2   :  { %4882 = vmatprep.subr.bf16.mxu1 %v6892_v29  ;;  %v3225_v29 = vld [vmem:[#allocation9 + $0x730] sm:$0xff]  ;;  %v7977_v5 = vld [vmem:[#allocation12 + $0xa0] sm:$0xff]  }
 0x4b3   :  { %v6953_v41 = vcombine.low %v3221_v27, %v3225_v29  ;;  %v7978_v21 = vld [vmem:[#allocation12 + $0x68] sm:$0xff]  }
 0x4b4   :  { %4797 = vmatpush1.bf16.msra.mxu0 %v6889_v35  ;;  %v6954_v35 = vcombine.high %v3221_v27, %v3225_v29  ;;  %v7983_v27 = vld [vmem:[#allocation12 + $0xf0] sm:$0xff]  }
 0x4b5   :  { %4883 = vmatpush1.bf16.msra.mxu1 %v6891_v36  ;;  %4798 = vmatprep.subr.bf16.mxu0 %v6898_v37  ;;  %v6956_v36 = vcombine.high %v3222_v30, %v3226_v31  ;;  %v3229_v37 = vld [vmem:[#allocation9 + $0x750] sm:$0xff]  ;;  %v7984_v29 = vld [vmem:[#allocation12 + $0x30] sm:$0xff]   ;;  %v7986_v31 = vld [vmem:[#allocation12 + $0x78] sm:$0xff]  }
 0x4b6   :  { %4884 = vmatprep.subr.bf16.mxu1 %v6900_v38  ;;  %v3233_v38 = vld [vmem:[#allocation9 + $0x770] sm:$0xff]  ;;  %v7985_v30 = vld [vmem:[#allocation12 + $0xb0] sm:$0xff]  }
 0x4b7   :  { %v6961_v43 = vcombine.low %v3229_v37, %v3233_v38 }
 0x4b8   :  { %4799 = vmatpush1.bf16.msra.mxu0 %v6897_v9  ;;  %v6962_v9 = vcombine.high %v3229_v37, %v3233_v38  ;;  %v7991_v37 = vld [vmem:[#allocation12 + $0x1c0] sm:$0xff]   ;;  %v8642_v38 = vld [vmem:[#allocation10] sm:$0xff] }
 0x4b9   :  { %4885 = vmatpush1.bf16.msra.mxu1 %v6899_v10  ;;  %4800 = vmatprep.subr.bf16.mxu0 %v6906_v56  ;;  %v6964_v10 = vcombine.high %v3230_v39, %v3234_v40  ;;  %v3237_v56 = vld [vmem:[#allocation9 + $0x790] sm:$0xff]  ;;  %v3256_v39 = vrot.slane %v8642_v38, %v8501_v46  ;;  %v3264_v40 = vrot.slane %v8642_v38, %v8507_v49 }
 0x4ba   :  { %4886 = vmatprep.subr.bf16.mxu1 %v6908_v13  ;;  %v3241_v13 = vld [vmem:[#allocation9 + $0x7b0] sm:$0xff] }
 0x4bb   :  { %v6969_v53 = vcombine.low %v3237_v56, %v3241_v13 }
 0x4bc   :  { %4801 = vmatpush1.bf16.msra.mxu0 %v6905_v47  ;;  %v6970_v47 = vcombine.high %v3237_v56, %v3241_v13 }
 0x4bd   :  { %4887 = vmatpush1.bf16.msra.mxu1 %v6907_v50  ;;  %4802 = vmatprep.subr.bf16.mxu0 %v6914_v51  ;;  %v6972_v50 = vcombine.high %v3238_v14, %v3242_v16  ;;  %v3245_v51 = vld [vmem:[#allocation9 + $0x7d0] sm:$0xff] }
 0x4be   :  { %4888 = vmatprep.subr.bf16.mxu1 %v6916_v0  ;;  %v3249_v0 = vld [vmem:[#allocation9 + $0x7f0] sm:$0xff] }
 0x4c0   :  { %4803 = vmatpush1.bf16.msra.mxu0 %v6913_v7  ;;  %v6978_v7 = vcombine.high %v3245_v51, %v3249_v0 }
 0x4c1   :  { %4889 = vmatpush1.bf16.msra.mxu1 %v6915_v55  ;;  %4804 = vmatprep.subr.bf16.mxu0 %v6922_v57  ;;  %v6980_v55 = vcombine.high %v3246_v62, %v3250_v1  ;;  %v6977_v57 = vcombine.low %v3245_v51, %v3249_v0 }
 0x4c2   :  { %4890 = vmatprep.subr.bf16.mxu1 %v6924_v58  ;;  %v6979_v58 = vcombine.low %v3246_v62, %v3250_v1 }
 0x4c4   :  { %4805 = vmatpush1.bf16.msra.mxu0 %v6921_v24  ;;  %v7962_v24 = vld [vmem:[#allocation12 + $0x48] sm:$0xff]  }
 0x4c5   :  { %4891 = vmatpush1.bf16.msra.mxu1 %v6923_v12  ;;  %4806 = vmatprep.subr.bf16.mxu0 %v6930_v63  ;;  %v7963_v12 = vld [vmem:[#allocation12 + $0xc8] sm:$0xff]  }
 0x4c6   :  { %4892 = vmatprep.subr.bf16.mxu1 %v6932_v17  ;;  %v7964_v63 = vld [vmem:[#allocation12 + $0x8] sm:$0xff]  }
 0x4c7   :  { %v7965_v17 = vld [vmem:[#allocation12 + $0x88] sm:$0xff]  }
 0x4c8   :  { %4807 = vmatpush1.bf16.msra.mxu0 %v6929_v6  ;;  %v7970_v6 = vld [vmem:[#allocation12 + $0x58] sm:$0xff]  }
 0x4c9   :  { %4893 = vmatpush1.bf16.msra.mxu1 %v6931_v19  ;;  %4808 = vmatprep.subr.bf16.mxu0 %v6938_v15  ;;  %v7971_v19 = vld [vmem:[#allocation12 + $0xd8] sm:$0xff]  }
 0x4ca   :  { %4894 = vmatprep.subr.bf16.mxu1 %v6940_v25  ;;  %v7972_v15 = vld [vmem:[#allocation12 + $0x18] sm:$0xff]   ;;  %v7974_v25 = vld [vmem:[#allocation12 + $0x60] sm:$0xff]  }
 0x4cc   :  { %4809 = vmatpush1.bf16.msra.mxu0 %v6937_v22  ;;  %v7979_v22 = vld [vmem:[#allocation12 + $0xe8] sm:$0xff]  }
 0x4cd   :  { %4895 = vmatpush1.bf16.msra.mxu1 %v6939_v23  ;;  %4810 = vmatprep.subr.bf16.mxu0 %v6946_v34  ;;  %v7980_v23 = vld [vmem:[#allocation12 + $0x28] sm:$0xff]  }
 0x4ce   :  { %4896 = vmatprep.subr.bf16.mxu1 %v6948_v26  ;;  %v7981_v34 = vld [vmem:[#allocation12 + $0xa8] sm:$0xff]   ;;  %v7982_v26 = vld [vmem:[#allocation12 + $0x70] sm:$0xff]  }
 0x4d0   :  { %4811 = vmatpush1.bf16.msra.mxu0 %v6945_v32  ;;  %v7987_v32 = vld [vmem:[#allocation12 + $0xf8] sm:$0xff]  }
 0x4d1   :  { %4897 = vmatpush1.bf16.msra.mxu1 %v6947_v33  ;;  %4812 = vmatprep.subr.bf16.mxu0 %v6954_v35  ;;  %v7988_v33 = vld [vmem:[#allocation12 + $0x38] sm:$0xff]  }
 0x4d2   :  { %4898 = vmatprep.subr.bf16.mxu1 %v6956_v36  ;;  %v7989_v35 = vld [vmem:[#allocation12 + $0xb8] sm:$0xff]   ;;  %v7990_v36 = vld [vmem:[#allocation12 + $0x140] sm:$0xff]  }
 0x4d4   :  { %4813 = vmatpush1.bf16.msra.mxu0 %v6953_v41  ;;  %v3260_v41 = vrot.slane %v8642_v38, %v8504_v48 }
 0x4d5   :  { %4899 = vmatpush1.bf16.msra.mxu1 %v6955_v42  ;;  %4814 = vmatprep.subr.bf16.mxu0 %v6962_v9  ;;  %v3268_v42 = vrot.slane %v8642_v38, %v8512_v52 }
 0x4d6   :  { %4900 = vmatprep.subr.bf16.mxu1 %v6964_v10 }
 0x4d8   :  { %4815 = vmatpush1.bf16.msra.mxu0 %v6961_v43 }
 0x4d9   :  { %4901 = vmatpush1.bf16.msra.mxu1 %v6963_v44  ;;  %4816 = vmatprep.subr.bf16.mxu0 %v6970_v47 }
 0x4da   :  { %4902 = vmatprep.subr.bf16.mxu1 %v6972_v50 }
 0x4dc   :  { %4817 = vmatpush1.bf16.msra.mxu0 %v6969_v53 }
 0x4dd   :  { %4903 = vmatpush1.bf16.msra.mxu1 %v6971_v54  ;;  %4818 = vmatprep.subr.bf16.mxu0 %v6978_v7 }
 0x4de   :  { %4904 = vmatprep.subr.bf16.mxu1 %v6980_v55 }
 0x4e0   :  { %4819 = vmatpush1.bf16.msra.mxu0 %v6977_v57 }
 0x4e1   :  { %4905 = vmatpush1.bf16.msra.mxu1 %v6979_v58  ;;  %7143 = vmatprep.subr.bf16.mxu0 %v7958_v60  ;;  %v7992_v60 = vld [vmem:[#allocation12 + $0x100] sm:$0xff]  }
 0x4e2   :  { %7165 = vmatprep.subr.bf16.mxu1 %v7959_v61  ;;  %v7993_v61 = vld [vmem:[#allocation12 + $0x180] sm:$0xff]  }
 0x4e3   :  { %4821 = vmatmul.mubr.bf16.vlgmr.msra.gmra.mrb[8].mxu0 %v8616_v28 }
 0x4e4   :  { %4907 = vmatmul.mubr.bf16.vlgmr.msra.gmra.mrb[8].mxu1 %v8616_v28  ;;  %7144 = vmatpush3.bf16.msra.mxu0 %v7960_v3  ;;  %v7973_v28 = vld [vmem:[#allocation12 + $0x98] sm:$0xff]   ;;  %v7994_v3 = vld [vmem:[#allocation12 + $0x148] sm:$0xff]  }
 0x4e5   :  { %7166 = vmatpush3.bf16.msra.mxu1 %v7961_v8  ;;  %7145 = vmatprep.subr.bf16.mxu0 %v7962_v24  ;;  %v7995_v8 = vld [vmem:[#allocation12 + $0x1c8] sm:$0xff]  }
 0x4e6   :  { %7167 = vmatprep.subr.bf16.mxu1 %v7963_v12  ;;  %v7996_v24 = vld [vmem:[#allocation12 + $0x108] sm:$0xff]  }
 0x4e7   :  { %v7997_v12 = vld [vmem:[#allocation12 + $0x188] sm:$0xff]  }
 0x4e8   :  { %7146 = vmatpush3.bf16.msra.mxu0 %v7964_v63  ;;  %v7998_v63 = vld [vmem:[#allocation12 + $0x150] sm:$0xff]  }
 0x4e9   :  { %7168 = vmatpush3.bf16.msra.mxu1 %v7965_v17  ;;  %7147 = vmatprep.subr.bf16.mxu0 %v7966_v2  ;;  %v7999_v17 = vld [vmem:[#allocation12 + $0x1d0] sm:$0xff]  }
 0x4ea   :  { %7169 = vmatprep.subr.bf16.mxu1 %v7967_v4  ;;  %v8000_v2 = vld [vmem:[#allocation12 + $0x110] sm:$0xff]  }
 0x4eb   :  { %v8001_v4 = vld [vmem:[#allocation12 + $0x190] sm:$0xff]  }
 0x4ec   :  { %7148 = vmatpush3.bf16.msra.mxu0 %v7968_v59  ;;  %v8002_v59 = vld [vmem:[#allocation12 + $0x158] sm:$0xff]  }
 0x4ed   :  { %7170 = vmatpush3.bf16.msra.mxu1 %v7969_v18  ;;  %7149 = vmatprep.subr.bf16.mxu0 %v7970_v6  ;;  %v8003_v18 = vld [vmem:[#allocation12 + $0x1d8] sm:$0xff]  }
 0x4ee   :  { %7171 = vmatprep.subr.bf16.mxu1 %v7971_v19  ;;  %v8004_v6 = vld [vmem:[#allocation12 + $0x118] sm:$0xff]  }
 0x4ef   :  { %v8005_v19 = vld [vmem:[#allocation12 + $0x198] sm:$0xff]  }
 0x4f0   :  { %7150 = vmatpush3.bf16.msra.mxu0 %v7972_v15  ;;  %v8006_v15 = vld [vmem:[#allocation12 + $0x160] sm:$0xff]  }
 0x4f1   :  { %7172 = vmatpush3.bf16.msra.mxu1 %v7973_v28  ;;  %7151 = vmatprep.subr.bf16.mxu0 %v7974_v25  ;;  %v8007_v28 = vld [vmem:[#allocation12 + $0x1e0] sm:$0xff]  }
 0x4f2   :  { %7173 = vmatprep.subr.bf16.mxu1 %v7975_v20  ;;  %v8008_v25 = vld [vmem:[#allocation12 + $0x120] sm:$0xff]  }
 0x4f3   :  { %v8009_v20 = vld [vmem:[#allocation12 + $0x1a0] sm:$0xff]  }
 0x4f4   :  { %7152 = vmatpush3.bf16.msra.mxu0 %v7976_v11  ;;  %v8010_v11 = vld [vmem:[#allocation12 + $0x168] sm:$0xff]  }
 0x4f5   :  { %7174 = vmatpush3.bf16.msra.mxu1 %v7977_v5  ;;  %7153 = vmatprep.subr.bf16.mxu0 %v7978_v21  ;;  %v8011_v5 = vld [vmem:[#allocation12 + $0x1e8] sm:$0xff]  }
 0x4f6   :  { %7175 = vmatprep.subr.bf16.mxu1 %v7979_v22  ;;  %v8012_v21 = vld [vmem:[#allocation12 + $0x128] sm:$0xff]  }
 0x4f7   :  { %v8013_v22 = vld [vmem:[#allocation12 + $0x1a8] sm:$0xff]  }
 0x4f8   :  { %7154 = vmatpush3.bf16.msra.mxu0 %v7980_v23  ;;  %v8014_v23 = vld [vmem:[#allocation12 + $0x170] sm:$0xff]  }
 0x4f9   :  { %7176 = vmatpush3.bf16.msra.mxu1 %v7981_v34  ;;  %7155 = vmatprep.subr.bf16.mxu0 %v7982_v26  ;;  %v8015_v34 = vld [vmem:[#allocation12 + $0x1f0] sm:$0xff]  }
 0x4fa   :  { %7177 = vmatprep.subr.bf16.mxu1 %v7983_v27  ;;  %v8016_v26 = vld [vmem:[#allocation12 + $0x130] sm:$0xff]  }
 0x4fb   :  { %v8017_v27 = vld [vmem:[#allocation12 + $0x1b0] sm:$0xff]  }
 0x4fc   :  { %7156 = vmatpush3.bf16.msra.mxu0 %v7984_v29  ;;  %v8018_v29 = vld [vmem:[#allocation12 + $0x178] sm:$0xff]  }
 0x4fd   :  { %7178 = vmatpush3.bf16.msra.mxu1 %v7985_v30  ;;  %7157 = vmatprep.subr.bf16.mxu0 %v7986_v31  ;;  %v8019_v30 = vld [vmem:[#allocation12 + $0x1f8] sm:$0xff]  }
 0x4fe   :  { %7179 = vmatprep.subr.bf16.mxu1 %v7987_v32  ;;  %v8020_v31 = vld [vmem:[#allocation12 + $0x138] sm:$0xff]  }
 0x4ff   :  { %v8021_v32 = vld [vmem:[#allocation12 + $0x1b8] sm:$0xff]  }
 0x500   :  { %7158 = vmatpush3.bf16.msra.mxu0 %v7988_v33  ;;  %v8022_v33 = vld [vmem:[#allocation13 + $0x40] sm:$0xff]  }
 0x501   :  { %7180 = vmatpush3.bf16.msra.mxu1 %v7989_v35  ;;  %7187 = vmatprep.subr.bf16.mxu0 %v7990_v36  ;;  %v8023_v35 = vld [vmem:[#allocation13 + $0xc0] sm:$0xff]   ;;  %v3271_v36 = vsub.s32 4, %v8498_v45 }
 0x502   :  { %7209 = vmatprep.subr.bf16.mxu1 %v7991_v37  ;;  %v3279_v37 = vsub.s32 6, %v8498_v45 }
 0x536   :  { %v4650_v9 = vpop.f32.mrb[4].mxu0  ;;  %v4736_v10 = vpop.f32.mrb[4].mxu1 }
 0x537   :  { %v7327_v56 = vadd.f32 %v4650_v9, %v3256_v39  ;;  %v7331_v13 = vadd.f32 %v4736_v10, %v3264_v40  ;;  %v4652_v14 = vpop.f32.mrb[5].mxu0  ;;  %v4738_v16 = vpop.f32.mrb[5].mxu1 }
 0x538   :  { %v7328_v43 = vadd.f32 %v4652_v14, %v3260_v41  ;;  %v7332_v44 = vadd.f32 %v4738_v16, %v3268_v42  ;;  %v4654_v47 = vpop.f32.mrb[6].mxu0  ;;  %v4740_v50 = vpop.f32.mrb[6].mxu1 }
 0x539   :  { %v7329_v46 = vadd.f32 %v4654_v47, %v3256_v39  ;;  %v7333_v51 = vadd.f32 %v4740_v50, %v3264_v40  ;;  %v4656_v0 = vpop.f32.mrb[7].mxu0  ;;  %v4742_v49 = vpop.f32.mrb[7].mxu1  ;;  %v3275_v39 = vsub.s32 5, %v8498_v45  ;;  %v3283_v40 = vsub.s32 7, %v8498_v45 }
 0x53a   :  { %v7121_v62 = vpack.c.bf16 %v7328_v43, %v7327_v56  ;;  %v7122_v1 = vpack.c.bf16 %v7332_v44, %v7331_v13  ;;  %v7330_v48 = vadd.f32 %v4656_v0, %v3260_v41  ;;  %v7334_v53 = vadd.f32 %v4742_v49, %v3268_v42 }
 0x53b   :  { %v8652_v54 = vpack.c.bf16 %v7329_v46, %v7327_v56  ;;  %v8654_v52 = vpack.c.bf16 %v7333_v51, %v7331_v13  ;;  %v3272_v41 = vrot.slane %v8642_v38, %v3271_v36  ;;  %v3280_v42 = vrot.slane %v8642_v38, %v3279_v37  ;;  %v8054_v36 = vld [vmem:[#allocation13 + $0x140] sm:$0xff]  }
 0x53c   :  { %4965 = vst [vmem:[%s8731_s9] sm:$0xff] %v7121_v62  ;;  %4966 = vst [vmem:[%s8731_s9 + $0x8] sm:$0xff] %v7122_v1  ;;  %v8662_v7 = vpack.c.bf16 %v7330_v48, %v7328_v43  ;;  %v7125_v55 = vpack.c.bf16 %v7330_v48, %v7329_v46  ;;  %v8664_v57 = vpack.c.bf16 %v7334_v53, %v7332_v44  ;;  %v8055_v37 = vld [vmem:[#allocation13 + $0x1c0] sm:$0xff]  }
 0x53d   :  { %v7126_v58 = vpack.c.bf16 %v7334_v53, %v7333_v51  ;;  %v3276_v9 = vrot.slane %v8642_v38, %v3275_v39  ;;  %v3284_v10 = vrot.slane %v8642_v38, %v3283_v40  ;;  %v8056_v39 = vld [vmem:[#allocation13 + $0x100] sm:$0xff]  }
 0x53e   :  { %4969 = vst [vmem:[%s8731_s9 + $0x20] sm:$0xff] %v7125_v55  ;;  %5517 = vmatprep.mubr.bf16.mxu0 %v8662_v7  ;;  %5558 = vmatprep.mubr.bf16.mxu1 %v8664_v57  ;;  %v8057_v40 = vld [vmem:[#allocation13 + $0x180] sm:$0xff]  }
 0x53f   :  { %4970 = vst [vmem:[%s8731_s9 + $0x28] sm:$0xff] %v7126_v58  ;;  %5518 = vmatmul.mubr.bf16.vlgmr.msra.gmra.mrb[12].mxu0 %v8652_v54  ;;  %5559 = vmatmul.mubr.bf16.vlgmr.msra.gmra.mrb[12].mxu1 %v8654_v52 }
 0x540   :  { %7188 = vmatpush3.bf16.msra.mxu0 %v7992_v60  ;;  %7210 = vmatpush3.bf16.msra.mxu1 %v7993_v61 }
 0x541   :  { %7189 = vmatprep.subr.bf16.mxu0 %v7994_v3  ;;  %7211 = vmatprep.subr.bf16.mxu1 %v7995_v8  ;;  %v8024_v3 = vld [vmem:[#allocation13] sm:$0xff]  }
 0x544   :  { %7190 = vmatpush3.bf16.msra.mxu0 %v7996_v24  ;;  %7212 = vmatpush3.bf16.msra.mxu1 %v7997_v12  ;;  %v8025_v12 = vld [vmem:[#allocation13 + $0x80] sm:$0xff]  }
 0x545   :  { %7191 = vmatprep.subr.bf16.mxu0 %v7998_v63  ;;  %7213 = vmatprep.subr.bf16.mxu1 %v7999_v17  ;;  %v8026_v63 = vld [vmem:[#allocation13 + $0x48] sm:$0xff]  }
 0x546   :  { %v8027_v17 = vld [vmem:[#allocation13 + $0xc8] sm:$0xff]  }
 0x548   :  { %7192 = vmatpush3.bf16.msra.mxu0 %v8000_v2  ;;  %7214 = vmatpush3.bf16.msra.mxu1 %v8001_v4  ;;  %v8028_v2 = vld [vmem:[#allocation13 + $0x8] sm:$0xff]  }
 0x549   :  { %7193 = vmatprep.subr.bf16.mxu0 %v8002_v59  ;;  %7215 = vmatprep.subr.bf16.mxu1 %v8003_v18  ;;  %v8029_v4 = vld [vmem:[#allocation13 + $0x88] sm:$0xff]   ;;  %v8030_v59 = vld [vmem:[#allocation13 + $0x50] sm:$0xff]  }
 0x54a   :  { %v8031_v18 = vld [vmem:[#allocation13 + $0xd0] sm:$0xff]  }
 0x54c   :  { %7194 = vmatpush3.bf16.msra.mxu0 %v8004_v6  ;;  %7216 = vmatpush3.bf16.msra.mxu1 %v8005_v19  ;;  %v8032_v6 = vld [vmem:[#allocation13 + $0x10] sm:$0xff]  }
 0x54d   :  { %7195 = vmatprep.subr.bf16.mxu0 %v8006_v15  ;;  %7217 = vmatprep.subr.bf16.mxu1 %v8007_v28  ;;  %v8033_v19 = vld [vmem:[#allocation13 + $0x90] sm:$0xff]   ;;  %v8034_v15 = vld [vmem:[#allocation13 + $0x58] sm:$0xff]  }
 0x54e   :  { %v8035_v28 = vld [vmem:[#allocation13 + $0xd8] sm:$0xff]  }
 0x550   :  { %7196 = vmatpush3.bf16.msra.mxu0 %v8008_v25  ;;  %7218 = vmatpush3.bf16.msra.mxu1 %v8009_v20  ;;  %v8036_v25 = vld [vmem:[#allocation13 + $0x18] sm:$0xff]   ;;  %v8038_v20 = vld [vmem:[#allocation13 + $0x60] sm:$0xff]  }
 0x551   :  { %7197 = vmatprep.subr.bf16.mxu0 %v8010_v11  ;;  %7219 = vmatprep.subr.bf16.mxu1 %v8011_v5  ;;  %v8039_v11 = vld [vmem:[#allocation13 + $0xe0] sm:$0xff]  }
 0x552   :  { %v8041_v5 = vld [vmem:[#allocation13 + $0xa0] sm:$0xff]  }
 0x554   :  { %7198 = vmatpush3.bf16.msra.mxu0 %v8012_v21  ;;  %7220 = vmatpush3.bf16.msra.mxu1 %v8013_v22  ;;  %v8042_v21 = vld [vmem:[#allocation13 + $0x68] sm:$0xff]  }
 0x555   :  { %7199 = vmatprep.subr.bf16.mxu0 %v8014_v23  ;;  %7221 = vmatprep.subr.bf16.mxu1 %v8015_v34  ;;  %v8043_v22 = vld [vmem:[#allocation13 + $0xe8] sm:$0xff]  }
 0x556   :  { %v8044_v23 = vld [vmem:[#allocation13 + $0x28] sm:$0xff]  }
 0x557   :  { %v8045_v34 = vld [vmem:[#allocation13 + $0xa8] sm:$0xff]  }
 0x558   :  { %7200 = vmatpush3.bf16.msra.mxu0 %v8016_v26  ;;  %7222 = vmatpush3.bf16.msra.mxu1 %v8017_v27  ;;  %v8046_v26 = vld [vmem:[#allocation13 + $0x70] sm:$0xff]  }
 0x559   :  { %7201 = vmatprep.subr.bf16.mxu0 %v8018_v29  ;;  %7223 = vmatprep.subr.bf16.mxu1 %v8019_v30  ;;  %v8047_v27 = vld [vmem:[#allocation13 + $0xf0] sm:$0xff]  }
 0x55a   :  { %v8048_v29 = vld [vmem:[#allocation13 + $0x30] sm:$0xff]  }
 0x55b   :  { %v8049_v30 = vld [vmem:[#allocation13 + $0xb0] sm:$0xff]  }
 0x55c   :  { %7202 = vmatpush3.bf16.msra.mxu0 %v8020_v31  ;;  %7224 = vmatpush3.bf16.msra.mxu1 %v8021_v32  ;;  %v8050_v31 = vld [vmem:[#allocation13 + $0x78] sm:$0xff]  }
 0x55d   :  { %7231 = vmatprep.subr.bf16.mxu0 %v8022_v33  ;;  %7253 = vmatprep.subr.bf16.mxu1 %v8023_v35  ;;  %v8051_v32 = vld [vmem:[#allocation13 + $0xf8] sm:$0xff]  }
 0x55e   :  { %v8052_v33 = vld [vmem:[#allocation13 + $0x38] sm:$0xff]  }
 0x55f   :  { %v8053_v35 = vld [vmem:[#allocation13 + $0xb8] sm:$0xff]  }
 0x5b6   :  { %v4822_v56 = vpop.f32.mrb[8].mxu0 }
 0x5b7   :  { %v7335_v13 = vadd.f32 %v4822_v56, %v3272_v41  ;;  %v4908_v14 = vpop.f32.mrb[8].mxu1  ;;  %v4824_v16 = vpop.f32.mrb[9].mxu0  ;;  %v8062_v56 = vld [vmem:[#allocation13 + $0x150] sm:$0xff]  }
 0x5b8   :  { %v7339_v43 = vadd.f32 %v4908_v14, %v3280_v42  ;;  %v7336_v44 = vadd.f32 %v4824_v16, %v3276_v9  ;;  %v4910_v47 = vpop.f32.mrb[9].mxu1  ;;  %v4826_v50 = vpop.f32.mrb[10].mxu0  ;;  %v8064_v14 = vld [vmem:[#allocation13 + $0x110] sm:$0xff]   ;;  %v8066_v16 = vld [vmem:[#allocation13 + $0x158] sm:$0xff]  }
 0x5b9   :  { %v7340_v46 = vadd.f32 %v4910_v47, %v3284_v10  ;;  %v7337_v51 = vadd.f32 %v4826_v50, %v3272_v41  ;;  %v4912_v0 = vpop.f32.mrb[10].mxu1  ;;  %v4828_v45 = vpop.f32.mrb[11].mxu0  ;;  %v8058_v41 = vld [vmem:[#allocation13 + $0x148] sm:$0xff]   ;;  %v8070_v47 = vld [vmem:[#allocation13 + $0x160] sm:$0xff]  }
 0x5ba   :  { %v7123_v49 = vpack.c.bf16 %v7336_v44, %v7335_v13  ;;  %v7341_v62 = vadd.f32 %v4912_v0, %v3280_v42  ;;  %v7338_v1 = vadd.f32 %v4828_v45, %v3276_v9  ;;  %v4914_v48 = vpop.f32.mrb[11].mxu1  ;;  %v8059_v42 = vld [vmem:[#allocation13 + $0x1c8] sm:$0xff]   ;;  %v8071_v50 = vld [vmem:[#allocation13 + $0x1e0] sm:$0xff]  }
 0x5bb   :  { %v7124_v53 = vpack.c.bf16 %v7340_v46, %v7339_v43  ;;  %v8684_v55 = vpack.c.bf16 %v7337_v51, %v7335_v13  ;;  %v7342_v38 = vadd.f32 %v4914_v48, %v3284_v10  ;;  %v8060_v9 = vld [vmem:[#allocation13 + $0x108] sm:$0xff]   ;;  %v8063_v13 = vld [vmem:[#allocation13 + $0x1d0] sm:$0xff]  }
 0x5bc   :  { %4967 = vst [vmem:[%s8731_s9 + $0x10] sm:$0xff] %v7123_v49  ;;  %v8689_v58 = vpack.c.bf16 %v7341_v62, %v7339_v43  ;;  %v8691_v60 = vpack.c.bf16 %v7338_v1, %v7336_v44  ;;  %v7127_v61 = vpack.c.bf16 %v7338_v1, %v7337_v51  ;;  %v8061_v10 = vld [vmem:[#allocation13 + $0x188] sm:$0xff]   ;;  %v8068_v43 = vld [vmem:[#allocation13 + $0x118] sm:$0xff]   ;;  %v8073_v51 = vld [vmem:[#allocation13 + $0x1a0] sm:$0xff]  }
 0x5bd   :  { %4968 = vst [vmem:[%s8731_s9 + $0x18] sm:$0xff] %v7124_v53  ;;  %v8696_v8 = vpack.c.bf16 %v7342_v38, %v7340_v46  ;;  %v7128_v24 = vpack.c.bf16 %v7342_v38, %v7341_v62  ;;  %v8069_v44 = vld [vmem:[#allocation13 + $0x198] sm:$0xff]   ;;  %v8072_v46 = vld [vmem:[#allocation13 + $0x120] sm:$0xff]   ;;  %v8074_v0 = vld [vmem:[#allocation13 + $0x168] sm:$0xff]  }
 0x5be   :  { %4971 = vst [vmem:[%s8731_s9 + $0x30] sm:$0xff] %v7127_v61  ;;  %5599 = vmatprep.mubr.bf16.mxu0 %v8691_v60  ;;  %v8075_v45 = vld [vmem:[#allocation13 + $0x1e8] sm:$0xff]   ;;  %v8078_v1 = vld [vmem:[#allocation13 + $0x170] sm:$0xff]   ;;  %v8083_v61 = vld [vmem:[#allocation13 + $0x1f8] sm:$0xff]  }
 0x5bf   :  { %4972 = vst [vmem:[%s8731_s9 + $0x38] sm:$0xff] %v7128_v24  ;;  %5640 = vmatprep.mubr.bf16.mxu1 %v8696_v8  ;;  %5600 = vmatmul.mubr.bf16.vlgmr.msra.gmra.mrb[16].mxu0 %v8684_v55  ;;  %v8076_v49 = vld [vmem:[#allocation13 + $0x128] sm:$0xff]   ;;  %v8079_v48 = vld [vmem:[#allocation13 + $0x1f0] sm:$0xff]  }
 0x5c0   :  { %5641 = vmatmul.mubr.bf16.vlgmr.msra.gmra.mrb[16].mxu1 %v8689_v58  ;;  %7232 = vmatpush3.bf16.msra.mxu0 %v8024_v3  ;;  %v8077_v62 = vld [vmem:[#allocation13 + $0x1a8] sm:$0xff]   ;;  %v8080_v53 = vld [vmem:[#allocation13 + $0x130] sm:$0xff]   ;;  %v8084_v3 = vld [vmem:[#allocation13 + $0x138] sm:$0xff]  }
 0x5c1   :  { %7254 = vmatpush3.bf16.msra.mxu1 %v8025_v12  ;;  %6203 = vmatprep.mubr.bf16.mxu0 %v8662_v7  ;;  %v8037_v7 = vld [vmem:[#allocation13 + $0x98] sm:$0xff]   ;;  %v8081_v38 = vld [vmem:[#allocation13 + $0x1b0] sm:$0xff]  }
 0x5c2   :  { %6244 = vmatprep.mubr.bf16.mxu1 %v8664_v57  ;;  %7233 = vmatprep.subr.bf16.mxu0 %v8026_v63  ;;  %v8040_v57 = vld [vmem:[#allocation13 + $0x20] sm:$0xff]  }
 0x5c3   :  { %7255 = vmatprep.subr.bf16.mxu1 %v8027_v17 }
 0x5c4   :  { %7234 = vmatpush3.bf16.msra.mxu0 %v8028_v2 }
 0x5c5   :  { %7256 = vmatpush3.bf16.msra.mxu1 %v8029_v4  ;;  %7235 = vmatprep.subr.bf16.mxu0 %v8030_v59 }
 0x5c6   :  { %7257 = vmatprep.subr.bf16.mxu1 %v8031_v18 }
 0x5c8   :  { %7236 = vmatpush3.bf16.msra.mxu0 %v8032_v6 }
 0x5c9   :  { %7258 = vmatpush3.bf16.msra.mxu1 %v8033_v19  ;;  %7237 = vmatprep.subr.bf16.mxu0 %v8034_v15 }
 0x5ca   :  { %7259 = vmatprep.subr.bf16.mxu1 %v8035_v28 }
 0x5cc   :  { %7238 = vmatpush3.bf16.msra.mxu0 %v8036_v25 }
 0x5cd   :  { %7260 = vmatpush3.bf16.msra.mxu1 %v8037_v7  ;;  %7239 = vmatprep.subr.bf16.mxu0 %v8038_v20 }
 0x5ce   :  { %7261 = vmatprep.subr.bf16.mxu1 %v8039_v11 }
 0x5d0   :  { %7240 = vmatpush3.bf16.msra.mxu0 %v8040_v57 }
 0x5d1   :  { %7262 = vmatpush3.bf16.msra.mxu1 %v8041_v5  ;;  %7241 = vmatprep.subr.bf16.mxu0 %v8042_v21 }
 0x5d2   :  { %7263 = vmatprep.subr.bf16.mxu1 %v8043_v22 }
 0x5d4   :  { %7242 = vmatpush3.bf16.msra.mxu0 %v8044_v23 }
 0x5d5   :  { %7264 = vmatpush3.bf16.msra.mxu1 %v8045_v34  ;;  %7243 = vmatprep.subr.bf16.mxu0 %v8046_v26 }
 0x5d6   :  { %7265 = vmatprep.subr.bf16.mxu1 %v8047_v27 }
 0x5d8   :  { %7244 = vmatpush3.bf16.msra.mxu0 %v8048_v29 }
 0x5d9   :  { %7266 = vmatpush3.bf16.msra.mxu1 %v8049_v30  ;;  %7245 = vmatprep.subr.bf16.mxu0 %v8050_v31 }
 0x5da   :  { %7267 = vmatprep.subr.bf16.mxu1 %v8051_v32 }
 0x5dc   :  { %7246 = vmatpush3.bf16.msra.mxu0 %v8052_v33 }
 0x5dd   :  { %7268 = vmatpush3.bf16.msra.mxu1 %v8053_v35  ;;  %7275 = vmatprep.subr.bf16.mxu0 %v8054_v36 }
 0x5de   :  { %7297 = vmatprep.subr.bf16.mxu1 %v8055_v37 }
 0x5df   :  { %6204 = vmatmul.mubr.bf16.vlgmr.msra.gmra.mrb[20].mxu0 %v8652_v54  ;;  %v8065_v54 = vld [vmem:[#allocation13 + $0x190] sm:$0xff]  }
 0x5e0   :  { %6245 = vmatmul.mubr.bf16.vlgmr.msra.gmra.mrb[20].mxu1 %v8654_v52  ;;  %7276 = vmatpush3.bf16.msra.mxu0 %v8056_v39  ;;  %v8067_v52 = vld [vmem:[#allocation13 + $0x1d8] sm:$0xff]  }
 0x5e1   :  { %6285 = vmatprep.mubr.bf16.mxu0 %v8691_v60  ;;  %7298 = vmatpush3.bf16.msra.mxu1 %v8057_v40  ;;  %v8082_v60 = vld [vmem:[#allocation13 + $0x178] sm:$0xff]  }
 0x5e2   :  { %6326 = vmatprep.mubr.bf16.mxu1 %v8696_v8  ;;  %7277 = vmatprep.subr.bf16.mxu0 %v8058_v41  ;;  %v8085_v8 = vld [vmem:[#allocation13 + $0x1b8] sm:$0xff]  }
 0x5e3   :  { %7299 = vmatprep.subr.bf16.mxu1 %v8059_v42 }
 0x5e4   :  { %7278 = vmatpush3.bf16.msra.mxu0 %v8060_v9 }
 0x5e5   :  { %7300 = vmatpush3.bf16.msra.mxu1 %v8061_v10  ;;  %7279 = vmatprep.subr.bf16.mxu0 %v8062_v56 }
 0x5e6   :  { %7301 = vmatprep.subr.bf16.mxu1 %v8063_v13 }
 0x5e8   :  { %7280 = vmatpush3.bf16.msra.mxu0 %v8064_v14 }
 0x5e9   :  { %7302 = vmatpush3.bf16.msra.mxu1 %v8065_v54  ;;  %7281 = vmatprep.subr.bf16.mxu0 %v8066_v16 }
 0x5ea   :  { %7303 = vmatprep.subr.bf16.mxu1 %v8067_v52 }
 0x5ec   :  { %7282 = vmatpush3.bf16.msra.mxu0 %v8068_v43 }
 0x5ed   :  { %7304 = vmatpush3.bf16.msra.mxu1 %v8069_v44  ;;  %7283 = vmatprep.subr.bf16.mxu0 %v8070_v47 }
 0x5ee   :  { %7305 = vmatprep.subr.bf16.mxu1 %v8071_v50 }
 0x5f0   :  { %7284 = vmatpush3.bf16.msra.mxu0 %v8072_v46 }
 0x5f1   :  { %7306 = vmatpush3.bf16.msra.mxu1 %v8073_v51  ;;  %7285 = vmatprep.subr.bf16.mxu0 %v8074_v0 }
 0x5f2   :  { %7307 = vmatprep.subr.bf16.mxu1 %v8075_v45 }
 0x5f4   :  { %7286 = vmatpush3.bf16.msra.mxu0 %v8076_v49 }
 0x5f5   :  { %7308 = vmatpush3.bf16.msra.mxu1 %v8077_v62  ;;  %7287 = vmatprep.subr.bf16.mxu0 %v8078_v1 }
 0x5f6   :  { %7309 = vmatprep.subr.bf16.mxu1 %v8079_v48 }
 0x5f8   :  { %7288 = vmatpush3.bf16.msra.mxu0 %v8080_v53 }
 0x5f9   :  { %7310 = vmatpush3.bf16.msra.mxu1 %v8081_v38  ;;  %7289 = vmatprep.subr.bf16.mxu0 %v8082_v60 }
 0x5fa   :  { %7311 = vmatprep.subr.bf16.mxu1 %v8083_v61 }
 0x5fc   :  { %7290 = vmatpush3.bf16.msra.mxu0 %v8084_v3 }
 0x5fd   :  { %7312 = vmatpush3.bf16.msra.mxu1 %v8085_v8 }
 0x5ff   :  { %6286 = vmatmul.mubr.bf16.vlgmr.msra.gmra.mrb[24].mxu0 %v8684_v55 }
 0x600   :  { %6327 = vmatmul.mubr.bf16.vlgmr.msra.gmra.mrb[24].mxu1 %v8689_v58 }
 0x612   :  { %v7159_v24 = vpop.f32.mrb[12].mxu0  ;;  %v7181_v12 = vpop.f32.mrb[12].mxu1 }
 0x613   :  { %v7160_v63 = vpop.f32.mrb[13].mxu0  ;;  %v7182_v17 = vpop.f32.mrb[13].mxu1 }
 0x614   :  { %v7161_v2 = vadd.f32 %v7160_v63, %v7159_v24  ;;  %v7183_v4 = vadd.f32 %v7182_v17, %v7181_v12  ;;  %v7162_v59 = vpop.f32.mrb[14].mxu0  ;;  %v7184_v18 = vpop.f32.mrb[14].mxu1 }
 0x615   :  { %v7163_v6 = vpop.f32.mrb[15].mxu0  ;;  %v7185_v19 = vpop.f32.mrb[15].mxu1 }
 0x616   :  { %v5561_v15 = vadd.f32 %v7183_v4, %v7161_v2  ;;  %v7164_v28 = vadd.f32 %v7163_v6, %v7162_v59  ;;  %v7186_v25 = vadd.f32 %v7185_v19, %v7184_v18 }
 0x618   :  { %v5564_v7 = vadd.f32 %v7186_v25, %v7164_v28 }
 0x692   :  { %v7203_v20 = vpop.f32.mrb[16].mxu0 }
 0x693   :  { %v7225_v11 = vpop.f32.mrb[16].mxu1  ;;  %v7204_v57 = vpop.f32.mrb[17].mxu0 }
 0x694   :  { %v7205_v55 = vadd.f32 %v7204_v57, %v7203_v20  ;;  %v7226_v5 = vpop.f32.mrb[17].mxu1  ;;  %v7206_v58 = vpop.f32.mrb[18].mxu0 }
 0x695   :  { %v7227_v21 = vadd.f32 %v7226_v5, %v7225_v11  ;;  %v7228_v22 = vpop.f32.mrb[18].mxu1  ;;  %v7207_v23 = vpop.f32.mrb[19].mxu0 }
 0x696   :  { %v5602_v34 = vadd.f32 %v7205_v55, %v5561_v15  ;;  %v7208_v26 = vadd.f32 %v7207_v23, %v7206_v58  ;;  %v7229_v27 = vpop.f32.mrb[19].mxu1 }
 0x697   :  { %v7230_v29 = vadd.f32 %v7229_v27, %v7228_v22 }
 0x698   :  { %v5643_v30 = vadd.f32 %v7227_v21, %v5602_v34  ;;  %v5605_v31 = vadd.f32 %v7208_v26, %v5564_v7 }
 0x69a   :  { %v5646_v32 = vadd.f32 %v7230_v29, %v5605_v31 }
 0x69c   :  { %v7136_v33 = vpack.c.bf16 %v5646_v32, %v5643_v30 }
 0x69e   :  { %7137 = vst [vmem:[%s8732_s10] sm:$0xff] %v7136_v33  }
 0x6b2   :  { %v7247_v35 = vpop.f32.mrb[20].mxu0 }
 0x6b3   :  { %v7269_v36 = vpop.f32.mrb[20].mxu1  ;;  %v7248_v37 = vpop.f32.mrb[21].mxu0 }
 0x6b4   :  { %v7249_v39 = vadd.f32 %v7248_v37, %v7247_v35  ;;  %v7270_v40 = vpop.f32.mrb[21].mxu1  ;;  %v7250_v41 = vpop.f32.mrb[22].mxu0 }
 0x6b5   :  { %v7271_v42 = vadd.f32 %v7270_v40, %v7269_v36  ;;  %v7272_v9 = vpop.f32.mrb[22].mxu1  ;;  %v7251_v10 = vpop.f32.mrb[23].mxu0 }
 0x6b6   :  { %v7252_v56 = vadd.f32 %v7251_v10, %v7250_v41  ;;  %v7273_v13 = vpop.f32.mrb[23].mxu1 }
 0x6b7   :  { %v6247_v14 = vadd.f32 %v7271_v42, %v7249_v39  ;;  %v7274_v54 = vadd.f32 %v7273_v13, %v7272_v9 }
 0x6b9   :  { %v6250_v16 = vadd.f32 %v7274_v54, %v7252_v56 }
 0x6d2   :  { %v7291_v52 = vpop.f32.mrb[24].mxu0 }
 0x6d3   :  { %v7313_v43 = vpop.f32.mrb[24].mxu1  ;;  %v7292_v44 = vpop.f32.mrb[25].mxu0 }
 0x6d4   :  { %v7293_v47 = vadd.f32 %v7292_v44, %v7291_v52  ;;  %v7314_v50 = vpop.f32.mrb[25].mxu1  ;;  %v7294_v46 = vpop.f32.mrb[26].mxu0 }
 0x6d5   :  { %v7315_v51 = vadd.f32 %v7314_v50, %v7313_v43  ;;  %v7316_v0 = vpop.f32.mrb[26].mxu1  ;;  %v7295_v45 = vpop.f32.mrb[27].mxu0 }
 0x6d6   :  { %v6288_v49 = vadd.f32 %v7293_v47, %v6247_v14  ;;  %v7296_v62 = vadd.f32 %v7295_v45, %v7294_v46  ;;  %v7317_v1 = vpop.f32.mrb[27].mxu1 }
 0x6d7   :  { %v7318_v48 = vadd.f32 %v7317_v1, %v7316_v0 }
 0x6d8   :  { %v6329_v53 = vadd.f32 %v7315_v51, %v6288_v49  ;;  %v6291_v38 = vadd.f32 %v7296_v62, %v6250_v16 }
 0x6da   :  { %v6332_v60 = vadd.f32 %v7318_v48, %v6291_v38 }
 0x6dc   :  { %v7141_v61 = vpack.c.bf16 %v6332_v60, %v6329_v53 }
 0x6de   :  { %7142 = vst [vmem:[%s8733_s11] sm:$0xff] %v7141_v61  }
 0x6df   :  { %6357 = vsyncpa [#allocation3], 1 }
 0x6e0   :  { %6358 = vsyncpa [#allocation5], 1 }
 0x6e1   :  { %6359 = vsyncpa [#allocation8], 1 }
 0x6e2   :  { %6360 = vsyncpa [#allocation11], 1 }
 0x6e3   :  { %6361 = vsyncpa [#allocation14], 1 }

</bundles_post_ra>
